<compile_context>
chip_gen: v7x
topology: tpu7x:2x2x1
jax: 0.10.0
libtpu: 0.0.40
codegen_flags: <defaults>
</compile_context>

<pallas_src>
import jax
import jax.numpy as jnp
from jax.experimental import pallas as pl
from jax.experimental.pallas import tpu as pltpu

EPS = 1e-5          # default eps of nn.LayerNorm / nn.GroupNorm
GROUPS = 16         # nn.GroupNorm(num_groups=16, ...)
SQRT_HALF = 0.7071067811865476


# ---------------------------------------------------------------------------
# elementwise helpers (kernel-only)
# ---------------------------------------------------------------------------
def _erf(x):
    # Abramowitz & Stegun 7.1.26 rational approximation, |err| < 1.5e-7.
    # The divide is routed to the (otherwise idle) EUP via an approximate
    # reciprocal; one Newton step brings it back to ~f32 accuracy so the
    # stated erf error bound holds.  exp also runs on the EUP.
    a1, a2, a3, a4, a5 = 0.254829592, -0.284496736, 1.421413741, -1.453152027, 1.061405429
    p = 0.3275911
    ax = jnp.abs(x)
    d = 1.0 + p * ax
    t = pl.reciprocal(d, approx=True)
    t = t * (2.0 - d * t)                       # Newton refinement of 1/d
    poly = ((((a5 * t + a4) * t + a3) * t + a2) * t + a1) * t
    y = 1.0 - poly * jnp.exp(-ax * ax)
    return jnp.where(x >= 0.0, y, -y)


def _gelu(x):
    # erf-based GELU, matching torch.nn.GELU() default
    return 0.5 * x * (1.0 + _erf(x * SQRT_HALF))


# ---------------------------------------------------------------------------
# Fused kernel: embeddings -> conditioning -> concat -> Conv3x3+GN+GELU
#               -> Conv3x3+GN+GELU -> GN
# ---------------------------------------------------------------------------
def _cond_res_block_kernel(times_ref, cls_ref, x_ref, r_ref,
                           tw0_ref, tw1_ref, tw2_ref, tv_ref,
                           cw0_ref, cw1_ref, cw2_ref, cv_ref,
                           w1_ref, w2_ref, gn_ref, m_ref, mt_ref,
                           out_ref,
                           pad1_ref, pad2_ref):
    Bb, H, W, C1 = x_ref.shape
    C2 = r_ref.shape[3]
    Cin = C1 + C2
    Cout = out_ref.shape[2]
    HW = H * W
    MB = Bb * HW

    Mm = m_ref[...]          # (Cout, G) one-hot group membership, f32
    Mt = mt_ref[...]         # (G, Cout)
    G = Mm.shape[1]
    inv_n = 1.0 / float(HW * (Cout // G))

    def row(ref, i):         # (1, C) row of a stacked-parameter ref
        return ref[pl.ds(i, 1), :]

    # ---- LinearEmbedding: Linear -> LN -> GELU -> Linear -> LN -> GELU -> Linear(+b)
    def mlp_embed(xin, w0, w1, w2, v):
        def ln(h, g, b):
            mu = jnp.mean(h, axis=-1, keepdims=True)
            var = jnp.mean((h - mu) ** 2, axis=-1, keepdims=True)
            return (h - mu) * jax.lax.rsqrt(var + EPS) * g + b
        h = jnp.dot(xin, w0[...], preferred_element_type=jnp.float32)
        h = _gelu(ln(h, row(v, 0), row(v, 1)))
        h = jnp.dot(h, w1[...], preferred_element_type=jnp.float32)
        h = _gelu(ln(h, row(v, 2), row(v, 3)))
        return jnp.dot(h, w2[...], preferred_element_type=jnp.float32) + row(v, 4)

    # ---- per-sample GroupNorm(G) on (MB, Cout).
    # Two-pass form (mean first, then centered second moment) -- numerically safe
    # (no E[x^2]-mean^2 cancellation) and implemented with two small matmuls
    # instead of a (2*MB, Cout) sublane concat + one matmul.
    def group_norm(h2, gamma, beta):
        sum_g = jnp.dot(h2, Mm, preferred_element_type=jnp.float32)        # (MB, G)
        mean_g = jnp.sum(sum_g.reshape(Bb, HW, G), axis=1) * inv_n         # (Bb, G)
        mean_c = jnp.dot(mean_g, Mt, preferred_element_type=jnp.float32)   # (Bb, Cout)
        centered = h2.reshape(Bb, HW, Cout) - mean_c[:, None, :]           # (Bb, HW, Cout)
        sq_g = jnp.dot((centered * centered).reshape(MB, Cout), Mm,
                       preferred_element_type=jnp.float32)                 # (MB, G)
        var_g = jnp.sum(sq_g.reshape(Bb, HW, G), axis=1) * inv_n           # (Bb, G)
        inv_c = jnp.dot(jax.lax.rsqrt(var_g + EPS), Mt,
                        preferred_element_type=jnp.float32)                # (Bb, Cout)
        return centered * (inv_c * gamma)[:, None, :] + beta               # (Bb, HW, Cout)

    # ---- 3x3 "same" conv from the bf16 padded scratch.  bf16 operands, f32 acc.
    def conv3x3(pad_ref, w_ref, cin):
        taps = [(ky, kx) for ky in range(3) for kx in range(3)]
        if cin >= 128:
            # Deep levels: 9 per-tap matmuls, skip the (MB, 9*cin) slab entirely.
            acc = jnp.zeros((MB, Cout), jnp.float32)
            for k, (ky, kx) in enumerate(taps):
                tap = pad_ref[:, pl.ds(ky, H), pl.ds(kx, W), :].reshape(MB, cin)
                acc = acc + jnp.dot(tap, w_ref[pl.ds(k * cin, cin), :],
                                    preferred_element_type=jnp.float32)
            return acc
        # Shallow levels: one im2col matmul (K = 9*cin) to fill MXU depth.
        cols = [pad_ref[:, pl.ds(ky, H), pl.ds(kx, W), :].reshape(MB, cin)
                for ky, kx in taps]
        slab = jnp.concatenate(cols, axis=-1)            # already bf16, no cast
        return jnp.dot(slab, w_ref[...], preferred_element_type=jnp.float32)

    # ---- store interior + halo into the bf16 padded scratch.
    # The interior rows are composed with their zero halo columns in registers so
    # every store is full/aligned in the minor (sublane, lane) dims; only the
    # top/bottom halo rows need separate (also aligned) stores.  Everything is
    # rewritten every grid step, so scratch reuse is megacore-safe.
    def store_padded(pad, interior_bf16, cin):
        zrow = jnp.zeros((Bb, 1, W + 2, cin), jnp.bfloat16)
        zcol = jnp.zeros((Bb, H, 1, cin), jnp.bfloat16)
        pad[:, pl.ds(0, 1), :, :] = zrow
        pad[:, pl.ds(H + 1, 1), :, :] = zrow
        pad[:, pl.ds(1, H), :, :] = jnp.concatenate(
            [zcol, interior_bf16, zcol], axis=2)

    # ---- time / class embeddings for this batch block (fused; tiny matmuls)
    temb = mlp_embed(times_ref[...][:, 0, :], tw0_ref, tw1_ref, tw2_ref, tv_ref)  # (Bb, C1)
    cemb = mlp_embed(cls_ref[...][:, 0, :], cw0_ref, cw1_ref, cw2_ref, cv_ref)    # (Bb, C1)

    # ---- conditioning (x*classEmb + timeEmb), concat residual, into padded buf
    xmod = x_ref[...] * cemb[:, None, None, :] + temb[:, None, None, :]
    store_padded(pad1_ref,
                 jnp.concatenate([xmod.astype(jnp.bfloat16),
                                  r_ref[...].astype(jnp.bfloat16)], axis=-1),
                 Cin)

    # ---- c1: Conv3x3 -> GroupNorm(16) -> GELU
    h1 = conv3x3(pad1_ref, w1_ref, Cin)                                  # (MB, Cout) f32
    h1 = _gelu(group_norm(h1, row(gn_ref, 0), row(gn_ref, 1)))           # (Bb, HW, Cout)
    store_padded(pad2_ref, h1.reshape(Bb, H, W, Cout).astype(jnp.bfloat16), Cout)

    # ---- c2: Conv3x3 -> GroupNorm(16) -> GELU
    h2 = conv3x3(pad2_ref, w2_ref, Cout)                                 # (MB, Cout)
    h2g = _gelu(group_norm(h2, row(gn_ref, 2), row(gn_ref, 3)))          # (Bb, HW, Cout)

    # ---- outNorm: GroupNorm(16)
    # TODO(synk): when Cout < 128 (shallow levels) this store is lane-sparse;
    # fold HW into the lane axis or pad Cout at the model level for full vst.
    out_ref[...] = group_norm(h2g.reshape(MB, Cout), row(gn_ref, 4), row(gn_ref, 5))


def conditional_residual_block(x, residual, times, class_onehot, params, *,
                               block_b=None, vmem_limit_bytes=48 * 1024 * 1024):
    """Pallas implementation of ConditionalResidualBlock.forward.

    x:            (B, C1, N, N) float32  (NCHW)
    residual:     (B, C2, N, N) float32
    times:        (B,)          float32 timesteps
    class_onehot: (B, numClasses) float32 one-hot labels
    returns:      (B, Cout, N, N) float32
    """
    B, C1, H, W = x.shape
    C2 = residual.shape[1]
    Cout = params["gn1_g"].shape[0]
    Cin = C1 + C2
    G = GROUPS
    assert Cout % G == 0
    HW = H * W

    # Rough per-step VMEM footprint (bf16 pads, double-buffered f32 I/O blocks,
    # double-buffered bf16 conv weights, transient im2col slab, GN/GELU temps).
    def vmem_bytes(bb):
        pads = bb * (H + 2) * (W + 2) * (Cin + Cout) * 2
        io = 2 * bb * HW * (C1 + C2 + Cout) * 4
        wts = 2 * 9 * (Cin + Cout) * Cout * 2
        slab = bb * HW * 9 * max(Cin, Cout) * 2 if max(Cin, Cout) < 128 else 0
        live = 4 * bb * HW * Cout * 4
        return pads + io + wts + slab + live

    # batch elements per grid step: target >=256 MXU rows (v6e pass width, fine on
    # v5e/v7x), stay inside the VMEM budget (v7x has 64 MiB/TC), and keep at least
    # 2 grid steps so the "parallel" batch axis gives both v7x TensorCores work.
    if block_b is None:
        block_b = 1
        budget = int(0.8 * vmem_limit_bytes)
        while (B % (block_b * 2) == 0
               and block_b * HW < 256
               and B // (block_b * 2) >= 2
               and vmem_bytes(block_b * 2) <= budget):
            block_b *= 2
    assert B % block_b == 0
    # TODO(synk): at very deep UNet levels (Cout>=512) on v7x even block_b=1 may
    # exceed the budget; add a spatial (H) grid split there.

    # layout: NCHW -> NHWC (channels on the lane axis)
    # TODO(synk): keep the whole UNet NHWC (and bf16 activations) so these full
    # HBM read+write transposes and the f32 writeback disappear at the model level.
    x_nhwc = jnp.transpose(x, (0, 2, 3, 1)).astype(jnp.float32)
    r_nhwc = jnp.transpose(residual, (0, 2, 3, 1)).astype(jnp.float32)

    # conv weights: OIHW -> im2col layout (9*Cin, Cout), bf16 MXU operands
    w1m = jnp.transpose(params["conv1_w"], (2, 3, 1, 0)).reshape(9 * Cin, Cout).astype(jnp.bfloat16)
    w2m = jnp.transpose(params["conv2_w"], (2, 3, 1, 0)).reshape(9 * Cout, Cout).astype(jnp.bfloat16)

    # GroupNorm affine params stacked [g1, b1, g2, b2, g3, b3]
    gnv = jnp.stack([params["gn1_g"], params["gn1_b"],
                     params["gn2_g"], params["gn2_b"],
                     params["gn3_g"], params["gn3_b"]], axis=0).astype(jnp.float32)

    # group-membership matrices for GroupNorm statistics via matmul
    cg = Cout // G
    m = (jnp.arange(Cout)[:, None] // cg == jnp.arange(G)[None, :]).astype(jnp.float32)
    mt = m.T

    # embedding MLP params; pad the tiny first contraction dim to >= 8 (zeros)
    def mlp_pack(p, fin, kmin=8):
        kpad = max(fin, kmin)
        w0 = jnp.zeros((kpad, C1), jnp.float32).at[:fin, :].set(p["w0"].astype(jnp.float32))
        vec = jnp.stack([p["ln0_g"], p["ln0_b"], p["ln1_g"], p["ln1_b"], p["b2"]],
                        axis=0).astype(jnp.float32)
        return w0, p["w1"].astype(jnp.float32), p["w2"].astype(jnp.float32), vec, kpad

    tw0, tw1, tw2, tv, TK = mlp_pack(params["time"], 1)
    NC = class_onehot.shape[-1]
    cw0, cw1, cw2, cv, NCP = mlp_pack(params["cls"], NC)

    times_p = jnp.zeros((B, 1, TK), jnp.float32).at[:, 0, 0].set(times.astype(jnp.float32))
    cls_p = jnp.zeros((B, 1, NCP), jnp.float32).at[:, 0, :NC].set(class_onehot.astype(jnp.float32))

    def full_spec(shape):
        # Constant index map: fetched once per call.
        # TODO(synk): single-buffer these (pipeline_mode=pl.Buffered(1) or a
        # one-shot DMA into scratch) to drop the 2x weight VMEM at Cout>=512.
        return pl.BlockSpec(shape, lambda b: (0,) * len(shape))

    out = pl.pallas_call(
        _cond_res_block_kernel,
        out_shape=jax.ShapeDtypeStruct((B, HW, Cout), jnp.float32),
        grid_spec=pltpu.PrefetchScalarGridSpec(
            num_scalar_prefetch=0,
            grid=(B // block_b,),
            in_specs=[
                pl.BlockSpec((block_b, 1, TK), lambda b: (b, 0, 0)),
                pl.BlockSpec((block_b, 1, NCP), lambda b: (b, 0, 0)),
                pl.BlockSpec((block_b, H, W, C1), lambda b: (b, 0, 0, 0)),
                pl.BlockSpec((block_b, H, W, C2), lambda b: (b, 0, 0, 0)),
                full_spec((TK, C1)), full_spec((C1, C1)), full_spec((C1, C1)), full_spec((5, C1)),
                full_spec((NCP, C1)), full_spec((C1, C1)), full_spec((C1, C1)), full_spec((5, C1)),
                full_spec((9 * Cin, Cout)), full_spec((9 * Cout, Cout)),
                full_spec((6, Cout)), full_spec((Cout, G)), full_spec((G, Cout)),
            ],
            out_specs=pl.BlockSpec((block_b, HW, Cout), lambda b: (b, 0, 0)),
            scratch_shapes=[
                pltpu.VMEM((block_b, H + 2, W + 2, Cin), jnp.bfloat16),   # padded conv1 input
                pltpu.VMEM((block_b, H + 2, W + 2, Cout), jnp.bfloat16),  # padded conv2 input
            ],
        ),
        # batch axis is fully independent -> megacore sharding on v7x, no-op on
        # v5e/v6e.  vmem_limit_bytes is set explicitly (default 48 MiB fits v7x's
        # 64 MiB/TC; raise toward ~100 MiB on v5e/v6e for bigger blocks).
        compiler_params=pltpu.CompilerParams(
            dimension_semantics=("parallel",),
            vmem_limit_bytes=vmem_limit_bytes),
    )(times_p, cls_p, x_nhwc, r_nhwc,
      tw0, tw1, tw2, tv,
      cw0, cw1, cw2, cv,
      w1m, w2m, gnv, m, mt)

    return jnp.transpose(out.reshape(B, H, W, Cout), (0, 3, 1, 2))


# ---------------------------------------------------------------------------
# Pure-JAX references (for numerical verification only)
# ---------------------------------------------------------------------------
def _linear_embedding_ref(x, p):
    def ln(h, g, b):
        mu = jnp.mean(h, axis=-1, keepdims=True)
        var = jnp.mean((h - mu) ** 2, axis=-1, keepdims=True)
        return (h - mu) / jnp.sqrt(var + EPS) * g + b
    h = jax.nn.gelu(ln(x @ p["w0"], p["ln0_g"], p["ln0_b"]), approximate=False)
    h = jax.nn.gelu(ln(h @ p["w1"], p["ln1_g"], p["ln1_b"]), approximate=False)
    return h @ p["w2"] + p["b2"]


def _group_norm_ref(x, gamma, beta, groups=GROUPS):
    B, C, H, W = x.shape
    xg = x.reshape(B, groups, C // groups, H, W)
    mu = jnp.mean(xg, axis=(2, 3, 4), keepdims=True)
    var = jnp.mean((xg - mu) ** 2, axis=(2, 3, 4), keepdims=True)
    xn = ((xg - mu) / jnp.sqrt(var + EPS)).reshape(B, C, H, W)
    return xn * gamma[None, :, None, None] + beta[None, :, None, None]


def _reference_forward(x, residual, times, class_onehot, params, conv_dtype=jnp.float32):
    B = x.shape[0]
    temb = _linear_embedding_ref(times.reshape(B, 1).astype(jnp.float32), params["time"])
    cemb = _linear_embedding_ref(class_onehot.astype(jnp.float32), params["cls"])
    h = x * cemb[:, :, None, None] + temb[:, :, None, None]
    h = jnp.concatenate([h, residual], axis=1)

    def conv(a, w):
        # optional operand quantization to mimic the kernel's bf16 MXU operands
        a = a.astype(conv_dtype).astype(jnp.float32)
        w = w.astype(conv_dtype).astype(jnp.float32)
        return jax.lax.conv_general_dilated(
            a, w, window_strides=(1, 1), padding=((1, 1), (1, 1)),
            dimension_numbers=("NCHW", "OIHW", "NCHW"))

    h = jax.nn.gelu(_group_norm_ref(conv(h, params["conv1_w"]),
                                    params["gn1_g"], params["gn1_b"]), approximate=False)
    h = jax.nn.gelu(_group_norm_ref(conv(h, params["conv2_w"]),
                                    params["gn2_g"], params["gn2_b"]), approximate=False)
    return _group_norm_ref(h, params["gn3_g"], params["gn3_b"])


# ---------------------------------------------------------------------------
if __name__ == "__main__":
    B, C1, C2, COUT, N, NUM_CLASSES = 4, 8, 8, 32, 8, 8

    key = jax.random.PRNGKey(0)
    keys = iter(jax.random.split(key, 32))

    def nrm(shape, scale=0.2):
        return scale * jax.random.normal(next(keys), shape, jnp.float32)

    def emb_params(fin, c):
        return dict(
            w0=nrm((fin, c), 0.5),
            ln0_g=1.0 + nrm((c,), 0.1), ln0_b=nrm((c,), 0.1),
            w1=nrm((c, c), 0.3),
            ln1_g=1.0 + nrm((c,), 0.1), ln1_b=nrm((c,), 0.1),
            w2=nrm((c, c), 0.3), b2=nrm((c,), 0.1),
        )

    params = dict(
        time=emb_params(1, C1),
        cls=emb_params(NUM_CLASSES, C1),
        conv1_w=nrm((COUT, C1 + C2, 3, 3), 0.2),
        gn1_g=1.0 + nrm((COUT,), 0.1), gn1_b=nrm((COUT,), 0.1),
        conv2_w=nrm((COUT, COUT, 3, 3), 0.2),
        gn2_g=1.0 + nrm((COUT,), 0.1), gn2_b=nrm((COUT,), 0.1),
        gn3_g=1.0 + nrm((COUT,), 0.1), gn3_b=nrm((COUT,), 0.1),
    )

    x = nrm((B, C1, N, N), 1.0)
    residual = nrm((B, C2, N, N), 1.0)
    times = jnp.array([3.0, 17.0, 42.0, 101.0], jnp.float32)     # integer timesteps as floats
    labels = jnp.array([1, 5, 0, 7], jnp.int32)
    class_onehot = jax.nn.one_hot(labels, NUM_CLASSES, dtype=jnp.float32)

    out = conditional_residual_block(x, residual, times, class_onehot, params)
    out = jax.block_until_ready(out)
    assert out.shape == (B, COUT, N, N), out.shape

    # Two references: one with the conv operands rounded to bf16 (isolates kernel
    # implementation error), one pure-f32 (includes the expected bf16-MXU operand
    # rounding).
    ref_q = _reference_forward(x, residual, times, class_onehot, params, conv_dtype=jnp.bfloat16)
    ref_f = _reference_forward(x, residual, times, class_onehot, params, conv_dtype=jnp.float32)
    err_q = float(jnp.max(jnp.abs(out - ref_q)))
    err_f = float(jnp.max(jnp.abs(out - ref_f)))
    if not bool(jnp.all(jnp.isfinite(out))) or err_q > 2e-2 or err_f > 1e-1:
        raise SystemExit(f"numerical mismatch: err_vs_bf16ref={err_q}, err_vs_f32ref={err_f}")

    print("KERNEL_OK")
</pallas_src>

<mosaic_0001>
module attributes {stable_mosaic.version = 11 : i64} {
  func.func @_cond_res_block_kernel(%arg0: i32, %arg1: memref<2x1x8xf32, #tpu.memory_space<vmem>>, %arg2: memref<2x1x8xf32, #tpu.memory_space<vmem>>, %arg3: memref<2x8x8x8xf32, #tpu.memory_space<vmem>>, %arg4: memref<2x8x8x8xf32, #tpu.memory_space<vmem>>, %arg5: memref<8x8xf32, #tpu.memory_space<vmem>>, %arg6: memref<8x8xf32, #tpu.memory_space<vmem>>, %arg7: memref<8x8xf32, #tpu.memory_space<vmem>>, %arg8: memref<5x8xf32, #tpu.memory_space<vmem>>, %arg9: memref<8x8xf32, #tpu.memory_space<vmem>>, %arg10: memref<8x8xf32, #tpu.memory_space<vmem>>, %arg11: memref<8x8xf32, #tpu.memory_space<vmem>>, %arg12: memref<5x8xf32, #tpu.memory_space<vmem>>, %arg13: memref<144x32xbf16, #tpu.memory_space<vmem>>, %arg14: memref<288x32xbf16, #tpu.memory_space<vmem>>, %arg15: memref<6x32xf32, #tpu.memory_space<vmem>>, %arg16: memref<32x16xf32, #tpu.memory_space<vmem>>, %arg17: memref<16x32xf32, #tpu.memory_space<vmem>>, %arg18: memref<2x64x32xf32, #tpu.memory_space<vmem>>, %arg19: memref<2x10x10x16xbf16, #tpu.memory_space<vmem>>, %arg20: memref<2x10x10x32xbf16, #tpu.memory_space<vmem>>) attributes {dimension_semantics = [#tpu.dimension_semantics<parallel>], iteration_bounds = array<i64: 2>, scalar_prefetch = 0 : i64, scratch_operands = 2 : i64, tpu.core_type = #tpu.core_type<tc>, window_params = [{transform_indices = @transform_0, window_bounds = array<i64: 2, 1, 8>}, {transform_indices = @transform_1, window_bounds = array<i64: 2, 1, 8>}, {transform_indices = @transform_2, window_bounds = array<i64: 2, 8, 8, 8>}, {transform_indices = @transform_3, window_bounds = array<i64: 2, 8, 8, 8>}, {pipeline_mode = #tpu.pipeline_mode<synchronous>, transform_indices = @transform_4, window_bounds = array<i64: 8, 8>}, {pipeline_mode = #tpu.pipeline_mode<synchronous>, transform_indices = @transform_5, window_bounds = array<i64: 8, 8>}, {pipeline_mode = #tpu.pipeline_mode<synchronous>, transform_indices = @transform_6, window_bounds = array<i64: 8, 8>}, {pipeline_mode = #tpu.pipeline_mode<synchronous>, transform_indices = @transform_7, window_bounds = array<i64: 5, 8>}, {pipeline_mode = #tpu.pipeline_mode<synchronous>, transform_indices = @transform_8, window_bounds = array<i64: 8, 8>}, {pipeline_mode = #tpu.pipeline_mode<synchronous>, transform_indices = @transform_9, window_bounds = array<i64: 8, 8>}, {pipeline_mode = #tpu.pipeline_mode<synchronous>, transform_indices = @transform_10, window_bounds = array<i64: 8, 8>}, {pipeline_mode = #tpu.pipeline_mode<synchronous>, transform_indices = @transform_11, window_bounds = array<i64: 5, 8>}, {pipeline_mode = #tpu.pipeline_mode<synchronous>, transform_indices = @transform_12, window_bounds = array<i64: 144, 32>}, {pipeline_mode = #tpu.pipeline_mode<synchronous>, transform_indices = @transform_13, window_bounds = array<i64: 288, 32>}, {pipeline_mode = #tpu.pipeline_mode<synchronous>, transform_indices = @transform_14, window_bounds = array<i64: 6, 32>}, {pipeline_mode = #tpu.pipeline_mode<synchronous>, transform_indices = @transform_15, window_bounds = array<i64: 32, 16>}, {pipeline_mode = #tpu.pipeline_mode<synchronous>, transform_indices = @transform_16, window_bounds = array<i64: 16, 32>}, {transform_indices = @transform_17, window_bounds = array<i64: 2, 64, 32>}]} {
    %c0 = arith.constant 0 : index
    %c0_0 = arith.constant 0 : index
    %0 = vector.load %arg16[%c0, %c0_0] : memref<32x16xf32, #tpu.memory_space<vmem>>, vector<32x16xf32>
    %c0_1 = arith.constant 0 : index
    %c0_2 = arith.constant 0 : index
    %1 = vector.load %arg17[%c0_1, %c0_2] : memref<16x32xf32, #tpu.memory_space<vmem>>, vector<16x32xf32>
    %c0_3 = arith.constant 0 : index
    %c0_4 = arith.constant 0 : index
    %c0_5 = arith.constant 0 : index
    %2 = vector.load %arg1[%c0_3, %c0_4, %c0_5] : memref<2x1x8xf32, #tpu.memory_space<vmem>>, vector<2x1x8xf32>
    %3 = vector.shape_cast %2 : vector<2x1x8xf32> to vector<2x8xf32>
    %c0_6 = arith.constant 0 : index
    %c0_7 = arith.constant 0 : index
    %4 = vector.load %arg5[%c0_6, %c0_7] : memref<8x8xf32, #tpu.memory_space<vmem>>, vector<8x8xf32>
    %cst = arith.constant dense<0.000000e+00> : vector<2x8xf32>
    %5 = tpu.matmul %3, %4, %cst {dimension_numbers = #tpu.dot_dimension_numbers<[1], [0], [0], [1], [0, 0, 1, 1], [], []>} : vector<2x8xf32>, vector<8x8xf32>, vector<2x8xf32> -> vector<2x8xf32>
    %c0_8 = arith.constant 0 : index
    %c0_9 = arith.constant 0 : index
    %6 = vector.load %arg8[%c0_8, %c0_9] : memref<5x8xf32, #tpu.memory_space<vmem>>, vector<1x8xf32>
    %c1 = arith.constant 1 : index
    %c0_10 = arith.constant 0 : index
    %7 = vector.load %arg8[%c1, %c0_10] : memref<5x8xf32, #tpu.memory_space<vmem>>, vector<1x8xf32>
    %cst_11 = arith.constant dense<0.000000e+00> : vector<2xf32>
    %8 = vector.multi_reduction <add>, %5, %cst_11 [1] : vector<2x8xf32> to vector<2xf32>
    %9 = vector.shape_cast %8 : vector<2xf32> to vector<2x1xf32>
    %cst_12 = arith.constant 8.000000e+00 : f32
    %10 = vector.broadcast %cst_12 : f32 to vector<2x1xf32>
    %11 = arith.divf %9, %10 : vector<2x1xf32>
    %12 = vector.broadcast %11 : vector<2x1xf32> to vector<2x8xf32>
    %13 = arith.subf %5, %12 : vector<2x8xf32>
    %14 = arith.mulf %13, %13 : vector<2x8xf32>
    %cst_13 = arith.constant dense<0.000000e+00> : vector<2xf32>
    %15 = vector.multi_reduction <add>, %14, %cst_13 [1] : vector<2x8xf32> to vector<2xf32>
    %16 = vector.shape_cast %15 : vector<2xf32> to vector<2x1xf32>
    %cst_14 = arith.constant 8.000000e+00 : f32
    %17 = vector.broadcast %cst_14 : f32 to vector<2x1xf32>
    %18 = arith.divf %16, %17 : vector<2x1xf32>
    %19 = vector.broadcast %11 : vector<2x1xf32> to vector<2x8xf32>
    %20 = arith.subf %5, %19 : vector<2x8xf32>
    %cst_15 = arith.constant 9.99999974E-6 : f32
    %21 = vector.broadcast %cst_15 : f32 to vector<2x1xf32>
    %22 = arith.addf %18, %21 : vector<2x1xf32>
    %23 = math.rsqrt %22 : vector<2x1xf32>
    %24 = vector.broadcast %23 : vector<2x1xf32> to vector<2x8xf32>
    %25 = arith.mulf %20, %24 : vector<2x8xf32>
    %26 = vector.broadcast %6 : vector<1x8xf32> to vector<2x8xf32>
    %27 = arith.mulf %25, %26 : vector<2x8xf32>
    %28 = vector.broadcast %7 : vector<1x8xf32> to vector<2x8xf32>
    %29 = arith.addf %27, %28 : vector<2x8xf32>
    %cst_16 = arith.constant 5.000000e-01 : f32
    %30 = vector.broadcast %cst_16 : f32 to vector<2x8xf32>
    %31 = arith.mulf %30, %29 : vector<2x8xf32>
    %cst_17 = arith.constant 0.707106769 : f32
    %32 = vector.broadcast %cst_17 : f32 to vector<2x8xf32>
    %33 = arith.mulf %29, %32 : vector<2x8xf32>
    %34 = math.absf %33 : vector<2x8xf32>
    %cst_18 = arith.constant 0.327591091 : f32
    %35 = vector.broadcast %cst_18 : f32 to vector<2x8xf32>
    %36 = arith.mulf %35, %34 : vector<2x8xf32>
    %cst_19 = arith.constant 1.000000e+00 : f32
    %37 = vector.broadcast %cst_19 : f32 to vector<2x8xf32>
    %38 = arith.addf %37, %36 : vector<2x8xf32>
    %39 = tpu.reciprocal %38 {approx = true} : vector<2x8xf32> -> vector<2x8xf32>
    %40 = arith.mulf %38, %39 : vector<2x8xf32>
    %cst_20 = arith.constant 2.000000e+00 : f32
    %41 = vector.broadcast %cst_20 : f32 to vector<2x8xf32>
    %42 = arith.subf %41, %40 : vector<2x8xf32>
    %43 = arith.mulf %39, %42 : vector<2x8xf32>
    %cst_21 = arith.constant 1.06140542 : f32
    %44 = vector.broadcast %cst_21 : f32 to vector<2x8xf32>
    %45 = arith.mulf %44, %43 : vector<2x8xf32>
    %cst_22 = arith.constant -1.45315206 : f32
    %46 = vector.broadcast %cst_22 : f32 to vector<2x8xf32>
    %47 = arith.addf %45, %46 : vector<2x8xf32>
    %48 = arith.mulf %47, %43 : vector<2x8xf32>
    %cst_23 = arith.constant 1.42141378 : f32
    %49 = vector.broadcast %cst_23 : f32 to vector<2x8xf32>
    %50 = arith.addf %48, %49 : vector<2x8xf32>
    %51 = arith.mulf %50, %43 : vector<2x8xf32>
    %cst_24 = arith.constant -0.284496725 : f32
    %52 = vector.broadcast %cst_24 : f32 to vector<2x8xf32>
    %53 = arith.addf %51, %52 : vector<2x8xf32>
    %54 = arith.mulf %53, %43 : vector<2x8xf32>
    %cst_25 = arith.constant 0.254829586 : f32
    %55 = vector.broadcast %cst_25 : f32 to vector<2x8xf32>
    %56 = arith.addf %54, %55 : vector<2x8xf32>
    %57 = arith.mulf %56, %43 : vector<2x8xf32>
    %cst_26 = arith.constant 0.000000e+00 : f32
    %58 = vector.broadcast %cst_26 : f32 to vector<2x8xf32>
    %59 = arith.subf %58, %34 : vector<2x8xf32>
    %60 = arith.mulf %59, %34 : vector<2x8xf32>
    %61 = math.exp %60 : vector<2x8xf32>
    %62 = arith.mulf %57, %61 : vector<2x8xf32>
    %cst_27 = arith.constant 1.000000e+00 : f32
    %63 = vector.broadcast %cst_27 : f32 to vector<2x8xf32>
    %64 = arith.subf %63, %62 : vector<2x8xf32>
    %cst_28 = arith.constant 0.000000e+00 : f32
    %65 = vector.broadcast %cst_28 : f32 to vector<2x8xf32>
    %66 = arith.cmpf oge, %33, %65 : vector<2x8xf32>
    %cst_29 = arith.constant 0.000000e+00 : f32
    %67 = vector.broadcast %cst_29 : f32 to vector<2x8xf32>
    %68 = arith.subf %67, %64 : vector<2x8xf32>
    %69 = arith.select %66, %64, %68 : vector<2x8xi1>, vector<2x8xf32>
    %cst_30 = arith.constant 1.000000e+00 : f32
    %70 = vector.broadcast %cst_30 : f32 to vector<2x8xf32>
    %71 = arith.addf %70, %69 : vector<2x8xf32>
    %72 = arith.mulf %31, %71 : vector<2x8xf32>
    %c0_31 = arith.constant 0 : index
    %c0_32 = arith.constant 0 : index
    %73 = vector.load %arg6[%c0_31, %c0_32] : memref<8x8xf32, #tpu.memory_space<vmem>>, vector<8x8xf32>
    %cst_33 = arith.constant dense<0.000000e+00> : vector<2x8xf32>
    %74 = tpu.matmul %72, %73, %cst_33 {dimension_numbers = #tpu.dot_dimension_numbers<[1], [0], [0], [1], [0, 0, 1, 1], [], []>} : vector<2x8xf32>, vector<8x8xf32>, vector<2x8xf32> -> vector<2x8xf32>
    %c2 = arith.constant 2 : index
    %c0_34 = arith.constant 0 : index
    %75 = vector.load %arg8[%c2, %c0_34] : memref<5x8xf32, #tpu.memory_space<vmem>>, vector<1x8xf32>
    %c3 = arith.constant 3 : index
    %c0_35 = arith.constant 0 : index
    %76 = vector.load %arg8[%c3, %c0_35] : memref<5x8xf32, #tpu.memory_space<vmem>>, vector<1x8xf32>
    %cst_36 = arith.constant dense<0.000000e+00> : vector<2xf32>
    %77 = vector.multi_reduction <add>, %74, %cst_36 [1] : vector<2x8xf32> to vector<2xf32>
    %78 = vector.shape_cast %77 : vector<2xf32> to vector<2x1xf32>
    %cst_37 = arith.constant 8.000000e+00 : f32
    %79 = vector.broadcast %cst_37 : f32 to vector<2x1xf32>
    %80 = arith.divf %78, %79 : vector<2x1xf32>
    %81 = vector.broadcast %80 : vector<2x1xf32> to vector<2x8xf32>
    %82 = arith.subf %74, %81 : vector<2x8xf32>
    %83 = arith.mulf %82, %82 : vector<2x8xf32>
    %cst_38 = arith.constant dense<0.000000e+00> : vector<2xf32>
    %84 = vector.multi_reduction <add>, %83, %cst_38 [1] : vector<2x8xf32> to vector<2xf32>
    %85 = vector.shape_cast %84 : vector<2xf32> to vector<2x1xf32>
    %cst_39 = arith.constant 8.000000e+00 : f32
    %86 = vector.broadcast %cst_39 : f32 to vector<2x1xf32>
    %87 = arith.divf %85, %86 : vector<2x1xf32>
    %88 = vector.broadcast %80 : vector<2x1xf32> to vector<2x8xf32>
    %89 = arith.subf %74, %88 : vector<2x8xf32>
    %cst_40 = arith.constant 9.99999974E-6 : f32
    %90 = vector.broadcast %cst_40 : f32 to vector<2x1xf32>
    %91 = arith.addf %87, %90 : vector<2x1xf32>
    %92 = math.rsqrt %91 : vector<2x1xf32>
    %93 = vector.broadcast %92 : vector<2x1xf32> to vector<2x8xf32>
    %94 = arith.mulf %89, %93 : vector<2x8xf32>
    %95 = vector.broadcast %75 : vector<1x8xf32> to vector<2x8xf32>
    %96 = arith.mulf %94, %95 : vector<2x8xf32>
    %97 = vector.broadcast %76 : vector<1x8xf32> to vector<2x8xf32>
    %98 = arith.addf %96, %97 : vector<2x8xf32>
    %cst_41 = arith.constant 5.000000e-01 : f32
    %99 = vector.broadcast %cst_41 : f32 to vector<2x8xf32>
    %100 = arith.mulf %99, %98 : vector<2x8xf32>
    %cst_42 = arith.constant 0.707106769 : f32
    %101 = vector.broadcast %cst_42 : f32 to vector<2x8xf32>
    %102 = arith.mulf %98, %101 : vector<2x8xf32>
    %103 = math.absf %102 : vector<2x8xf32>
    %cst_43 = arith.constant 0.327591091 : f32
    %104 = vector.broadcast %cst_43 : f32 to vector<2x8xf32>
    %105 = arith.mulf %104, %103 : vector<2x8xf32>
    %cst_44 = arith.constant 1.000000e+00 : f32
    %106 = vector.broadcast %cst_44 : f32 to vector<2x8xf32>
    %107 = arith.addf %106, %105 : vector<2x8xf32>
    %108 = tpu.reciprocal %107 {approx = true} : vector<2x8xf32> -> vector<2x8xf32>
    %109 = arith.mulf %107, %108 : vector<2x8xf32>
    %cst_45 = arith.constant 2.000000e+00 : f32
    %110 = vector.broadcast %cst_45 : f32 to vector<2x8xf32>
    %111 = arith.subf %110, %109 : vector<2x8xf32>
    %112 = arith.mulf %108, %111 : vector<2x8xf32>
    %cst_46 = arith.constant 1.06140542 : f32
    %113 = vector.broadcast %cst_46 : f32 to vector<2x8xf32>
    %114 = arith.mulf %113, %112 : vector<2x8xf32>
    %cst_47 = arith.constant -1.45315206 : f32
    %115 = vector.broadcast %cst_47 : f32 to vector<2x8xf32>
    %116 = arith.addf %114, %115 : vector<2x8xf32>
    %117 = arith.mulf %116, %112 : vector<2x8xf32>
    %cst_48 = arith.constant 1.42141378 : f32
    %118 = vector.broadcast %cst_48 : f32 to vector<2x8xf32>
    %119 = arith.addf %117, %118 : vector<2x8xf32>
    %120 = arith.mulf %119, %112 : vector<2x8xf32>
    %cst_49 = arith.constant -0.284496725 : f32
    %121 = vector.broadcast %cst_49 : f32 to vector<2x8xf32>
    %122 = arith.addf %120, %121 : vector<2x8xf32>
    %123 = arith.mulf %122, %112 : vector<2x8xf32>
    %cst_50 = arith.constant 0.254829586 : f32
    %124 = vector.broadcast %cst_50 : f32 to vector<2x8xf32>
    %125 = arith.addf %123, %124 : vector<2x8xf32>
    %126 = arith.mulf %125, %112 : vector<2x8xf32>
    %cst_51 = arith.constant 0.000000e+00 : f32
    %127 = vector.broadcast %cst_51 : f32 to vector<2x8xf32>
    %128 = arith.subf %127, %103 : vector<2x8xf32>
    %129 = arith.mulf %128, %103 : vector<2x8xf32>
    %130 = math.exp %129 : vector<2x8xf32>
    %131 = arith.mulf %126, %130 : vector<2x8xf32>
    %cst_52 = arith.constant 1.000000e+00 : f32
    %132 = vector.broadcast %cst_52 : f32 to vector<2x8xf32>
    %133 = arith.subf %132, %131 : vector<2x8xf32>
    %cst_53 = arith.constant 0.000000e+00 : f32
    %134 = vector.broadcast %cst_53 : f32 to vector<2x8xf32>
    %135 = arith.cmpf oge, %102, %134 : vector<2x8xf32>
    %cst_54 = arith.constant 0.000000e+00 : f32
    %136 = vector.broadcast %cst_54 : f32 to vector<2x8xf32>
    %137 = arith.subf %136, %133 : vector<2x8xf32>
    %138 = arith.select %135, %133, %137 : vector<2x8xi1>, vector<2x8xf32>
    %cst_55 = arith.constant 1.000000e+00 : f32
    %139 = vector.broadcast %cst_55 : f32 to vector<2x8xf32>
    %140 = arith.addf %139, %138 : vector<2x8xf32>
    %141 = arith.mulf %100, %140 : vector<2x8xf32>
    %c0_56 = arith.constant 0 : index
    %c0_57 = arith.constant 0 : index
    %142 = vector.load %arg7[%c0_56, %c0_57] : memref<8x8xf32, #tpu.memory_space<vmem>>, vector<8x8xf32>
    %cst_58 = arith.constant dense<0.000000e+00> : vector<2x8xf32>
    %143 = tpu.matmul %141, %142, %cst_58 {dimension_numbers = #tpu.dot_dimension_numbers<[1], [0], [0], [1], [0, 0, 1, 1], [], []>} : vector<2x8xf32>, vector<8x8xf32>, vector<2x8xf32> -> vector<2x8xf32>
    %c4 = arith.constant 4 : index
    %c0_59 = arith.constant 0 : index
    %144 = vector.load %arg8[%c4, %c0_59] : memref<5x8xf32, #tpu.memory_space<vmem>>, vector<1x8xf32>
    %145 = vector.broadcast %144 : vector<1x8xf32> to vector<2x8xf32>
    %146 = arith.addf %143, %145 : vector<2x8xf32>
    %c0_60 = arith.constant 0 : index
    %c0_61 = arith.constant 0 : index
    %c0_62 = arith.constant 0 : index
    %147 = vector.load %arg2[%c0_60, %c0_61, %c0_62] : memref<2x1x8xf32, #tpu.memory_space<vmem>>, vector<2x1x8xf32>
    %148 = vector.shape_cast %147 : vector<2x1x8xf32> to vector<2x8xf32>
    %c0_63 = arith.constant 0 : index
    %c0_64 = arith.constant 0 : index
    %149 = vector.load %arg9[%c0_63, %c0_64] : memref<8x8xf32, #tpu.memory_space<vmem>>, vector<8x8xf32>
    %cst_65 = arith.constant dense<0.000000e+00> : vector<2x8xf32>
    %150 = tpu.matmul %148, %149, %cst_65 {dimension_numbers = #tpu.dot_dimension_numbers<[1], [0], [0], [1], [0, 0, 1, 1], [], []>} : vector<2x8xf32>, vector<8x8xf32>, vector<2x8xf32> -> vector<2x8xf32>
    %c0_66 = arith.constant 0 : index
    %c0_67 = arith.constant 0 : index
    %151 = vector.load %arg12[%c0_66, %c0_67] : memref<5x8xf32, #tpu.memory_space<vmem>>, vector<1x8xf32>
    %c1_68 = arith.constant 1 : index
    %c0_69 = arith.constant 0 : index
    %152 = vector.load %arg12[%c1_68, %c0_69] : memref<5x8xf32, #tpu.memory_space<vmem>>, vector<1x8xf32>
    %cst_70 = arith.constant dense<0.000000e+00> : vector<2xf32>
    %153 = vector.multi_reduction <add>, %150, %cst_70 [1] : vector<2x8xf32> to vector<2xf32>
    %154 = vector.shape_cast %153 : vector<2xf32> to vector<2x1xf32>
    %cst_71 = arith.constant 8.000000e+00 : f32
    %155 = vector.broadcast %cst_71 : f32 to vector<2x1xf32>
    %156 = arith.divf %154, %155 : vector<2x1xf32>
    %157 = vector.broadcast %156 : vector<2x1xf32> to vector<2x8xf32>
    %158 = arith.subf %150, %157 : vector<2x8xf32>
    %159 = arith.mulf %158, %158 : vector<2x8xf32>
    %cst_72 = arith.constant dense<0.000000e+00> : vector<2xf32>
    %160 = vector.multi_reduction <add>, %159, %cst_72 [1] : vector<2x8xf32> to vector<2xf32>
    %161 = vector.shape_cast %160 : vector<2xf32> to vector<2x1xf32>
    %cst_73 = arith.constant 8.000000e+00 : f32
    %162 = vector.broadcast %cst_73 : f32 to vector<2x1xf32>
    %163 = arith.divf %161, %162 : vector<2x1xf32>
    %164 = vector.broadcast %156 : vector<2x1xf32> to vector<2x8xf32>
    %165 = arith.subf %150, %164 : vector<2x8xf32>
    %cst_74 = arith.constant 9.99999974E-6 : f32
    %166 = vector.broadcast %cst_74 : f32 to vector<2x1xf32>
    %167 = arith.addf %163, %166 : vector<2x1xf32>
    %168 = math.rsqrt %167 : vector<2x1xf32>
    %169 = vector.broadcast %168 : vector<2x1xf32> to vector<2x8xf32>
    %170 = arith.mulf %165, %169 : vector<2x8xf32>
    %171 = vector.broadcast %151 : vector<1x8xf32> to vector<2x8xf32>
    %172 = arith.mulf %170, %171 : vector<2x8xf32>
    %173 = vector.broadcast %152 : vector<1x8xf32> to vector<2x8xf32>
    %174 = arith.addf %172, %173 : vector<2x8xf32>
    %cst_75 = arith.constant 5.000000e-01 : f32
    %175 = vector.broadcast %cst_75 : f32 to vector<2x8xf32>
    %176 = arith.mulf %175, %174 : vector<2x8xf32>
    %cst_76 = arith.constant 0.707106769 : f32
    %177 = vector.broadcast %cst_76 : f32 to vector<2x8xf32>
    %178 = arith.mulf %174, %177 : vector<2x8xf32>
    %179 = math.absf %178 : vector<2x8xf32>
    %cst_77 = arith.constant 0.327591091 : f32
    %180 = vector.broadcast %cst_77 : f32 to vector<2x8xf32>
    %181 = arith.mulf %180, %179 : vector<2x8xf32>
    %cst_78 = arith.constant 1.000000e+00 : f32
    %182 = vector.broadcast %cst_78 : f32 to vector<2x8xf32>
    %183 = arith.addf %182, %181 : vector<2x8xf32>
    %184 = tpu.reciprocal %183 {approx = true} : vector<2x8xf32> -> vector<2x8xf32>
    %185 = arith.mulf %183, %184 : vector<2x8xf32>
    %cst_79 = arith.constant 2.000000e+00 : f32
    %186 = vector.broadcast %cst_79 : f32 to vector<2x8xf32>
    %187 = arith.subf %186, %185 : vector<2x8xf32>
    %188 = arith.mulf %184, %187 : vector<2x8xf32>
    %cst_80 = arith.constant 1.06140542 : f32
    %189 = vector.broadcast %cst_80 : f32 to vector<2x8xf32>
    %190 = arith.mulf %189, %188 : vector<2x8xf32>
    %cst_81 = arith.constant -1.45315206 : f32
    %191 = vector.broadcast %cst_81 : f32 to vector<2x8xf32>
    %192 = arith.addf %190, %191 : vector<2x8xf32>
    %193 = arith.mulf %192, %188 : vector<2x8xf32>
    %cst_82 = arith.constant 1.42141378 : f32
    %194 = vector.broadcast %cst_82 : f32 to vector<2x8xf32>
    %195 = arith.addf %193, %194 : vector<2x8xf32>
    %196 = arith.mulf %195, %188 : vector<2x8xf32>
    %cst_83 = arith.constant -0.284496725 : f32
    %197 = vector.broadcast %cst_83 : f32 to vector<2x8xf32>
    %198 = arith.addf %196, %197 : vector<2x8xf32>
    %199 = arith.mulf %198, %188 : vector<2x8xf32>
    %cst_84 = arith.constant 0.254829586 : f32
    %200 = vector.broadcast %cst_84 : f32 to vector<2x8xf32>
    %201 = arith.addf %199, %200 : vector<2x8xf32>
    %202 = arith.mulf %201, %188 : vector<2x8xf32>
    %cst_85 = arith.constant 0.000000e+00 : f32
    %203 = vector.broadcast %cst_85 : f32 to vector<2x8xf32>
    %204 = arith.subf %203, %179 : vector<2x8xf32>
    %205 = arith.mulf %204, %179 : vector<2x8xf32>
    %206 = math.exp %205 : vector<2x8xf32>
    %207 = arith.mulf %202, %206 : vector<2x8xf32>
    %cst_86 = arith.constant 1.000000e+00 : f32
    %208 = vector.broadcast %cst_86 : f32 to vector<2x8xf32>
    %209 = arith.subf %208, %207 : vector<2x8xf32>
    %cst_87 = arith.constant 0.000000e+00 : f32
    %210 = vector.broadcast %cst_87 : f32 to vector<2x8xf32>
    %211 = arith.cmpf oge, %178, %210 : vector<2x8xf32>
    %cst_88 = arith.constant 0.000000e+00 : f32
    %212 = vector.broadcast %cst_88 : f32 to vector<2x8xf32>
    %213 = arith.subf %212, %209 : vector<2x8xf32>
    %214 = arith.select %211, %209, %213 : vector<2x8xi1>, vector<2x8xf32>
    %cst_89 = arith.constant 1.000000e+00 : f32
    %215 = vector.broadcast %cst_89 : f32 to vector<2x8xf32>
    %216 = arith.addf %215, %214 : vector<2x8xf32>
    %217 = arith.mulf %176, %216 : vector<2x8xf32>
    %c0_90 = arith.constant 0 : index
    %c0_91 = arith.constant 0 : index
    %218 = vector.load %arg10[%c0_90, %c0_91] : memref<8x8xf32, #tpu.memory_space<vmem>>, vector<8x8xf32>
    %cst_92 = arith.constant dense<0.000000e+00> : vector<2x8xf32>
    %219 = tpu.matmul %217, %218, %cst_92 {dimension_numbers = #tpu.dot_dimension_numbers<[1], [0], [0], [1], [0, 0, 1, 1], [], []>} : vector<2x8xf32>, vector<8x8xf32>, vector<2x8xf32> -> vector<2x8xf32>
    %c2_93 = arith.constant 2 : index
    %c0_94 = arith.constant 0 : index
    %220 = vector.load %arg12[%c2_93, %c0_94] : memref<5x8xf32, #tpu.memory_space<vmem>>, vector<1x8xf32>
    %c3_95 = arith.constant 3 : index
    %c0_96 = arith.constant 0 : index
    %221 = vector.load %arg12[%c3_95, %c0_96] : memref<5x8xf32, #tpu.memory_space<vmem>>, vector<1x8xf32>
    %cst_97 = arith.constant dense<0.000000e+00> : vector<2xf32>
    %222 = vector.multi_reduction <add>, %219, %cst_97 [1] : vector<2x8xf32> to vector<2xf32>
    %223 = vector.shape_cast %222 : vector<2xf32> to vector<2x1xf32>
    %cst_98 = arith.constant 8.000000e+00 : f32
    %224 = vector.broadcast %cst_98 : f32 to vector<2x1xf32>
    %225 = arith.divf %223, %224 : vector<2x1xf32>
    %226 = vector.broadcast %225 : vector<2x1xf32> to vector<2x8xf32>
    %227 = arith.subf %219, %226 : vector<2x8xf32>
    %228 = arith.mulf %227, %227 : vector<2x8xf32>
    %cst_99 = arith.constant dense<0.000000e+00> : vector<2xf32>
    %229 = vector.multi_reduction <add>, %228, %cst_99 [1] : vector<2x8xf32> to vector<2xf32>
    %230 = vector.shape_cast %229 : vector<2xf32> to vector<2x1xf32>
    %cst_100 = arith.constant 8.000000e+00 : f32
    %231 = vector.broadcast %cst_100 : f32 to vector<2x1xf32>
    %232 = arith.divf %230, %231 : vector<2x1xf32>
    %233 = vector.broadcast %225 : vector<2x1xf32> to vector<2x8xf32>
    %234 = arith.subf %219, %233 : vector<2x8xf32>
    %cst_101 = arith.constant 9.99999974E-6 : f32
    %235 = vector.broadcast %cst_101 : f32 to vector<2x1xf32>
    %236 = arith.addf %232, %235 : vector<2x1xf32>
    %237 = math.rsqrt %236 : vector<2x1xf32>
    %238 = vector.broadcast %237 : vector<2x1xf32> to vector<2x8xf32>
    %239 = arith.mulf %234, %238 : vector<2x8xf32>
    %240 = vector.broadcast %220 : vector<1x8xf32> to vector<2x8xf32>
    %241 = arith.mulf %239, %240 : vector<2x8xf32>
    %242 = vector.broadcast %221 : vector<1x8xf32> to vector<2x8xf32>
    %243 = arith.addf %241, %242 : vector<2x8xf32>
    %cst_102 = arith.constant 5.000000e-01 : f32
    %244 = vector.broadcast %cst_102 : f32 to vector<2x8xf32>
    %245 = arith.mulf %244, %243 : vector<2x8xf32>
    %cst_103 = arith.constant 0.707106769 : f32
    %246 = vector.broadcast %cst_103 : f32 to vector<2x8xf32>
    %247 = arith.mulf %243, %246 : vector<2x8xf32>
    %248 = math.absf %247 : vector<2x8xf32>
    %cst_104 = arith.constant 0.327591091 : f32
    %249 = vector.broadcast %cst_104 : f32 to vector<2x8xf32>
    %250 = arith.mulf %249, %248 : vector<2x8xf32>
    %cst_105 = arith.constant 1.000000e+00 : f32
    %251 = vector.broadcast %cst_105 : f32 to vector<2x8xf32>
    %252 = arith.addf %251, %250 : vector<2x8xf32>
    %253 = tpu.reciprocal %252 {approx = true} : vector<2x8xf32> -> vector<2x8xf32>
    %254 = arith.mulf %252, %253 : vector<2x8xf32>
    %cst_106 = arith.constant 2.000000e+00 : f32
    %255 = vector.broadcast %cst_106 : f32 to vector<2x8xf32>
    %256 = arith.subf %255, %254 : vector<2x8xf32>
    %257 = arith.mulf %253, %256 : vector<2x8xf32>
    %cst_107 = arith.constant 1.06140542 : f32
    %258 = vector.broadcast %cst_107 : f32 to vector<2x8xf32>
    %259 = arith.mulf %258, %257 : vector<2x8xf32>
    %cst_108 = arith.constant -1.45315206 : f32
    %260 = vector.broadcast %cst_108 : f32 to vector<2x8xf32>
    %261 = arith.addf %259, %260 : vector<2x8xf32>
    %262 = arith.mulf %261, %257 : vector<2x8xf32>
    %cst_109 = arith.constant 1.42141378 : f32
    %263 = vector.broadcast %cst_109 : f32 to vector<2x8xf32>
    %264 = arith.addf %262, %263 : vector<2x8xf32>
    %265 = arith.mulf %264, %257 : vector<2x8xf32>
    %cst_110 = arith.constant -0.284496725 : f32
    %266 = vector.broadcast %cst_110 : f32 to vector<2x8xf32>
    %267 = arith.addf %265, %266 : vector<2x8xf32>
    %268 = arith.mulf %267, %257 : vector<2x8xf32>
    %cst_111 = arith.constant 0.254829586 : f32
    %269 = vector.broadcast %cst_111 : f32 to vector<2x8xf32>
    %270 = arith.addf %268, %269 : vector<2x8xf32>
    %271 = arith.mulf %270, %257 : vector<2x8xf32>
    %cst_112 = arith.constant 0.000000e+00 : f32
    %272 = vector.broadcast %cst_112 : f32 to vector<2x8xf32>
    %273 = arith.subf %272, %248 : vector<2x8xf32>
    %274 = arith.mulf %273, %248 : vector<2x8xf32>
    %275 = math.exp %274 : vector<2x8xf32>
    %276 = arith.mulf %271, %275 : vector<2x8xf32>
    %cst_113 = arith.constant 1.000000e+00 : f32
    %277 = vector.broadcast %cst_113 : f32 to vector<2x8xf32>
    %278 = arith.subf %277, %276 : vector<2x8xf32>
    %cst_114 = arith.constant 0.000000e+00 : f32
    %279 = vector.broadcast %cst_114 : f32 to vector<2x8xf32>
    %280 = arith.cmpf oge, %247, %279 : vector<2x8xf32>
    %cst_115 = arith.constant 0.000000e+00 : f32
    %281 = vector.broadcast %cst_115 : f32 to vector<2x8xf32>
    %282 = arith.subf %281, %278 : vector<2x8xf32>
    %283 = arith.select %280, %278, %282 : vector<2x8xi1>, vector<2x8xf32>
    %cst_116 = arith.constant 1.000000e+00 : f32
    %284 = vector.broadcast %cst_116 : f32 to vector<2x8xf32>
    %285 = arith.addf %284, %283 : vector<2x8xf32>
    %286 = arith.mulf %245, %285 : vector<2x8xf32>
    %c0_117 = arith.constant 0 : index
    %c0_118 = arith.constant 0 : index
    %287 = vector.load %arg11[%c0_117, %c0_118] : memref<8x8xf32, #tpu.memory_space<vmem>>, vector<8x8xf32>
    %cst_119 = arith.constant dense<0.000000e+00> : vector<2x8xf32>
    %288 = tpu.matmul %286, %287, %cst_119 {dimension_numbers = #tpu.dot_dimension_numbers<[1], [0], [0], [1], [0, 0, 1, 1], [], []>} : vector<2x8xf32>, vector<8x8xf32>, vector<2x8xf32> -> vector<2x8xf32>
    %c4_120 = arith.constant 4 : index
    %c0_121 = arith.constant 0 : index
    %289 = vector.load %arg12[%c4_120, %c0_121] : memref<5x8xf32, #tpu.memory_space<vmem>>, vector<1x8xf32>
    %290 = vector.broadcast %289 : vector<1x8xf32> to vector<2x8xf32>
    %291 = arith.addf %288, %290 : vector<2x8xf32>
    %c0_122 = arith.constant 0 : index
    %c0_123 = arith.constant 0 : index
    %c0_124 = arith.constant 0 : index
    %c0_125 = arith.constant 0 : index
    %292 = vector.load %arg3[%c0_122, %c0_123, %c0_124, %c0_125] : memref<2x8x8x8xf32, #tpu.memory_space<vmem>>, vector<2x8x8x8xf32>
    %293 = vector.shape_cast %291 : vector<2x8xf32> to vector<2x1x1x8xf32>
    %294 = vector.broadcast %293 : vector<2x1x1x8xf32> to vector<2x8x8x8xf32>
    %295 = arith.mulf %292, %294 : vector<2x8x8x8xf32>
    %296 = vector.shape_cast %146 : vector<2x8xf32> to vector<2x1x1x8xf32>
    %297 = vector.broadcast %296 : vector<2x1x1x8xf32> to vector<2x8x8x8xf32>
    %298 = arith.addf %295, %297 : vector<2x8x8x8xf32>
    %299 = arith.truncf %298 : vector<2x8x8x8xf32> to vector<2x8x8x8xbf16>
    %c0_126 = arith.constant 0 : index
    %c0_127 = arith.constant 0 : index
    %c0_128 = arith.constant 0 : index
    %c0_129 = arith.constant 0 : index
    %300 = vector.load %arg4[%c0_126, %c0_127, %c0_128, %c0_129] : memref<2x8x8x8xf32, #tpu.memory_space<vmem>>, vector<2x8x8x8xf32>
    %301 = arith.truncf %300 : vector<2x8x8x8xf32> to vector<2x8x8x8xbf16>
    %302 = tpu.concatenate %299, %301 in 3 : vector<2x8x8x8xbf16>, vector<2x8x8x8xbf16> -> vector<2x8x8x16xbf16>
    %cst_130 = arith.constant 0.000000e+00 : bf16
    %303 = vector.broadcast %cst_130 : bf16 to vector<2x1x10x16xbf16>
    %cst_131 = arith.constant 0.000000e+00 : bf16
    %304 = vector.broadcast %cst_131 : bf16 to vector<2x8x1x16xbf16>
    %c0_132 = arith.constant 0 : index
    %c0_133 = arith.constant 0 : index
    %c0_134 = arith.constant 0 : index
    %c0_135 = arith.constant 0 : index
    %305 = vector.load %arg19[%c0_132, %c0_133, %c0_134, %c0_135] : memref<2x10x10x16xbf16, #tpu.memory_space<vmem>>, vector<2x1x10x16xbf16>
    tpu.vector_store %arg19[%c0_132, %c0_133, %c0_134, %c0_135], %303 {strides = array<i32>} : memref<2x10x10x16xbf16, #tpu.memory_space<vmem>>, vector<2x1x10x16xbf16>,
    %c0_136 = arith.constant 0 : index
    %c9 = arith.constant 9 : index
    %c0_137 = arith.constant 0 : index
    %c0_138 = arith.constant 0 : index
    %306 = vector.load %arg19[%c0_136, %c9, %c0_137, %c0_138] : memref<2x10x10x16xbf16, #tpu.memory_space<vmem>>, vector<2x1x10x16xbf16>
    tpu.vector_store %arg19[%c0_136, %c9, %c0_137, %c0_138], %303 {strides = array<i32>} : memref<2x10x10x16xbf16, #tpu.memory_space<vmem>>, vector<2x1x10x16xbf16>,
    %307 = tpu.concatenate %304, %302, %304 in 2 : vector<2x8x1x16xbf16>, vector<2x8x8x16xbf16>, vector<2x8x1x16xbf16> -> vector<2x8x10x16xbf16>
    %c0_139 = arith.constant 0 : index
    %c1_140 = arith.constant 1 : index
    %c0_141 = arith.constant 0 : index
    %c0_142 = arith.constant 0 : index
    %308 = vector.load %arg19[%c0_139, %c1_140, %c0_141, %c0_142] : memref<2x10x10x16xbf16, #tpu.memory_space<vmem>>, vector<2x8x10x16xbf16>
    tpu.vector_store %arg19[%c0_139, %c1_140, %c0_141, %c0_142], %307 {strides = array<i32>} : memref<2x10x10x16xbf16, #tpu.memory_space<vmem>>, vector<2x8x10x16xbf16>,
    %c0_143 = arith.constant 0 : index
    %c0_144 = arith.constant 0 : index
    %c0_145 = arith.constant 0 : index
    %c0_146 = arith.constant 0 : index
    %309 = vector.load %arg19[%c0_143, %c0_144, %c0_145, %c0_146] : memref<2x10x10x16xbf16, #tpu.memory_space<vmem>>, vector<2x8x8x16xbf16>
    %310 = vector.shape_cast %309 : vector<2x8x8x16xbf16> to vector<128x16xbf16>
    %c0_147 = arith.constant 0 : index
    %c0_148 = arith.constant 0 : index
    %c1_149 = arith.constant 1 : index
    %c0_150 = arith.constant 0 : index
    %311 = vector.load %arg19[%c0_147, %c0_148, %c1_149, %c0_150] : memref<2x10x10x16xbf16, #tpu.memory_space<vmem>>, vector<2x8x8x16xbf16>
    %312 = vector.shape_cast %311 : vector<2x8x8x16xbf16> to vector<128x16xbf16>
    %c0_151 = arith.constant 0 : index
    %c0_152 = arith.constant 0 : index
    %c2_153 = arith.constant 2 : index
    %c0_154 = arith.constant 0 : index
    %313 = vector.load %arg19[%c0_151, %c0_152, %c2_153, %c0_154] : memref<2x10x10x16xbf16, #tpu.memory_space<vmem>>, vector<2x8x8x16xbf16>
    %314 = vector.shape_cast %313 : vector<2x8x8x16xbf16> to vector<128x16xbf16>
    %c0_155 = arith.constant 0 : index
    %c1_156 = arith.constant 1 : index
    %c0_157 = arith.constant 0 : index
    %c0_158 = arith.constant 0 : index
    %315 = vector.load %arg19[%c0_155, %c1_156, %c0_157, %c0_158] : memref<2x10x10x16xbf16, #tpu.memory_space<vmem>>, vector<2x8x8x16xbf16>
    %316 = vector.shape_cast %315 : vector<2x8x8x16xbf16> to vector<128x16xbf16>
    %c0_159 = arith.constant 0 : index
    %c1_160 = arith.constant 1 : index
    %c1_161 = arith.constant 1 : index
    %c0_162 = arith.constant 0 : index
    %317 = vector.load %arg19[%c0_159, %c1_160, %c1_161, %c0_162] : memref<2x10x10x16xbf16, #tpu.memory_space<vmem>>, vector<2x8x8x16xbf16>
    %318 = vector.shape_cast %317 : vector<2x8x8x16xbf16> to vector<128x16xbf16>
    %c0_163 = arith.constant 0 : index
    %c1_164 = arith.constant 1 : index
    %c2_165 = arith.constant 2 : index
    %c0_166 = arith.constant 0 : index
    %319 = vector.load %arg19[%c0_163, %c1_164, %c2_165, %c0_166] : memref<2x10x10x16xbf16, #tpu.memory_space<vmem>>, vector<2x8x8x16xbf16>
    %320 = vector.shape_cast %319 : vector<2x8x8x16xbf16> to vector<128x16xbf16>
    %c0_167 = arith.constant 0 : index
    %c2_168 = arith.constant 2 : index
    %c0_169 = arith.constant 0 : index
    %c0_170 = arith.constant 0 : index
    %321 = vector.load %arg19[%c0_167, %c2_168, %c0_169, %c0_170] : memref<2x10x10x16xbf16, #tpu.memory_space<vmem>>, vector<2x8x8x16xbf16>
    %322 = vector.shape_cast %321 : vector<2x8x8x16xbf16> to vector<128x16xbf16>
    %c0_171 = arith.constant 0 : index
    %c2_172 = arith.constant 2 : index
    %c1_173 = arith.constant 1 : index
    %c0_174 = arith.constant 0 : index
    %323 = vector.load %arg19[%c0_171, %c2_172, %c1_173, %c0_174] : memref<2x10x10x16xbf16, #tpu.memory_space<vmem>>, vector<2x8x8x16xbf16>
    %324 = vector.shape_cast %323 : vector<2x8x8x16xbf16> to vector<128x16xbf16>
    %c0_175 = arith.constant 0 : index
    %c2_176 = arith.constant 2 : index
    %c2_177 = arith.constant 2 : index
    %c0_178 = arith.constant 0 : index
    %325 = vector.load %arg19[%c0_175, %c2_176, %c2_177, %c0_178] : memref<2x10x10x16xbf16, #tpu.memory_space<vmem>>, vector<2x8x8x16xbf16>
    %326 = vector.shape_cast %325 : vector<2x8x8x16xbf16> to vector<128x16xbf16>
    %327 = tpu.concatenate %310, %312, %314, %316, %318, %320, %322, %324, %326 in 1 : vector<128x16xbf16>, vector<128x16xbf16>, vector<128x16xbf16>, vector<128x16xbf16>, vector<128x16xbf16>, vector<128x16xbf16>, vector<128x16xbf16>, vector<128x16xbf16>, vector<128x16xbf16> -> vector<128x144xbf16>
    %c0_179 = arith.constant 0 : index
    %c0_180 = arith.constant 0 : index
    %328 = vector.load %arg13[%c0_179, %c0_180] : memref<144x32xbf16, #tpu.memory_space<vmem>>, vector<144x32xbf16>
    %cst_181 = arith.constant dense<0.000000e+00> : vector<128x32xf32>
    %329 = tpu.matmul %327, %328, %cst_181 {dimension_numbers = #tpu.dot_dimension_numbers<[1], [0], [0], [1], [0, 0, 1, 1], [], []>} : vector<128x144xbf16>, vector<144x32xbf16>, vector<128x32xf32> -> vector<128x32xf32>
    %c0_182 = arith.constant 0 : index
    %c0_183 = arith.constant 0 : index
    %330 = vector.load %arg15[%c0_182, %c0_183] : memref<6x32xf32, #tpu.memory_space<vmem>>, vector<1x32xf32>
    %c1_184 = arith.constant 1 : index
    %c0_185 = arith.constant 0 : index
    %331 = vector.load %arg15[%c1_184, %c0_185] : memref<6x32xf32, #tpu.memory_space<vmem>>, vector<1x32xf32>
    %cst_186 = arith.constant dense<0.000000e+00> : vector<128x16xf32>
    %332 = tpu.matmul %329, %0, %cst_186 {dimension_numbers = #tpu.dot_dimension_numbers<[1], [0], [0], [1], [0, 0, 1, 1], [], []>} : vector<128x32xf32>, vector<32x16xf32>, vector<128x16xf32> -> vector<128x16xf32>
    %333 = vector.shape_cast %332 : vector<128x16xf32> to vector<2x64x16xf32>
    %cst_187 = arith.constant dense<0.000000e+00> : vector<2x16xf32>
    %334 = vector.multi_reduction <add>, %333, %cst_187 [1] : vector<2x64x16xf32> to vector<2x16xf32>
    %cst_188 = arith.constant 7.812500e-03 : f32
    %335 = vector.broadcast %cst_188 : f32 to vector<2x16xf32>
    %336 = arith.mulf %334, %335 : vector<2x16xf32>
    %cst_189 = arith.constant dense<0.000000e+00> : vector<2x32xf32>
    %337 = tpu.matmul %336, %1, %cst_189 {dimension_numbers = #tpu.dot_dimension_numbers<[1], [0], [0], [1], [0, 0, 1, 1], [], []>} : vector<2x16xf32>, vector<16x32xf32>, vector<2x32xf32> -> vector<2x32xf32>
    %338 = vector.shape_cast %329 : vector<128x32xf32> to vector<2x64x32xf32>
    %339 = vector.shape_cast %337 : vector<2x32xf32> to vector<2x1x32xf32>
    %340 = vector.broadcast %339 : vector<2x1x32xf32> to vector<2x64x32xf32>
    %341 = arith.subf %338, %340 : vector<2x64x32xf32>
    %342 = arith.mulf %341, %341 : vector<2x64x32xf32>
    %343 = vector.shape_cast %342 : vector<2x64x32xf32> to vector<128x32xf32>
    %cst_190 = arith.constant dense<0.000000e+00> : vector<128x16xf32>
    %344 = tpu.matmul %343, %0, %cst_190 {dimension_numbers = #tpu.dot_dimension_numbers<[1], [0], [0], [1], [0, 0, 1, 1], [], []>} : vector<128x32xf32>, vector<32x16xf32>, vector<128x16xf32> -> vector<128x16xf32>
    %345 = vector.shape_cast %344 : vector<128x16xf32> to vector<2x64x16xf32>
    %cst_191 = arith.constant dense<0.000000e+00> : vector<2x16xf32>
    %346 = vector.multi_reduction <add>, %345, %cst_191 [1] : vector<2x64x16xf32> to vector<2x16xf32>
    %cst_192 = arith.constant 7.812500e-03 : f32
    %347 = vector.broadcast %cst_192 : f32 to vector<2x16xf32>
    %348 = arith.mulf %346, %347 : vector<2x16xf32>
    %cst_193 = arith.constant 9.99999974E-6 : f32
    %349 = vector.broadcast %cst_193 : f32 to vector<2x16xf32>
    %350 = arith.addf %348, %349 : vector<2x16xf32>
    %351 = math.rsqrt %350 : vector<2x16xf32>
    %cst_194 = arith.constant dense<0.000000e+00> : vector<2x32xf32>
    %352 = tpu.matmul %351, %1, %cst_194 {dimension_numbers = #tpu.dot_dimension_numbers<[1], [0], [0], [1], [0, 0, 1, 1], [], []>} : vector<2x16xf32>, vector<16x32xf32>, vector<2x32xf32> -> vector<2x32xf32>
    %353 = vector.broadcast %330 : vector<1x32xf32> to vector<2x32xf32>
    %354 = arith.mulf %352, %353 : vector<2x32xf32>
    %355 = vector.shape_cast %354 : vector<2x32xf32> to vector<2x1x32xf32>
    %356 = vector.broadcast %355 : vector<2x1x32xf32> to vector<2x64x32xf32>
    %357 = arith.mulf %341, %356 : vector<2x64x32xf32>
    %358 = vector.shape_cast %331 : vector<1x32xf32> to vector<1x1x32xf32>
    %359 = vector.broadcast %358 : vector<1x1x32xf32> to vector<2x64x32xf32>
    %360 = arith.addf %357, %359 : vector<2x64x32xf32>
    %cst_195 = arith.constant 5.000000e-01 : f32
    %361 = vector.broadcast %cst_195 : f32 to vector<2x64x32xf32>
    %362 = arith.mulf %361, %360 : vector<2x64x32xf32>
    %cst_196 = arith.constant 0.707106769 : f32
    %363 = vector.broadcast %cst_196 : f32 to vector<2x64x32xf32>
    %364 = arith.mulf %360, %363 : vector<2x64x32xf32>
    %365 = math.absf %364 : vector<2x64x32xf32>
    %cst_197 = arith.constant 0.327591091 : f32
    %366 = vector.broadcast %cst_197 : f32 to vector<2x64x32xf32>
    %367 = arith.mulf %366, %365 : vector<2x64x32xf32>
    %cst_198 = arith.constant 1.000000e+00 : f32
    %368 = vector.broadcast %cst_198 : f32 to vector<2x64x32xf32>
    %369 = arith.addf %368, %367 : vector<2x64x32xf32>
    %370 = tpu.reciprocal %369 {approx = true} : vector<2x64x32xf32> -> vector<2x64x32xf32>
    %371 = arith.mulf %369, %370 : vector<2x64x32xf32>
    %cst_199 = arith.constant 2.000000e+00 : f32
    %372 = vector.broadcast %cst_199 : f32 to vector<2x64x32xf32>
    %373 = arith.subf %372, %371 : vector<2x64x32xf32>
    %374 = arith.mulf %370, %373 : vector<2x64x32xf32>
    %cst_200 = arith.constant 1.06140542 : f32
    %375 = vector.broadcast %cst_200 : f32 to vector<2x64x32xf32>
    %376 = arith.mulf %375, %374 : vector<2x64x32xf32>
    %cst_201 = arith.constant -1.45315206 : f32
    %377 = vector.broadcast %cst_201 : f32 to vector<2x64x32xf32>
    %378 = arith.addf %376, %377 : vector<2x64x32xf32>
    %379 = arith.mulf %378, %374 : vector<2x64x32xf32>
    %cst_202 = arith.constant 1.42141378 : f32
    %380 = vector.broadcast %cst_202 : f32 to vector<2x64x32xf32>
    %381 = arith.addf %379, %380 : vector<2x64x32xf32>
    %382 = arith.mulf %381, %374 : vector<2x64x32xf32>
    %cst_203 = arith.constant -0.284496725 : f32
    %383 = vector.broadcast %cst_203 : f32 to vector<2x64x32xf32>
    %384 = arith.addf %382, %383 : vector<2x64x32xf32>
    %385 = arith.mulf %384, %374 : vector<2x64x32xf32>
    %cst_204 = arith.constant 0.254829586 : f32
    %386 = vector.broadcast %cst_204 : f32 to vector<2x64x32xf32>
    %387 = arith.addf %385, %386 : vector<2x64x32xf32>
    %388 = arith.mulf %387, %374 : vector<2x64x32xf32>
    %cst_205 = arith.constant 0.000000e+00 : f32
    %389 = vector.broadcast %cst_205 : f32 to vector<2x64x32xf32>
    %390 = arith.subf %389, %365 : vector<2x64x32xf32>
    %391 = arith.mulf %390, %365 : vector<2x64x32xf32>
    %392 = math.exp %391 : vector<2x64x32xf32>
    %393 = arith.mulf %388, %392 : vector<2x64x32xf32>
    %cst_206 = arith.constant 1.000000e+00 : f32
    %394 = vector.broadcast %cst_206 : f32 to vector<2x64x32xf32>
    %395 = arith.subf %394, %393 : vector<2x64x32xf32>
    %cst_207 = arith.constant 0.000000e+00 : f32
    %396 = vector.broadcast %cst_207 : f32 to vector<2x64x32xf32>
    %397 = arith.cmpf oge, %364, %396 : vector<2x64x32xf32>
    %cst_208 = arith.constant 0.000000e+00 : f32
    %398 = vector.broadcast %cst_208 : f32 to vector<2x64x32xf32>
    %399 = arith.subf %398, %395 : vector<2x64x32xf32>
    %400 = arith.select %397, %395, %399 : vector<2x64x32xi1>, vector<2x64x32xf32>
    %cst_209 = arith.constant 1.000000e+00 : f32
    %401 = vector.broadcast %cst_209 : f32 to vector<2x64x32xf32>
    %402 = arith.addf %401, %400 : vector<2x64x32xf32>
    %403 = arith.mulf %362, %402 : vector<2x64x32xf32>
    %404 = vector.shape_cast %403 : vector<2x64x32xf32> to vector<2x8x8x32xf32>
    %405 = arith.truncf %404 : vector<2x8x8x32xf32> to vector<2x8x8x32xbf16>
    %cst_210 = arith.constant 0.000000e+00 : bf16
    %406 = vector.broadcast %cst_210 : bf16 to vector<2x1x10x32xbf16>
    %cst_211 = arith.constant 0.000000e+00 : bf16
    %407 = vector.broadcast %cst_211 : bf16 to vector<2x8x1x32xbf16>
    %c0_212 = arith.constant 0 : index
    %c0_213 = arith.constant 0 : index
    %c0_214 = arith.constant 0 : index
    %c0_215 = arith.constant 0 : index
    %408 = vector.load %arg20[%c0_212, %c0_213, %c0_214, %c0_215] : memref<2x10x10x32xbf16, #tpu.memory_space<vmem>>, vector<2x1x10x32xbf16>
    tpu.vector_store %arg20[%c0_212, %c0_213, %c0_214, %c0_215], %406 {strides = array<i32>} : memref<2x10x10x32xbf16, #tpu.memory_space<vmem>>, vector<2x1x10x32xbf16>,
    %c0_216 = arith.constant 0 : index
    %c9_217 = arith.constant 9 : index
    %c0_218 = arith.constant 0 : index
    %c0_219 = arith.constant 0 : index
    %409 = vector.load %arg20[%c0_216, %c9_217, %c0_218, %c0_219] : memref<2x10x10x32xbf16, #tpu.memory_space<vmem>>, vector<2x1x10x32xbf16>
    tpu.vector_store %arg20[%c0_216, %c9_217, %c0_218, %c0_219], %406 {strides = array<i32>} : memref<2x10x10x32xbf16, #tpu.memory_space<vmem>>, vector<2x1x10x32xbf16>,
    %410 = tpu.concatenate %407, %405, %407 in 2 : vector<2x8x1x32xbf16>, vector<2x8x8x32xbf16>, vector<2x8x1x32xbf16> -> vector<2x8x10x32xbf16>
    %c0_220 = arith.constant 0 : index
    %c1_221 = arith.constant 1 : index
    %c0_222 = arith.constant 0 : index
    %c0_223 = arith.constant 0 : index
    %411 = vector.load %arg20[%c0_220, %c1_221, %c0_222, %c0_223] : memref<2x10x10x32xbf16, #tpu.memory_space<vmem>>, vector<2x8x10x32xbf16>
    tpu.vector_store %arg20[%c0_220, %c1_221, %c0_222, %c0_223], %410 {strides = array<i32>} : memref<2x10x10x32xbf16, #tpu.memory_space<vmem>>, vector<2x8x10x32xbf16>,
    %c0_224 = arith.constant 0 : index
    %c0_225 = arith.constant 0 : index
    %c0_226 = arith.constant 0 : index
    %c0_227 = arith.constant 0 : index
    %412 = vector.load %arg20[%c0_224, %c0_225, %c0_226, %c0_227] : memref<2x10x10x32xbf16, #tpu.memory_space<vmem>>, vector<2x8x8x32xbf16>
    %413 = vector.shape_cast %412 : vector<2x8x8x32xbf16> to vector<128x32xbf16>
    %c0_228 = arith.constant 0 : index
    %c0_229 = arith.constant 0 : index
    %c1_230 = arith.constant 1 : index
    %c0_231 = arith.constant 0 : index
    %414 = vector.load %arg20[%c0_228, %c0_229, %c1_230, %c0_231] : memref<2x10x10x32xbf16, #tpu.memory_space<vmem>>, vector<2x8x8x32xbf16>
    %415 = vector.shape_cast %414 : vector<2x8x8x32xbf16> to vector<128x32xbf16>
    %c0_232 = arith.constant 0 : index
    %c0_233 = arith.constant 0 : index
    %c2_234 = arith.constant 2 : index
    %c0_235 = arith.constant 0 : index
    %416 = vector.load %arg20[%c0_232, %c0_233, %c2_234, %c0_235] : memref<2x10x10x32xbf16, #tpu.memory_space<vmem>>, vector<2x8x8x32xbf16>
    %417 = vector.shape_cast %416 : vector<2x8x8x32xbf16> to vector<128x32xbf16>
    %c0_236 = arith.constant 0 : index
    %c1_237 = arith.constant 1 : index
    %c0_238 = arith.constant 0 : index
    %c0_239 = arith.constant 0 : index
    %418 = vector.load %arg20[%c0_236, %c1_237, %c0_238, %c0_239] : memref<2x10x10x32xbf16, #tpu.memory_space<vmem>>, vector<2x8x8x32xbf16>
    %419 = vector.shape_cast %418 : vector<2x8x8x32xbf16> to vector<128x32xbf16>
    %c0_240 = arith.constant 0 : index
    %c1_241 = arith.constant 1 : index
    %c1_242 = arith.constant 1 : index
    %c0_243 = arith.constant 0 : index
    %420 = vector.load %arg20[%c0_240, %c1_241, %c1_242, %c0_243] : memref<2x10x10x32xbf16, #tpu.memory_space<vmem>>, vector<2x8x8x32xbf16>
    %421 = vector.shape_cast %420 : vector<2x8x8x32xbf16> to vector<128x32xbf16>
    %c0_244 = arith.constant 0 : index
    %c1_245 = arith.constant 1 : index
    %c2_246 = arith.constant 2 : index
    %c0_247 = arith.constant 0 : index
    %422 = vector.load %arg20[%c0_244, %c1_245, %c2_246, %c0_247] : memref<2x10x10x32xbf16, #tpu.memory_space<vmem>>, vector<2x8x8x32xbf16>
    %423 = vector.shape_cast %422 : vector<2x8x8x32xbf16> to vector<128x32xbf16>
    %c0_248 = arith.constant 0 : index
    %c2_249 = arith.constant 2 : index
    %c0_250 = arith.constant 0 : index
    %c0_251 = arith.constant 0 : index
    %424 = vector.load %arg20[%c0_248, %c2_249, %c0_250, %c0_251] : memref<2x10x10x32xbf16, #tpu.memory_space<vmem>>, vector<2x8x8x32xbf16>
    %425 = vector.shape_cast %424 : vector<2x8x8x32xbf16> to vector<128x32xbf16>
    %c0_252 = arith.constant 0 : index
    %c2_253 = arith.constant 2 : index
    %c1_254 = arith.constant 1 : index
    %c0_255 = arith.constant 0 : index
    %426 = vector.load %arg20[%c0_252, %c2_253, %c1_254, %c0_255] : memref<2x10x10x32xbf16, #tpu.memory_space<vmem>>, vector<2x8x8x32xbf16>
    %427 = vector.shape_cast %426 : vector<2x8x8x32xbf16> to vector<128x32xbf16>
    %c0_256 = arith.constant 0 : index
    %c2_257 = arith.constant 2 : index
    %c2_258 = arith.constant 2 : index
    %c0_259 = arith.constant 0 : index
    %428 = vector.load %arg20[%c0_256, %c2_257, %c2_258, %c0_259] : memref<2x10x10x32xbf16, #tpu.memory_space<vmem>>, vector<2x8x8x32xbf16>
    %429 = vector.shape_cast %428 : vector<2x8x8x32xbf16> to vector<128x32xbf16>
    %430 = tpu.concatenate %413, %415, %417, %419, %421, %423, %425, %427, %429 in 1 : vector<128x32xbf16>, vector<128x32xbf16>, vector<128x32xbf16>, vector<128x32xbf16>, vector<128x32xbf16>, vector<128x32xbf16>, vector<128x32xbf16>, vector<128x32xbf16>, vector<128x32xbf16> -> vector<128x288xbf16>
    %c0_260 = arith.constant 0 : index
    %c0_261 = arith.constant 0 : index
    %431 = vector.load %arg14[%c0_260, %c0_261] : memref<288x32xbf16, #tpu.memory_space<vmem>>, vector<288x32xbf16>
    %cst_262 = arith.constant dense<0.000000e+00> : vector<128x32xf32>
    %432 = tpu.matmul %430, %431, %cst_262 {dimension_numbers = #tpu.dot_dimension_numbers<[1], [0], [0], [1], [0, 0, 1, 1], [], []>} : vector<128x288xbf16>, vector<288x32xbf16>, vector<128x32xf32> -> vector<128x32xf32>
    %c2_263 = arith.constant 2 : index
    %c0_264 = arith.constant 0 : index
    %433 = vector.load %arg15[%c2_263, %c0_264] : memref<6x32xf32, #tpu.memory_space<vmem>>, vector<1x32xf32>
    %c3_265 = arith.constant 3 : index
    %c0_266 = arith.constant 0 : index
    %434 = vector.load %arg15[%c3_265, %c0_266] : memref<6x32xf32, #tpu.memory_space<vmem>>, vector<1x32xf32>
    %cst_267 = arith.constant dense<0.000000e+00> : vector<128x16xf32>
    %435 = tpu.matmul %432, %0, %cst_267 {dimension_numbers = #tpu.dot_dimension_numbers<[1], [0], [0], [1], [0, 0, 1, 1], [], []>} : vector<128x32xf32>, vector<32x16xf32>, vector<128x16xf32> -> vector<128x16xf32>
    %436 = vector.shape_cast %435 : vector<128x16xf32> to vector<2x64x16xf32>
    %cst_268 = arith.constant dense<0.000000e+00> : vector<2x16xf32>
    %437 = vector.multi_reduction <add>, %436, %cst_268 [1] : vector<2x64x16xf32> to vector<2x16xf32>
    %cst_269 = arith.constant 7.812500e-03 : f32
    %438 = vector.broadcast %cst_269 : f32 to vector<2x16xf32>
    %439 = arith.mulf %437, %438 : vector<2x16xf32>
    %cst_270 = arith.constant dense<0.000000e+00> : vector<2x32xf32>
    %440 = tpu.matmul %439, %1, %cst_270 {dimension_numbers = #tpu.dot_dimension_numbers<[1], [0], [0], [1], [0, 0, 1, 1], [], []>} : vector<2x16xf32>, vector<16x32xf32>, vector<2x32xf32> -> vector<2x32xf32>
    %441 = vector.shape_cast %432 : vector<128x32xf32> to vector<2x64x32xf32>
    %442 = vector.shape_cast %440 : vector<2x32xf32> to vector<2x1x32xf32>
    %443 = vector.broadcast %442 : vector<2x1x32xf32> to vector<2x64x32xf32>
    %444 = arith.subf %441, %443 : vector<2x64x32xf32>
    %445 = arith.mulf %444, %444 : vector<2x64x32xf32>
    %446 = vector.shape_cast %445 : vector<2x64x32xf32> to vector<128x32xf32>
    %cst_271 = arith.constant dense<0.000000e+00> : vector<128x16xf32>
    %447 = tpu.matmul %446, %0, %cst_271 {dimension_numbers = #tpu.dot_dimension_numbers<[1], [0], [0], [1], [0, 0, 1, 1], [], []>} : vector<128x32xf32>, vector<32x16xf32>, vector<128x16xf32> -> vector<128x16xf32>
    %448 = vector.shape_cast %447 : vector<128x16xf32> to vector<2x64x16xf32>
    %cst_272 = arith.constant dense<0.000000e+00> : vector<2x16xf32>
    %449 = vector.multi_reduction <add>, %448, %cst_272 [1] : vector<2x64x16xf32> to vector<2x16xf32>
    %cst_273 = arith.constant 7.812500e-03 : f32
    %450 = vector.broadcast %cst_273 : f32 to vector<2x16xf32>
    %451 = arith.mulf %449, %450 : vector<2x16xf32>
    %cst_274 = arith.constant 9.99999974E-6 : f32
    %452 = vector.broadcast %cst_274 : f32 to vector<2x16xf32>
    %453 = arith.addf %451, %452 : vector<2x16xf32>
    %454 = math.rsqrt %453 : vector<2x16xf32>
    %cst_275 = arith.constant dense<0.000000e+00> : vector<2x32xf32>
    %455 = tpu.matmul %454, %1, %cst_275 {dimension_numbers = #tpu.dot_dimension_numbers<[1], [0], [0], [1], [0, 0, 1, 1], [], []>} : vector<2x16xf32>, vector<16x32xf32>, vector<2x32xf32> -> vector<2x32xf32>
    %456 = vector.broadcast %433 : vector<1x32xf32> to vector<2x32xf32>
    %457 = arith.mulf %455, %456 : vector<2x32xf32>
    %458 = vector.shape_cast %457 : vector<2x32xf32> to vector<2x1x32xf32>
    %459 = vector.broadcast %458 : vector<2x1x32xf32> to vector<2x64x32xf32>
    %460 = arith.mulf %444, %459 : vector<2x64x32xf32>
    %461 = vector.shape_cast %434 : vector<1x32xf32> to vector<1x1x32xf32>
    %462 = vector.broadcast %461 : vector<1x1x32xf32> to vector<2x64x32xf32>
    %463 = arith.addf %460, %462 : vector<2x64x32xf32>
    %cst_276 = arith.constant 5.000000e-01 : f32
    %464 = vector.broadcast %cst_276 : f32 to vector<2x64x32xf32>
    %465 = arith.mulf %464, %463 : vector<2x64x32xf32>
    %cst_277 = arith.constant 0.707106769 : f32
    %466 = vector.broadcast %cst_277 : f32 to vector<2x64x32xf32>
    %467 = arith.mulf %463, %466 : vector<2x64x32xf32>
    %468 = math.absf %467 : vector<2x64x32xf32>
    %cst_278 = arith.constant 0.327591091 : f32
    %469 = vector.broadcast %cst_278 : f32 to vector<2x64x32xf32>
    %470 = arith.mulf %469, %468 : vector<2x64x32xf32>
    %cst_279 = arith.constant 1.000000e+00 : f32
    %471 = vector.broadcast %cst_279 : f32 to vector<2x64x32xf32>
    %472 = arith.addf %471, %470 : vector<2x64x32xf32>
    %473 = tpu.reciprocal %472 {approx = true} : vector<2x64x32xf32> -> vector<2x64x32xf32>
    %474 = arith.mulf %472, %473 : vector<2x64x32xf32>
    %cst_280 = arith.constant 2.000000e+00 : f32
    %475 = vector.broadcast %cst_280 : f32 to vector<2x64x32xf32>
    %476 = arith.subf %475, %474 : vector<2x64x32xf32>
    %477 = arith.mulf %473, %476 : vector<2x64x32xf32>
    %cst_281 = arith.constant 1.06140542 : f32
    %478 = vector.broadcast %cst_281 : f32 to vector<2x64x32xf32>
    %479 = arith.mulf %478, %477 : vector<2x64x32xf32>
    %cst_282 = arith.constant -1.45315206 : f32
    %480 = vector.broadcast %cst_282 : f32 to vector<2x64x32xf32>
    %481 = arith.addf %479, %480 : vector<2x64x32xf32>
    %482 = arith.mulf %481, %477 : vector<2x64x32xf32>
    %cst_283 = arith.constant 1.42141378 : f32
    %483 = vector.broadcast %cst_283 : f32 to vector<2x64x32xf32>
    %484 = arith.addf %482, %483 : vector<2x64x32xf32>
    %485 = arith.mulf %484, %477 : vector<2x64x32xf32>
    %cst_284 = arith.constant -0.284496725 : f32
    %486 = vector.broadcast %cst_284 : f32 to vector<2x64x32xf32>
    %487 = arith.addf %485, %486 : vector<2x64x32xf32>
    %488 = arith.mulf %487, %477 : vector<2x64x32xf32>
    %cst_285 = arith.constant 0.254829586 : f32
    %489 = vector.broadcast %cst_285 : f32 to vector<2x64x32xf32>
    %490 = arith.addf %488, %489 : vector<2x64x32xf32>
    %491 = arith.mulf %490, %477 : vector<2x64x32xf32>
    %cst_286 = arith.constant 0.000000e+00 : f32
    %492 = vector.broadcast %cst_286 : f32 to vector<2x64x32xf32>
    %493 = arith.subf %492, %468 : vector<2x64x32xf32>
    %494 = arith.mulf %493, %468 : vector<2x64x32xf32>
    %495 = math.exp %494 : vector<2x64x32xf32>
    %496 = arith.mulf %491, %495 : vector<2x64x32xf32>
    %cst_287 = arith.constant 1.000000e+00 : f32
    %497 = vector.broadcast %cst_287 : f32 to vector<2x64x32xf32>
    %498 = arith.subf %497, %496 : vector<2x64x32xf32>
    %cst_288 = arith.constant 0.000000e+00 : f32
    %499 = vector.broadcast %cst_288 : f32 to vector<2x64x32xf32>
    %500 = arith.cmpf oge, %467, %499 : vector<2x64x32xf32>
    %cst_289 = arith.constant 0.000000e+00 : f32
    %501 = vector.broadcast %cst_289 : f32 to vector<2x64x32xf32>
    %502 = arith.subf %501, %498 : vector<2x64x32xf32>
    %503 = arith.select %500, %498, %502 : vector<2x64x32xi1>, vector<2x64x32xf32>
    %cst_290 = arith.constant 1.000000e+00 : f32
    %504 = vector.broadcast %cst_290 : f32 to vector<2x64x32xf32>
    %505 = arith.addf %504, %503 : vector<2x64x32xf32>
    %506 = arith.mulf %465, %505 : vector<2x64x32xf32>
    %507 = vector.shape_cast %506 : vector<2x64x32xf32> to vector<128x32xf32>
    %c4_291 = arith.constant 4 : index
    %c0_292 = arith.constant 0 : index
    %508 = vector.load %arg15[%c4_291, %c0_292] : memref<6x32xf32, #tpu.memory_space<vmem>>, vector<1x32xf32>
    %c5 = arith.constant 5 : index
    %c0_293 = arith.constant 0 : index
    %509 = vector.load %arg15[%c5, %c0_293] : memref<6x32xf32, #tpu.memory_space<vmem>>, vector<1x32xf32>
    %cst_294 = arith.constant dense<0.000000e+00> : vector<128x16xf32>
    %510 = tpu.matmul %507, %0, %cst_294 {dimension_numbers = #tpu.dot_dimension_numbers<[1], [0], [0], [1], [0, 0, 1, 1], [], []>} : vector<128x32xf32>, vector<32x16xf32>, vector<128x16xf32> -> vector<128x16xf32>
    %511 = vector.shape_cast %510 : vector<128x16xf32> to vector<2x64x16xf32>
    %cst_295 = arith.constant dense<0.000000e+00> : vector<2x16xf32>
    %512 = vector.multi_reduction <add>, %511, %cst_295 [1] : vector<2x64x16xf32> to vector<2x16xf32>
    %cst_296 = arith.constant 7.812500e-03 : f32
    %513 = vector.broadcast %cst_296 : f32 to vector<2x16xf32>
    %514 = arith.mulf %512, %513 : vector<2x16xf32>
    %cst_297 = arith.constant dense<0.000000e+00> : vector<2x32xf32>
    %515 = tpu.matmul %514, %1, %cst_297 {dimension_numbers = #tpu.dot_dimension_numbers<[1], [0], [0], [1], [0, 0, 1, 1], [], []>} : vector<2x16xf32>, vector<16x32xf32>, vector<2x32xf32> -> vector<2x32xf32>
    %516 = vector.shape_cast %507 : vector<128x32xf32> to vector<2x64x32xf32>
    %517 = vector.shape_cast %515 : vector<2x32xf32> to vector<2x1x32xf32>
    %518 = vector.broadcast %517 : vector<2x1x32xf32> to vector<2x64x32xf32>
    %519 = arith.subf %516, %518 : vector<2x64x32xf32>
    %520 = arith.mulf %519, %519 : vector<2x64x32xf32>
    %521 = vector.shape_cast %520 : vector<2x64x32xf32> to vector<128x32xf32>
    %cst_298 = arith.constant dense<0.000000e+00> : vector<128x16xf32>
    %522 = tpu.matmul %521, %0, %cst_298 {dimension_numbers = #tpu.dot_dimension_numbers<[1], [0], [0], [1], [0, 0, 1, 1], [], []>} : vector<128x32xf32>, vector<32x16xf32>, vector<128x16xf32> -> vector<128x16xf32>
    %523 = vector.shape_cast %522 : vector<128x16xf32> to vector<2x64x16xf32>
    %cst_299 = arith.constant dense<0.000000e+00> : vector<2x16xf32>
    %524 = vector.multi_reduction <add>, %523, %cst_299 [1] : vector<2x64x16xf32> to vector<2x16xf32>
    %cst_300 = arith.constant 7.812500e-03 : f32
    %525 = vector.broadcast %cst_300 : f32 to vector<2x16xf32>
    %526 = arith.mulf %524, %525 : vector<2x16xf32>
    %cst_301 = arith.constant 9.99999974E-6 : f32
    %527 = vector.broadcast %cst_301 : f32 to vector<2x16xf32>
    %528 = arith.addf %526, %527 : vector<2x16xf32>
    %529 = math.rsqrt %528 : vector<2x16xf32>
    %cst_302 = arith.constant dense<0.000000e+00> : vector<2x32xf32>
    %530 = tpu.matmul %529, %1, %cst_302 {dimension_numbers = #tpu.dot_dimension_numbers<[1], [0], [0], [1], [0, 0, 1, 1], [], []>} : vector<2x16xf32>, vector<16x32xf32>, vector<2x32xf32> -> vector<2x32xf32>
    %531 = vector.broadcast %508 : vector<1x32xf32> to vector<2x32xf32>
    %532 = arith.mulf %530, %531 : vector<2x32xf32>
    %533 = vector.shape_cast %532 : vector<2x32xf32> to vector<2x1x32xf32>
    %534 = vector.broadcast %533 : vector<2x1x32xf32> to vector<2x64x32xf32>
    %535 = arith.mulf %519, %534 : vector<2x64x32xf32>
    %536 = vector.shape_cast %509 : vector<1x32xf32> to vector<1x1x32xf32>
    %537 = vector.broadcast %536 : vector<1x1x32xf32> to vector<2x64x32xf32>
    %538 = arith.addf %535, %537 : vector<2x64x32xf32>
    %c0_303 = arith.constant 0 : index
    %c0_304 = arith.constant 0 : index
    %c0_305 = arith.constant 0 : index
    %539 = vector.load %arg18[%c0_303, %c0_304, %c0_305] : memref<2x64x32xf32, #tpu.memory_space<vmem>>, vector<2x64x32xf32>
    tpu.vector_store %arg18[%c0_303, %c0_304, %c0_305], %538 {strides = array<i32>} : memref<2x64x32xf32, #tpu.memory_space<vmem>>, vector<2x64x32xf32>,
    return
  }
  func.func @transform_0(%arg0: i32) -> (i32, i32, i32) {
    %c0_i32 = arith.constant 0 : i32
    %c0_i32_0 = arith.constant 0 : i32
    %c0_i32_1 = arith.constant 0 : i32
    return %arg0, %c0_i32, %c0_i32_0 : i32, i32, i32
  }
  func.func @transform_1(%arg0: i32) -> (i32, i32, i32) {
    %c0_i32 = arith.constant 0 : i32
    %c0_i32_0 = arith.constant 0 : i32
    %c0_i32_1 = arith.constant 0 : i32
    return %arg0, %c0_i32, %c0_i32_0 : i32, i32, i32
  }
  func.func @transform_2(%arg0: i32) -> (i32, i32, i32, i32) {
    %c0_i32 = arith.constant 0 : i32
    %c0_i32_0 = arith.constant 0 : i32
    %c0_i32_1 = arith.constant 0 : i32
    %c0_i32_2 = arith.constant 0 : i32
    return %arg0, %c0_i32, %c0_i32_0, %c0_i32_1 : i32, i32, i32, i32
  }
  func.func @transform_3(%arg0: i32) -> (i32, i32, i32, i32) {
    %c0_i32 = arith.constant 0 : i32
    %c0_i32_0 = arith.constant 0 : i32
    %c0_i32_1 = arith.constant 0 : i32
    %c0_i32_2 = arith.constant 0 : i32
    return %arg0, %c0_i32, %c0_i32_0, %c0_i32_1 : i32, i32, i32, i32
  }
  func.func @transform_4(%arg0: i32) -> (i32, i32) {
    %c0_i32 = arith.constant 0 : i32
    %c0_i32_0 = arith.constant 0 : i32
    %c0_i32_1 = arith.constant 0 : i32
    return %c0_i32, %c0_i32_0 : i32, i32
  }
  func.func @transform_5(%arg0: i32) -> (i32, i32) {
    %c0_i32 = arith.constant 0 : i32
    %c0_i32_0 = arith.constant 0 : i32
    %c0_i32_1 = arith.constant 0 : i32
    return %c0_i32, %c0_i32_0 : i32, i32
  }
  func.func @transform_6(%arg0: i32) -> (i32, i32) {
    %c0_i32 = arith.constant 0 : i32
    %c0_i32_0 = arith.constant 0 : i32
    %c0_i32_1 = arith.constant 0 : i32
    return %c0_i32, %c0_i32_0 : i32, i32
  }
  func.func @transform_7(%arg0: i32) -> (i32, i32) {
    %c0_i32 = arith.constant 0 : i32
    %c0_i32_0 = arith.constant 0 : i32
    %c0_i32_1 = arith.constant 0 : i32
    return %c0_i32, %c0_i32_0 : i32, i32
  }
  func.func @transform_8(%arg0: i32) -> (i32, i32) {
    %c0_i32 = arith.constant 0 : i32
    %c0_i32_0 = arith.constant 0 : i32
    %c0_i32_1 = arith.constant 0 : i32
    return %c0_i32, %c0_i32_0 : i32, i32
  }
  func.func @transform_9(%arg0: i32) -> (i32, i32) {
    %c0_i32 = arith.constant 0 : i32
    %c0_i32_0 = arith.constant 0 : i32
    %c0_i32_1 = arith.constant 0 : i32
    return %c0_i32, %c0_i32_0 : i32, i32
  }
  func.func @transform_10(%arg0: i32) -> (i32, i32) {
    %c0_i32 = arith.constant 0 : i32
    %c0_i32_0 = arith.constant 0 : i32
    %c0_i32_1 = arith.constant 0 : i32
    return %c0_i32, %c0_i32_0 : i32, i32
  }
  func.func @transform_11(%arg0: i32) -> (i32, i32) {
    %c0_i32 = arith.constant 0 : i32
    %c0_i32_0 = arith.constant 0 : i32
    %c0_i32_1 = arith.constant 0 : i32
    return %c0_i32, %c0_i32_0 : i32, i32
  }
  func.func @transform_12(%arg0: i32) -> (i32, i32) {
    %c0_i32 = arith.constant 0 : i32
    %c0_i32_0 = arith.constant 0 : i32
    %c0_i32_1 = arith.constant 0 : i32
    return %c0_i32, %c0_i32_0 : i32, i32
  }
  func.func @transform_13(%arg0: i32) -> (i32, i32) {
    %c0_i32 = arith.constant 0 : i32
    %c0_i32_0 = arith.constant 0 : i32
    %c0_i32_1 = arith.constant 0 : i32
    return %c0_i32, %c0_i32_0 : i32, i32
  }
  func.func @transform_14(%arg0: i32) -> (i32, i32) {
    %c0_i32 = arith.constant 0 : i32
    %c0_i32_0 = arith.constant 0 : i32
    %c0_i32_1 = arith.constant 0 : i32
    return %c0_i32, %c0_i32_0 : i32, i32
  }
  func.func @transform_15(%arg0: i32) -> (i32, i32) {
    %c0_i32 = arith.constant 0 : i32
    %c0_i32_0 = arith.constant 0 : i32
    %c0_i32_1 = arith.constant 0 : i32
    return %c0_i32, %c0_i32_0 : i32, i32
  }
  func.func @transform_16(%arg0: i32) -> (i32, i32) {
    %c0_i32 = arith.constant 0 : i32
    %c0_i32_0 = arith.constant 0 : i32
    %c0_i32_1 = arith.constant 0 : i32
    return %c0_i32, %c0_i32_0 : i32, i32
  }
  func.func @transform_17(%arg0: i32) -> (i32, i32, i32) {
    %c0_i32 = arith.constant 0 : i32
    %c0_i32_0 = arith.constant 0 : i32
    %c0_i32_1 = arith.constant 0 : i32
    return %arg0, %c0_i32, %c0_i32_0 : i32, i32, i32
  }
}

</mosaic_0001>

<bundles_post_ra>
// kernel: tpu_custom_call.1
= control target key start
LH: loop header
LB: loop body
LE: loop exit
PB: predicated region body
PF: predicated region fallthrough
CT: control target
= control target key end

     0   :  { %s16223_s0 = inlined_call_operand.hbm [shape: f32[4,1,8], index: 0, kind: input, shape index: {}]   ;;  %s16224_s1 = inlined_call_operand.hbm [shape: f32[4,1,8], index: 1, kind: input, shape index: {}]   ;;  %s16225_s2 = inlined_call_operand.vmem [shape: f32[4,8,8,8], index: 2, kind: input, shape index: {}]   ;;  %s16226_s3 = inlined_call_operand.hbm [shape: f32[4,8,8,8], index: 3, kind: input, shape index: {}]   ;;  %s16227_s4 = inlined_call_operand.hbm [shape: f32[8,8], index: 4, kind: input, shape index: {}]   ;;  %s16228_s5 = inlined_call_operand.hbm [shape: f32[8,8], index: 5, kind: input, shape index: {}]   ;;  %s16229_s6 = inlined_call_operand.hbm [shape: f32[8,8], index: 6, kind: input, shape index: {}]   ;;  %s16230_s7 = inlined_call_operand.hbm [shape: f32[5,8], index: 7, kind: input, shape index: {}]   ;;  %s16231_s8 = inlined_call_operand.hbm [shape: f32[8,8], index: 8, kind: input, shape index: {}]   ;;  %s16232_s9 = inlined_call_operand.vmem [shape: f32[8,8], index: 9, kind: input, shape index: {}]   ;;  %s16233_s10 = inlined_call_operand.hbm [shape: f32[8,8], index: 10, kind: input, shape index: {}]   ;;  %s16234_s11 = inlined_call_operand.hbm [shape: f32[5,8], index: 11, kind: input, shape index: {}]   ;;  %s16235_s12 = inlined_call_operand.vmem [shape: bf16[144,32], index: 12, kind: input, shape index: {}]   ;;  %s16236_s13 = inlined_call_operand.vmem [shape: bf16[288,32], index: 13, kind: input, shape index: {}]   ;;  %s16237_s14 = inlined_call_operand.vmem [shape: f32[6,32], index: 14, kind: input, shape index: {}]   ;;  %s16238_s15 = inlined_call_operand.vmem [shape: f32[32,16], index: 15, kind: input, shape index: {}]   ;;  %s16239_s16 = inlined_call_operand.vmem [shape: f32[16,32], index: 16, kind: input, shape index: {}]   ;;  %s16240_s17 = inlined_call_operand.vmem [shape: f32[4,64,32], index: 17, kind: output, shape index: {}]  }
   0x1   :  { %16366 = sst [smem:[#allocation68_spill]] %s16223_s0 }
   0x2   :  { %16367 = sst [smem:[#allocation69_spill]] %s16224_s1 }
   0x3   :  { %16368 = sst [smem:[#allocation70_spill]] %s16227_s4 }
   0x4   :  { %16369 = sst [smem:[#allocation71_spill]] %s16229_s6 }
   0x5   :  { %16370 = sst [smem:[#allocation72_spill]] %s16231_s8 }
   0x6   :  { %16371 = sst [smem:[#allocation73_spill]] %s16235_s12 }
   0x7   :  { %16372 = sst [smem:[#allocation74_spill]] %s16236_s13 }
   0x8   :  { %16373 = sst [smem:[#allocation75_spill]] %s16237_s14 }
   0x9   :  { %16374 = sst [smem:[#allocation76_spill]] %s16238_s15 }
   0xa   :  { %16375 = sst [smem:[#allocation77_spill]] %s16239_s16 }
   0xb   :  { %16376 = sst [smem:[#allocation78_spill]] %s16240_s17 }
   0xc   :  { %22 = vsyncpa [#allocation5], 0 }
   0xd   :  { %24 = vsyncpa [#allocation5 + $0x1], 0 }
   0xe   :  { %25 = vsyncpa [#allocation7], 0 }
   0xf   :  { %27 = vsyncpa [#allocation7 + $0x1], 0 }
  0x10   :  { %28 = vsyncpa [#allocation10], 0 }
  0x11   :  { %29 = vsyncpa [#allocation13], 0 }
  0x12   :  { %30 = vsyncpa [#allocation16], 0 }
  0x13   :  { %31 = vsyncpa [#allocation19], 0  ;;  %s11527_s24 = smov 0   ;;  %s11529_s25 = smov 0  }
  0x14   :  { %s11531_s26 = smov 0   ;;  %s11533_s27 = smov 0  }
  0x15 LB: > { %16377 = sst [smem:[#allocation26_spill]] %s11404_s26  ;;  %s11410_s28 = smov [#allocation9]   ;;  %s11408_s27 = sphi %s11533_s27, %s16922_s27   ;;  %s11404_s26 = sphi %s11531_s26, %s16924_s26   ;;  %s11400_s25 = sphi %s11529_s25, %s16926_s25   ;;  %s11396_s24 = sphi %s11527_s24, %s16925_s24  }
  0x16   : > { %s458_s29 = sshll.u32 %s11410_s28, 4  ;;  %s11548_s0 = sadd.s32 4294967295, %s11408_s27   ;;  %s459_s29 = int_to_ptr.vmem [resolvable:$true] %s458_s29 }
  0x17   : > { %p9593_p0 = scmp.ge.s32.totalorder %s11408_s27, 1  ;;  %p16245_p1 = scmp.eq.s32.totalorder %s11548_s0, 0 }
  0x18   : > { %p445_p2 = scmp.lt.s32.totalorder %s11408_s27, 3  ;;  %s11411_s18 = smov [#allocation12]  }
  0x19   : > { %s480_s19 = sshll.u32 %s11411_s18, 4  ;;  %s11412_s1 = smov [#allocation15]   ;;  %s11559_s19 = int_to_ptr.vmem [resolvable:$true] %s480_s19 }
  0x1a   : > { %p11553_p3 = pnand %p9593_p0, %p445_p2  ;;  %s502_s20 = sshll.u32 %s11412_s1, 4  ;;  %s11567_s20 = int_to_ptr.vmem [resolvable:$true] %s502_s20 }
  0x1b   : > { %s16380_s4 = sld [smem:[#allocation70_spill]] }
  0x1c   : > { %s16378_s30 = scalar_select %p11553_p3, 1, 0 }
  0x1d   : > { %p10720_p4 = pneg %p11553_p3 }
  0x1f   : > { %p11563_p5 = pnand %p10720_p4, %p16245_p1 }
  0x21   : > { %s16379_s21 = scalar_select %p11563_p5, 1, 0 }
  0x22   : > { %s11068_s28 = scalar_lea.hbm %s16380_s4, 128  ;;  %p11577_p7 = pneg %p11563_p5 }
  0x23   : > { %p11069_p6 = scmp.ne.s32.totalorder %s16380_s4, %s11068_s28  ;;  %p11075_p10 = scmp.lt.u32.totalorder %s11068_s28, %s16380_s4 }
  0x24   : > { %s16381_s18 = scalar_select %p11577_p7, 1, 0 }
  0x25   : > { %p11071_p8 = pnand %p11577_p7, %p11069_p6 }
  0x27   : > { %p11072_p9 = pneg %p11071_p8 }
  0x29   : > { %p11077_p11 = pnand %p11075_p10, %p11072_p9 }
  0x2b   : > { %11080 = shalt.err (!%p11077_p11)
}
  0x2c   : > { %s11081_s22 = scalar_lea.vmem %s459_s29, 128  ;;  %p11089_p2 = scmp.lt.s32.totalorder %s459_s29, %s459_s29 }
  0x2d   : > { %p11082_p12 = scmp.ne.s32.totalorder %s459_s29, %s11081_s22  ;;  %p11090_p4 = scmp.lt.s32.totalorder %s11081_s22, %s11081_s22 }
  0x2f   : > { %p11084_p13 = pnand %p11082_p12, %p11577_p7  ;;  %p11091_p1 = por %p11090_p4, %p11089_p2 }
  0x31   : > { %p11085_p0 = pneg %p11084_p13 }
  0x33   : > { %p11092_p3 = pnand %p11091_p1, %p11085_p0 }
  0x35   : > { %11095 = shalt.err (!%p11092_p3)
}
  0x36   : > { %10723 = dma.hbm_to_vmem [thread:$0]  (!%p11563_p5), %s16380_s4, 128, %s459_s29, [#allocation10]  }
  0x37   : > { %s16382_s6 = sld [smem:[#allocation71_spill]] }
  0x3d   : > { %s11096_s28 = scalar_lea.hbm %s16382_s6, 128 }
  0x3e   : > { %p11097_p6 = scmp.ne.s32.totalorder %s16382_s6, %s11096_s28  ;;  %p11103_p1 = scmp.lt.u32.totalorder %s11096_s28, %s16382_s6 }
  0x40   : > { %p11099_p8 = pnand %p11097_p6, %p11577_p7 }
  0x42   : > { %p11100_p9 = pneg %p11099_p8 }
  0x44   : > { %p11105_p3 = pnand %p11103_p1, %p11100_p9 }
  0x46   : > { %11108 = shalt.err (!%p11105_p3)
}
  0x47   : > { %s11109_s29 = scalar_lea.vmem %s11559_s19, 128  ;;  %p11117_p13 = scmp.lt.s32.totalorder %s11559_s19, %s11559_s19 }
  0x48   : > { %p11110_p10 = scmp.ne.s32.totalorder %s11559_s19, %s11109_s29  ;;  %p11118_p0 = scmp.lt.s32.totalorder %s11109_s29, %s11109_s29 }
  0x4a   : > { %p11112_p11 = pnand %p11110_p10, %p11577_p7  ;;  %p11119_p2 = por %p11118_p0, %p11117_p13 }
  0x4c   : > { %p11113_p12 = pneg %p11112_p11 }
  0x4e   : > { %p11120_p4 = pnand %p11119_p2, %p11113_p12 }
  0x50   : > { %11123 = shalt.err (!%p11120_p4)
}
  0x51   : > { %10729 = dma.hbm_to_vmem [thread:$0]  (!%p11563_p5), %s16382_s6, 128, %s11559_s19, [#allocation13]  }
  0x52   : > { %s16383_s8 = sld [smem:[#allocation72_spill]] }
  0x58   : > { %s11124_s14 = scalar_lea.hbm %s16383_s8, 128 }
  0x59   : > { %p11125_p6 = scmp.ne.s32.totalorder %s16383_s8, %s11124_s14  ;;  %p11131_p1 = scmp.lt.u32.totalorder %s11124_s14, %s16383_s8 }
  0x5b   : > { %p11127_p8 = pnand %p11125_p6, %p11577_p7 }
  0x5d   : > { %p11128_p9 = pneg %p11127_p8 }
  0x5f   : > { %p11133_p3 = pnand %p11131_p1, %p11128_p9 }
  0x61   : > { %11136 = shalt.err (!%p11133_p3)
}
  0x62   : > { %s11137_s19 = scalar_lea.vmem %s11567_s20, 128  ;;  %p11145_p13 = scmp.lt.s32.totalorder %s11567_s20, %s11567_s20 }
  0x63   : > { %p11138_p10 = scmp.ne.s32.totalorder %s11567_s20, %s11137_s19  ;;  %p11146_p0 = scmp.lt.s32.totalorder %s11137_s19, %s11137_s19 }
  0x65   : > { %p11140_p11 = pnand %p11138_p10, %p11577_p7  ;;  %p11147_p2 = por %p11146_p0, %p11145_p13 }
  0x67   : > { %p11141_p12 = pneg %p11140_p11 }
  0x69   : > { %p11148_p4 = pnand %p11147_p2, %p11141_p12 }
  0x6b   : > { %11151 = shalt.err (!%p11148_p4)
}
  0x6c   : > { %10735 = dma.hbm_to_vmem [thread:$0]  (!%p11563_p5), %s16383_s8, 128, %s11567_s20, [#allocation16]  }
  0x6d   : > { %s11640_s16 = sadd.s32 1, %s11408_s27   ;;  %s44_s17 = sadd.s32 1, %s11404_s26 }
  0x6e   : > { %16384 = sst [smem:[#allocation27_spill]] %s11640_s16  ;;  %s41_s13 = ssub.s32 %s11408_s27, %s11640_s16 }
  0x6f   : > { %p42_p6 = scmp.eq.s32.totalorder %s41_s13, 0  ;;  %p51_p8 = scmp.ne.s32.totalorder %s11404_s26, %s11400_s25 }
  0x70   : > { %p52_p9 = scmp.eq.s32.totalorder %s11408_s27, 0  ;;  %p57_p1 = scmp.ne.s32.totalorder %s11400_s25, %s11396_s24 }
  0x71   : > { %s11651_s14 = scalar_select %p42_p6, %s11404_s26, %s44_s17  }
  0x72   : > { %p53_p3 = por %p52_p9, %p51_p8  ;;  %p16386_p10 = scmp.eq.s32.totalorder %s11548_s0, 0 }
  0x73   : > { %16385 = sst [smem:[#allocation28_spill]] %s11651_s14  ;;  %p10759_p12 = scmp.lt.s32.totalorder %s11408_s27, 2 }
  0x74   : > { %p11655_p11 = por %p16386_p10, %p57_p1  ;;  %s11661_s20 = sand.u32 1, %s11404_s26  }
  0x75   : > { %s16250_s28 = sshll.u32 %s11661_s20, 1  ;;  %s16251_s1 = sshll.u32 %s11408_s27, 5 }
  0x76   : > { %s16387_s23 = scalar_select %p11655_p11, 1, 0 }
  0x77   : > { %p11665_p13 = pnand %p10759_p12, %p53_p3  ;;  %s574_s24 = sand.u32 1, %s11408_s27  }
  0x78   : > { %s16389_s15 = sld [smem:[#allocation69_spill]]  ;;  %s578_s17 = scalar_lea.vmem [#allocation6], %s16250_s28 }
  0x79   : > { %s16388_s22 = scalar_select %p11665_p13, 1, 0 }
  0x7a   : > { %s585_s4 = sshll.u32 %s578_s17, 4  ;;  %s11413_s6 = smov [#allocation11]   ;;  %s11679_s4 = int_to_ptr.vmem [resolvable:$true] %s585_s4 }
  0x7b   : > { %s11681_s8 = sshll.u32 %s11413_s6, 4  ;;  %s11683_s14 = scalar_lea.sflag [#allocation7], %s574_s24  ;;  %s470_s8 = int_to_ptr.vmem [resolvable:$true] %s11681_s8 }
  0x7c   : > { %p11689_p2 = pneg %p11665_p13 }
  0x7e   : > { %s11675_s13 = scalar_lea.hbm %s16389_s15, %s16251_s1  ;;  %s11157_s28 = scalar_lea.hbm %s16389_s15, 64 }
  0x7f   : > { %s11152_s26 = scalar_lea.hbm %s11675_s13, 32  ;;  %p11158_p8 = scmp.lt.u32.totalorder %s11675_s13, %s16389_s15 }
  0x80   : > { %p11153_p0 = scmp.ne.s32.totalorder %s11675_s13, %s11152_s26  ;;  %p11159_p9 = scmp.lt.u32.totalorder %s11157_s28, %s11152_s26 }
  0x81   : > { %s16390_s19 = scalar_select %p11689_p2, 1, 0 }
  0x82   : > { %p11155_p4 = pnand %p11689_p2, %p11153_p0  ;;  %p11160_p1 = por %p11159_p9, %p11158_p8 }
  0x83   : > { %p11161_p3 = scmp.lt.u32.totalorder %s11152_s26, %s11675_s13 }
  0x84   : > { %p11156_p6 = pneg %p11155_p4 }
  0x85   : > { %p11162_p10 = por %p11161_p3, %p11160_p1 }
  0x87   : > { %p11163_p12 = pnand %p11162_p10, %p11156_p6 }
  0x89   : > { %11166 = shalt.err (!%p11163_p12)
}
  0x8a   : > { %s11167_s24 = scalar_lea.vmem %s11679_s4, 32  ;;  %s11414_s29 = smov [#allocation6]  }
  0x8b   : > { %p11168_p0 = scmp.ne.s32.totalorder %s11679_s4, %s11167_s24  ;;  %s11172_s17 = sshll.u32 %s11414_s29, 4  ;;  %s11173_s17 = int_to_ptr.vmem [resolvable:$false] %s11172_s17 }
  0x8c   : > { %s11174_s1 = scalar_lea.vmem %s11173_s17, 64  ;;  %p11175_p5 = scmp.lt.s32.totalorder %s11679_s4, %s11173_s17 }
  0x8d   : > { %p11170_p4 = pnand %p11168_p0, %p11689_p2  ;;  %p11176_p7 = scmp.lt.s32.totalorder %s11174_s1, %s11167_s24 }
  0x8f   : > { %p11171_p11 = pneg %p11170_p4  ;;  %p11177_p8 = por %p11176_p7, %p11175_p5 }
  0x91   : > { %p11178_p9 = pnand %p11177_p8, %p11171_p11 }
  0x93   : > { %11181 = shalt.err (!%p11178_p9)
}
  0x94   : > { %s16263_s26 = smov 16   ;;  %s16264_s28 = smov 1  }
  0x95   : > { %10748 = dma.hbm_to_vmem [thread:$0]  (!%p11665_p13), %s11675_s13, 32, %s11679_s4, %s11683_s14, %s16263_s26, %s16263_s26, %s16264_s28  }
  0x96   : > { %s11182_s24 = scalar_lea.hbm %s16228_s5, 128  ;;  %p16391_p7 = scmp.ne.s32.totalorder %s16381_s18, 0 }
  0x97   : > { %p11183_p5 = scmp.ne.s32.totalorder %s16228_s5, %s11182_s24  ;;  %p11189_p1 = scmp.lt.u32.totalorder %s11182_s24, %s16228_s5 }
  0x99   : > { %p11185_p11 = pnand %p11183_p5, %p16391_p7 }
  0x9b   : > { %p11186_p6 = pneg %p11185_p11 }
  0x9d   : > { %p11191_p3 = pnand %p11189_p1, %p11186_p6 }
  0x9f   : > { %11194 = shalt.err (!%p11191_p3)
}
  0xa0   : > { %s11195_s12 = scalar_lea.vmem %s470_s8, 128  ;;  %p11203_p4 = scmp.lt.s32.totalorder %s470_s8, %s470_s8 }
  0xa1   : > { %p11196_p10 = scmp.ne.s32.totalorder %s470_s8, %s11195_s12  ;;  %p11204_p8 = scmp.lt.s32.totalorder %s11195_s12, %s11195_s12 }
  0xa3   : > { %p11198_p12 = pnand %p11196_p10, %p16391_p7  ;;  %p11205_p9 = por %p11204_p8, %p11203_p4 }
  0xa5   : > { %p11199_p0 = pneg %p11198_p12 }
  0xa7   : > { %p11206_p13 = pnand %p11205_p9, %p11199_p0 }
  0xa9   : > { %11209 = shalt.err (!%p11206_p13)
}
  0xaa   : > { %p16392_p5 = scmp.ne.s32.totalorder %s16379_s21, 0  ;;  %s11417_s16 = smov [#allocation14]  }
  0xab   : > { %s491_s15 = sshll.u32 %s11417_s16, 4  ;;  %s11418_s6 = smov [#allocation17]   ;;  %s492_s15 = int_to_ptr.vmem [resolvable:$true] %s491_s15 }
  0xac   : > { %10726 = dma.hbm_to_vmem [thread:$0]  (!%p16392_p5), %s16228_s5, 128, %s470_s8, [#allocation10]  }
  0xad   : > { %s516_s29 = sshll.u32 %s11418_s6, 4  ;;  %s11210_s1 = scalar_lea.hbm %s16230_s7, 128  ;;  %s517_s29 = int_to_ptr.vmem [resolvable:$true] %s516_s29 }
  0xae   : > { %p11211_p13 = scmp.ne.s32.totalorder %s16230_s7, %s11210_s1  ;;  %p11217_p1 = scmp.lt.u32.totalorder %s11210_s1, %s16230_s7 }
  0xb0   : > { %p11213_p11 = pnand %p11211_p13, %p16391_p7 }
  0xb2   : > { %p11214_p6 = pneg %p11213_p11 }
  0xb4   : > { %p11219_p3 = pnand %p11217_p1, %p11214_p6 }
  0xb6   : > { %11222 = shalt.err (!%p11219_p3)
}
  0xb7   : > { %s11223_s8 = scalar_lea.vmem %s492_s15, 128  ;;  %p11231_p4 = scmp.lt.s32.totalorder %s492_s15, %s492_s15 }
  0xb8   : > { %p11224_p10 = scmp.ne.s32.totalorder %s492_s15, %s11223_s8  ;;  %p11232_p8 = scmp.lt.s32.totalorder %s11223_s8, %s11223_s8 }
  0xba   : > { %p11226_p12 = pnand %p11224_p10, %p16391_p7  ;;  %p11233_p9 = por %p11232_p8, %p11231_p4 }
  0xbc   : > { %p11227_p0 = pneg %p11226_p12 }
  0xbe   : > { %p11234_p2 = pnand %p11233_p9, %p11227_p0 }
  0xc0   : > { %11237 = shalt.err (!%p11234_p2)
}
  0xc1   : > { %10732 = dma.hbm_to_vmem [thread:$0]  (!%p16392_p5), %s16230_s7, 128, %s492_s15, [#allocation13]  }
  0xc2   : > { %s11238_s6 = scalar_lea.hbm %s16233_s10, 128 }
  0xc3   : > { %p11239_p13 = scmp.ne.s32.totalorder %s16233_s10, %s11238_s6  ;;  %p11245_p2 = scmp.lt.u32.totalorder %s11238_s6, %s16233_s10 }
  0xc5   : > { %p11241_p11 = pnand %p11239_p13, %p16391_p7 }
  0xc7   : > { %p11242_p6 = pneg %p11241_p11 }
  0xc9   : > { %p11247_p1 = pnand %p11245_p2, %p11242_p6 }
  0xcb   : > { %11250 = shalt.err (!%p11247_p1)
}
  0xcc   : > { %s11251_s4 = scalar_lea.vmem %s517_s29, 128  ;;  %p11259_p0 = scmp.lt.s32.totalorder %s517_s29, %s517_s29 }
  0xcd   : > { %p11252_p3 = scmp.ne.s32.totalorder %s517_s29, %s11251_s4  ;;  %p11260_p4 = scmp.lt.s32.totalorder %s11251_s4, %s11251_s4 }
  0xcf   : > { %p11254_p10 = pnand %p11252_p3, %p16391_p7  ;;  %p11261_p8 = por %p11260_p4, %p11259_p0 }
  0xd1   : > { %p11255_p12 = pneg %p11254_p10 }
  0xd3   : > { %p11262_p9 = pnand %p11261_p8, %p11255_p12 }
  0xd5   : > { %11265 = shalt.err (!%p11262_p9)
}
  0xd6   : > { %10738 = dma.hbm_to_vmem [thread:$0]  (!%p16392_p5), %s16233_s10, 128, %s517_s29, [#allocation16]  }
  0xd7   : > { %s11419_s26 = smov [#allocation18]   ;;  %s11266_s6 = scalar_lea.hbm %s16234_s11, 128 }
  0xd8   : > { %s527_s13 = sshll.u32 %s11419_s26, 4  ;;  %p11267_p13 = scmp.ne.s32.totalorder %s16234_s11, %s11266_s6  ;;  %s528_s13 = int_to_ptr.vmem [resolvable:$true] %s527_s13 }
  0xd9   : > { %p11273_p2 = scmp.lt.u32.totalorder %s11266_s6, %s16234_s11 }
  0xda   : > { %p11269_p11 = pnand %p11267_p13, %p16391_p7 }
  0xdc   : > { %p11270_p6 = pneg %p11269_p11 }
  0xde   : > { %p11275_p1 = pnand %p11273_p2, %p11270_p6 }
  0xe0   : > { %11278 = shalt.err (!%p11275_p1)
}
  0xe1   : > { %s11279_s29 = scalar_lea.vmem %s528_s13, 128  ;;  %p11287_p0 = scmp.lt.s32.totalorder %s528_s13, %s528_s13 }
  0xe2   : > { %p11280_p3 = scmp.ne.s32.totalorder %s528_s13, %s11279_s29  ;;  %p11288_p4 = scmp.lt.s32.totalorder %s11279_s29, %s11279_s29 }
  0xe4   : > { %p11282_p10 = pnand %p11280_p3, %p16391_p7  ;;  %p11289_p8 = por %p11288_p4, %p11287_p0 }
  0xe6   : > { %p11283_p12 = pneg %p11282_p10 }
  0xe8   : > { %p11290_p9 = pnand %p11289_p8, %p11283_p12 }
  0xea   : > { %11293 = shalt.err (!%p11290_p9)
}
  0xeb   : > { %10741 = dma.hbm_to_vmem [thread:$0]  (!%p16392_p5), %s16234_s11, 128, %s528_s13, [#allocation19]  }
  0xec   : > { %s16393_s8 = sshll.u32 %s11408_s27, 5  ;;  %s16394_s28 = sld [smem:[#allocation68_spill]] }
  0xed   : > { %s16395_s6 = sshll.u32 %s11661_s20, 1  ;;  %s9608_s17 = sshll.u32 %s11661_s20, 7 }
  0xee   : > { %s557_s21 = scalar_lea.vmem [#allocation4], %s16395_s6  ;;  %s554_s1 = scalar_lea.sflag [#allocation5], %s11661_s20 }
  0xef   : > { %s564_s24 = sshll.u32 %s557_s21, 4  ;;  %p16396_p5 = scmp.ne.s32.totalorder %s16390_s19, 0  ;;  %s11798_s24 = int_to_ptr.vmem [resolvable:$true] %s564_s24 }
  0xf2   : > { %s11794_s16 = scalar_lea.hbm %s16394_s28, %s16393_s8  ;;  %s11299_s4 = scalar_lea.hbm %s16394_s28, 64 }
  0xf3   : > { %s11294_s12 = scalar_lea.hbm %s11794_s16, 32  ;;  %p11300_p6 = scmp.lt.u32.totalorder %s11794_s16, %s16394_s28 }
  0xf4   : > { %p11295_p7 = scmp.ne.s32.totalorder %s11794_s16, %s11294_s12  ;;  %p11301_p2 = scmp.lt.u32.totalorder %s11299_s4, %s11294_s12 }
  0xf5   : > { %p11303_p3 = scmp.lt.u32.totalorder %s11294_s12, %s11794_s16 }
  0xf6   : > { %p11297_p13 = pnand %p11295_p7, %p16396_p5  ;;  %p11302_p1 = por %p11301_p2, %p11300_p6 }
  0xf8   : > { %p11298_p11 = pneg %p11297_p13  ;;  %p11304_p10 = por %p11303_p3, %p11302_p1 }
  0xfa   : > { %p11305_p12 = pnand %p11304_p10, %p11298_p11 }
  0xfc   : > { %11308 = shalt.err (!%p11305_p12)
}
  0xfd   : > { %s11309_s18 = scalar_lea.vmem %s11798_s24, 32  ;;  %s11420_s26 = smov [#allocation4]  }
  0xfe   : > { %p11310_p0 = scmp.ne.s32.totalorder %s11798_s24, %s11309_s18  ;;  %s11314_s6 = sshll.u32 %s11420_s26, 4  ;;  %s11315_s6 = int_to_ptr.vmem [resolvable:$false] %s11314_s6 }
  0xff   : > { %s11316_s21 = scalar_lea.vmem %s11315_s6, 64  ;;  %p11317_p9 = scmp.lt.s32.totalorder %s11798_s24, %s11315_s6 }
 0x100   : > { %p11312_p4 = pnand %p11310_p0, %p16396_p5  ;;  %p11318_p7 = scmp.lt.s32.totalorder %s11316_s21, %s11309_s18 }
 0x102   : > { %p11313_p8 = pneg %p11312_p4  ;;  %p11319_p13 = por %p11318_p7, %p11317_p9 }
 0x104   : > { %p11320_p6 = pnand %p11319_p13, %p11313_p8 }
 0x106   : > { %11323 = shalt.err (!%p11320_p6)
}
 0x107   : > { %p16397_p11 = scmp.ne.s32.totalorder %s16388_s22, 0  ;;  %s16398_s12 = smov 1  }
 0x108   : > { %s16399_s13 = smov 16   ;;  %s10105_s29 = sshll.u32 %s11408_s27, 11 }
 0x109   : > { %10745 = dma.hbm_to_vmem [thread:$0]  (!%p16397_p11), %s11794_s16, 32, %s11798_s24, %s554_s1, %s16399_s13, %s16399_s13, %s16398_s12  }
 0x10a   : > { %s11832_s8 = scalar_lea.hbm %s16226_s3, %s10105_s29  ;;  %s609_s18 = scalar_lea.vmem [#allocation8], %s9608_s17 }
 0x10b   : > { %s617_s26 = sshll.u32 %s609_s18, 4  ;;  %s11324_s6 = scalar_lea.hbm %s11832_s8, 2048  ;;  %s11836_s26 = int_to_ptr.vmem [resolvable:$true] %s617_s26 }
 0x10c   : > { %p11325_p2 = scmp.ne.s32.totalorder %s11832_s8, %s11324_s6  ;;  %s11329_s24 = scalar_lea.hbm %s16226_s3, 4096 }
 0x10d   : > { %p11330_p10 = scmp.lt.u32.totalorder %s11832_s8, %s16226_s3  ;;  %p11331_p12 = scmp.lt.u32.totalorder %s11329_s24, %s11324_s6 }
 0x10e   : > { %p11327_p1 = pnand %p11325_p2, %p16396_p5  ;;  %p11333_p4 = scmp.lt.u32.totalorder %s11324_s6, %s11832_s8 }
 0x10f   : > { %p11332_p0 = por %p11331_p12, %p11330_p10 }
 0x110   : > { %p11328_p3 = pneg %p11327_p1 }
 0x111   : > { %p11334_p8 = por %p11333_p4, %p11332_p0 }
 0x113   : > { %p11335_p9 = pnand %p11334_p8, %p11328_p3 }
 0x115   : > { %11338 = shalt.err (!%p11335_p9)
}
 0x116   : > { %s11339_s20 = scalar_lea.vmem %s11836_s26, 2048  ;;  %s11421_s17 = smov [#allocation8]  }
 0x117   : > { %p11340_p7 = scmp.ne.s32.totalorder %s11836_s26, %s11339_s20  ;;  %s11344_s12 = sshll.u32 %s11421_s17, 4  ;;  %s11345_s12 = int_to_ptr.vmem [resolvable:$false] %s11344_s12 }
 0x118   : > { %s11346_s13 = scalar_lea.vmem %s11345_s12, 4096  ;;  %p11347_p2 = scmp.lt.s32.totalorder %s11836_s26, %s11345_s12 }
 0x119   : > { %p11342_p13 = pnand %p11340_p7, %p16396_p5  ;;  %p11348_p1 = scmp.lt.s32.totalorder %s11346_s13, %s11339_s20 }
 0x11b   : > { %p11343_p6 = pneg %p11342_p13  ;;  %p11349_p10 = por %p11348_p1, %p11347_p2 }
 0x11d   : > { %p11350_p12 = pnand %p11349_p10, %p11343_p6 }
 0x11f   : > { %11353 = shalt.err (!%p11350_p12)
}
 0x120   : > { %s11422_s29 = smov 128   ;;  %s11423_s4 = smov 8  }
 0x121   : > { %10751 = dma.hbm_to_vmem [thread:$0]  (!%p16397_p11), %s11832_s8, 2048, %s11836_s26, %s11683_s14, %s11422_s29, %s11422_s29, %s11423_s4  }
 0x122   : > { %p16400_p5 = scmp.ne.s32.totalorder %s16378_s30, 0 }
 0x124   : > { %629 = sbr.rel (%p16400_p5) target bundleno = 6509 (0x196d), region = 88 }
 0x12b   : > { %s631_s19 = sand.u32 1, %s11400_s25   ;;  %p16401_p3 = scmp.ne.s32.totalorder %s16387_s23, 0 }
 0x12c   : > { %s9613_s15 = sshll.u32 %s631_s19, 1  ;;  %s632_s18 = scalar_lea.sflag [#allocation5], %s631_s19 }
 0x12d   : > { %s11863_s6 = scalar_lea.vmem [#allocation4], %s9613_s15 }
 0x12e   : > { %11371 = dma.done.wait (%p16401_p3), %s632_s18, 32  }
 0x12f   : > { %11373 = vsyncadd (%p16401_p3), %s632_s18, 4294967264  ;;  %s640_s27 = sand.u32 1, %s11548_s0   ;;  %s11870_s14 = scalar_lea.vmem [#allocation6], %s9613_s15 }
 0x130   : > { %s641_s22 = scalar_lea.sflag [#allocation7], %s640_s27 }
 0x131   : > { %11375 = dma.done.wait (%p16401_p3), %s641_s22, 2080  }
 0x132   : > { %11377 = vsyncadd (%p16401_p3), %s641_s22, 4294965216  ;;  %s9615_s30 = sshll.u32 %s631_s19, 7  ;;  %p16402_p11 = scmp.eq.s32.totalorder %s11548_s0, 0 }
 0x133   : > { %s11876_s8 = scalar_lea.vmem [#allocation8], %s9615_s30 }
 0x134   : > { %11379 = dma.done.wait (%p16402_p11), [#allocation10], 256   ;;  %p16403_p0 = pmov %p16402_p11 }
 0x136   : > { %11381 = vsyncadd (%p16403_p0), [#allocation10], 4294967040  ;;  %p16404_p4 = pmov %p16403_p0 }
 0x137   : > { %p16405_p8 = pmov %p16403_p0 }
 0x138   : > { %11383 = dma.done.wait (%p16404_p4), [#allocation13], 256  }
 0x139   : > { %11385 = vsyncadd (%p16405_p8), [#allocation13], 4294967040  ;;  %p16406_p9 = pmov %p16403_p0 }
 0x13a   : > { %p16407_p7 = pmov %p16403_p0 }
 0x13b   : > { %11387 = dma.done.wait (%p16406_p9), [#allocation16], 256  }
 0x13c   : > { %11389 = vsyncadd (%p16407_p7), [#allocation16], 4294967040  ;;  %p16408_p13 = pmov %p16403_p0 }
 0x13d   : > { %p16409_p6 = pmov %p16403_p0 }
 0x13e   : > { %11391 = dma.done.wait (%p16408_p13), [#allocation19], 128  }
 0x13f   : > { %11393 = vsyncadd (%p16409_p6), [#allocation19], 4294967168  ;;  %v782_v0 = vlaneseq  ;;  %v16267_v1 = vmov 0.0   ;;  %vm16332_vm0 = vmmov 0   ;;  %v11426_v2 = vmov 1966171168  }
 0x140   : > { %10332 = vmatprep.subr.mxu0 %v16267_v1  ;;  %10334 = vmatprep.mubr.msk.f32.mxu0 %vm16332_vm0, %v16267_v1  ;;  %v780_v3 = vunpack.c.l.s4 %v11426_v2  ;;  %v775_v7 = vld [vmem:[#allocation9] sm:$0xff]  ;;  %v773_v8 = vld [vmem:[%s11863_s6] sm:$0x1]  ;;  %v774_v9 = vld [vmem:[%s11863_s6 + $0x1] sm:$0x1]  ;;  %vm793_vm1 = vcmask 64512  }
 0x141   : > { %v11897_v4 = vshrl.u32 %v782_v0, 7  ;;  %10337 = vmatprep.subr.mxu1 %v16267_v1  ;;  %10339 = vmatprep.mubr.msk.f32.mxu1 %vm16332_vm0, %v16267_v1  ;;  %v778_v10 = vcombine.low %v773_v8, %v774_v9  ;;  %vm868_vm2 = vcmask 58368   ;;  %v922_v21 = vld [vmem:[#allocation11] sm:$0xff]  ;;  %v9630_v26 = vld [vmem:[#allocation14] ss:$0 sm:$0xff]  ;;  %v1131_v63 = vld [vmem:[#allocation15] sm:$0xff] }
 0x142   : > { %v781_v5 = vunpack.c.0.s8 %v780_v3  ;;  %10333 = vmatpush3.msra.mxu0 %v775_v7  ;;  %10338 = vmatpush3.msra.mxu1 %v922_v21  ;;  %v9631_v28 = vld [vmem:[#allocation14 + $0x1] ss:$0 sm:$0xff]  ;;  %v1129_v53 = vld [vmem:[%s11870_s14] sm:$0x1]  ;;  %v1130_v54 = vld [vmem:[%s11870_s14 + $0x1] sm:$0x1] }
 0x143   : > { %10342 = vmatprep.subr.mxu0 %v16267_v1  ;;  %10347 = vmatprep.subr.mxu1 %v16267_v1  ;;  %v1134_v56 = vcombine.low %v1129_v53, %v1130_v54  ;;  %s11427_s16 = smov 8   ;;  %vm1740_vm7 = vcmask 125952   ;;  %vm1742_vm8 = vcmask 122880   ;;  %s9623_s24 = sshll.u32 %s11548_s0, 1  ;;  %vm1863_vm9 = vcmask 1040384  }
 0x144   : > { %v11903_v6 = vsub.s32 %v781_v5, %v11897_v4  ;;  %p752_p2 = scmp.lt.s32.totalorder %s9623_s24, 3  ;;  %vm1864_vm10 = vsmask.f32 256  ;;  %vm1882_vm11 = vcmask 1044480   ;;  %vm1883_vm12 = vsmask.f32 4352 }
 0x145   : > { %vm12118_vm13 = vmand %vm1863_vm9, %vm1864_vm10  ;;  %vm2353_vm15 = vcmask 1042432   ;;  %s11429_s17 = smov 96   ;;  %s11430_s12 = smov 48   ;;  %vm16335_vm9 = vcmask 523264   ;;  %vm3609_vm10 = vcmask 654336  }
 0x146   : > { %16410 = vst [vmem:[#allocation29_spill] sm:$0xff] %v11903_v6  ;;  %v785_v11 = vrot.slane %v778_v10, %v11903_v6  ;;  %v1141_v61 = vrot.slane %v1134_v56, %v11903_v6  ;;  %s16928_s24 = smov (!%p752_p2, %s9623_s24), 3  ;;  %vm12127_vm14 = vmand %vm1882_vm11, %vm1883_vm12  ;;  %s16452_s4 = sld [smem:[#allocation73_spill]]  ;;  %vm16334_vm11 = vcmask 785408   ;;  %vm3643_vm12 = vcmask 916480  }
 0x147   : > { %s10106_s1 = sshll.u32 %s16928_s24, 6  ;;  %s11431_s18 = smov 80  }
 0x148   : > { %v792_v12 = vrot.slane %v785_v11, %v11903_v6  ;;  %v1148_v0 = vrot.slane %v1141_v61, %v11903_v6  ;;  %s12017_s20 = scalar_lea.vmem %s16225_s2, %s10106_s1  ;;  %s11432_s22 = smov 32  }
 0x149   : > { %s11433_s15 = smov 16   ;;  %s11434_s6 = smov 64  }
 0x14a   : > { %10335 = vmatmul.mubr.msk.f32.vlgmr.msra.gmra.mrb[0].mxu0 %vm793_vm1, %v792_v12  ;;  %s11435_s27 = smov 112   ;;  %s16503_s14 = sld [smem:[#allocation76_spill]] }
 0x14b   : > { %10344 = vmatprep.mubr.msk.f32.mxu0 %vm16332_vm0, %v16267_v1  ;;  %s16521_s13 = sld [smem:[#allocation77_spill]]  ;;  %s16551_s26 = sld [smem:[#allocation74_spill]] }
 0x21d   : > { %v862_v13 = vpop.f32.mrb[0].mxu0 }
 0x21e   : > { %v10336_v14 = vpop.f32.mrb[1].mxu0  ;;  %v869_v15 = vsel %vm868_vm2, %v862_v13, 0.0 }
 0x21f   : > { %870 = vadd.xlane.f32.xlu0 %v869_v15 }
 0x2ac   : > { %v871_v16 = vpop.xlane.xlu0 %870 }
 0x2ad   : > { %v873_v17 = vmul.f32 0.125, %v871_v16 }
 0x2af   : > { %v874_v18 = vsub.f32 %v862_v13, %v873_v17 }
 0x2b1   : > { %v875_v19 = vmul.f32 %v874_v18, %v874_v18 }
 0x2b3   : > { %v876_v20 = vsel %vm868_vm2, %v875_v19, 0.0 }
 0x2b4   : > { %877 = vadd.xlane.f32.xlu0 %v876_v20  ;;  %v1050_v20 = vld [vmem:[#allocation12] sm:$0xff] }
 0x2b5   : > { %10343 = vmatpush3.msra.mxu0 %v1050_v20 }
 0x2b6   : > { %10352 = vmatprep.subr.mxu0 %v16267_v1 }
 0x341   : > { %v878_v22 = vpop.xlane.xlu0 %877 }
 0x342   : > { %v879_v23 = vmul.f32 0.125, %v878_v22 }
 0x344   : > { %v880_v24 = vadd.f32 1e-05, %v879_v23 }
 0x346   : > { %10897 = vrsqrt.f32 %v880_v24 }
 0x350   : > { %v10898_v25 = vpop.eup %10897 }
 0x351   : > { %v882_v27 = vmul.f32 %v10898_v25, %v874_v18 }
 0x353   : > { %v887_v29 = vmul.f32 %v9630_v26, %v882_v27 }
 0x355   : > { %v892_v30 = vadd.f32 %v9631_v28, %v887_v29  ;;  %v9633_v28 = vld [vmem:[#allocation14 + $0x2] ss:$0 sm:$0xff] }
 0x357   : > { %v894_v31 = vmul.f32 0.70710677, %v892_v30  ;;  %v893_v59 = vmul.f32 0.5, %v892_v30  ;;  %v9634_v30 = vld [vmem:[#allocation14 + $0x3] ss:$0 sm:$0xff] }
 0x359   : > { %v895_v32 = vand.u32 2147483647, %v894_v31  ;;  %vm917_vm3 = vcmp.ge.f32.partialorder %v894_v31, 0.0 }
 0x35b   : > { %v896_v33 = vmul.f32 0.3275911, %v895_v32  ;;  %v911_v37 = vsub.f32 0.0, %v895_v32 }
 0x35d   : > { %v897_v34 = vadd.f32 1.0, %v896_v33  ;;  %v912_v40 = vmul.f32 %v911_v37, %v895_v32  ;;  %v9638_v33 = vld [vmem:[#allocation18] ss:$0 sm:$0xff] }
 0x35f   : > { %10899 = vrcp.f32 %v897_v34  ;;  %v913_v43 = vmul.f32 1.442695, %v912_v40 }
 0x361   : > { %10901 = vpow2.f32 %v913_v43 }
 0x369   : > { %v10900_v35 = vpop.eup %10899 }
 0x36a   : > { %v899_v36 = vmul.f32 %v10900_v35, %v897_v34 }
 0x36b   : > { %v10902_v51 = vpop.eup %10901 }
 0x36c   : > { %v900_v38 = vsub.f32 2.0, %v899_v36  ;;  %v9639_v36 = vld [vmem:[#allocation18 + $0x1] ss:$0 sm:$0xff] }
 0x36e   : > { %v901_v39 = vmul.f32 %v10900_v35, %v900_v38 }
 0x370   : > { %v902_v41 = vmul.f32 1.0614054, %v901_v39 }
 0x372   : > { %v903_v42 = vadd.f32 -1.4531521, %v902_v41 }
 0x374   : > { %v904_v44 = vmul.f32 %v903_v42, %v901_v39 }
 0x376   : > { %v905_v45 = vadd.f32 1.4214138, %v904_v44 }
 0x378   : > { %v906_v46 = vmul.f32 %v905_v45, %v901_v39 }
 0x37a   : > { %v907_v47 = vadd.f32 -0.28449672, %v906_v46 }
 0x37c   : > { %v908_v48 = vmul.f32 %v907_v47, %v901_v39 }
 0x37e   : > { %v909_v49 = vadd.f32 0.2548296, %v908_v48 }
 0x380   : > { %v910_v50 = vmul.f32 %v909_v49, %v901_v39 }
 0x382   : > { %v915_v52 = vmul.f32 %v10902_v51, %v910_v50 }
 0x384   : > { %v916_v55 = vsub.f32 1.0, %v915_v52 }
 0x386   : > { %v918_v57 = vsub.f32 0.0, %v916_v55 }
 0x388   : > { %v919_v58 = vsel %vm917_vm3, %v916_v55, %v918_v57 }
 0x389   : > { %v920_v60 = vadd.f32 1.0, %v919_v58 }
 0x38b   : > { %v921_v62 = vmul.f32 %v920_v60, %v893_v59 }
 0x38d   : > { %10340 = vmatmul.mubr.msk.f32.vlgmr.msra.gmra.mrb[0].mxu1 %vm793_vm1, %v921_v62 }
 0x38e   : > { %10348 = vmatpush3.msra.mxu1 %v1131_v63  ;;  %10349 = vmatprep.mubr.msk.f32.mxu1 %vm16332_vm0, %v16267_v1 }
 0x38f   : > { %10357 = vmatprep.subr.mxu1 %v16267_v1 }
 0x391   : > { %10350 = vmatmul.mubr.msk.f32.vlgmr.msra.gmra.mrb[2].mxu1 %vm793_vm1, %v1148_v0 }
 0x392   : > { %10359 = vmatprep.mubr.msk.f32.mxu1 %vm16332_vm0, %v16267_v1 }
 0x460   : > { %v992_v2 = vpop.f32.mrb[0].mxu1 }
 0x461   : > { %v10341_v3 = vpop.f32.mrb[1].mxu1  ;;  %v998_v5 = vsel %vm868_vm2, %v992_v2, 0.0 }
 0x462   : > { %999 = vadd.xlane.f32.xlu1 %v998_v5 }
 0x464   : > { %v1217_v7 = vpop.f32.mrb[2].mxu1 }
 0x465   : > { %v10351_v8 = vpop.f32.mrb[3].mxu1  ;;  %v1223_v9 = vsel %vm868_vm2, %v1217_v7, 0.0 }
 0x466   : > { %1224 = vadd.xlane.f32.xlu1 %v1223_v9 }
 0x4ef   : > { %v1000_v10 = vpop.xlane.xlu1 %999 }
 0x4f0   : > { %v1001_v11 = vmul.f32 0.125, %v1000_v10 }
 0x4f2   : > { %v1002_v12 = vsub.f32 %v992_v2, %v1001_v11 }
 0x4f3   : > { %v1225_v13 = vpop.xlane.xlu1 %1224 }
 0x4f4   : > { %v1226_v14 = vmul.f32 0.125, %v1225_v13  ;;  %v1003_v15 = vmul.f32 %v1002_v12, %v1002_v12 }
 0x4f6   : > { %v1227_v16 = vsub.f32 %v1217_v7, %v1226_v14  ;;  %v1004_v17 = vsel %vm868_vm2, %v1003_v15, 0.0 }
 0x4f7   : > { %1005 = vadd.xlane.f32.xlu0 %v1004_v17 }
 0x4f8   : > { %v1228_v18 = vmul.f32 %v1227_v16, %v1227_v16 }
 0x4fa   : > { %v1229_v19 = vsel %vm868_vm2, %v1228_v18, 0.0 }
 0x4fb   : > { %1230 = vadd.xlane.f32.xlu1 %v1229_v19 }
 0x584   : > { %v1006_v21 = vpop.xlane.xlu0 %1005 }
 0x585   : > { %v1007_v22 = vmul.f32 0.125, %v1006_v21 }
 0x587   : > { %v1008_v23 = vadd.f32 1e-05, %v1007_v22 }
 0x588   : > { %v1231_v24 = vpop.xlane.xlu1 %1230 }
 0x589   : > { %10903 = vrsqrt.f32 %v1008_v23  ;;  %v1232_v25 = vmul.f32 0.125, %v1231_v24 }
 0x58b   : > { %v1233_v26 = vadd.f32 1e-05, %v1232_v25 }
 0x58d   : > { %10905 = vrsqrt.f32 %v1233_v26 }
 0x593   : > { %v10904_v27 = vpop.eup %10903 }
 0x594   : > { %v1010_v29 = vmul.f32 %v10904_v27, %v1002_v12 }
 0x596   : > { %v1015_v31 = vmul.f32 %v9633_v28, %v1010_v29 }
 0x597   : > { %v10906_v32 = vpop.eup %10905 }
 0x598   : > { %v1235_v34 = vmul.f32 %v10906_v32, %v1227_v16  ;;  %v1020_v35 = vadd.f32 %v9634_v30, %v1015_v31  ;;  %v1275_v30 = vld [vmem:[%s16232_s9] sm:$0xff] }
 0x59a   : > { %v1240_v37 = vmul.f32 %v9638_v33, %v1235_v34  ;;  %v1022_v38 = vmul.f32 0.70710677, %v1020_v35  ;;  %v1021_v26 = vmul.f32 0.5, %v1020_v35 }
 0x59c   : > { %v1023_v39 = vand.u32 2147483647, %v1022_v38  ;;  %v1245_v40 = vadd.f32 %v9639_v36, %v1240_v37  ;;  %vm1045_vm4 = vcmp.ge.f32.partialorder %v1022_v38, 0.0 }
 0x59e   : > { %v1024_v41 = vmul.f32 0.3275911, %v1023_v39  ;;  %v1247_v42 = vmul.f32 0.70710677, %v1245_v40  ;;  %v1039_v49 = vsub.f32 0.0, %v1023_v39  ;;  %v1246_v32 = vmul.f32 0.5, %v1245_v40 }
 0x5a0   : > { %v1025_v43 = vadd.f32 1.0, %v1024_v41  ;;  %v1248_v44 = vand.u32 2147483647, %v1247_v42  ;;  %v1040_v54 = vmul.f32 %v1039_v49, %v1023_v39  ;;  %vm1270_vm5 = vcmp.ge.f32.partialorder %v1247_v42, 0.0 }
 0x5a2   : > { %10907 = vrcp.f32 %v1025_v43  ;;  %v1249_v45 = vmul.f32 0.3275911, %v1248_v44  ;;  %v1264_v55 = vsub.f32 0.0, %v1248_v44  ;;  %v1041_v60 = vmul.f32 1.442695, %v1040_v54  ;;  %v1615_v54 = vld [vmem:[%s11876_s8 + $0x18] sm:$0xff] }
 0x5a4   : > { %v1250_v46 = vadd.f32 1.0, %v1249_v45  ;;  %v1265_v61 = vmul.f32 %v1264_v55, %v1248_v44  ;;  %v1403_v45 = vld [vmem:[#allocation17] sm:$0xff]  ;;  %v1618_v55 = vld [vmem:[%s11876_s8 + $0x30] sm:$0xff] }
 0x5a5   : > { %10358 = vmatpush3.msra.mxu1 %v1403_v45 }
 0x5a6   : > { %10909 = vrcp.f32 %v1250_v46  ;;  %v1266_v3 = vmul.f32 1.442695, %v1265_v61 }
 0x5a7   : > { %10911 = vpow2.f32 %v1041_v60 }
 0x5a8   : > { %10913 = vpow2.f32 %v1266_v3  ;;  %v1621_v3 = vld [vmem:[%s11876_s8 + $0x48] sm:$0xff] }
 0x5ac   : > { %v10908_v47 = vpop.eup %10907 }
 0x5ad   : > { %v1027_v48 = vmul.f32 %v10908_v47, %v1025_v43 }
 0x5af   : > { %v1028_v50 = vsub.f32 2.0, %v1027_v48  ;;  %v1612_v48 = vld [vmem:[%s11876_s8] sm:$0xff] }
 0x5b0   : > { %v10910_v51 = vpop.eup %10909 }
 0x5b1   : > { %v1029_v52 = vmul.f32 %v10908_v47, %v1028_v50  ;;  %v1252_v53 = vmul.f32 %v10910_v51, %v1250_v46  ;;  %v10912_v16 = vpop.eup %10911  ;;  %v1613_v46 = vld [vmem:[%s11876_s8 + $0x8] sm:$0xff]  ;;  %v1614_v47 = vld [vmem:[%s11876_s8 + $0x10] sm:$0xff]  ;;  %v1628_v50 = vpack.c.bf16 %v1612_v48, %v1612_v48 }
 0x5b2   : > { %v10914_v21 = vpop.eup %10913  ;;  %v1629_v49 = vpack.c.bf16 %v1613_v46, %v1613_v46 }
 0x5b3   : > { %v1030_v56 = vmul.f32 1.0614054, %v1029_v52  ;;  %v1253_v57 = vsub.f32 2.0, %v1252_v53 }
 0x5b5   : > { %v1031_v58 = vadd.f32 -1.4531521, %v1030_v56  ;;  %v1254_v59 = vmul.f32 %v10910_v51, %v1253_v57  ;;  %v1616_v51 = vld [vmem:[%s11876_s8 + $0x20] sm:$0xff]  ;;  %v1631_v56 = vpack.c.bf16 %v1615_v54, %v1615_v54  ;;  %v1634_v57 = vpack.c.bf16 %v1618_v55, %v1618_v55 }
 0x5b6   : > { %v1632_v53 = vpack.c.bf16 %v1616_v51, %v1616_v51  ;;  %v16269_v55 = vmov 0  }
 0x5b7   : > { %v1032_v62 = vmul.f32 %v1031_v58, %v1029_v52  ;;  %v1255_v63 = vmul.f32 1.0614054, %v1254_v59  ;;  %v1617_v58 = vld [vmem:[%s11876_s8 + $0x28] sm:$0xff]  ;;  %1747 = vst.msk [vmem:[#allocation2 + $0x48] sm:$0xf] %vm1740_vm7, %v16269_v55 }
 0x5b8   : > { %v1633_v60 = vpack.c.bf16 %v1617_v58, %v1617_v58  ;;  %1741 = vst.msk [vmem:[#allocation2] sm:$0xf] %vm1740_vm7, %v16269_v55  ;;  %1744 = vst.msk [vmem:[#allocation2 + $0x50] sm:$0xf] %vm1740_vm7, %v16269_v55 }
 0x5b9   : > { %v1033_v0 = vadd.f32 1.4214138, %v1032_v62  ;;  %v1256_v2 = vadd.f32 -1.4531521, %v1255_v63  ;;  %v1619_v62 = vld [vmem:[%s11876_s8 + $0x38] sm:$0xff]  ;;  %v1622_v63 = vld [vmem:[%s11876_s8 + $0x50] sm:$0xff] }
 0x5ba   : > { %1743 = vst.msk [vmem:[#allocation2 + $0x4] sm:$0x1] %vm1742_vm8, %v16269_v55  ;;  %1745 = vst.msk [vmem:[#allocation2 + $0x54] sm:$0x1] %vm1742_vm8, %v16269_v55 }
 0x5bb   : > { %v1034_v5 = vmul.f32 %v1033_v0, %v1029_v52  ;;  %v1257_v7 = vmul.f32 %v1256_v2, %v1254_v59  ;;  %v1635_v0 = vpack.c.bf16 %v1619_v62, %v1619_v62  ;;  %v1638_v2 = vpack.c.bf16 %v1622_v63, %v1622_v63  ;;  %1748 = vst.msk [vmem:[#allocation2 + $0x4c] sm:$0x1] %vm1742_vm8, %v16269_v55 }
 0x5bc   : > { %1749 = vst.msk [vmem:[#allocation2 + $0x98] sm:$0xf] %vm1740_vm7, %v16269_v55 }
 0x5bd   : > { %v1035_v8 = vadd.f32 -0.28449672, %v1034_v5  ;;  %v1258_v9 = vadd.f32 1.4214138, %v1257_v7  ;;  %v1624_v5 = vld [vmem:[%s11876_s8 + $0x60] sm:$0xff]  ;;  %v1637_v7 = vpack.c.bf16 %v1621_v3, %v1621_v3 }
 0x5be   : > { %1750 = vst.msk [vmem:[#allocation2 + $0x9c] sm:$0x1] %vm1742_vm8, %v16269_v55  ;;  %v12003_v3 = vld [vmem:[#allocation2 + $0x48] sm:$0xf] }
 0x5bf   : > { %v1036_v10 = vmul.f32 %v1035_v8, %v1029_v52  ;;  %v1259_v11 = vmul.f32 %v1258_v9, %v1254_v59  ;;  %v1640_v8 = vpack.c.bf16 %v1624_v5, %v1624_v5  ;;  %v1623_v9 = vld [vmem:[%s11876_s8 + $0x58] sm:$0xff] }
 0x5c1   : > { %v1037_v12 = vadd.f32 0.2548296, %v1036_v10  ;;  %v1260_v13 = vadd.f32 -0.28449672, %v1259_v11  ;;  %v1626_v10 = vld [vmem:[%s11876_s8 + $0x70] sm:$0xff]  ;;  %v1639_v11 = vpack.c.bf16 %v1623_v9, %v1623_v9 }
 0x5c3   : > { %v1038_v14 = vmul.f32 %v1037_v12, %v1029_v52  ;;  %v1261_v15 = vmul.f32 %v1260_v13, %v1254_v59  ;;  %v1630_v52 = vpack.c.bf16 %v1614_v47, %v1614_v47  ;;  %v1642_v12 = vpack.c.bf16 %v1626_v10, %v1626_v10  ;;  %v1625_v13 = vld [vmem:[%s11876_s8 + $0x68] sm:$0xff] }
 0x5c5   : > { %v1043_v17 = vmul.f32 %v10912_v16, %v1038_v14  ;;  %v1262_v18 = vadd.f32 0.2548296, %v1261_v15  ;;  %v1641_v14 = vpack.c.bf16 %v1625_v13, %v1625_v13  ;;  %v1627_v15 = vld [vmem:[%s11876_s8 + $0x78] sm:$0xff] }
 0x5c6   : > { %v1643_v16 = vpack.c.bf16 %v1627_v15, %v1627_v15 }
 0x5c7   : > { %v1044_v19 = vsub.f32 1.0, %v1043_v17  ;;  %v1263_v20 = vmul.f32 %v1262_v18, %v1254_v59  ;;  %v1620_v59 = vld [vmem:[%s11876_s8 + $0x40] sm:$0xff] }
 0x5c8   : > { %v1636_v61 = vpack.c.bf16 %v1620_v59, %v1620_v59  ;;  %v2046_v59 = vld [vmem:[#allocation2] sm:$0xf] }
 0x5c9   : > { %v1046_v22 = vsub.f32 0.0, %v1044_v19  ;;  %v1268_v23 = vmul.f32 %v10914_v21, %v1263_v20  ;;  %v9641_v21 = vld [vmem:[#allocation18 + $0x2] ss:$0 sm:$0xff]  ;;  %v2082_v62 = vshrl.u32 %v2046_v59, 16  ;;  %v2085_v63 = vshll.u32 %v2046_v59, 16 }
 0x5cb   : > { %v1047_v24 = vsel %vm1045_vm4, %v1044_v19, %v1046_v22  ;;  %v1269_v25 = vsub.f32 1.0, %v1268_v23  ;;  %v9642_v23 = vld [vmem:[#allocation18 + $0x3] ss:$0 sm:$0xff]  ;;  %vm2078_vm4 = vsmask.f32 3328 }
 0x5cc   : > { %v1048_v27 = vadd.f32 1.0, %v1047_v24 }
 0x5cd   : > { %v1271_v28 = vsub.f32 0.0, %v1269_v25 }
 0x5ce   : > { %v1049_v29 = vmul.f32 %v1048_v27, %v1021_v26 }
 0x5cf   : > { %v1272_v31 = vsel %vm1270_vm5, %v1269_v25, %v1271_v28  ;;  %vm2079_vm5 = vsmask.f32 7440 }
 0x5d0   : > { %10345 = vmatmul.mubr.msk.f32.vlgmr.msra.gmra.mrb[2].mxu0 %vm793_vm1, %v1049_v29  ;;  %v1273_v33 = vadd.f32 1.0, %v1272_v31 }
 0x5d1   : > { %10353 = vmatpush3.msra.mxu0 %v1275_v30  ;;  %10354 = vmatprep.mubr.msk.f32.mxu0 %vm16332_vm0, %v16267_v1 }
 0x5d2   : > { %v1274_v34 = vmul.f32 %v1273_v33, %v1246_v32  ;;  %3764 = vmatprep.subr.bf16.mxu0 %v16269_v55 }
 0x5d4   : > { %10355 = vmatmul.mubr.msk.f32.vlgmr.msra.gmra.mrb[4].mxu0 %vm793_vm1, %v1274_v34 }
 0x6a3   : > { %v11939_v35 = vpop.f32.mrb[2].mxu0 }
 0x6a4   : > { %v10346_v36 = vpop.f32.mrb[3].mxu0 }
 0x6a7   : > { %v1345_v37 = vpop.f32.mrb[4].mxu0 }
 0x6a8   : > { %v10356_v38 = vpop.f32.mrb[5].mxu0  ;;  %v1351_v39 = vsel %vm868_vm2, %v1345_v37, 0.0 }
 0x6a9   : > { %1352 = vadd.xlane.f32.xlu0 %v1351_v39 }
 0x6bf   : > { %1660 = vrot.lane.b32.xlu0 %v1628_v50, %s11427_s16 }
 0x6c3   : > { %1668 = vrot.lane.b32.xlu0 %v1632_v53, %s11427_s16 }
 0x6c7   : > { %1672 = vrot.lane.b32.xlu0 %v1634_v57, %s11427_s16 }
 0x6cb   : > { %1676 = vrot.lane.b32.xlu0 %v1636_v61, %s11427_s16 }
 0x6cf   : > { %1680 = vrot.lane.b32.xlu0 %v1638_v2, %s11427_s16  ;;  %v9643_v2 = vld [vmem:[#allocation18 + $0x4] ss:$0 sm:$0xff] }
 0x6d3   : > { %1684 = vrot.lane.b32.xlu0 %v1640_v8, %s11427_s16  ;;  %v12006_v8 = vsub.s32 0, %v11897_v4  ;;  %v2920_v4 = vshrl.u32 %v12003_v3, 16 }
 0x6d5   : > { %16411 = vst [vmem:[#allocation30_spill] sm:$0xff] %v12006_v8 }
 0x6d7   : > { %1688 = vrot.lane.b32.xlu0 %v1642_v12, %s11427_s16 }
 0x736   : > { %v1353_v40 = vpop.xlane.xlu0 %1352 }
 0x737   : > { %v1354_v41 = vmul.f32 0.125, %v1353_v40 }
 0x739   : > { %v1355_v42 = vsub.f32 %v1345_v37, %v1354_v41 }
 0x73b   : > { %v1356_v43 = vmul.f32 %v1355_v42, %v1355_v42 }
 0x73d   : > { %v1357_v44 = vsel %vm868_vm2, %v1356_v43, 0.0  ;;  %vm2354_vm2 = vcmask 1046532  }
 0x73e   : > { %1358 = vadd.xlane.f32.xlu1 %v1357_v44  ;;  %vm12289_vm3 = vmor %vm2353_vm15, %vm2354_vm2  ;;  %vm16330_vm15 = vcmask 1041409  }
 0x74f   : > { %1662 = vrot.lane.b32.xlu1 %v1629_v49, %s11427_s16 }
 0x753   : > { %1664 = vrot.lane.b32.xlu1 %v1630_v52, %s11427_s16 }
 0x757   : > { %1666 = vrot.lane.b32.xlu1 %v1631_v56, %s11427_s16  ;;  %v9635_v56 = vld [vmem:[#allocation14 + $0x4] ss:$0 sm:$0xff] }
 0x758   : > { %v1126_v58 = vadd.f32 %v9635_v56, %v11939_v35  ;;  %v2087_v35 = vrot.slane %v2085_v63, 5 }
 0x75b   : > { %1670 = vrot.lane.b32.xlu1 %v1633_v60, %s11427_s16  ;;  %v1554_v60 = vrot.slane %v1126_v58, %v11903_v6 }
 0x75d   : > { %v1562_v12 = vrot.slane %v1554_v60, %v11903_v6 }
 0x75f   : > { %1674 = vrot.lane.b32.xlu1 %v1635_v0, %s11427_s16  ;;  %v1555_v0 = vcombine.high %v1554_v60, %v1554_v60 }
 0x761   : > { %v1569_v13 = vrot.slane %v1555_v0, %v11903_v6 }
 0x763   : > { %1678 = vrot.lane.b32.xlu1 %v1637_v7, %s11427_s16  ;;  %v2084_v7 = vrot.slane %v2082_v62, 4 }
 0x767   : > { %1682 = vrot.lane.b32.xlu1 %v1639_v11, %s11427_s16 }
 0x76b   : > { %1686 = vrot.lane.b32.xlu1 %v1641_v14, %s11427_s16  ;;  %v2923_v14 = vshll.u32 %v12003_v3, 16 }
 0x76f   : > { %1690 = vrot.lane.b32.xlu1 %v1643_v16, %s11427_s16  ;;  %v12022_v16 = vld [vmem:[#allocation2 + $0x4] sm:$0x1]  ;;  %s16552_s16 = smov %s16551_s26 }
 0x7cb   : > { %v1359_v17 = vpop.xlane.xlu1 %1358 }
 0x7cc   : > { %v1360_v18 = vmul.f32 0.125, %v1359_v17  ;;  %v12024_v17 = vld [vmem:[#allocation2] sm:$0xe] }
 0x7ce   : > { %v1361_v19 = vadd.f32 1e-05, %v1360_v18  ;;  %v2088_v18 = vor.u32 %v2087_v35, %v2084_v7 }
 0x7cf   : > { %v11994_v57 = vpop.permute.xlu1 %1662 }
 0x7d0   : > { %10915 = vrsqrt.f32 %v1361_v19  ;;  %v1661_v19 = vpop.permute.xlu0 %1660 }
 0x7d3   : > { %v11998_v61 = vpop.permute.xlu1 %1664 }
 0x7d7   : > { %v12008_v9 = vpop.permute.xlu1 %1666 }
 0x7da   : > { %v10916_v20 = vpop.eup %10915 }
 0x7db   : > { %v1363_v22 = vmul.f32 %v10916_v20, %v1355_v42  ;;  %v1482_v20 = vld [vmem:[%s12017_s20] sm:$0xff] }
 0x7dd   : > { %v1368_v24 = vmul.f32 %v9641_v21, %v1363_v22 }
 0x7df   : > { %v1373_v25 = vadd.f32 %v9642_v23, %v1368_v24  ;;  %v12028_v23 = vld [vmem:[#allocation2 + $0x54] sm:$0x1]  ;;  %v12030_v24 = vld [vmem:[#allocation2 + $0x50] sm:$0xe] }
 0x7e1   : > { %v1375_v26 = vmul.f32 0.70710677, %v1373_v25  ;;  %v1374_v52 = vmul.f32 0.5, %v1373_v25  ;;  %v1573_v25 = vrot.slane %v1562_v12, %v12006_v8 }
 0x7e3   : > { %v1376_v27 = vand.u32 2147483647, %v1375_v26  ;;  %vm1398_vm6 = vcmp.ge.f32.partialorder %v1375_v26, 0.0  ;;  %v12034_v26 = vrot.slane %v1569_v13, %v12006_v8 }
 0x7e5   : > { %v1377_v28 = vmul.f32 0.3275911, %v1376_v27  ;;  %v1392_v32 = vsub.f32 0.0, %v1376_v27 }
 0x7e7   : > { %v1378_v29 = vadd.f32 1.0, %v1377_v28  ;;  %v1393_v36 = vmul.f32 %v1392_v32, %v1376_v27  ;;  %v1483_v27 = vld [vmem:[%s12017_s20 + $0x8] sm:$0xff]  ;;  %v1484_v28 = vld [vmem:[%s12017_s20 + $0x10] sm:$0xff]  ;;  %v1671_v32 = vpop.permute.xlu1 %1670 }
 0x7e9   : > { %10917 = vrcp.f32 %v1378_v29  ;;  %v1394_v39 = vmul.f32 1.442695, %v1393_v36 }
 0x7eb   : > { %10919 = vpow2.f32 %v1394_v39 }
 0x7f3   : > { %v10918_v30 = vpop.eup %10917 }
 0x7f4   : > { %v1380_v31 = vmul.f32 %v10918_v30, %v1378_v29  ;;  %v1485_v29 = vld [vmem:[%s12017_s20 + $0x18] sm:$0xff] }
 0x7f5   : > { %v10920_v47 = vpop.eup %10919 }
 0x7f6   : > { %v1381_v33 = vsub.f32 2.0, %v1380_v31  ;;  %v12041_v31 = vrot.slane %v2923_v14, 5 }
 0x7f8   : > { %v1382_v34 = vmul.f32 %v10918_v30, %v1381_v33  ;;  %v12039_v30 = vrot.slane %v2920_v4, 4  ;;  %16413 = vst [vmem:[#allocation32_spill] sm:$0xff] %v12041_v31  ;;  %v1486_v33 = vld [vmem:[%s12017_s20 + $0x20] sm:$0xff] }
 0x7fa   : > { %v1383_v37 = vmul.f32 1.0614054, %v1382_v34  ;;  %16412 = vst [vmem:[#allocation31_spill] sm:$0xff] %v12039_v30 }
 0x7fc   : > { %v1384_v38 = vadd.f32 -1.4531521, %v1383_v37 }
 0x7fe   : > { %v1385_v40 = vmul.f32 %v1384_v38, %v1382_v34  ;;  %v1489_v38 = vld [vmem:[%s12017_s20 + $0x38] sm:$0xff] }
 0x800   : > { %v1386_v41 = vadd.f32 1.4214138, %v1385_v40 }
 0x802   : > { %v1387_v42 = vmul.f32 %v1386_v41, %v1382_v34  ;;  %v1488_v41 = vld [vmem:[%s12017_s20 + $0x30] sm:$0xff] }
 0x804   : > { %v1388_v43 = vadd.f32 -0.28449672, %v1387_v42 }
 0x806   : > { %v1389_v44 = vmul.f32 %v1388_v43, %v1382_v34 }
 0x808   : > { %v1390_v45 = vadd.f32 0.2548296, %v1389_v44  ;;  %v12053_v44 = vrot.slane %v2088_v18, 4 }
 0x80a   : > { %v1391_v46 = vmul.f32 %v1390_v45, %v1382_v34  ;;  %v1487_v34 = vld [vmem:[%s12017_s20 + $0x28] sm:$0xff]  ;;  %v2091_v45 = vshll.u32 %v12022_v16, 16 }
 0x80c   : > { %v1396_v48 = vmul.f32 %v10920_v47, %v1391_v46 }
 0x80e   : > { %v1397_v49 = vsub.f32 1.0, %v1396_v48 }
 0x810   : > { %v1399_v50 = vsub.f32 0.0, %v1397_v49 }
 0x812   : > { %v1400_v51 = vsel %vm1398_vm6, %v1397_v49, %v1399_v50  ;;  %vm12416_vm6 = vmor %vm2078_vm4, %vm2079_vm5  ;;  %vm16337_vm4 = vcmask 257024  }
 0x813   : > { %v1401_v53 = vadd.f32 1.0, %v1400_v51 }
 0x815   : > { %v1402_v54 = vmul.f32 %v1401_v53, %v1374_v52 }
 0x817   : > { %10360 = vmatmul.mubr.msk.f32.vlgmr.msra.gmra.mrb[4].mxu1 %vm793_vm1, %v1402_v54  ;;  %v1669_v54 = vpop.permute.xlu0 %1668 }
 0x8ea   : > { %v1478_v5 = vpop.f32.mrb[4].mxu1 }
 0x8eb   : > { %v1479_v10 = vadd.f32 %v9643_v2, %v1478_v5  ;;  %v10361_v11 = vpop.f32.mrb[5].mxu1 }
 0x8ed   : > { %v1505_v15 = vrot.slane %v1479_v10, %v11903_v6  ;;  %v1675_v10 = vpop.permute.xlu1 %1674 }
 0x8ef   : > { %v1506_v21 = vcombine.high %v1505_v15, %v1505_v15  ;;  %v1513_v22 = vrot.slane %v1505_v15, %v11903_v6 }
 0x8f1   : > { %v1520_v36 = vrot.slane %v1506_v21, %v11903_v6  ;;  %v1524_v37 = vrot.slane %v1513_v22, %v12006_v8 }
 0x8f3   : > { %v12057_v46 = vrot.slane %v1520_v36, %v12006_v8  ;;  %v1531_v47 = vmul.f32 %v1524_v37, %v1482_v20  ;;  %v1532_v48 = vmul.f32 %v1524_v37, %v1483_v27  ;;  %v1533_v49 = vmul.f32 %v1524_v37, %v1484_v28 }
 0x8f4   : > { %v1534_v50 = vmul.f32 %v1524_v37, %v1485_v29  ;;  %v1535_v51 = vmul.f32 %v1524_v37, %v1486_v33  ;;  %v1536_v52 = vmul.f32 %v1524_v37, %v1487_v34  ;;  %v1538_v53 = vmul.f32 %v1524_v37, %v1489_v38 }
 0x8f5   : > { %v1580_v56 = vadd.f32 %v1573_v25, %v1531_v47  ;;  %v1581_v58 = vadd.f32 %v1573_v25, %v1532_v48  ;;  %v1582_v59 = vadd.f32 %v1573_v25, %v1533_v49  ;;  %v1537_v60 = vmul.f32 %v1524_v37, %v1488_v41  ;;  %v1491_v48 = vld [vmem:[%s12017_s20 + $0x48] sm:$0xff]  ;;  %v1679_v49 = vpop.permute.xlu1 %1678 }
 0x8f6   : > { %v1583_v62 = vadd.f32 %v1573_v25, %v1534_v50  ;;  %v1584_v63 = vadd.f32 %v1573_v25, %v1535_v51  ;;  %v1585_v0 = vadd.f32 %v1573_v25, %v1536_v52  ;;  %v1587_v2 = vadd.f32 %v1573_v25, %v1538_v53 }
 0x8f7   : > { %v1596_v5 = vpack.c.bf16 %v1580_v56, %v1580_v56  ;;  %v1597_v7 = vpack.c.bf16 %v1581_v58, %v1581_v58  ;;  %v1598_v35 = vpack.c.bf16 %v1582_v59, %v1582_v59  ;;  %v1586_v11 = vadd.f32 %v1573_v25, %v1537_v60  ;;  %v1493_v56 = vld [vmem:[%s12017_s20 + $0x58] sm:$0xff]  ;;  %v1492_v58 = vld [vmem:[%s12017_s20 + $0x50] sm:$0xff] }
 0x8f8   : > { %v1599_v12 = vpack.c.bf16 %v1583_v62, %v1583_v62  ;;  %v1600_v13 = vpack.c.bf16 %v1584_v63, %v1584_v63  ;;  %v1601_v4 = vpack.c.bf16 %v1585_v0, %v1585_v0  ;;  %v1603_v14 = vpack.c.bf16 %v1587_v2, %v1587_v2  ;;  %v1495_v0 = vld [vmem:[%s12017_s20 + $0x68] sm:$0xff]  ;;  %v1494_v2 = vld [vmem:[%s12017_s20 + $0x60] sm:$0xff] }
 0x8f9   : > { %v12060_v15 = vsel %vm793_vm1, %v1596_v5, %v1661_v19  ;;  %v12064_v18 = vsel %vm793_vm1, %v1597_v7, %v11994_v57  ;;  %v12068_v20 = vsel %vm793_vm1, %v1598_v35, %v11998_v61  ;;  %v1602_v21 = vpack.c.bf16 %v1586_v11, %v1586_v11 }
 0x8fa   : > { %v12072_v22 = vsel %vm793_vm1, %v1599_v12, %v12008_v9  ;;  %v12075_v25 = vsel %vm793_vm1, %v1600_v13, %v1669_v54  ;;  %v12078_v19 = vsel %vm793_vm1, %v1601_v4, %v1671_v32  ;;  %v1751_v27 = vshrl.u32 %v12060_v15, 16  ;;  %v1673_v9 = vpop.permute.xlu0 %1672  ;;  %v1490_v54 = vld [vmem:[%s12017_s20 + $0x40] sm:$0xff] }
 0x8fb   : > { %v1754_v57 = vshll.u32 %v12060_v15, 16  ;;  %v1757_v28 = vshrl.u32 %v12064_v18, 16  ;;  %v1760_v61 = vshll.u32 %v12064_v18, 16  ;;  %v1763_v29 = vshrl.u32 %v12068_v20, 16 }
 0x8fc   : > { %v12085_v33 = vrot.slane %v1751_v27, 7  ;;  %v1766_v34 = vshll.u32 %v12068_v20, 16  ;;  %v1769_v32 = vshrl.u32 %v12072_v22, 16  ;;  %v1772_v36 = vshll.u32 %v12072_v22, 16 }
 0x8fd   : > { %v12090_v37 = vrot.slane %v1757_v28, 7  ;;  %v12092_v38 = vrot.slane %v1763_v29, 7  ;;  %v1775_v41 = vshrl.u32 %v12075_v25, 16  ;;  %v1778_v47 = vshll.u32 %v12075_v25, 16 }
 0x8fe   : > { %v12097_v50 = vrot.slane %v1769_v32, 7  ;;  %v1781_v51 = vshrl.u32 %v12078_v19, 16  ;;  %v1784_v52 = vshll.u32 %v12078_v19, 16  ;;  %v1715_v53 = vsel %vm793_vm1, %v1603_v14, %v1675_v10  ;;  %v1677_v13 = vpop.permute.xlu0 %1676 }
 0x8ff   : > { %v12105_v59 = vrot.slane %v1775_v41, 7  ;;  %v1793_v60 = vshrl.u32 %v1715_v53, 16  ;;  %v1796_v62 = vshll.u32 %v1715_v53, 16  ;;  %v1712_v63 = vsel %vm793_vm1, %v1602_v21, %v1673_v9  ;;  %v1683_v53 = vpop.permute.xlu1 %1682 }
 0x900   : > { %v12110_v5 = vrot.slane %v1781_v51, 7  ;;  %v1787_v7 = vshrl.u32 %v1712_v63, 16  ;;  %v1790_v35 = vshll.u32 %v1712_v63, 16  ;;  %v1540_v11 = vmul.f32 %v12057_v46, %v1491_v48 }
 0x901   : > { %v1795_v12 = vrot.slane %v1793_v60, 7  ;;  %v1539_v10 = vmul.f32 %v12057_v46, %v1490_v54  ;;  %v1542_v4 = vmul.f32 %v12057_v46, %v1493_v56  ;;  %v1541_v14 = vmul.f32 %v12057_v46, %v1492_v58 }
 0x902   : > { %v16414_v21 = vmov 0  ;;  %v1789_v27 = vrot.slane %v1787_v7, 7  ;;  %v1589_v28 = vadd.f32 %v12034_v26, %v1540_v11  ;;  %v1544_v29 = vmul.f32 %v12057_v46, %v1495_v0 }
 0x903   : > { %v16415_v21 = vsel %vm12118_vm13, 4294967295, %v16414_v21  ;;  %v1543_v9 = vmul.f32 %v12057_v46, %v1494_v2  ;;  %v16417_v32 = vmov 0  ;;  %v1798_v41 = vor.u32 %v1796_v62, %v1795_v12 }
 0x904   : > { %16416 = vst [vmem:[#allocation33_spill] sm:$0xff] %v16415_v21  ;;  %v16418_v32 = vsel %vm12127_vm14, 4294967295, %v16417_v32  ;;  %v1588_v48 = vadd.f32 %v12034_v26, %v1539_v10  ;;  %v1591_v51 = vadd.f32 %v12034_v26, %v1542_v4  ;;  %v1590_v54 = vadd.f32 %v12034_v26, %v1541_v14 }
 0x905   : > { %16419 = vst [vmem:[#allocation34_spill] sm:$0xff] %v16418_v32  ;;  %v1792_v56 = vor.u32 %v1790_v35, %v1789_v27  ;;  %v1605_v58 = vpack.c.bf16 %v1589_v28, %v1589_v28  ;;  %v1593_v60 = vadd.f32 %v12034_v26, %v1544_v29  ;;  %v1592_v63 = vadd.f32 %v12034_v26, %v1543_v9  ;;  %v1681_v29 = vpop.permute.xlu0 %1680 }
 0x906   : > { %v1873_v0 = vsel %vm12118_vm13, 0, %v1798_v41  ;;  %v1604_v2 = vpack.c.bf16 %v1588_v48, %v1588_v48  ;;  %v1607_v7 = vpack.c.bf16 %v1591_v51, %v1591_v51  ;;  %v1606_v11 = vpack.c.bf16 %v1590_v54, %v1590_v54 }
 0x907   : > { %v1892_v62 = vsel %vm12127_vm14, %v1873_v0, 0  ;;  %v1872_v12 = vsel %vm12118_vm13, 0, %v1792_v56  ;;  %v1721_v10 = vsel %vm793_vm1, %v1605_v58, %v1679_v49  ;;  %v1609_v35 = vpack.c.bf16 %v1593_v60, %v1593_v60  ;;  %v1687_v60 = vpop.permute.xlu1 %1686 }
 0x908   : > { %v9659_v4 = vcombine.low %v1892_v62, %v1892_v62  ;;  %v9660_v14 = vcombine.high %v1892_v62, %v1892_v62  ;;  %v1891_v27 = vsel %vm12127_vm14, %v1872_v12, 0  ;;  %v1805_v28 = vshrl.u32 %v1721_v10, 16 }
 0x909   : > { %v9657_v9 = vcombine.low %v1891_v27, %v1891_v27  ;;  %v9658_v41 = vcombine.high %v1891_v27, %v1891_v27  ;;  %v1808_v48 = vshll.u32 %v1721_v10, 16  ;;  %v1718_v51 = vsel %vm793_vm1, %v1604_v2, %v1677_v13  ;;  %v1497_v2 = vld [vmem:[%s12017_s20 + $0x78] sm:$0xff]  ;;  %v1685_v55 = vpop.permute.xlu0 %1684 }
 0x90a   : > { %2028 = vst.msk [vmem:[#allocation2 + $0x40] sm:$0xf] %vm1740_vm7, %v9659_v4  ;;  %v1807_v54 = vrot.slane %v1805_v28, 7  ;;  %v1799_v49 = vshrl.u32 %v1718_v51, 16  ;;  %v1802_v56 = vshll.u32 %v1718_v51, 16  ;;  %v1727_v58 = vsel %vm793_vm1, %v1607_v7, %v1683_v53 }
 0x90b   : > { %2029 = vst.msk [vmem:[#allocation2 + $0x44] sm:$0x1] %vm1742_vm8, %v9660_v14  ;;  %2027 = vst.msk [vmem:[#allocation2 + $0x3c] sm:$0x1] %vm1742_vm8, %v9658_v41  ;;  %v1817_v0 = vshrl.u32 %v1727_v58, 16  ;;  %v1820_v62 = vshll.u32 %v1727_v58, 16  ;;  %v1724_v12 = vsel %vm793_vm1, %v1606_v11, %v1681_v29  ;;  %v1733_v13 = vsel %vm793_vm1, %v1609_v35, %v1687_v60 }
 0x90c   : > { %2026 = vst.msk [vmem:[#allocation2 + $0x38] sm:$0xf] %vm1740_vm7, %v9657_v9  ;;  %v1810_v10 = vor.u32 %v1808_v48, %v1807_v54  ;;  %v1801_v4 = vrot.slane %v1799_v49, 7  ;;  %v1811_v14 = vshrl.u32 %v1724_v12, 16  ;;  %v1814_v27 = vshll.u32 %v1724_v12, 16 }
 0x90d   : > { %v1819_v28 = vrot.slane %v1817_v0, 7  ;;  %v1829_v51 = vshrl.u32 %v1733_v13, 16  ;;  %v1832_v1 = vshll.u32 %v1733_v13, 16  ;;  %v1608_v53 = vpack.c.bf16 %v1592_v63, %v1592_v63 }
 0x90e   : > { %v1875_v7 = vsel %vm12118_vm13, 0, %v1810_v10  ;;  %v1804_v9 = vor.u32 %v1802_v56, %v1801_v4  ;;  %v1813_v41 = vrot.slane %v1811_v14, 7  ;;  %v1546_v58 = vmul.f32 %v12057_v46, %v1497_v2 }
 0x90f   : > { %v1894_v11 = vsel %vm12127_vm14, %v1875_v7, 0  ;;  %v1822_v35 = vor.u32 %v1820_v62, %v1819_v28  ;;  %v1831_v29 = vrot.slane %v1829_v51, 7  ;;  %v1730_v48 = vsel %vm793_vm1, %v1608_v53, %v1685_v55  ;;  %v1496_v28 = vld [vmem:[%s12017_s20 + $0x70] sm:$0xff] }
 0x910   : > { %v9663_v54 = vcombine.low %v1894_v11, %v1894_v11  ;;  %v9664_v49 = vcombine.high %v1894_v11, %v1894_v11  ;;  %v1874_v63 = vsel %vm12118_vm13, 0, %v1804_v9  ;;  %v1816_v60 = vor.u32 %v1814_v27, %v1813_v41 }
 0x911   : > { %v1893_v56 = vsel %vm12127_vm14, %v1874_v63, 0  ;;  %v1877_v0 = vsel %vm12118_vm13, 0, %v1822_v35  ;;  %v1834_v12 = vor.u32 %v1832_v1, %v1831_v29  ;;  %v1823_v13 = vshrl.u32 %v1730_v48, 16 }
 0x912   : > { %2032 = vst.msk [vmem:[#allocation2 + $0x60] sm:$0xf] %vm1740_vm7, %v9663_v54  ;;  %v9661_v55 = vcombine.low %v1893_v56, %v1893_v56  ;;  %v9662_v62 = vcombine.high %v1893_v56, %v1893_v56  ;;  %v1896_v2 = vsel %vm12127_vm14, %v1877_v0, 0  ;;  %v1876_v10 = vsel %vm12118_vm13, 0, %v1816_v60  ;;  %v1691_v54 = vpop.permute.xlu1 %1690 }
 0x913   : > { %2033 = vst.msk [vmem:[#allocation2 + $0x64] sm:$0x1] %vm1742_vm8, %v9664_v49  ;;  %v9667_v4 = vcombine.low %v1896_v2, %v1896_v2  ;;  %v9668_v14 = vcombine.high %v1896_v2, %v1896_v2  ;;  %v1895_v27 = vsel %vm12127_vm14, %v1876_v10, 0  ;;  %v1879_v1 = vsel %vm12118_vm13, 0, %v1834_v12 }
 0x914   : > { %2030 = vst.msk [vmem:[#allocation2 + $0x58] sm:$0xf] %vm1740_vm7, %v9661_v55  ;;  %v9665_v51 = vcombine.low %v1895_v27, %v1895_v27  ;;  %v9666_v53 = vcombine.high %v1895_v27, %v1895_v27  ;;  %v1898_v7 = vsel %vm12127_vm14, %v1879_v1, 0  ;;  %v1825_v9 = vrot.slane %v1823_v13, 7  ;;  %v12229_v1 = vld [vmem:[#allocation2 + $0x38] sm:$0xf] }
 0x915   : > { %2031 = vst.msk [vmem:[#allocation2 + $0x5c] sm:$0x1] %vm1742_vm8, %v9662_v62  ;;  %2037 = vst.msk [vmem:[#allocation2 + $0x74] sm:$0x1] %vm1742_vm8, %v9668_v14  ;;  %v9671_v41 = vcombine.low %v1898_v7, %v1898_v7  ;;  %v9672_v11 = vcombine.high %v1898_v7, %v1898_v7  ;;  %v1826_v35 = vshll.u32 %v1730_v48, 16  ;;  %v1595_v29 = vadd.f32 %v12034_v26, %v1546_v58 }
 0x916   : > { %2036 = vst.msk [vmem:[#allocation2 + $0x70] sm:$0xf] %vm1740_vm7, %v9667_v4  ;;  %2034 = vst.msk [vmem:[#allocation2 + $0x68] sm:$0xf] %vm1740_vm7, %v9665_v51  ;;  %v1545_v49 = vmul.f32 %v12057_v46, %v1496_v28  ;;  %v1762_v63 = vor.u32 %v1760_v61, %v12090_v37  ;;  %v1768_v60 = vor.u32 %v1766_v34, %v12092_v38  ;;  %v1689_v34 = vpop.permute.xlu0 %1688 }
 0x917   : > { %2035 = vst.msk [vmem:[#allocation2 + $0x6c] sm:$0x1] %vm1742_vm8, %v9666_v53  ;;  %v1756_v48 = vor.u32 %v1754_v57, %v12085_v33  ;;  %2041 = vst.msk [vmem:[#allocation2 + $0x84] sm:$0x1] %vm1742_vm8, %v9672_v11  ;;  %v1828_v58 = vor.u32 %v1826_v35, %v1825_v9  ;;  %v1611_v56 = vpack.c.bf16 %v1595_v29, %v1595_v29 }
 0x918   : > { %2040 = vst.msk [vmem:[#allocation2 + $0x80] sm:$0xf] %vm1740_vm7, %v9671_v41  ;;  %v1774_v46 = vor.u32 %v1772_v36, %v12097_v50  ;;  %v1780_v18 = vor.u32 %v1778_v47, %v12105_v59  ;;  %v1594_v20 = vadd.f32 %v12034_v26, %v1545_v49  ;;  %v1867_v15 = vsel %vm12118_vm13, 0, %v1762_v63 }
 0x919   : > { %v1868_v57 = vsel %vm12118_vm13, 0, %v1768_v60  ;;  %v1866_v61 = vsel %vm12118_vm13, 0, %v1756_v48  ;;  %v1878_v33 = vsel %vm12118_vm13, 0, %v1828_v58  ;;  %v1739_v22 = vsel %vm793_vm1, %v1611_v56, %v1691_v54 }
 0x91a   : > { %v1886_v25 = vsel %vm12127_vm14, %v1867_v15, 0  ;;  %v1887_v26 = vsel %vm12127_vm14, %v1868_v57, 0  ;;  %v1897_v36 = vsel %vm12127_vm14, %v1878_v33, 0  ;;  %v1841_v37 = vshrl.u32 %v1739_v22, 16 }
 0x91b   : > { %v1844_v38 = vshll.u32 %v1739_v22, 16  ;;  %v1610_v47 = vpack.c.bf16 %v1594_v20, %v1594_v20  ;;  %v9669_v50 = vcombine.low %v1897_v36, %v1897_v36  ;;  %v9670_v59 = vcombine.high %v1897_v36, %v1897_v36 }
 0x91c   : > { %v9647_v0 = vcombine.low %v1886_v25, %v1886_v25  ;;  %v9648_v12 = vcombine.high %v1886_v25, %v1886_v25  ;;  %v1843_v13 = vrot.slane %v1841_v37, 7  ;;  %v9649_v62 = vcombine.low %v1887_v26, %v1887_v26 }
 0x91d   : > { %v1736_v55 = vsel %vm793_vm1, %v1610_v47, %v1689_v34  ;;  %v9650_v2 = vcombine.high %v1887_v26, %v1887_v26  ;;  %2038 = vst.msk [vmem:[#allocation2 + $0x78] sm:$0xf] %vm1740_vm7, %v9669_v50  ;;  %v1885_v14 = vsel %vm12127_vm14, %v1866_v61, 0  ;;  %v1869_v27 = vsel %vm12118_vm13, 0, %v1774_v46  ;;  %v12251_v46 = vld [vmem:[#allocation2 + $0x40] sm:$0xf] }
 0x91e   : > { %2039 = vst.msk [vmem:[#allocation2 + $0x7c] sm:$0x1] %vm1742_vm8, %v9670_v59  ;;  %v1835_v10 = vshrl.u32 %v1736_v55, 16  ;;  %v1838_v4 = vshll.u32 %v1736_v55, 16  ;;  %2017 = vst.msk [vmem:[#allocation2 + $0x14] sm:$0x1] %vm1742_vm8, %v9648_v12  ;;  %v1846_v28 = vor.u32 %v1844_v38, %v1843_v13  ;;  %v9645_v51 = vcombine.low %v1885_v14, %v1885_v14 }
 0x91f   : > { %2016 = vst.msk [vmem:[#allocation2 + $0x10] sm:$0xf] %vm1740_vm7, %v9647_v0  ;;  %2018 = vst.msk [vmem:[#allocation2 + $0x18] sm:$0xf] %vm1740_vm7, %v9649_v62  ;;  %v9646_v53 = vcombine.high %v1885_v14, %v1885_v14  ;;  %v1888_v7 = vsel %vm12127_vm14, %v1869_v27, 0  ;;  %v1870_v35 = vsel %vm12118_vm13, 0, %v1780_v18  ;;  %v1786_v49 = vor.u32 %v1784_v52, %v12110_v5 }
 0x920   : > { %2019 = vst.msk [vmem:[#allocation2 + $0x1c] sm:$0x1] %vm1742_vm8, %v9650_v2  ;;  %v1837_v9 = vrot.slane %v1835_v10, 7  ;;  %v9651_v41 = vcombine.low %v1888_v7, %v1888_v7  ;;  %v9652_v11 = vcombine.high %v1888_v7, %v1888_v7  ;;  %v1881_v29 = vsel %vm12118_vm13, 0, %v1846_v28 }
 0x921   : > { %2014 = vst.msk [vmem:[#allocation2 + $0x8] sm:$0xf] %vm1740_vm7, %v9645_v51  ;;  %v1889_v54 = vsel %vm12127_vm14, %v1870_v35, 0  ;;  %v2892_v63 = vshrl.u32 %v12229_v1, 16  ;;  %v1900_v60 = vsel %vm12127_vm14, %v1881_v29, 0  ;;  %v1871_v19 = vsel %vm12118_vm13, 0, %v1786_v49 }
 0x922   : > { %2015 = vst.msk [vmem:[#allocation2 + $0xc] sm:$0x1] %vm1742_vm8, %v9646_v53  ;;  %v1840_v48 = vor.u32 %v1838_v4, %v1837_v9  ;;  %2021 = vst.msk [vmem:[#allocation2 + $0x24] sm:$0x1] %vm1742_vm8, %v9652_v11  ;;  %v9653_v58 = vcombine.low %v1889_v54, %v1889_v54  ;;  %v9654_v56 = vcombine.high %v1889_v54, %v1889_v54  ;;  %v12257_v52 = vrot.slane %v2091_v45, 5 }
 0x923   : > { %2020 = vst.msk [vmem:[#allocation2 + $0x20] sm:$0xf] %vm1740_vm7, %v9651_v41  ;;  %v9675_v18 = vcombine.low %v1900_v60, %v1900_v60  ;;  %v9676_v20 = vcombine.high %v1900_v60, %v1900_v60  ;;  %v1890_v15 = vsel %vm12127_vm14, %v1871_v19, 0  ;;  %v12265_v57 = vrot.slane %v2892_v63, 4  ;;  %v12300_v54 = vld [vmem:[#allocation2 + $0x38] sm:$0xf] }
 0x924   : > { %v1880_v5 = vsel %vm12118_vm13, 0, %v1840_v48  ;;  %2022 = vst.msk [vmem:[#allocation2 + $0x28] sm:$0xf] %vm1740_vm7, %v9653_v58  ;;  %v2895_v61 = vshll.u32 %v12229_v1, 16  ;;  %vm16331_vm1 = vcmask 130048   ;;  %v9655_v34 = vcombine.low %v1890_v15, %v1890_v15 }
 0x925   : > { %2023 = vst.msk [vmem:[#allocation2 + $0x2c] sm:$0x1] %vm1742_vm8, %v9654_v56  ;;  %16420 = vst [vmem:[#allocation35_spill] sm:$0xff] %v12265_v57  ;;  %v1899_v45 = vsel %vm12127_vm14, %v1880_v5, 0  ;;  %v9656_v25 = vcombine.high %v1890_v15, %v1890_v15  ;;  %v2906_v26 = vshrl.u32 %v12251_v46, 16  ;;  %v16421_v51 = vmov 0 }
 0x926   : > { %2044 = vst.msk [vmem:[#allocation2 + $0x90] sm:$0xf] %vm1740_vm7, %v9675_v18  ;;  %v2789_v33 = vld [vmem:[#allocation2 + $0x10] sm:$0xf]  ;;  %v9673_v36 = vcombine.low %v1899_v45, %v1899_v45  ;;  %v9674_v37 = vcombine.high %v1899_v45, %v1899_v45  ;;  %v2790_v38 = vld [vmem:[#allocation2 + $0x18] sm:$0xf] }
 0x927   : > { %2045 = vst.msk [vmem:[#allocation2 + $0x94] sm:$0x1] %vm1742_vm8, %v9676_v20  ;;  %v2421_v22 = vld [vmem:[#allocation2 + $0x10] sm:$0xf]  ;;  %v2822_v47 = vshrl.u32 %v2789_v33, 16  ;;  %v2825_v50 = vshll.u32 %v2789_v33, 16  ;;  %v9773_v0 = vcombine.low %v2789_v33, %v2790_v38 }
 0x928   : > { %v12273_v59 = vld [vmem:[#allocation2 + $0x14] sm:$0x1]  ;;  %v2836_v12 = vshrl.u32 %v2790_v38, 16  ;;  %v2839_v13 = vshll.u32 %v2790_v38, 16  ;;  %v2467_v55 = vshrl.u32 %v2421_v22, 16  ;;  %v2470_v2 = vshll.u32 %v2421_v22, 16 }
 0x929   : > { %2024 = vst.msk [vmem:[#allocation2 + $0x30] sm:$0xf] %vm1740_vm7, %v9655_v34  ;;  %2042 = vst.msk [vmem:[#allocation2 + $0x88] sm:$0xf] %vm1740_vm7, %v9673_v36  ;;  %v2420_v62 = vld [vmem:[#allocation2 + $0x8] sm:$0xf]  ;;  %3453 = vrot.lane.b32.xlu1 %v9773_v0, %s11429_s17 }
 0x92a   : > { %2025 = vst.msk [vmem:[#allocation2 + $0x34] sm:$0x1] %vm1742_vm8, %v9656_v25  ;;  %2043 = vst.msk [vmem:[#allocation2 + $0x8c] sm:$0x1] %vm1742_vm8, %v9674_v37  ;;  %v12279_v10 = vld [vmem:[#allocation2 + $0x1c] sm:$0x1]  ;;  %v9749_v28 = vcombine.low %v2420_v62, %v2421_v22 }
 0x92b   : > { %v3095_v4 = vrot.slane %v12273_v59, 5  ;;  %v12282_v14 = vrot.slane %v2822_v47, 4  ;;  %v12284_v27 = vrot.slane %v2825_v50, 5  ;;  %v16422_v51 = vsel %vm12289_vm3, 4294967295, %v16421_v51  ;;  %v3045_v53 = vld [vmem:[#allocation2 + $0x10] sm:$0xe] }
 0x92c   : > { %16423 = vst [vmem:[#allocation36_spill] sm:$0xff] %v16422_v51  ;;  %v2909_v7 = vshll.u32 %v12251_v46, 16  ;;  %v12294_v9 = vrot.slane %v2836_v12, 4  ;;  %v12296_v41 = vrot.slane %v2839_v13, 5  ;;  %v12298_v11 = vrot.slane %v2467_v55, 4  ;;  %3317 = vrot.lane.b32.xlu0 %v9749_v28, %s11430_s12 }
 0x92d   : > { %v3046_v35 = vld [vmem:[#allocation2 + $0x18] sm:$0xe]  ;;  %v9709_v29 = vrot.slane %v3045_v53, 9  ;;  %v12302_v49 = vld [vmem:[#allocation2 + $0x40] sm:$0xf]  ;;  %v3099_v60 = vrot.slane %v12279_v10, 5  ;;  %v9776_v47 = vcombine.low %v12251_v46, %v12003_v3 }
 0x92e   : > { %v9710_v63 = vrot.slane %v3046_v35, 9  ;;  %v2422_v48 = vld [vmem:[#allocation2 + $0x18] sm:$0xf]  ;;  %v2423_v58 = vld [vmem:[#allocation2 + $0x20] sm:$0xf]  ;;  %v12306_v56 = vrot.slane %v2470_v2, 5  ;;  %v9752_v55 = vcombine.low %v12300_v54, %v12302_v49 }
 0x92f   : > { %v2453_v18 = vshrl.u32 %v2420_v62, 16  ;;  %v2456_v20 = vshll.u32 %v2420_v62, 16  ;;  %v3096_v19 = vsel %vm12289_vm3, %v9709_v29, %v3095_v4  ;;  %v2791_v5 = vld [vmem:[#allocation2 + $0x20] sm:$0xf]  ;;  %v2481_v45 = vshrl.u32 %v2422_v48, 16 }
 0x930   : > { %v3100_v15 = vsel %vm12289_vm3, %v9710_v63, %v3099_v60  ;;  %v2484_v33 = vshll.u32 %v2422_v48, 16  ;;  %v9750_v22 = vcombine.low %v2422_v48, %v2423_v58  ;;  %v2792_v34 = vld [vmem:[#allocation2 + $0x28] sm:$0xf]  ;;  %v2495_v36 = vshrl.u32 %v2423_v58, 16  ;;  %v2425_v38 = vld [vmem:[#allocation2 + $0x30] sm:$0xf] }
 0x931   : > { %v9789_v25 = vcombine.low %v3096_v19, %v3100_v15  ;;  %v2498_v37 = vshll.u32 %v2423_v58, 16  ;;  %v2850_v50 = vshrl.u32 %v2791_v5, 16  ;;  %v2853_v0 = vshll.u32 %v2791_v5, 16  ;;  %v2424_v13 = vld [vmem:[#allocation2 + $0x28] sm:$0xf] }
 0x932   : > { %3319 = vrot.lane.b32.xlu1 %v9750_v22, %s11430_s12  ;;  %v9774_v12 = vcombine.low %v2791_v5, %v2792_v34  ;;  %v12317_v62 = vrot.slane %v2453_v18, 4  ;;  %v12319_v2 = vrot.slane %v2456_v20, 5  ;;  %v2864_v4 = vshrl.u32 %v2792_v34, 16  ;;  %v2793_v63 = vld [vmem:[#allocation2 + $0x30] sm:$0xf] }
 0x933   : > { %9806 = vmatprep.mubr.msk.bf16.mxu0 %vm16331_vm1, %v9789_v25  ;;  %v2867_v28 = vshll.u32 %v2792_v34, 16  ;;  %v12322_v53 = vrot.slane %v2481_v45, 4  ;;  %v12324_v3 = vrot.slane %v2484_v33, 5  ;;  %v2523_v35 = vshrl.u32 %v2425_v38, 16  ;;  %v2429_v45 = vld [vmem:[#allocation2 + $0x60] sm:$0xf] }
 0x934   : > { %3455 = vrot.lane.b32.xlu0 %v9774_v12, %s11429_s17  ;;  %v2526_v29 = vshll.u32 %v2425_v38, 16  ;;  %v12327_v60 = vrot.slane %v2495_v36, 4  ;;  %v12329_v48 = vrot.slane %v2498_v37, 5  ;;  %v2509_v58 = vshrl.u32 %v2424_v13, 16  ;;  %v2428_v36 = vld [vmem:[#allocation2 + $0x58] sm:$0xf] }
 0x935   : > { %v2512_v18 = vshll.u32 %v2424_v13, 16  ;;  %v12331_v20 = vrot.slane %v2850_v50, 4  ;;  %v12333_v19 = vrot.slane %v2853_v0, 5  ;;  %v12335_v5 = vrot.slane %v2864_v4, 4  ;;  %v12360_v42 = vld [vmem:[#allocation2 + $0xc] sm:$0x1] }
 0x936   : > { %v9751_v15 = vcombine.low %v2424_v13, %v2425_v38  ;;  %v12337_v33 = vrot.slane %v2867_v28, 5  ;;  %v2878_v22 = vshrl.u32 %v2793_v63, 16  ;;  %v2881_v34 = vshll.u32 %v2793_v63, 16  ;;  %v2677_v32 = vld [vmem:[#allocation2 + $0x10] sm:$0xe] }
 0x937   : > { %16424 = vst [vmem:[#allocation37_spill] sm:$0xff] %v12333_v19  ;;  %16425 = vst [vmem:[#allocation38_spill] sm:$0xff] %v12335_v5  ;;  %v9775_v25 = vcombine.low %v2793_v63, %v12229_v1  ;;  %v12340_v37 = vrot.slane %v2523_v35, 4  ;;  %v12342_v12 = vrot.slane %v2526_v29, 5  ;;  %v12345_v50 = vrot.slane %v2509_v58, 4 }
 0x938   : > { %16426 = vst [vmem:[#allocation39_spill] sm:$0xff] %v12337_v33  ;;  %3321 = vrot.lane.b32.xlu0 %v9751_v15, %s11430_s12  ;;  %v12347_v0 = vrot.slane %v2512_v18, 5  ;;  %v2551_v38 = vshrl.u32 %v12302_v49, 16  ;;  %v2554_v13 = vshll.u32 %v12302_v49, 16  ;;  %v2537_v4 = vshrl.u32 %v12300_v54, 16 }
 0x939   : > { %16427 = vst [vmem:[#allocation40_spill] sm:$0xff] %v12340_v37  ;;  %16428 = vst [vmem:[#allocation41_spill] sm:$0xff] %v12342_v12  ;;  %3457 = vrot.lane.b32.xlu1 %v9775_v25, %s11429_s17  ;;  %v2540_v28 = vshll.u32 %v12300_v54, 16  ;;  %v2797_v35 = vld [vmem:[#allocation2 + $0x60] sm:$0xf]  ;;  %v12356_v29 = vrot.slane %v2895_v61, 5 }
 0x93a   : > { %16429 = vst [vmem:[#allocation42_spill] sm:$0xff] %v12345_v50  ;;  %16430 = vst [vmem:[#allocation43_spill] sm:$0xff] %v12347_v0  ;;  %v2579_v63 = vshrl.u32 %v2429_v45, 16  ;;  %v2582_v58 = vshll.u32 %v2429_v45, 16  ;;  %v2565_v15 = vshrl.u32 %v2428_v36, 16  ;;  %v12362_v25 = vrot.slane %v2878_v22, 4 }
 0x93b   : > { %16431 = vst [vmem:[#allocation44_spill] sm:$0xff] %v12356_v29  ;;  %v12358_v18 = vld [vmem:[#allocation2 + $0x68] sm:$0xf]  ;;  %v12364_v43 = vrot.slane %v2881_v34, 5  ;;  %v12368_v49 = vrot.slane %v2906_v26, 4  ;;  %v12372_v1 = vrot.slane %v2909_v7, 5  ;;  %v9753_v22 = vcombine.low %v2428_v36, %v2429_v45 }
 0x93c   : > { %16432 = vst [vmem:[#allocation45_spill] sm:$0xff] %v12362_v25  ;;  %v12374_v61 = vld [vmem:[#allocation2 + $0x14] sm:$0x1]  ;;  %v2676_v54 = vld [vmem:[#allocation2 + $0x8] sm:$0xe]  ;;  %3459 = vrot.lane.b32.xlu0 %v9776_v47, %s11429_s17  ;;  %v12377_v39 = vrot.slane %v2551_v38, 4 }
 0x93d   : > { %16433 = vst [vmem:[#allocation46_spill] sm:$0xff] %v12364_v43  ;;  %16434 = vst [vmem:[#allocation47_spill] sm:$0xff] %v12368_v49  ;;  %v12379_v40 = vrot.slane %v2554_v13, 5  ;;  %v2568_v34 = vshll.u32 %v2428_v36, 16  ;;  %3323 = vrot.lane.b32.xlu1 %v9752_v55, %s11430_s12  ;;  %v12382_v26 = vrot.slane %v2537_v4, 4  ;;  %v12384_v21 = vrot.slane %v2540_v28, 5 }
 0x93e   : > { %16435 = vst [vmem:[#allocation48_spill] sm:$0xff] %v12372_v1  ;;  %16436 = vst [vmem:[#allocation49_spill] sm:$0xff] %v12377_v39  ;;  %v12386_v46 = vrot.slane %v2579_v63, 4  ;;  %v2934_v7 = vshrl.u32 %v2797_v35, 16  ;;  %v12388_v8 = vld [vmem:[#allocation2 + $0x14] sm:$0x1]  ;;  %v9777_v28 = vcombine.low %v2797_v35, %v12358_v18 }
 0x93f   : > { %16437 = vst [vmem:[#allocation50_spill] sm:$0xff] %v12379_v40  ;;  %16438 = vst [vmem:[#allocation51_spill] sm:$0xff] %v12382_v26  ;;  %v12390_v6 = vrot.slane %v2582_v58, 5  ;;  %v12392_v47 = vrot.slane %v2565_v15, 4  ;;  %v9693_v38 = vrot.slane %v2676_v54, 9  ;;  %v2726_v45 = vrot.slane %v12360_v42, 5 }
 0x940   : > { %16439 = vst [vmem:[#allocation52_spill] sm:$0xff] %v12384_v21  ;;  %16440 = vst [vmem:[#allocation53_spill] sm:$0xff] %v12386_v46  ;;  %v12395_v36 = vld [vmem:[#allocation2 + $0x68] sm:$0xf]  ;;  %v12397_v13 = vld [vmem:[#allocation2 + $0x70] sm:$0xf]  ;;  %3325 = vrot.lane.b32.xlu0 %v9753_v22, %s11430_s12 }
 0x941   : > { %16441 = vst [vmem:[#allocation54_spill] sm:$0xff] %v12390_v6  ;;  %16442 = vst [vmem:[#allocation55_spill] sm:$0xff] %v12392_v47  ;;  %v2307_v55 = vld [vmem:[#allocation2 + $0x10] sm:$0xe]  ;;  %v2937_v4 = vshll.u32 %v2797_v35, 16  ;;  %v9694_v46 = vrot.slane %v2677_v32, 9  ;;  %v2727_v47 = vsel %vm12289_vm3, %v9693_v38, %v2726_v45  ;;  %3461 = vrot.lane.b32.xlu1 %v9777_v28, %s11429_s17 }
 0x942   : > { %v12401_v31 = vld [vmem:[#allocation2 + $0x1c] sm:$0x1]  ;;  %v2308_v58 = vld [vmem:[#allocation2 + $0x18] sm:$0xe]  ;;  %v2306_v6 = vld [vmem:[#allocation2 + $0x8] sm:$0xe] }
 0x943   : > { %v12404_v15 = vrot.slane %v2568_v34, 5  ;;  %v2730_v30 = vrot.slane %v12374_v61, 5  ;;  %v12410_v1 = vld [vmem:[#allocation2 + $0xc] sm:$0x1]  ;;  %v16445_v32 = vmov 0  ;;  %v12420_v22 = vrot.slane %v2934_v7, 4 }
 0x944   : > { %v12412_v35 = vld [vmem:[#allocation2 + $0x2c] sm:$0x1]  ;;  %v16446_v32 = vsel %vm12416_vm6, 4294967295, %v16445_v32  ;;  %v16449_v34 = vrot.slane %v12022_v16, 5  ;;  %v16450_v38 = vrot.slane %v12024_v17, 9  ;;  %v2366_v28 = vrot.slane %v12388_v8, 5 }
 0x945   : > { %16443 = vst [vmem:[#allocation56_spill] sm:$0xff] %v12404_v15  ;;  %16444 = vst [vmem:[#allocation57_spill] sm:$0xff] %v12412_v35  ;;  %v12431_v54 = vld [vmem:[#allocation2 + $0x34] sm:$0x1]  ;;  %v2680_v63 = vld [vmem:[#allocation2 + $0x28] sm:$0xe]  ;;  %v2731_v7 = vsel %vm12289_vm3, %v9694_v46, %v2730_v30  ;;  %v9754_v30 = vcombine.low %v12395_v36, %v12397_v13 }
 0x946   : > { %16447 = vst [vmem:[#allocation58_spill] sm:$0xff] %v16446_v32  ;;  %16448 = vst [vmem:[#allocation59_spill] sm:$0xff] %v12420_v22  ;;  %v12429_v45 = vsel %vm12289_vm3, %v16450_v38, %v16449_v34  ;;  %v10839_v15 = vld [vmem:[%s16452_s4] sm:$0xff]   ;;  %v9679_v22 = vrot.slane %v2307_v55, 9  ;;  %v2681_v16 = vld [vmem:[#allocation2 + $0x30] sm:$0xe]  ;;  %v9765_v39 = vcombine.low %v2727_v47, %v2731_v7 }
 0x947   : > { %16451 = vst [vmem:[#allocation60_spill] sm:$0xff] %v12431_v54  ;;  %v12439_v49 = vld [vmem:[#allocation2 + $0x1c] sm:$0x1]  ;;  %v16453_v17 = vrot.slane %v12028_v23, 5  ;;  %v16454_v34 = vrot.slane %v12030_v24, 9  ;;  %v12449_v40 = vrot.slane %v2937_v4, 5  ;;  %3765 = vmatpush1.bf16.msra.mxu0 %v10839_v15  ;;  %3327 = vrot.lane.b32.xlu1 %v9754_v30, %s11430_s12 }
 0x948   : > { %v12453_v46 = vld [vmem:[#allocation2 + $0x24] sm:$0x1]  ;;  %v2678_v55 = vld [vmem:[#allocation2 + $0x18] sm:$0xe]  ;;  %v10840_v24 = vld [vmem:[%s16452_s4 + $0x8] sm:$0xff]   ;;  %v2367_v4 = vsel %vm12289_vm3, %v9679_v22, %v2366_v28  ;;  %v9680_v47 = vrot.slane %v2308_v58, 9  ;;  %3397 = vrot.lane.b32.xlu0 %v9765_v39, %s11431_s18 }
 0x949   : > { %v12447_v38 = vsel %vm12289_vm3, %v16454_v34, %v16453_v17  ;;  %16455 = vst [vmem:[#allocation61_spill] sm:$0xff] %v12449_v40  ;;  %v2370_v7 = vrot.slane %v12401_v31, 5  ;;  %v9678_v17 = vrot.slane %v2306_v6, 9  ;;  %v2679_v34 = vld [vmem:[#allocation2 + $0x20] sm:$0xe]  ;;  %v16456_v21 = vmov 0  }
 0x94a   : > { %v2312_v40 = vld [vmem:[#allocation2 + $0x38] sm:$0xe]  ;;  %3766 = vmatprep.subr.bf16.mxu0 %v16456_v21  ;;  %v2362_v15 = vrot.slane %v12410_v1, 5  ;;  %v9697_v23 = vrot.slane %v2680_v63, 9  ;;  %v2742_v26 = vrot.slane %v12412_v35, 5  ;;  %v9698_v29 = vrot.slane %v2681_v16, 9 }
 0x94b   : > { %v12470_v22 = vld [vmem:[#allocation2 + $0x34] sm:$0x1]  ;;  %v12472_v58 = vld [vmem:[#allocation2 + $0x3c] sm:$0x1]  ;;  %v2371_v6 = vsel %vm12289_vm3, %v9680_v47, %v2370_v7  ;;  %v2746_v28 = vrot.slane %v12431_v54, 5  ;;  %v9695_v57 = vrot.slane %v2678_v55, 9  ;;  %3767 = vmatpush1.bf16.msra.mxu0 %v10840_v24 }
 0x94c   : > { %16457 = vst [vmem:[#allocation62_spill] sm:$0xff] %v12470_v22  ;;  %16458 = vst [vmem:[#allocation63_spill] sm:$0xff] %v12472_v58  ;;  %v2734_v39 = vrot.slane %v12439_v49, 5  ;;  %v2311_v43 = vld [vmem:[#allocation2 + $0x30] sm:$0xe]  ;;  %v9742_v30 = vcombine.low %v2367_v4, %v2371_v6  ;;  %v2363_v63 = vsel %vm12289_vm3, %v9678_v17, %v2362_v15  ;;  %v2743_v16 = vsel %vm12289_vm3, %v9697_v23, %v2742_v26 }
 0x94d   : > { %v9696_v25 = vrot.slane %v2679_v34, 9  ;;  %v12482_v12 = vld [vmem:[#allocation2 + $0x24] sm:$0x1]  ;;  %v12484_v37 = vld [vmem:[#allocation2 + $0x2c] sm:$0x1]  ;;  %v10841_v55 = vld [vmem:[%s16452_s4 + $0x10] sm:$0xff]   ;;  %v9741_v4 = vcombine.low %v12429_v45, %v2363_v63  ;;  %v2747_v47 = vsel %vm12289_vm3, %v9698_v29, %v2746_v28  ;;  %3768 = vmatprep.subr.bf16.mxu0 %v16456_v21 }
 0x94e   : > { %16459 = vst [vmem:[#allocation64_spill] sm:$0xff] %v12484_v37  ;;  %v12486_v35 = vld [vmem:[#allocation2 + $0x5c] sm:$0x1]  ;;  %v2735_v26 = vsel %vm12289_vm3, %v9695_v57, %v2734_v39  ;;  %v2738_v23 = vrot.slane %v12453_v46, 5  ;;  %v2309_v7 = vld [vmem:[#allocation2 + $0x20] sm:$0xe]  ;;  %3263 = vrot.lane.b32.xlu0 %v9742_v30, %s11432_s22  ;;  %v9767_v24 = vcombine.low %v2743_v16, %v2747_v47 }
 0x94f   : > { %16460 = vst [vmem:[#allocation65_spill] sm:$0xff] %v12486_v35  ;;  %v2310_v17 = vld [vmem:[#allocation2 + $0x28] sm:$0xe]  ;;  %v12497_v34 = vld [vmem:[#allocation2 + $0x64] sm:$0x1]  ;;  %v9683_v15 = vrot.slane %v2311_v43, 9  ;;  %3261 = vrot.lane.b32.xlu1 %v9741_v4, %s11432_s22  ;;  %3769 = vmatpush1.bf16.msra.mxu0 %v10841_v55 }
 0x950   : > { %v2382_v45 = vrot.slane %v12470_v22, 5  ;;  %v9684_v6 = vrot.slane %v2312_v40, 9  ;;  %v2684_v29 = vld [vmem:[#allocation2 + $0x58] sm:$0xe]  ;;  %v12502_v28 = vld [vmem:[#allocation2 + $0x3c] sm:$0x1]  ;;  %v2739_v39 = vsel %vm12289_vm3, %v9696_v25, %v2738_v23  ;;  %3770 = vmatprep.subr.bf16.mxu0 %v16456_v21 }
 0x951   : > { %v2682_v57 = vld [vmem:[#allocation2 + $0x38] sm:$0xe]  ;;  %v2386_v63 = vrot.slane %v12472_v58, 5  ;;  %v9681_v54 = vrot.slane %v2309_v7, 9  ;;  %v2374_v0 = vrot.slane %v12482_v12, 5  ;;  %v9766_v47 = vcombine.low %v2735_v26, %v2739_v39 }
 0x952   : > { %v2685_v30 = vld [vmem:[#allocation2 + $0x60] sm:$0xe]  ;;  %v12509_v16 = vld [vmem:[#allocation2 + $0x44] sm:$0x1]  ;;  %v2383_v40 = vsel %vm12289_vm3, %v9683_v15, %v2382_v45  ;;  %v9682_v22 = vrot.slane %v2310_v17, 9  ;;  %v2378_v50 = vrot.slane %v12484_v37, 5  ;;  %3401 = vrot.lane.b32.xlu0 %v9767_v24, %s11431_s18 }
 0x953   : > { %v2683_v43 = vld [vmem:[#allocation2 + $0x40] sm:$0xe]  ;;  %v12514_v4 = vld [vmem:[#allocation2 + $0x5c] sm:$0x1]  ;;  %v2314_v33 = vld [vmem:[#allocation2 + $0x58] sm:$0xe]  ;;  %v2387_v23 = vsel %vm12289_vm3, %v9684_v6, %v2386_v63  ;;  %v2375_v26 = vsel %vm12289_vm3, %v9681_v54, %v2374_v0  ;;  %3399 = vrot.lane.b32.xlu1 %v9766_v47, %s11431_s18 }
 0x954   : > { %v10842_v25 = vld [vmem:[%s16452_s4 + $0x18] sm:$0xff]   ;;  %v9701_v7 = vrot.slane %v2684_v29, 9  ;;  %v2758_v15 = vrot.slane %v12486_v35, 5  ;;  %v12524_v17 = vld [vmem:[#allocation2 + $0x64] sm:$0x1]  ;;  %v16461_v55 = vshrl.u32 %v12358_v18, 16  ;;  %v2379_v6 = vsel %vm12289_vm3, %v9682_v22, %v2378_v50 }
 0x955   : > { %v12526_v45 = vld [vmem:[#allocation2 + $0x6c] sm:$0x1]  ;;  %v9702_v63 = vrot.slane %v2685_v30, 9  ;;  %v2762_v0 = vrot.slane %v12497_v34, 5  ;;  %v2315_v54 = vld [vmem:[#allocation2 + $0x60] sm:$0xe]  ;;  %v9744_v29 = vcombine.low %v2383_v40, %v2387_v23  ;;  %v9743_v35 = vcombine.low %v2375_v26, %v2379_v6  ;;  %3771 = vmatpush1.bf16.msra.mxu0 %v10842_v25 }
 0x956   : > { %v12531_v39 = vrot.slane %v16461_v55, 4  ;;  %v9699_v58 = vrot.slane %v2682_v57, 9  ;;  %v2750_v5 = vrot.slane %v12502_v28, 5  ;;  %v2316_v37 = vld [vmem:[#allocation2 + $0x68] sm:$0xe]  ;;  %v2759_v24 = vsel %vm12289_vm3, %v9701_v7, %v2758_v15  ;;  %v10843_v57 = vld [vmem:[%s16452_s4 + $0x20] sm:$0xff]   ;;  %3772 = vmatprep.subr.bf16.mxu0 %v16456_v21 }
 0x957   : > { %v12539_v19 = vld [vmem:[#allocation2 + $0x6c] sm:$0x1]  ;;  %v2763_v50 = vsel %vm12289_vm3, %v9702_v63, %v2762_v0  ;;  %v9700_v22 = vrot.slane %v2683_v43, 9  ;;  %v2754_v30 = vrot.slane %v12509_v16, 5  ;;  %v12546_v55 = vld [vmem:[#allocation2 + $0x74] sm:$0x1]  ;;  %3267 = vrot.lane.b32.xlu0 %v9744_v29, %s11432_s22  ;;  %3265 = vrot.lane.b32.xlu1 %v9743_v35, %s11432_s22 }
 0x958   : > { %16462 = vst [vmem:[#allocation66_spill] sm:$0xff] %v12531_v39  ;;  %16463 = vst [vmem:[#allocation67_spill] sm:$0xff] %v12539_v19  ;;  %v2686_v47 = vld [vmem:[#allocation2 + $0x68] sm:$0xe]  ;;  %v2751_v40 = vsel %vm12289_vm3, %v9699_v58, %v2750_v5  ;;  %v9686_v23 = vrot.slane %v2314_v33, 9  ;;  %v2394_v26 = vrot.slane %v12514_v4, 5  ;;  %v9769_v39 = vcombine.low %v2759_v24, %v2763_v50 }
 0x959   : > { %v9687_v7 = vrot.slane %v2315_v54, 9  ;;  %v2687_v15 = vld [vmem:[#allocation2 + $0x70] sm:$0xe]  ;;  %v2755_v43 = vsel %vm12289_vm3, %v9700_v22, %v2754_v30  ;;  %v2398_v25 = vrot.slane %v12524_v17, 5  ;;  %v9688_v6 = vrot.slane %v2316_v37, 9  ;;  %3773 = vmatpush1.bf16.msra.mxu0 %v10843_v57 }
 0x95a   : > { %v2402_v63 = vrot.slane %v12526_v45, 5  ;;  %v2047_v0 = vld [vmem:[#allocation2 + $0x8] sm:$0xf]  ;;  %v16464_v5 = vshll.u32 %v12358_v18, 16  ;;  %v2607_v58 = vshrl.u32 %v12397_v13, 16  ;;  %v9703_v54 = vrot.slane %v2686_v47, 9  ;;  %3774 = vmatprep.subr.bf16.mxu0 %v16456_v21 }
 0x95b   : > { %v2766_v29 = vrot.slane %v12539_v19, 5  ;;  %v2399_v22 = vsel %vm12289_vm3, %v9687_v7, %v2398_v25  ;;  %v9704_v30 = vrot.slane %v2687_v15, 9  ;;  %v10844_v18 = vld [vmem:[%s16452_s4 + $0x28] sm:$0xff]   ;;  %v2395_v35 = vsel %vm12289_vm3, %v9686_v23, %v2394_v26  ;;  %3405 = vrot.lane.b32.xlu0 %v9769_v39, %s11431_s18 }
 0x95c   : > { %v12562_v33 = vrot.slane %v16464_v5, 5  ;;  %v2403_v37 = vsel %vm12289_vm3, %v9688_v6, %v2402_v63  ;;  %v9768_v5 = vcombine.low %v2751_v40, %v2755_v43  ;;  %v2770_v47 = vrot.slane %v12546_v55, 5 }
 0x95d   : > { %v2096_v19 = vshrl.u32 %v2047_v0, 16  ;;  %v9746_v24 = vcombine.low %v2399_v22, %v2403_v37  ;;  %v2099_v50 = vshll.u32 %v2047_v0, 16  ;;  %v2459_v57 = vor.u32 %v12319_v2, %v12317_v62  ;;  %v12591_v2 = vld [vmem:[#allocation2 + $0x70] sm:$0xf]  ;;  %3775 = vmatpush1.bf16.msra.mxu0 %v10844_v18  ;;  %v2049_v18 = vld [vmem:[#allocation2 + $0x18] sm:$0xf] }
 0x95e   : > { %v2462_v7 = vshll.u32 %v12360_v42, 16  ;;  %3403 = vrot.lane.b32.xlu1 %v9768_v5, %s11431_s18  ;;  %v2767_v40 = vsel %vm12289_vm3, %v9703_v54, %v2766_v29  ;;  %v2473_v26 = vor.u32 %v12306_v56, %v12298_v11  ;;  %v2476_v15 = vshll.u32 %v12374_v61, 16  ;;  %v10845_v42 = vld [vmem:[%s16452_s4 + $0x30] sm:$0xff]   ;;  %v12597_v61 = vld [vmem:[#allocation2 + $0x78] sm:$0xf]  ;;  %3776 = vmatprep.subr.bf16.mxu0 %v16456_v21 }
 0x95f   : > { %v2098_v23 = vrot.slane %v2096_v19, 4  ;;  %v2771_v39 = vsel %vm12289_vm3, %v9704_v30, %v2770_v47  ;;  %v2101_v43 = vrot.slane %v2099_v50, 5  ;;  %v2105_v25 = vshll.u32 %v12410_v1, 16  ;;  %3271 = vrot.lane.b32.xlu0 %v9746_v24, %s11432_s22  ;;  %v2048_v29 = vld [vmem:[#allocation2 + $0x10] sm:$0xf] }
 0x960   : > { %v2460_v62 = vrot.slane %v2459_v57, 4  ;;  %v9745_v19 = vcombine.low %v12447_v38, %v2395_v35  ;;  %v2464_v6 = vrot.slane %v2462_v7, 5  ;;  %v2474_v11 = vrot.slane %v2473_v26, 4 }
 0x961   : > { %v2478_v56 = vrot.slane %v2476_v15, 5  ;;  %v2610_v63 = vshll.u32 %v12397_v13, 16  ;;  %v2593_v1 = vshrl.u32 %v12395_v36, 16  ;;  %v2596_v0 = vshll.u32 %v12395_v36, 16  ;;  %3777 = vmatpush1.bf16.msra.mxu0 %v10845_v42 }
 0x962   : > { %v2102_v54 = vor.u32 %v2101_v43, %v2098_v23  ;;  %v12604_v22 = vrot.slane %v2607_v58, 4  ;;  %3269 = vrot.lane.b32.xlu1 %v9745_v19, %s11432_s22  ;;  %v9770_v38 = vcombine.low %v2767_v40, %v2771_v39  ;;  %v2465_v37 = vsel %vm12416_vm6, %v2460_v62, %v2464_v6  ;;  %v10847_v58 = vld [vmem:[%s16452_s4 + $0x38] sm:$0xff]   ;;  %3778 = vmatprep.subr.bf16.mxu0 %v16456_v21 }
 0x963   : > { %v2479_v30 = vsel %vm12416_vm6, %v2474_v11, %v2478_v56  ;;  %v2107_v35 = vrot.slane %v2105_v25, 5  ;;  %v2962_v47 = vshrl.u32 %v12591_v2, 16  ;;  %v9778_v24 = vcombine.low %v12591_v2, %v12597_v61 }
 0x964   : > { %v2103_v5 = vrot.slane %v2102_v54, 4  ;;  %v9757_v50 = vcombine.low %v2465_v37, %v2479_v30  ;;  %v2110_v57 = vshrl.u32 %v2048_v29, 16  ;;  %v2113_v7 = vshll.u32 %v2048_v29, 16  ;;  %v12642_v30 = vld [vmem:[#allocation2 + $0x74] sm:$0x1] }
 0x965   : > { %v2119_v40 = vshll.u32 %v12388_v8, 16  ;;  %v2124_v26 = vshrl.u32 %v2049_v18, 16  ;;  %v2127_v15 = vshll.u32 %v2049_v18, 16  ;;  %v2133_v39 = vshll.u32 %v12401_v31, 16  ;;  %3779 = vmatpush1.bf16.msra.mxu0 %v10847_v58  ;;  %v10848_v31 = vld [vmem:[%s16452_s4 + $0x40] sm:$0xff]  }
 0x966   : > { %v2108_v23 = vsel %vm12416_vm6, %v2103_v5, %v2107_v35  ;;  %3407 = vrot.lane.b32.xlu1 %v9770_v38, %s11431_s18  ;;  %v16465_v43 = vsel %vm12416_vm6, %v12053_v44, %v12257_v52  ;;  %v2112_v62 = vrot.slane %v2110_v57, 4  ;;  %v2115_v42 = vrot.slane %v2113_v7, 5  ;;  %3780 = vmatprep.subr.bf16.mxu0 %v16456_v21 }
 0x967   : > { %v9733_v25 = vcombine.low %v16465_v43, %v2108_v23  ;;  %v2121_v8 = vrot.slane %v2119_v40, 5  ;;  %v2126_v19 = vrot.slane %v2124_v26, 4  ;;  %v2129_v6 = vrot.slane %v2127_v15, 5  ;;  %v2318_v40 = vld [vmem:[#allocation2 + $0x78] sm:$0xe] }
 0x968   : > { %v2135_v11 = vrot.slane %v2133_v39, 5  ;;  %v2828_v56 = vor.u32 %v12284_v27, %v12282_v14  ;;  %v2116_v54 = vor.u32 %v2115_v42, %v2112_v62  ;;  %v2831_v44 = vshll.u32 %v12273_v59, 16  ;;  %v2050_v23 = vld [vmem:[#allocation2 + $0x20] sm:$0xf]  ;;  %v2051_v15 = vld [vmem:[#allocation2 + $0x28] sm:$0xf] }
 0x969   : > { %3221 = vrot.lane.b32.xlu0 %v9733_v25, %s11433_s15  ;;  %v2842_v52 = vor.u32 %v12296_v41, %v12294_v9  ;;  %v2845_v29 = vshll.u32 %v12279_v10, 16  ;;  %v2130_v38 = vor.u32 %v2129_v6, %v2126_v19  ;;  %v2487_v27 = vor.u32 %v12324_v3, %v12322_v53  ;;  %v12645_v41 = vld [vmem:[#allocation2 + $0x7c] sm:$0x1]  ;;  %v2317_v53 = vld [vmem:[#allocation2 + $0x70] sm:$0xe]  ;;  %3781 = vmatpush1.bf16.msra.mxu0 %v10848_v31 }
 0x96a   : > { %v2829_v14 = vrot.slane %v2828_v56, 4  ;;  %v2490_v37 = vshll.u32 %v12439_v49, 16  ;;  %3357 = vrot.lane.b32.xlu1 %v9757_v50, %s11434_s6  ;;  %v2117_v59 = vrot.slane %v2116_v54, 4  ;;  %v2833_v18 = vrot.slane %v2831_v44, 5  ;;  %v12670_v54 = vld [vmem:[#allocation2 + $0x24] sm:$0x1] }
 0x96b   : > { %v2843_v5 = vrot.slane %v2842_v52, 4  ;;  %v2847_v9 = vrot.slane %v2845_v29, 5  ;;  %v2131_v10 = vrot.slane %v2130_v38, 4  ;;  %v2488_v35 = vrot.slane %v2487_v27, 4 }
 0x96c   : > { %v2492_v58 = vrot.slane %v2490_v37, 5  ;;  %v2501_v57 = vor.u32 %v12329_v48, %v12327_v60  ;;  %v2122_v3 = vsel %vm12416_vm6, %v2117_v59, %v2121_v8  ;;  %v2834_v49 = vsel %vm12416_vm6, %v2829_v14, %v2833_v18  ;;  %v12675_v14 = vld [vmem:[#allocation2 + $0x2c] sm:$0x1] }
 0x96d   : > { %3463 = vrot.lane.b32.xlu0 %v9778_v24, %s11429_s17  ;;  %v2848_v50 = vsel %vm12416_vm6, %v2843_v5, %v2847_v9  ;;  %v2504_v7 = vshll.u32 %v12453_v46, 16  ;;  %v2136_v60 = vsel %vm12416_vm6, %v2131_v10, %v2135_v11  ;;  %v9689_v25 = vrot.slane %v2317_v53, 9  ;;  %v16466_v10 = vld [vmem:[#allocation37_spill] sm:$0xff] }
 0x96e   : > { %v9781_v48 = vcombine.low %v2834_v49, %v2848_v50  ;;  %v2493_v24 = vsel %vm12416_vm6, %v2488_v35, %v2492_v58  ;;  %v2502_v26 = vrot.slane %v2501_v57, 4  ;;  %v9734_v39 = vcombine.low %v2122_v3, %v2136_v60  ;;  %v16468_v3 = vld [vmem:[#allocation38_spill] sm:$0xff]  ;;  %v16469_v49 = vld [vmem:[#allocation39_spill] sm:$0xff] }
 0x96f   : > { %v2506_v43 = vrot.slane %v2504_v7, 5  ;;  %v2406_v62 = vrot.slane %v12642_v30, 5  ;;  %v9690_v42 = vrot.slane %v2318_v40, 9  ;;  %v2410_v8 = vrot.slane %v12645_v41, 5 }
 0x970   : > { %v2138_v46 = vshrl.u32 %v2050_v23, 16  ;;  %v2141_v19 = vshll.u32 %v2050_v23, 16  ;;  %v2965_v6 = vshll.u32 %v12591_v2, 16  ;;  %3223 = vrot.lane.b32.xlu1 %v9734_v39, %s11433_s15  ;;  %v2152_v31 = vshrl.u32 %v2051_v15, 16  ;;  %v12725_v2 = vld [vmem:[#allocation2 + $0x3c] sm:$0x1] }
 0x971   : > { %3493 = vrot.lane.b32.xlu0 %v9781_v48, %s11435_s27  ;;  %v2507_v11 = vsel %vm12416_vm6, %v2502_v26, %v2506_v43  ;;  %v2407_v56 = vsel %vm12289_vm3, %v9689_v25, %v2406_v62  ;;  %v2411_v44 = vsel %vm12289_vm3, %v9690_v42, %v2410_v8  ;;  %v2147_v38 = vshll.u32 %v12482_v12, 16  ;;  %v16467_v12 = vld [vmem:[#allocation64_spill] sm:$0xff] }
 0x972   : > { %v2140_v52 = vrot.slane %v2138_v46, 4  ;;  %v2143_v29 = vrot.slane %v2141_v19, 5  ;;  %v9758_v27 = vcombine.low %v2493_v24, %v2507_v11  ;;  %v9747_v37 = vcombine.low %v2407_v56, %v2411_v44  ;;  %v12716_v19 = vld [vmem:[#allocation2 + $0x34] sm:$0x1] }
 0x973   : > { %v2154_v59 = vrot.slane %v2152_v31, 4  ;;  %v2155_v18 = vshll.u32 %v2051_v15, 16  ;;  %v2976_v5 = vshrl.u32 %v12597_v61, 16  ;;  %v2856_v35 = vor.u32 %v16466_v10, %v12331_v20  ;;  %v16470_v31 = vld [vmem:[#allocation42_spill] sm:$0xff]  ;;  %v16471_v44 = vld [vmem:[#allocation43_spill] sm:$0xff] }
 0x974   : > { %v2144_v9 = vor.u32 %v2143_v29, %v2140_v52  ;;  %v2859_v58 = vshll.u32 %v12670_v54, 16  ;;  %3273 = vrot.lane.b32.xlu1 %v9747_v37, %s11432_s22  ;;  %v2161_v53 = vshll.u32 %v16467_v12, 16  ;;  %v2870_v50 = vor.u32 %v16469_v49, %v16468_v3  ;;  %v16472_v29 = vld [vmem:[#allocation57_spill] sm:$0xff] }
 0x975   : > { %3359 = vrot.lane.b32.xlu0 %v9758_v27, %s11434_s6  ;;  %v2157_v57 = vrot.slane %v2155_v18, 5  ;;  %v2873_v7 = vshll.u32 %v12675_v14, 16  ;;  %v2979_v40 = vshll.u32 %v12597_v61, 16  ;;  %v2857_v60 = vrot.slane %v2856_v35, 4  ;;  %v16473_v27 = vld [vmem:[#allocation40_spill] sm:$0xff]  ;;  %v16474_v37 = vld [vmem:[#allocation41_spill] sm:$0xff] }
 0x976   : > { %v2145_v23 = vrot.slane %v2144_v9, 4  ;;  %v2861_v48 = vrot.slane %v2859_v58, 5  ;;  %v2149_v20 = vrot.slane %v2147_v38, 5  ;;  %v2871_v26 = vrot.slane %v2870_v50, 4  ;;  %v16475_v18 = vld [vmem:[#allocation60_spill] sm:$0xff]  ;;  %v16476_v58 = vld [vmem:[#allocation45_spill] sm:$0xff] }
 0x977   : > { %v2158_v24 = vor.u32 %v2157_v57, %v2154_v59  ;;  %v2875_v15 = vrot.slane %v2873_v7, 5  ;;  %v12690_v39 = vrot.slane %v2610_v63, 5  ;;  %v12694_v43 = vrot.slane %v2593_v1, 4  ;;  %v12706_v63 = vld [vmem:[#allocation2 + $0x80] sm:$0xf]  ;;  %v16477_v57 = vld [vmem:[#allocation46_spill] sm:$0xff] }
 0x978   : > { %v12698_v25 = vrot.slane %v2596_v0, 5  ;;  %v2862_v61 = vsel %vm12416_vm6, %v2857_v60, %v2861_v48  ;;  %v2150_v62 = vsel %vm12416_vm6, %v2145_v23, %v2149_v20  ;;  %v2163_v8 = vrot.slane %v2161_v53, 5  ;;  %v12732_v9 = vld [vmem:[#allocation2 + $0x78] sm:$0xf]  ;;  %v16478_v50 = vld [vmem:[#allocation35_spill] sm:$0xff] }
 0x979   : > { %v2159_v42 = vrot.slane %v2158_v24, 4  ;;  %v2876_v13 = vsel %vm12416_vm6, %v2871_v26, %v2875_v15  ;;  %v12710_v1 = vrot.slane %v2962_v47, 4  ;;  %v12712_v36 = vrot.slane %v2965_v6, 5  ;;  %v16479_v7 = vld [vmem:[#allocation44_spill] sm:$0xff]  ;;  %v12741_v60 = vld [vmem:[#allocation2 + $0x30] sm:$0xf] }
 0x97a   : > { %v12714_v0 = vrot.slane %v2976_v5, 4  ;;  %v9782_v46 = vcombine.low %v2862_v61, %v2876_v13  ;;  %v12718_v11 = vrot.slane %v2979_v40, 5  ;;  %v2515_v52 = vor.u32 %v16471_v44, %v16470_v31  ;;  %v12746_v15 = vld [vmem:[#allocation2 + $0x38] sm:$0xf] }
 0x97b   : > { %v2164_v56 = vsel %vm12416_vm6, %v2159_v42, %v2163_v8  ;;  %v2518_v38 = vshll.u32 %v16472_v29, 16  ;;  %v2635_v6 = vshrl.u32 %v12706_v63, 16  ;;  %v2529_v59 = vor.u32 %v16474_v37, %v16473_v27 }
 0x97c   : > { %v9735_v47 = vcombine.low %v2150_v62, %v2164_v56  ;;  %3495 = vrot.lane.b32.xlu1 %v9782_v46, %s11435_s27  ;;  %v2532_v5 = vshll.u32 %v16475_v18, 16  ;;  %v2516_v10 = vrot.slane %v2515_v52, 4  ;;  %v2884_v12 = vor.u32 %v16477_v57, %v16476_v58  ;;  %v16480_v52 = vld [vmem:[#allocation62_spill] sm:$0xff]  ;;  %v16481_v18 = vld [vmem:[#allocation63_spill] sm:$0xff] }
 0x97d   : > { %v2520_v35 = vrot.slane %v2518_v38, 5  ;;  %v2887_v53 = vshll.u32 %v12716_v19, 16  ;;  %v2530_v3 = vrot.slane %v2529_v59, 4  ;;  %v2898_v40 = vor.u32 %v16479_v7, %v16478_v50  ;;  %v16482_v57 = vld [vmem:[#allocation51_spill] sm:$0xff] }
 0x97e   : > { %3225 = vrot.lane.b32.xlu0 %v9735_v47, %s11433_s15  ;;  %v2534_v49 = vrot.slane %v2532_v5, 5  ;;  %v2901_v23 = vshll.u32 %v12725_v2, 16  ;;  %v2638_v48 = vshll.u32 %v12706_v63, 16  ;;  %v2885_v24 = vrot.slane %v2884_v12, 4  ;;  %v16483_v12 = vld [vmem:[#allocation52_spill] sm:$0xff] }
 0x97f   : > { %v2521_v20 = vsel %vm12416_vm6, %v2516_v10, %v2520_v35  ;;  %v2889_v26 = vrot.slane %v2887_v53, 5  ;;  %v9755_v61 = vcombine.low %v12732_v9, %v12706_v63  ;;  %v2899_v42 = vrot.slane %v2898_v40, 4  ;;  %v16484_v40 = vld [vmem:[#allocation49_spill] sm:$0xff] }
 0x980   : > { %v2535_v62 = vsel %vm12416_vm6, %v2530_v3, %v2534_v49  ;;  %v2903_v8 = vrot.slane %v2901_v23, 5  ;;  %v2166_v56 = vshrl.u32 %v12741_v60, 16  ;;  %v2169_v31 = vshll.u32 %v12741_v60, 16  ;;  %v12766_v3 = vld [vmem:[#allocation2 + $0x44] sm:$0x1]  ;;  %v16485_v23 = vld [vmem:[#allocation50_spill] sm:$0xff] }
 0x981   : > { %v9759_v13 = vcombine.low %v2521_v20, %v2535_v62  ;;  %v2890_v46 = vsel %vm12416_vm6, %v2885_v24, %v2889_v26  ;;  %v2175_v29 = vshll.u32 %v16480_v52, 16  ;;  %v2180_v38 = vshrl.u32 %v12746_v15, 16  ;;  %v16486_v62 = vld [vmem:[#allocation47_spill] sm:$0xff] }
 0x982   : > { %3329 = vrot.lane.b32.xlu0 %v9755_v61, %s11430_s12  ;;  %v2904_v44 = vsel %vm12416_vm6, %v2899_v42, %v2903_v8  ;;  %v2183_v47 = vshll.u32 %v12746_v15, 16  ;;  %v2168_v37 = vrot.slane %v2166_v56, 4  ;;  %v2171_v59 = vrot.slane %v2169_v31, 5  ;;  %v16487_v42 = vld [vmem:[#allocation48_spill] sm:$0xff] }
 0x983   : > { %3361 = vrot.lane.b32.xlu1 %v9759_v13, %s11434_s6  ;;  %v9783_v27 = vcombine.low %v2890_v46, %v2904_v44  ;;  %v2189_v5 = vshll.u32 %v16481_v18, 16  ;;  %v2177_v10 = vrot.slane %v2175_v29, 5  ;;  %v2182_v35 = vrot.slane %v2180_v38, 4  ;;  %v16488_v38 = vld [vmem:[#allocation31_spill] sm:$0xff] }
 0x984   : > { %v2185_v58 = vrot.slane %v2183_v47, 5  ;;  %v2543_v53 = vor.u32 %v16483_v12, %v16482_v57  ;;  %v2172_v49 = vor.u32 %v2171_v59, %v2168_v37  ;;  %v2546_v7 = vshll.u32 %v12502_v28, 16  ;;  %v12776_v28 = vld [vmem:[#allocation2 + $0x4c] sm:$0x1]  ;;  %v16489_v47 = vld [vmem:[#allocation32_spill] sm:$0xff] }
 0x985   : > { %v2191_v50 = vrot.slane %v2189_v5, 5  ;;  %v2557_v20 = vor.u32 %v16485_v23, %v16484_v40  ;;  %v2560_v61 = vshll.u32 %v12509_v16, 16  ;;  %v2912_v8 = vor.u32 %v16487_v42, %v16486_v62  ;;  %v12786_v5 = vld [vmem:[#allocation2 + $0x50] sm:$0xf] }
 0x986   : > { %3497 = vrot.lane.b32.xlu0 %v9783_v27, %s11435_s27  ;;  %v2186_v24 = vor.u32 %v2185_v58, %v2182_v35  ;;  %v2544_v26 = vrot.slane %v2543_v53, 4  ;;  %v2173_v13 = vrot.slane %v2172_v49, 4  ;;  %v2548_v46 = vrot.slane %v2546_v7, 5  ;;  %v12792_v53 = vld [vmem:[#allocation2 + $0x58] sm:$0xf] }
 0x987   : > { %v2558_v56 = vrot.slane %v2557_v20, 4  ;;  %v2915_v31 = vshll.u32 %v12766_v3, 16  ;;  %v2562_v52 = vrot.slane %v2560_v61, 5  ;;  %v2913_v29 = vrot.slane %v2912_v8, 4  ;;  %v12806_v8 = vld [vmem:[#allocation2 + $0x80] sm:$0xf] }
 0x988   : > { %v2187_v44 = vrot.slane %v2186_v24, 4  ;;  %v2926_v27 = vor.u32 %v16489_v47, %v16488_v38  ;;  %v2621_v37 = vshrl.u32 %v12732_v9, 16  ;;  %v2178_v16 = vsel %vm12416_vm6, %v2173_v13, %v2177_v10  ;;  %v12808_v13 = vld [vmem:[#allocation2 + $0x7c] sm:$0x1] }
 0x989   : > { %v2549_v59 = vsel %vm12416_vm6, %v2544_v26, %v2548_v46  ;;  %v2929_v18 = vshll.u32 %v12776_v28, 16  ;;  %v2563_v58 = vsel %vm12416_vm6, %v2558_v56, %v2562_v52  ;;  %v2917_v57 = vrot.slane %v2915_v31, 5  ;;  %v12812_v52 = vld [vmem:[#allocation2 + $0x88] sm:$0xf] }
 0x98a   : > { %v2192_v35 = vsel %vm12416_vm6, %v2187_v44, %v2191_v50  ;;  %v2927_v12 = vrot.slane %v2926_v27, 4  ;;  %v2624_v49 = vshll.u32 %v12732_v9, 16  ;;  %v9760_v7 = vcombine.low %v2549_v59, %v2563_v58  ;;  %v11061_v50 = vld [vmem:[#allocation2 + $0x54] sm:$0x1] }
 0x98b   : > { %v9736_v10 = vcombine.low %v2178_v16, %v2192_v35  ;;  %v2931_v40 = vrot.slane %v2929_v18, 5  ;;  %v2918_v23 = vsel %vm12416_vm6, %v2913_v29, %v2917_v57  ;;  %v2194_v20 = vshrl.u32 %v12786_v5, 16  ;;  %v2688_v29 = vld [vmem:[#allocation2 + $0x78] sm:$0xe]  ;;  %v12818_v16 = vld [vmem:[#allocation2 + $0x84] sm:$0x1] }
 0x98c   : > { %v2197_v24 = vshll.u32 %v12786_v5, 16  ;;  %v2203_v26 = vshll.u32 %v11061_v50, 16  ;;  %3363 = vrot.lane.b32.xlu0 %v9760_v7, %s11434_s6  ;;  %v2208_v9 = vshrl.u32 %v12792_v53, 16  ;;  %v2211_v62 = vshll.u32 %v12792_v53, 16  ;;  %v2689_v57 = vld [vmem:[#allocation2 + $0x80] sm:$0xe] }
 0x98d   : > { %3227 = vrot.lane.b32.xlu1 %v9736_v10, %s11433_s15  ;;  %v2932_v61 = vsel %vm12416_vm6, %v2927_v12, %v2931_v40  ;;  %v2217_v42 = vshll.u32 %v12514_v4, 16  ;;  %v3103_v46 = vrot.slane %v12670_v54, 5  ;;  %v2196_v31 = vrot.slane %v2194_v20, 4 }
 0x98e   : > { %v2199_v44 = vrot.slane %v2197_v24, 5  ;;  %v12816_v38 = vrot.slane %v2635_v6, 4  ;;  %v9784_v47 = vcombine.low %v2918_v23, %v2932_v61  ;;  %v2210_v27 = vrot.slane %v2208_v9, 4  ;;  %v16490_v61 = vld [vmem:[#allocation55_spill] sm:$0xff]  ;;  %v16491_v9 = vld [vmem:[#allocation56_spill] sm:$0xff] }
 0x98f   : > { %v2213_v4 = vrot.slane %v2211_v62, 5  ;;  %v12822_v59 = vrot.slane %v2638_v48, 5  ;;  %v12824_v18 = vrot.slane %v2621_v37, 4  ;;  %v2205_v58 = vrot.slane %v2203_v26, 5 }
 0x990   : > { %v2200_v35 = vor.u32 %v2199_v44, %v2196_v31  ;;  %v12826_v12 = vrot.slane %v2624_v49, 5  ;;  %v2219_v10 = vrot.slane %v2217_v42, 5  ;;  %v9705_v7 = vrot.slane %v2688_v29, 9  ;;  %v16492_v42 = vld [vmem:[#allocation65_spill] sm:$0xff] }
 0x991   : > { %3499 = vrot.lane.b32.xlu1 %v9784_v47, %s11435_s27  ;;  %v2214_v6 = vor.u32 %v2213_v4, %v2210_v27  ;;  %v2990_v23 = vshrl.u32 %v12806_v8, 16  ;;  %v2993_v20 = vshll.u32 %v12806_v8, 16  ;;  %v2774_v63 = vrot.slane %v12808_v13, 5  ;;  %v12841_v44 = vld [vmem:[#allocation2 + $0x64] sm:$0x1]  ;;  %v16494_v4 = vld [vmem:[#allocation54_spill] sm:$0xff] }
 0x992   : > { %v2201_v40 = vrot.slane %v2200_v35, 4  ;;  %v9779_v37 = vcombine.low %v12806_v8, %v12812_v52  ;;  %v9706_v24 = vrot.slane %v2689_v57, 9  ;;  %v2778_v49 = vrot.slane %v12818_v16, 5  ;;  %v16493_v27 = vld [vmem:[#allocation53_spill] sm:$0xff]  ;;  %v12851_v57 = vld [vmem:[#allocation2 + $0x6c] sm:$0x1] }
 0x993   : > { %v2215_v48 = vrot.slane %v2214_v6, 4  ;;  %v3004_v26 = vshrl.u32 %v12812_v52, 16  ;;  %v2571_v62 = vor.u32 %v16491_v9, %v16490_v61  ;;  %v2574_v31 = vshll.u32 %v16492_v42, 16 }
 0x994   : > { %v2206_v50 = vsel %vm12416_vm6, %v2201_v40, %v2205_v58  ;;  %v2775_v47 = vsel %vm12289_vm3, %v9705_v7, %v2774_v63  ;;  %v2585_v35 = vor.u32 %v16494_v4, %v16493_v27  ;;  %v2588_v58 = vshll.u32 %v12497_v34, 16  ;;  %v12858_v63 = vld [vmem:[#allocation2 + $0x60] sm:$0xf] }
 0x995   : > { %v2220_v29 = vsel %vm12416_vm6, %v2215_v48, %v2219_v10  ;;  %3465 = vrot.lane.b32.xlu1 %v9779_v37, %s11429_s17  ;;  %v2779_v40 = vsel %vm12289_vm3, %v9706_v24, %v2778_v49  ;;  %v2572_v61 = vrot.slane %v2571_v62, 4  ;;  %v2576_v9 = vrot.slane %v2574_v31, 5  ;;  %v16495_v48 = vld [vmem:[#allocation59_spill] sm:$0xff]  ;;  %v16496_v37 = vld [vmem:[#allocation61_spill] sm:$0xff]  ;;  %v12868_v62 = vld [vmem:[#allocation2 + $0x68] sm:$0xf] }
 0x996   : > { %v9737_v6 = vcombine.low %v2206_v50, %v2220_v29  ;;  %v2586_v42 = vrot.slane %v2585_v35, 4  ;;  %v2590_v10 = vrot.slane %v2588_v58, 5  ;;  %v2940_v56 = vor.u32 %v16496_v37, %v16495_v48  ;;  %v16497_v29 = vld [vmem:[#allocation66_spill] sm:$0xff] }
 0x997   : > { %v2943_v7 = vshll.u32 %v12841_v44, 16  ;;  %v12861_v34 = vrot.slane %v2990_v23, 4  ;;  %v2577_v50 = vsel %vm12416_vm6, %v2572_v61, %v2576_v9  ;;  %v2954_v24 = vor.u32 %v12562_v33, %v16497_v29 }
 0x998   : > { %3229 = vrot.lane.b32.xlu0 %v9737_v6, %s11433_s15  ;;  %v2957_v49 = vshll.u32 %v12851_v57, 16  ;;  %v9771_v31 = vcombine.low %v2775_v47, %v2779_v40  ;;  %v2591_v27 = vsel %vm12416_vm6, %v2586_v42, %v2590_v10  ;;  %v2941_v4 = vrot.slane %v2940_v56, 4 }
 0x999   : > { %v2945_v35 = vrot.slane %v2943_v7, 5  ;;  %v9761_v58 = vcombine.low %v2577_v50, %v2591_v27  ;;  %v2955_v6 = vrot.slane %v2954_v24, 4  ;;  %v2222_v48 = vshrl.u32 %v12858_v63, 16  ;;  %v16498_v27 = vld [vmem:[#allocation67_spill] sm:$0xff] }
 0x99a   : > { %v2959_v23 = vrot.slane %v2957_v49, 5  ;;  %v2225_v33 = vshll.u32 %v12858_v63, 16  ;;  %v2231_v9 = vshll.u32 %v12524_v17, 16  ;;  %v2236_v37 = vshrl.u32 %v12868_v62, 16  ;;  %v12885_v17 = vld [vmem:[#allocation2 + $0x74] sm:$0x1] }
 0x99b   : > { %v2946_v61 = vsel %vm12416_vm6, %v2941_v4, %v2945_v35  ;;  %v3007_v47 = vshll.u32 %v12812_v52, 16  ;;  %3365 = vrot.lane.b32.xlu1 %v9761_v58, %s11434_s6  ;;  %v2224_v40 = vrot.slane %v2222_v48, 4  ;;  %v2239_v42 = vshll.u32 %v12868_v62, 16 }
 0x99c   : > { %3409 = vrot.lane.b32.xlu0 %v9771_v31, %s11431_s18  ;;  %v2960_v56 = vsel %vm12416_vm6, %v2955_v6, %v2959_v23  ;;  %v2227_v7 = vrot.slane %v2225_v33, 5  ;;  %v2238_v50 = vrot.slane %v2236_v37, 4  ;;  %v2245_v29 = vshll.u32 %v12526_v45, 16  ;;  %v12896_v33 = vld [vmem:[#allocation2 + $0x7c] sm:$0x1] }
 0x99d   : > { %v9785_v10 = vcombine.low %v2946_v61, %v2960_v56  ;;  %v2233_v24 = vrot.slane %v2231_v9, 5  ;;  %v2241_v49 = vrot.slane %v2239_v42, 5  ;;  %v2599_v31 = vor.u32 %v12698_v25, %v12694_v43 }
 0x99e   : > { %v2602_v4 = vshll.u32 %v16498_v27, 16  ;;  %v2228_v35 = vor.u32 %v2227_v7, %v2224_v40  ;;  %v2613_v58 = vor.u32 %v12690_v39, %v12604_v22  ;;  %v2616_v6 = vshll.u32 %v12546_v55, 16 }
 0x99f   : > { %v2968_v23 = vor.u32 %v12712_v36, %v12710_v1  ;;  %v2242_v45 = vor.u32 %v2241_v49, %v2238_v50  ;;  %v2600_v48 = vrot.slane %v2599_v31, 4  ;;  %v2971_v43 = vshll.u32 %v12885_v17, 16  ;;  %v12903_v1 = vld [vmem:[#allocation2 + $0x70] sm:$0xf]  ;;  %v12910_v50 = vld [vmem:[#allocation2 + $0x78] sm:$0xf] }
 0x9a0   : > { %3501 = vrot.lane.b32.xlu0 %v9785_v10, %s11435_s27  ;;  %v2604_v61 = vrot.slane %v2602_v4, 5  ;;  %v2229_v25 = vrot.slane %v2228_v35, 4  ;;  %v2614_v9 = vrot.slane %v2613_v58, 4  ;;  %v2618_v37 = vrot.slane %v2616_v6, 5  ;;  %v2435_v31 = vld [vmem:[#allocation2 + $0x90] sm:$0xf] }
 0x9a1   : > { %v2969_v56 = vrot.slane %v2968_v23, 4  ;;  %v2243_v40 = vrot.slane %v2242_v45, 4  ;;  %v2247_v22 = vrot.slane %v2245_v29, 5  ;;  %v2982_v39 = vor.u32 %v12718_v11, %v12714_v0 }
 0x9a2   : > { %v2605_v55 = vsel %vm12416_vm6, %v2600_v48, %v2604_v61  ;;  %v2234_v36 = vsel %vm12416_vm6, %v2229_v25, %v2233_v24  ;;  %v2619_v42 = vsel %vm12416_vm6, %v2614_v9, %v2618_v37  ;;  %v2973_v10 = vrot.slane %v2971_v43, 5  ;;  %v2434_v61 = vld [vmem:[#allocation2 + $0x88] sm:$0xf] }
 0x9a3   : > { %v2985_v7 = vshll.u32 %v12896_v33, 16  ;;  %v12914_v29 = vrot.slane %v2993_v20, 5  ;;  %v2248_v0 = vsel %vm12416_vm6, %v2243_v40, %v2247_v22  ;;  %v9762_v11 = vcombine.low %v2605_v55, %v2619_v42 }
 0x9a4   : > { %v2983_v49 = vrot.slane %v2982_v39, 4  ;;  %v9738_v27 = vcombine.low %v2234_v36, %v2248_v0  ;;  %v2974_v24 = vsel %vm12416_vm6, %v2969_v56, %v2973_v10  ;;  %v2250_v35 = vshrl.u32 %v12903_v1, 16  ;;  %v12932_v56 = vpop.permute.xlu1 %3453  ;;  %v12934_v36 = vpop.permute.xlu0 %3317  ;;  %v12938_v0 = vld [vmem:[#allocation2 + $0x84] sm:$0x1] }
 0x9a5   : > { %v2987_v4 = vrot.slane %v2985_v7, 5  ;;  %3367 = vrot.lane.b32.xlu0 %v9762_v11, %s11434_s6  ;;  %v2253_v58 = vshll.u32 %v12903_v1, 16  ;;  %v2259_v8 = vshll.u32 %v12642_v30, 16  ;;  %v2264_v20 = vshrl.u32 %v12910_v50, 16 }
 0x9a6   : > { %v2267_v6 = vshll.u32 %v12910_v50, 16  ;;  %3231 = vrot.lane.b32.xlu1 %v9738_v27, %s11433_s15  ;;  %v2252_v45 = vrot.slane %v2250_v35, 4  ;;  %v2273_v48 = vshll.u32 %v12645_v41, 16  ;;  %v2663_v43 = vshrl.u32 %v2435_v31, 16  ;;  %v2319_v27 = vld [vmem:[#allocation2 + $0x80] sm:$0xe] }
 0x9a7   : > { %v2988_v23 = vsel %vm12416_vm6, %v2983_v49, %v2987_v4  ;;  %v3006_v25 = vrot.slane %v3004_v26, 4  ;;  %v3009_v9 = vrot.slane %v3007_v47, 5  ;;  %v2255_v37 = vrot.slane %v2253_v58, 5  ;;  %v12944_v49 = vld [vmem:[#allocation2 + $0x8c] sm:$0x1] }
 0x9a8   : > { %v2266_v30 = vrot.slane %v2264_v20, 4  ;;  %v9786_v40 = vcombine.low %v2974_v24, %v2988_v23  ;;  %v2261_v22 = vrot.slane %v2259_v8, 5  ;;  %v2269_v55 = vrot.slane %v2267_v6, 5  ;;  %v2320_v58 = vld [vmem:[#allocation2 + $0x88] sm:$0xe] }
 0x9a9   : > { %v2666_v39 = vshll.u32 %v2435_v31, 16  ;;  %v2256_v42 = vor.u32 %v2255_v37, %v2252_v45  ;;  %v2275_v10 = vrot.slane %v2273_v48, 5  ;;  %v12936_v7 = vrot.slane %v2663_v43, 4  ;;  %v12951_v45 = vld [vmem:[#allocation2 + $0x84] sm:$0x1] }
 0x9aa   : > { %v9756_v41 = vcombine.low %v2434_v61, %v2435_v31  ;;  %3503 = vrot.lane.b32.xlu1 %v9786_v40, %s11435_s27  ;;  %v2270_v52 = vor.u32 %v2269_v55, %v2266_v30  ;;  %v2649_v26 = vshrl.u32 %v2434_v61, 16  ;;  %v2627_v47 = vor.u32 %v12826_v12, %v12824_v18  ;;  %v12956_v43 = vld [vmem:[#allocation2 + $0x8c] sm:$0x1]  ;;  %v12965_v30 = vpop.permute.xlu0 %3455 }
 0x9ab   : > { %v2630_v11 = vshll.u32 %v12808_v13, 16  ;;  %v2257_v24 = vrot.slane %v2256_v42, 4  ;;  %v12946_v4 = vrot.slane %v2666_v39, 5  ;;  %v2652_v35 = vshll.u32 %v2434_v61, 16  ;;  %v12958_v61 = vpop.permute.xlu1 %3319 }
 0x9ac   : > { %v2641_v31 = vor.u32 %v12822_v59, %v12816_v38  ;;  %v2271_v8 = vrot.slane %v2270_v52, 4  ;;  %v2628_v20 = vrot.slane %v2627_v47, 4  ;;  %v2644_v23 = vshll.u32 %v12818_v16, 16  ;;  %v12976_v47 = vld [vmem:[#allocation2 + $0x80] sm:$0xf] }
 0x9ad   : > { %v2632_v6 = vrot.slane %v2630_v11, 5  ;;  %v2262_v13 = vsel %vm12416_vm6, %v2257_v24, %v2261_v22  ;;  %v9691_v12 = vrot.slane %v2319_v27, 9  ;;  %v2414_v48 = vrot.slane %v12938_v0, 5 }
 0x9ae   : > { %v2642_v18 = vrot.slane %v2641_v31, 4  ;;  %v2276_v38 = vsel %vm12416_vm6, %v2271_v8, %v2275_v10  ;;  %3331 = vrot.lane.b32.xlu1 %v9756_v41, %s11430_s12  ;;  %v2646_v59 = vrot.slane %v2644_v23, 5  ;;  %v9692_v37 = vrot.slane %v2320_v58, 9  ;;  %v12981_v58 = vld [vmem:[#allocation2 + $0x88] sm:$0xf]  ;;  %s16525_s12 = sld [smem:[#allocation75_spill]] }
 0x9af   : > { %v2633_v16 = vsel %vm12416_vm6, %v2628_v20, %v2632_v6  ;;  %v9739_v40 = vcombine.low %v2262_v13, %v2276_v38  ;;  %v2415_v22 = vsel %vm12289_vm3, %v9691_v12, %v2414_v48  ;;  %v2418_v55 = vrot.slane %v12944_v49, 5  ;;  %v12983_v6 = vpop.permute.xlu0 %3321  ;;  %v12989_v13 = vpop.permute.xlu1 %3457  ;;  %v2450_v38 = vld [vmem:[#allocation2 + $0x8c] sm:$0x1] }
 0x9b0   : > { %v2996_v39 = vor.u32 %v12914_v29, %v12861_v34  ;;  %v2647_v42 = vsel %vm12416_vm6, %v2642_v18, %v2646_v59  ;;  %v2999_v10 = vshll.u32 %v12951_v45, 16  ;;  %v3010_v41 = vor.u32 %v3009_v9, %v3006_v25 }
 0x9b1   : > { %v3013_v52 = vshll.u32 %v12956_v43, 16  ;;  %3233 = vrot.lane.b32.xlu0 %v9739_v40, %s11433_s15  ;;  %v2651_v11 = vrot.slane %v2649_v26, 4  ;;  %v9763_v27 = vcombine.low %v2633_v16, %v2647_v42  ;;  %v2419_v24 = vsel %vm12289_vm3, %v9692_v37, %v2418_v55  ;;  %v2451_v16 = vld [vmem:[#allocation2 + $0x94] sm:$0x1] }
 0x9b2   : > { %v2997_v31 = vrot.slane %v2996_v39, 4  ;;  %v2654_v34 = vrot.slane %v2652_v35, 5  ;;  %v3001_v29 = vrot.slane %v2999_v10, 5  ;;  %v3011_v8 = vrot.slane %v3010_v41, 4 }
 0x9b3   : > { %v3015_v20 = vrot.slane %v3013_v52, 5  ;;  %3369 = vrot.lane.b32.xlu1 %v9763_v27, %s11434_s6  ;;  %v9748_v25 = vcombine.low %v2415_v22, %v2419_v24  ;;  %v2278_v9 = vshrl.u32 %v12976_v47, 16  ;;  %v2281_v26 = vshll.u32 %v12976_v47, 16  ;;  %v2690_v22 = vld [vmem:[#allocation2 + $0x88] sm:$0xe]  ;;  %v12999_v41 = vpop.permute.xlu0 %3459 }
 0x9b4   : > { %v2287_v23 = vshll.u32 %v12938_v0, 16  ;;  %v3002_v18 = vsel %vm12416_vm6, %v2997_v31, %v3001_v29  ;;  %v2292_v12 = vshrl.u32 %v12981_v58, 16  ;;  %v2295_v48 = vshll.u32 %v12981_v58, 16  ;;  %v2691_v29 = vld [vmem:[#allocation2 + $0x90] sm:$0xe] }
 0x9b5   : > { %v3016_v35 = vsel %vm12416_vm6, %v3011_v8, %v3015_v20  ;;  %3275 = vrot.lane.b32.xlu0 %v9748_v25, %s11432_s22  ;;  %v2280_v37 = vrot.slane %v2278_v9, 4  ;;  %v2283_v40 = vrot.slane %v2281_v26, 5  ;;  %v2301_v42 = vshll.u32 %v12944_v49, 16  ;;  %v13003_v8 = vpop.permute.xlu1 %3323 }
 0x9b6   : > { %v9787_v59 = vcombine.low %v3002_v18, %v3016_v35  ;;  %v2289_v0 = vrot.slane %v2287_v23, 5  ;;  %v2294_v55 = vrot.slane %v2292_v12, 4  ;;  %v2297_v39 = vrot.slane %v2295_v48, 5  ;;  %v2803_v23 = vld [vmem:[#allocation2 + $0x90] sm:$0xf] }
 0x9b7   : > { %v2655_v10 = vor.u32 %v2654_v34, %v2651_v11  ;;  %v2284_v52 = vor.u32 %v2283_v40, %v2280_v37  ;;  %v2658_v27 = vshll.u32 %v2450_v38, 16  ;;  %v2669_v24 = vor.u32 %v12946_v4, %v12936_v7  ;;  %v13006_v7 = vpop.permute.xlu0 %3325 }
 0x9b8   : > { %v2672_v31 = vshll.u32 %v2451_v16, 16  ;;  %v2298_v20 = vor.u32 %v2297_v39, %v2294_v55  ;;  %v2303_v25 = vrot.slane %v2301_v42, 5  ;;  %v9707_v26 = vrot.slane %v2690_v22, 9 }
 0x9b9   : > { %v2656_v9 = vrot.slane %v2655_v10, 4  ;;  %3505 = vrot.lane.b32.xlu0 %v9787_v59, %s11435_s27  ;;  %v2285_v49 = vrot.slane %v2284_v52, 4  ;;  %v2660_v11 = vrot.slane %v2658_v27, 5  ;;  %v2670_v34 = vrot.slane %v2669_v24, 4  ;;  %v2804_v59 = vld [vmem:[#allocation2 + $0x98] sm:$0xf]  ;;  %v13014_v39 = vpop.permute.xlu1 %3461 }
 0x9ba   : > { %v2674_v18 = vrot.slane %v2672_v31, 5  ;;  %v2299_v35 = vrot.slane %v2298_v20, 4  ;;  %v2782_v12 = vrot.slane %v2450_v38, 5  ;;  %v9708_v48 = vrot.slane %v2691_v29, 9  ;;  %v13020_v52 = vld [vmem:[#allocation2 + $0x94] sm:$0x1] }
 0x9bb   : > { %v2786_v37 = vrot.slane %v2451_v16, 5  ;;  %v2290_v4 = vsel %vm12416_vm6, %v2285_v49, %v2289_v0  ;;  %v2661_v40 = vsel %vm12416_vm6, %v2656_v9, %v2660_v11  ;;  %v3018_v55 = vshrl.u32 %v2803_v23, 16  ;;  %v13028_v49 = vld [vmem:[#allocation2 + $0x9c] sm:$0x1] }
 0x9bc   : > { %v2675_v22 = vsel %vm12416_vm6, %v2670_v34, %v2674_v18  ;;  %v3111_v42 = vrot.slane %v12716_v19, 5  ;;  %v2304_v16 = vsel %vm12416_vm6, %v2299_v35, %v2303_v25  ;;  %v3021_v31 = vshll.u32 %v2803_v23, 16 }
 0x9bd   : > { %v9764_v10 = vcombine.low %v2661_v40, %v2675_v22  ;;  %v9740_v27 = vcombine.low %v2290_v4, %v2304_v16  ;;  %v3020_v24 = vrot.slane %v3018_v55, 4  ;;  %v2783_v29 = vsel %vm12289_vm3, %v9707_v26, %v2782_v12  ;;  %v13034_v35 = vpop.permute.xlu1 %3327  ;;  %v13036_v4 = vpop.permute.xlu0 %3397  ;;  %v3047_v40 = vld [vmem:[#allocation2 + $0x20] sm:$0xe] }
 0x9be   : > { %v2787_v19 = vsel %vm12289_vm3, %v9708_v48, %v2786_v37  ;;  %v3032_v20 = vshrl.u32 %v2804_v59, 16  ;;  %v3035_v9 = vshll.u32 %v2804_v59, 16  ;;  %v3023_v11 = vrot.slane %v3021_v31, 5  ;;  %v3049_v31 = vld [vmem:[#allocation2 + $0x30] sm:$0xe] }
 0x9bf   : > { %3371 = vrot.lane.b32.xlu0 %v9764_v10, %s11434_s6  ;;  %3235 = vrot.lane.b32.xlu1 %v9740_v27, %s11433_s15  ;;  %v3027_v34 = vshll.u32 %v13020_v52, 16  ;;  %v3041_v18 = vshll.u32 %v13028_v49, 16  ;;  %v3127_v26 = vrot.slane %v12841_v44, 5  ;;  %v9780_v37 = vcombine.low %v2803_v23, %v2804_v59  ;;  %v3048_v27 = vld [vmem:[#allocation2 + $0x28] sm:$0xe]  ;;  %s16905_s15 = sld [smem:[#allocation78_spill]] }
 0x9c0   : > { %v3034_v12 = vrot.slane %v3032_v20, 4  ;;  %v3037_v48 = vrot.slane %v3035_v9, 5  ;;  %v3131_v22 = vrot.slane %v12851_v57, 5  ;;  %v9772_v16 = vcombine.low %v2783_v29, %v2787_v19  ;;  %v3050_v20 = vld [vmem:[#allocation2 + $0x38] sm:$0xe]  ;;  %v769_v57 = vld [vmem:[%s16503_s14 + $0x10] sm:$0xff] }
 0x9c1   : > { %v3024_v10 = vor.u32 %v3023_v11, %v3020_v24  ;;  %v3043_v44 = vrot.slane %v3041_v18, 5  ;;  %v3147_v23 = vrot.slane %v12956_v43, 5  ;;  %v3029_v9 = vrot.slane %v3027_v34, 5  ;;  %v13046_v55 = vpop.permute.xlu0 %3263  ;;  %v3051_v29 = vld [vmem:[#allocation2 + $0x40] sm:$0xe]  ;;  %v13049_v25 = vpop.permute.xlu1 %3261 }
 0x9c2   : > { %v3038_v38 = vor.u32 %v3037_v48, %v3034_v12  ;;  %v9711_v24 = vrot.slane %v3047_v40, 9  ;;  %v3151_v11 = vrot.slane %v13020_v52, 5  ;;  %v9712_v0 = vrot.slane %v3048_v27, 9  ;;  %v3052_v12 = vld [vmem:[#allocation2 + $0x48] sm:$0xe] }
 0x9c3   : > { %3467 = vrot.lane.b32.xlu0 %v9780_v37, %s11429_s17  ;;  %3411 = vrot.lane.b32.xlu1 %v9772_v16, %s11431_s18  ;;  %v3025_v59 = vrot.slane %v3024_v10, 4  ;;  %v9713_v37 = vrot.slane %v3049_v31, 9  ;;  %v3155_v48 = vrot.slane %v13028_v49, 5  ;;  %v9714_v40 = vrot.slane %v3050_v20, 9  ;;  %v3054_v27 = vld [vmem:[#allocation2 + $0x68] sm:$0xe] }
 0x9c4   : > { %v3039_v19 = vrot.slane %v3038_v38, 4  ;;  %v13058_v34 = vsel %vm12289_vm3, %v9711_v24, %v3103_v46  ;;  %v3053_v38 = vld [vmem:[#allocation2 + $0x60] sm:$0xe]  ;;  %v16499_v16 = vrot.slane %v12675_v14, 5  ;;  %v9715_v54 = vrot.slane %v3051_v29, 9 }
 0x9c5   : > { %v3030_v18 = vsel %vm12416_vm6, %v3025_v59, %v3029_v9  ;;  %v13070_v49 = vsel %vm12289_vm3, %v9713_v37, %v3111_v42  ;;  %v3055_v31 = vld [vmem:[#allocation2 + $0x70] sm:$0xe]  ;;  %v13072_v59 = vpop.permute.xlu0 %3401  ;;  %v3056_v9 = vld [vmem:[#allocation2 + $0x78] sm:$0xe]  ;;  %v13082_v24 = vpop.permute.xlu1 %3399  ;;  %v16501_v29 = vrot.slane %v12766_v3, 5  ;;  %v9717_v37 = vrot.slane %v3053_v38, 9 }
 0x9c6   : > { %v3044_v52 = vsel %vm12416_vm6, %v3039_v19, %v3043_v44  ;;  %v13066_v10 = vsel %vm12289_vm3, %v9712_v0, %v16499_v16  ;;  %v16500_v44 = vrot.slane %v12725_v2, 5  ;;  %v9716_v0 = vrot.slane %v3052_v12, 9  ;;  %v3060_v2 = vld [vmem:[#allocation2 + $0x98] sm:$0xe] }
 0x9c7   : > { %v9788_v46 = vcombine.low %v3030_v18, %v3044_v52  ;;  %v13090_v19 = vsel %vm12289_vm3, %v9715_v54, %v16501_v29  ;;  %v3057_v18 = vld [vmem:[#allocation2 + $0x80] sm:$0xe]  ;;  %v16502_v12 = vrot.slane %v12776_v28, 5  ;;  %v9718_v16 = vrot.slane %v3054_v27, 9  ;;  %v768_v28 = vld [vmem:[%s16503_s14 + $0x8] sm:$0xff] }
 0x9c8   : > { %v13080_v14 = vsel %vm12289_vm3, %v9714_v40, %v16500_v44  ;;  %v3058_v40 = vld [vmem:[#allocation2 + $0x88] sm:$0xe]  ;;  %v9719_v54 = vrot.slane %v3055_v31, 9  ;;  %v3059_v44 = vld [vmem:[#allocation2 + $0x90] sm:$0xe]  ;;  %v13107_v38 = vsel %vm12289_vm3, %v9717_v37, %v3127_v26  ;;  %v767_v27 = vld [vmem:[%s16503_s14] sm:$0xff] }
 0x9c9   : > { %3507 = vrot.lane.b32.xlu1 %v9788_v46, %s11435_s27  ;;  %v13099_v52 = vsel %vm12289_vm3, %v9716_v0, %v16502_v12  ;;  %v9720_v46 = vrot.slane %v3056_v9, 9  ;;  %v13114_v0 = vpop.permute.xlu0 %3267  ;;  %v13120_v31 = vsel %vm12289_vm3, %v9718_v16, %v3131_v22  ;;  %v16504_v26 = vrot.slane %v12885_v17, 5  ;;  %v770_v22 = vld [vmem:[%s16503_s14 + $0x18] sm:$0xff]  ;;  %v13137_v16 = vpop.permute.xlu1 %3265  ;;  %s16171_s27 = scalar_lea.vmem %s16905_s15, %s10106_s1 }
 0x9ca   : > { %v9721_v37 = vrot.slane %v3057_v18, 9  ;;  %v9722_v12 = vrot.slane %v3058_v40, 9  ;;  %v16505_v18 = vrot.slane %v12896_v33, 5  ;;  %v16506_v29 = vrot.slane %v12951_v45, 5 }
 0x9cb   : > { %v13126_v9 = vsel %vm12289_vm3, %v9719_v54, %v16504_v26  ;;  %v9723_v26 = vrot.slane %v3059_v44, 9  ;;  %v13169_v54 = vpack.c.bf16 %v768_v28, %v767_v27  ;;  %v13171_v45 = vpack.c.bf16 %v770_v22, %v769_v57 }
 0x9cc   : > { %v13145_v40 = vsel %vm12289_vm3, %v9720_v46, %v16505_v18  ;;  %v13155_v42 = vsel %vm12289_vm3, %v9721_v37, %v16506_v29  ;;  %v13161_v33 = vsel %vm12289_vm3, %v9722_v12, %v3147_v23  ;;  %v9724_v46 = vrot.slane %v3060_v2, 9  ;;  %v11063_v37 = vld [vmem:[#allocation2 + $0x8] sm:$0xf] }
 0x9cd   : > { %v13167_v44 = vsel %vm12289_vm3, %v9723_v26, %v3151_v11  ;;  %16507 = vst [vmem:[#allocation37_spill] sm:$0xff] %v13169_v54  ;;  %16508 = vst [vmem:[#allocation64_spill] sm:$0xff] %v13171_v45  ;;  %v13173_v29 = vpop.permute.xlu0 %3405  ;;  %10617 = vmatprep.subr.bf16.mxu1 %v13169_v54  ;;  %vm16336_vm7 = vcmask 261120   ;;  %vm3575_vm8 = vcmask 392192  }
 0x9ce   : > { %v13177_v43 = vsel %vm12289_vm3, %v9724_v46, %v3155_v48  ;;  %10619 = vmatpush3.bf16.msra.mxu1 %v13169_v54  ;;  %v11062_v48 = vld [vmem:[#allocation2] sm:$0xf] }
 0x9cf   : > { %10621 = vmatprep.subr.bf16.mxu1 %v13171_v45  ;;  %v9725_v12 = vcombine.low %v11062_v48, %v11063_v37 }
 0x9d0   : > { %v13179_v23 = vpop.permute.xlu1 %3403 }
 0x9d1   : > { %v13188_v28 = vpop.permute.xlu0 %3271 }
 0x9d2   : > { %10623 = vmatpush3.bf16.msra.mxu1 %v13171_v45 }
 0x9d4   : > { %v13186_v11 = vpop.permute.xlu1 %3269 }
 0x9d8   : > { %v13191_v27 = vpop.permute.xlu1 %3407 }
 0x9db   : > { %v3222_v57 = vpop.permute.xlu0 %3221 }
 0x9dc   : > { %v3536_v22 = vsel %vm16331_vm1, %v9725_v12, %v3222_v57  ;;  %v3358_v46 = vpop.permute.xlu1 %3357  ;;  %v11064_v12 = vld [vmem:[#allocation2 + $0x10] sm:$0xf]  ;;  %v11065_v57 = vld [vmem:[#allocation2 + $0x18] sm:$0xf] }
 0x9dd   : > { %v3560_v26 = vsel %vm16336_vm7, %v3536_v22, %v13049_v25  ;;  %v9726_v25 = vcombine.low %v11064_v12, %v11065_v57  ;;  %v16510_v57 = vcombine.low %v13070_v49, %v13080_v14  ;;  %v16511_v14 = vcombine.low %v13090_v19, %v13099_v52 }
 0x9de   : > { %v3577_v2 = vsel %vm3575_vm8, %v3560_v26, %v12934_v36 }
 0x9df   : > { %v3594_v18 = vsel %vm16335_vm9, %v3577_v2, %v3358_v46  ;;  %v13199_v3 = vpop.permute.xlu0 %3463 }
 0x9e0   : > { %v3611_v48 = vsel %vm3609_vm10, %v3594_v18, %v13036_v4  ;;  %v16509_v4 = vcombine.low %v13058_v34, %v13066_v10 }
 0x9e1   : > { %v3628_v37 = vsel %vm16334_vm11, %v3611_v48, %v12932_v56  ;;  %v11066_v48 = vld [vmem:[#allocation2 + $0x20] sm:$0xf] }
 0x9e2   : > { %v3224_v22 = vpop.permute.xlu1 %3223 }
 0x9e3   : > { %v3494_v17 = vpop.permute.xlu0 %3493  ;;  %v3539_v20 = vsel %vm16331_vm1, %v9726_v25, %v3224_v22 }
 0x9e4   : > { %v3645_v36 = vsel %vm3643_vm12, %v3628_v37, %v3494_v17  ;;  %v3562_v2 = vsel %vm16336_vm7, %v3539_v20, %v13046_v55  ;;  %v11067_v37 = vld [vmem:[#allocation2 + $0x28] sm:$0xf] }
 0x9e5   : > { %3797 = vmatmul.mubr.bf16.vlgmr.msra.gmra.mrb[8].mxu0 %v3645_v36  ;;  %v3579_v56 = vsel %vm3575_vm8, %v3562_v2, %v12958_v61  ;;  %v9727_v34 = vcombine.low %v11066_v48, %v11067_v37 }
 0x9e6   : > { %9807 = vmatprep.mubr.msk.bf16.mxu0 %vm16331_vm1, %v16509_v4  ;;  %v13215_v26 = vpop.permute.xlu1 %3273 }
 0x9e7   : > { %v3360_v18 = vpop.permute.xlu0 %3359 }
 0x9e8   : > { %v3596_v46 = vsel %vm16335_vm9, %v3579_v56, %v3360_v18 }
 0x9e9   : > { %v3613_v17 = vsel %vm3609_vm10, %v3596_v46, %v13082_v24 }
 0x9ea   : > { %v3630_v55 = vsel %vm16334_vm11, %v3613_v17, %v12965_v30 }
 0x9ee   : > { %v3496_v20 = vpop.permute.xlu1 %3495 }
 0x9ef   : > { %v3648_v10 = vsel %vm3643_vm12, %v3630_v55, %v3496_v20  ;;  %v16512_v20 = vcombine.low %v13107_v38, %v13120_v31 }
 0x9f0   : > { %v3226_v12 = vpop.permute.xlu0 %3225  ;;  %3805 = vmatmul.mubr.bf16.gmra.mrb[12].mxu0 %v3648_v10 }
 0x9f1   : > { %v3542_v61 = vsel %vm16331_vm1, %v9727_v34, %v3226_v12  ;;  %9808 = vmatprep.mubr.msk.bf16.mxu0 %vm16331_vm1, %v16510_v57 }
 0x9f2   : > { %v3564_v24 = vsel %vm16336_vm7, %v3542_v61, %v13137_v16 }
 0x9f3   : > { %v3581_v30 = vsel %vm3575_vm8, %v3564_v24, %v12983_v6  ;;  %v9728_v6 = vcombine.low %v12741_v60, %v12746_v15 }
 0x9f4   : > { %v3330_v25 = vpop.permute.xlu0 %3329 }
 0x9f5   : > { %v3362_v22 = vpop.permute.xlu1 %3361 }
 0x9f6   : > { %v3598_v36 = vsel %vm16335_vm9, %v3581_v30, %v3362_v22  ;;  %v16516_v22 = vcombine.low %v13155_v42, %v13161_v33 }
 0x9f7   : > { %v3615_v2 = vsel %vm3609_vm10, %v3598_v36, %v13072_v59 }
 0x9f8   : > { %v3498_v4 = vpop.permute.xlu0 %3497  ;;  %v3632_v56 = vsel %vm16334_vm11, %v3615_v2, %v12989_v13 }
 0x9f9   : > { %v3651_v49 = vsel %vm3643_vm12, %v3632_v56, %v3498_v4 }
 0x9fa   : > { %3813 = vmatmul.mubr.bf16.gmra.mrb[16].mxu0 %v3651_v49 }
 0x9fb   : > { %9809 = vmatprep.mubr.msk.bf16.mxu0 %vm16331_vm1, %v16511_v14 }
 0x9fe   : > { %v3364_v46 = vpop.permute.xlu0 %3363 }
 0x9ff   : > { %v3228_v16 = vpop.permute.xlu1 %3227 }
 0xa00   : > { %v3545_v18 = vsel %vm16331_vm1, %v9728_v6, %v3228_v16 }
 0xa01   : > { %v3566_v59 = vsel %vm16336_vm7, %v3545_v18, %v13114_v0 }
 0xa02   : > { %v3583_v13 = vsel %vm3575_vm8, %v3566_v59, %v13003_v8  ;;  %v16513_v8 = vcombine.low %v12786_v5, %v12792_v53  ;;  %v16514_v53 = vcombine.low %v13126_v9, %v13145_v40 }
 0xa03   : > { %v3500_v17 = vpop.permute.xlu1 %3499  ;;  %v3600_v55 = vsel %vm16335_vm9, %v3583_v13, %v3364_v46 }
 0xa04   : > { %v3617_v19 = vsel %vm3609_vm10, %v3600_v55, %v13179_v23 }
 0xa05   : > { %v3634_v52 = vsel %vm16334_vm11, %v3617_v19, %v12999_v41 }
 0xa06   : > { %v3654_v60 = vsel %vm3643_vm12, %v3634_v52, %v3500_v17 }
 0xa07   : > { %3821 = vmatmul.mubr.bf16.gmra.mrb[20].mxu0 %v3654_v60  ;;  %v3466_v15 = vpop.permute.xlu1 %3465 }
 0xa08   : > { %9810 = vmatprep.mubr.msk.bf16.mxu0 %vm16331_vm1, %v16512_v20 }
 0xa0a   : > { %v3230_v0 = vpop.permute.xlu0 %3229 }
 0xa0b   : > { %v3548_v48 = vsel %vm16331_vm1, %v16513_v8, %v3230_v0 }
 0xa0c   : > { %v3568_v23 = vsel %vm16336_vm7, %v3548_v48, %v13186_v11  ;;  %v16515_v11 = vcombine.low %v12858_v63, %v12868_v62 }
 0xa0d   : > { %v3585_v41 = vsel %vm3575_vm8, %v3568_v23, %v13006_v7  ;;  %v3366_v37 = vpop.permute.xlu1 %3365 }
 0xa0e   : > { %v3410_v34 = vpop.permute.xlu0 %3409  ;;  %v3602_v10 = vsel %vm16335_vm9, %v3585_v41, %v3366_v37 }
 0xa0f   : > { %v3619_v38 = vsel %vm3609_vm10, %v3602_v10, %v13173_v29 }
 0xa10   : > { %v3636_v31 = vsel %vm16334_vm11, %v3619_v38, %v13014_v39 }
 0xa12   : > { %v3502_v12 = vpop.permute.xlu0 %3501 }
 0xa13   : > { %v3657_v5 = vsel %vm3643_vm12, %v3636_v31, %v3502_v12 }
 0xa14   : > { %3829 = vmatmul.mubr.bf16.gmra.mrb[24].mxu0 %v3657_v5 }
 0xa15   : > { %9811 = vmatprep.mubr.msk.bf16.mxu0 %vm16331_vm1, %v16514_v53 }
 0xa17   : > { %v3368_v57 = vpop.permute.xlu0 %3367 }
 0xa18   : > { %v3232_v7 = vpop.permute.xlu1 %3231 }
 0xa19   : > { %v3551_v61 = vsel %vm16331_vm1, %v16515_v11, %v3232_v7 }
 0xa1a   : > { %v3570_v29 = vsel %vm16336_vm7, %v3551_v61, %v13188_v28 }
 0xa1b   : > { %v3587_v39 = vsel %vm3575_vm8, %v3570_v29, %v13034_v35  ;;  %v16517_v35 = vcombine.low %v12903_v1, %v12910_v50  ;;  %v16518_v1 = vcombine.low %v13167_v44, %v13177_v43 }
 0xa1c   : > { %v3504_v24 = vpop.permute.xlu1 %3503  ;;  %v3604_v30 = vsel %vm16335_vm9, %v3587_v39, %v3368_v57 }
 0xa1d   : > { %v3621_v9 = vsel %vm3609_vm10, %v3604_v30, %v13191_v27 }
 0xa1e   : > { %v3638_v40 = vsel %vm16334_vm11, %v3621_v9, %v13199_v3 }
 0xa1f   : > { %v3660_v63 = vsel %vm3643_vm12, %v3638_v40, %v3504_v24 }
 0xa20   : > { %v3332_v62 = vpop.permute.xlu1 %3331  ;;  %3837 = vmatmul.mubr.bf16.gmra.mrb[28].mxu0 %v3660_v63 }
 0xa21   : > { %9812 = vmatprep.mubr.msk.bf16.mxu0 %vm16331_vm1, %v16516_v22  ;;  %v16520_v22 = vmov 0.0  }
 0xa23   : > { %v3234_v28 = vpop.permute.xlu0 %3233 }
 0xa24   : > { %v3554_v36 = vsel %vm16331_vm1, %v16517_v35, %v3234_v28  ;;  %v771_v28 = vld [vmem:[%s16521_s13] sm:$0xff]  ;;  %v772_v35 = vld [vmem:[%s16521_s13 + $0x8] sm:$0xff] }
 0xa25   : > { %v3572_v27 = vsel %vm16336_vm7, %v3554_v36, %v13215_v26  ;;  %v3370_v2 = vpop.permute.xlu1 %3369  ;;  %v16286_v36 = vmov 0.0|0.0  }
 0xa26   : > { %v3589_v3 = vsel %vm3575_vm8, %v3572_v27, %v3330_v25  ;;  %v16519_v25 = vcombine.low %v12976_v47, %v12981_v58  ;;  %10624 = vmatprep.subr.bf16.mxu1 %v16286_v36  ;;  %v13393_v27 = vpack.c.bf16 %v772_v35, %v771_v28 }
 0xa27   : > { %v3606_v4 = vsel %vm16335_vm9, %v3589_v3, %v3370_v2  ;;  %v3276_v56 = vpop.permute.xlu0 %3275 }
 0xa28   : > { %v3623_v49 = vsel %vm3609_vm10, %v3606_v4, %v3410_v34  ;;  %16522 = vst [vmem:[#allocation38_spill] sm:$0xff] %v13393_v27 }
 0xa29   : > { %v3640_v42 = vsel %vm16334_vm11, %v3623_v49, %v3466_v15 }
 0xa2b   : > { %v3506_v33 = vpop.permute.xlu0 %3505 }
 0xa2c   : > { %v3663_v14 = vsel %vm3643_vm12, %v3640_v42, %v3506_v33 }
 0xa2d   : > { %3845 = vmatmul.mubr.bf16.gmra.mrb[32].mxu0 %v3663_v14 }
 0xa2e   : > { %9813 = vmatprep.mubr.msk.bf16.mxu0 %vm16331_vm1, %v16518_v1 }
 0xa31   : > { %v3372_v50 = vpop.permute.xlu0 %3371  ;;  %v3236_v26 = vpop.permute.xlu1 %3235 }
 0xa32   : > { %v3557_v6 = vsel %vm16331_vm1, %v16519_v25, %v3236_v26 }
 0xa33   : > { %v3574_v16 = vsel %vm16336_vm7, %v3557_v6, %v3276_v56 }
 0xa34   : > { %v3591_v18 = vsel %vm3575_vm8, %v3574_v16, %v3332_v62 }
 0xa35   : > { %v3412_v46 = vpop.permute.xlu1 %3411  ;;  %v3608_v59 = vsel %vm16335_vm9, %v3591_v18, %v3372_v50  ;;  %v3468_v13 = vpop.permute.xlu0 %3467 }
 0xa36   : > { %v3625_v17 = vsel %vm3609_vm10, %v3608_v59, %v3412_v46 }
 0xa37   : > { %v3642_v44 = vsel %vm16334_vm11, %v3625_v17, %v3468_v13 }
 0xa3b   : > { %v3508_v43 = vpop.permute.xlu1 %3507 }
 0xa3c   : > { %v3666_v55 = vsel %vm3643_vm12, %v3642_v44, %v3508_v43 }
 0xa3d   : > { %3853 = vmatmul.mubr.bf16.gmra.mrb[36].mxu0 %v3666_v55 }
 0xab8   : > { %v13320_v19 = vpop.f32.mrb[8].mxu0 }
 0xab9   : > { %v3800_v47 = vpop.f32.mrb[9].mxu0  ;;  %10370 = vmatprep.mubr.msk.f32.mxu1 %vm16336_vm7, %v13320_v19 }
 0xaba   : > { %v13324_v58 = vpop.f32.mrb[10].mxu0 }
 0xabb   : > { %v3803_v52 = vpop.f32.mrb[11].mxu0  ;;  %10371 = vmatmul.mubr.msk.f32.vlgmr.msra.gmra.mrb[6].mxu1 %vm16336_vm7, %v13324_v58 }
 0xabc   : > { %10626 = vmatpush3.bf16.msra.mxu1 %v13393_v27 }
 0xabd   : > { %10628 = vmatprep.subr.bf16.mxu1 %v13169_v54 }
 0xac3   : > { %v13328_v60 = vpop.f32.mrb[12].mxu0 }
 0xac4   : > { %v3808_v15 = vpop.f32.mrb[13].mxu0  ;;  %10373 = vmatprep.mubr.msk.f32.mxu1 %vm16336_vm7, %v13328_v60 }
 0xac5   : > { %v13332_v20 = vpop.f32.mrb[14].mxu0 }
 0xac6   : > { %v3811_v0 = vpop.f32.mrb[15].mxu0  ;;  %10374 = vmatmul.mubr.msk.f32.gmra.mrb[8].mxu1 %vm16336_vm7, %v13332_v20 }
 0xacd   : > { %v13336_v8 = vpop.f32.mrb[16].mxu0 }
 0xace   : > { %v3816_v48 = vpop.f32.mrb[17].mxu0  ;;  %10376 = vmatprep.mubr.msk.f32.mxu1 %vm16336_vm7, %v13336_v8 }
 0xacf   : > { %v13340_v23 = vpop.f32.mrb[18].mxu0 }
 0xad0   : > { %v3819_v41 = vpop.f32.mrb[19].mxu0  ;;  %10377 = vmatmul.mubr.msk.f32.gmra.mrb[10].mxu1 %vm16336_vm7, %v13340_v23 }
 0xada   : > { %v13344_v37 = vpop.f32.mrb[20].mxu0 }
 0xadb   : > { %v3824_v34 = vpop.f32.mrb[21].mxu0  ;;  %10379 = vmatprep.mubr.msk.f32.mxu1 %vm16336_vm7, %v13344_v37 }
 0xadc   : > { %v13348_v10 = vpop.f32.mrb[22].mxu0 }
 0xadd   : > { %v3827_v38 = vpop.f32.mrb[23].mxu0  ;;  %10380 = vmatmul.mubr.msk.f32.gmra.mrb[12].mxu1 %vm16336_vm7, %v13348_v10 }
 0xae7   : > { %v13352_v31 = vpop.f32.mrb[24].mxu0 }
 0xae8   : > { %v3832_v12 = vpop.f32.mrb[25].mxu0  ;;  %10382 = vmatprep.mubr.msk.f32.mxu1 %vm16336_vm7, %v13352_v31 }
 0xae9   : > { %v13356_v5 = vpop.f32.mrb[26].mxu0 }
 0xaea   : > { %v3835_v53 = vpop.f32.mrb[27].mxu0  ;;  %10383 = vmatmul.mubr.msk.f32.gmra.mrb[14].mxu1 %vm16336_vm7, %v13356_v5 }
 0xaf3   : > { %v13360_v7 = vpop.f32.mrb[28].mxu0 }
 0xaf4   : > { %v3840_v11 = vpop.f32.mrb[29].mxu0  ;;  %10385 = vmatprep.mubr.msk.f32.mxu1 %vm16336_vm7, %v13360_v7 }
 0xaf5   : > { %v13364_v61 = vpop.f32.mrb[30].mxu0 }
 0xaf6   : > { %v3843_v57 = vpop.f32.mrb[31].mxu0  ;;  %10386 = vmatmul.mubr.msk.f32.gmra.mrb[16].mxu1 %vm16336_vm7, %v13364_v61 }
 0xb00   : > { %v13368_v29 = vpop.f32.mrb[32].mxu0 }
 0xb01   : > { %v3848_v39 = vpop.f32.mrb[33].mxu0  ;;  %10388 = vmatprep.mubr.msk.f32.mxu1 %vm16336_vm7, %v13368_v29 }
 0xb02   : > { %v13372_v24 = vpop.f32.mrb[34].mxu0 }
 0xb03   : > { %v3851_v30 = vpop.f32.mrb[35].mxu0  ;;  %10389 = vmatmul.mubr.msk.f32.gmra.mrb[18].mxu1 %vm16336_vm7, %v13372_v24 }
 0xb10   : > { %v13376_v9 = vpop.f32.mrb[36].mxu0 }
 0xb11   : > { %v3856_v40 = vpop.f32.mrb[37].mxu0  ;;  %10391 = vmatprep.mubr.msk.f32.mxu1 %vm16336_vm7, %v13376_v9 }
 0xb12   : > { %v13380_v63 = vpop.f32.mrb[38].mxu0 }
 0xb13   : > { %v3859_v62 = vpop.f32.mrb[39].mxu0  ;;  %10392 = vmatmul.mubr.msk.f32.gmra.mrb[20].mxu1 %vm16336_vm7, %v13380_v63 }
 0xb14   : > { %10398 = vmatprep.mubr.msk.f32.mxu1 %vm16332_vm0, %v16520_v22 }
 0xb8e   : > { %v10372_v2 = vpop.f32.mrb[6].mxu1 }
 0xb8f   : > { %v4057_v3 = vsel %vm16331_vm1, %v10372_v2, 0.0  ;;  %v3977_v4 = vpop.f32.mrb[7].mxu1 }
 0xb90   : > { %v4056_v56 = vsel %vm16331_vm1, %v3977_v4, 0.0 }
 0xb91   : > { %v4058_v49 = vadd.f32 %v4057_v3, %v4056_v56 }
 0xb99   : > { %v10375_v42 = vpop.f32.mrb[8].mxu1 }
 0xb9a   : > { %v3987_v33 = vpop.f32.mrb[9].mxu1  ;;  %v4061_v50 = vsel %vm16331_vm1, %v10375_v42, 0.0 }
 0xb9b   : > { %v4059_v14 = vsel %vm16331_vm1, %v3987_v33, 0.0 }
 0xb9c   : > { %v4060_v1 = vadd.f32 %v4059_v14, %v4058_v49 }
 0xb9e   : > { %v4062_v26 = vadd.f32 %v4061_v50, %v4060_v1 }
 0xba3   : > { %v10378_v25 = vpop.f32.mrb[10].mxu1 }
 0xba4   : > { %v3997_v6 = vpop.f32.mrb[11].mxu1  ;;  %v4065_v46 = vsel %vm16331_vm1, %v10378_v25, 0.0 }
 0xba5   : > { %v4063_v16 = vsel %vm16331_vm1, %v3997_v6, 0.0 }
 0xba6   : > { %v4064_v18 = vadd.f32 %v4063_v16, %v4062_v26 }
 0xba8   : > { %v4066_v59 = vadd.f32 %v4065_v46, %v4064_v18 }
 0xbb0   : > { %v10381_v13 = vpop.f32.mrb[12].mxu1 }
 0xbb1   : > { %v4007_v17 = vpop.f32.mrb[13].mxu1  ;;  %v4069_v55 = vsel %vm16331_vm1, %v10381_v13, 0.0 }
 0xbb2   : > { %v4067_v44 = vsel %vm16331_vm1, %v4007_v17, 0.0 }
 0xbb3   : > { %v4068_v43 = vadd.f32 %v4067_v44, %v4066_v59 }
 0xbb5   : > { %v4070_v47 = vadd.f32 %v4069_v55, %v4068_v43 }
 0xbb7   : > { %v4071_v2 = vrot.slane %v4070_v47, 4 }
 0xbb9   : > { %v4072_v3 = vadd.f32 %v4071_v2, %v4070_v47  ;;  %v16523_v47 = vld [vmem:[#allocation29_spill] sm:$0xff] }
 0xbbb   : > { %v4073_v42 = vrot.slane %v4072_v3, 2 }
 0xbbd   : > { %v10384_v52 = vpop.f32.mrb[14].mxu1  ;;  %v4074_v50 = vadd.f32 %v4073_v42, %v4072_v3 }
 0xbbe   : > { %v4078_v15 = vsel %vm16331_vm1, %v10384_v52, 0.0  ;;  %v4017_v0 = vpop.f32.mrb[15].mxu1 }
 0xbbf   : > { %v4077_v48 = vsel %vm16331_vm1, %v4017_v0, 0.0  ;;  %v4075_v6 = vrot.slane %v4074_v50, 1 }
 0xbc0   : > { %v4079_v41 = vadd.f32 %v4078_v15, %v4077_v48 }
 0xbc1   : > { %v4076_v46 = vadd.f32 %v4075_v6, %v4074_v50 }
 0xbc3   : > { %v4098_v17 = vmul.f32 0.0078125, %v4076_v46 }
 0xbc9   : > { %v10387_v34 = vpop.f32.mrb[16].mxu1 }
 0xbca   : > { %v4027_v38 = vpop.f32.mrb[17].mxu1  ;;  %v4082_v11 = vsel %vm16331_vm1, %v10387_v34, 0.0  ;;  %v16524_v34 = vld [vmem:[#allocation30_spill] sm:$0xff] }
 0xbcb   : > { %v4080_v12 = vsel %vm16331_vm1, %v4027_v38, 0.0 }
 0xbcc   : > { %v4081_v53 = vadd.f32 %v4080_v12, %v4079_v41 }
 0xbce   : > { %v4083_v57 = vadd.f32 %v4082_v11, %v4081_v53 }
 0xbd6   : > { %v10390_v39 = vpop.f32.mrb[18].mxu1 }
 0xbd7   : > { %v4037_v30 = vpop.f32.mrb[19].mxu1  ;;  %v4086_v28 = vsel %vm16331_vm1, %v10390_v39, 0.0 }
 0xbd8   : > { %v4084_v40 = vsel %vm16331_vm1, %v4037_v30, 0.0 }
 0xbd9   : > { %v4085_v62 = vadd.f32 %v4084_v40, %v4083_v57 }
 0xbdb   : > { %v4087_v35 = vadd.f32 %v4086_v28, %v4085_v62 }
 0xbe6   : > { %v10393_v4 = vpop.f32.mrb[20].mxu1 }
 0xbe7   : > { %v4047_v56 = vpop.f32.mrb[21].mxu1  ;;  %v4090_v14 = vsel %vm16331_vm1, %v10393_v4, 0.0 }
 0xbe8   : > { %v4088_v49 = vsel %vm16331_vm1, %v4047_v56, 0.0 }
 0xbe9   : > { %v4089_v33 = vadd.f32 %v4088_v49, %v4087_v35 }
 0xbeb   : > { %v4091_v1 = vadd.f32 %v4090_v14, %v4089_v33 }
 0xbed   : > { %v4092_v26 = vrot.slane %v4091_v1, 4 }
 0xbef   : > { %v4093_v25 = vadd.f32 %v4092_v26, %v4091_v1 }
 0xbf1   : > { %v4094_v16 = vrot.slane %v4093_v25, 2 }
 0xbf3   : > { %v4095_v18 = vadd.f32 %v4094_v16, %v4093_v25 }
 0xbf5   : > { %v4096_v59 = vrot.slane %v4095_v18, 1 }
 0xbf7   : > { %v4097_v13 = vadd.f32 %v4096_v59, %v4095_v18 }
 0xbf9   : > { %v4099_v44 = vmul.f32 0.0078125, %v4097_v13 }
 0xbfb   : > { %v4103_v43 = vsel %vm16330_vm15, %v4099_v44, %v4098_v17 }
 0xbfc   : > { %10399 = vmatmul.mubr.msk.f32.vlgmr.msra.gmra.mrb[22].mxu1 %vm16331_vm1, %v4103_v43 }
 0xbfd   : > { %10630 = vmatpush3.bf16.msra.mxu1 %v13169_v54 }
 0xbfe   : > { %10632 = vmatprep.subr.bf16.mxu1 %v13171_v45 }
 0xc01   : > { %10634 = vmatpush3.bf16.msra.mxu1 %v13171_v45 }
 0xc02   : > { %10635 = vmatprep.subr.bf16.mxu1 %v16286_v36 }
 0xccf   : > { %v4172_v55 = vpop.f32.mrb[22].mxu1 }
 0xcd0   : > { %v4183_v52 = vrot.slane %v4172_v55, %v16523_v47  ;;  %v10400_v15 = vpop.f32.mrb[23].mxu1 }
 0xcd2   : > { %v4184_v0 = vcombine.high %v4183_v52, %v4183_v52  ;;  %v4191_v48 = vrot.slane %v4183_v52, %v16523_v47 }
 0xcd4   : > { %v4198_v41 = vrot.slane %v4184_v0, %v16523_v47  ;;  %v4202_v38 = vrot.slane %v4191_v48, %v16524_v34 }
 0xcd6   : > { %v4206_v12 = vrot.slane %v4198_v41, %v16524_v34  ;;  %v13425_v53 = vsub.f32 %v13320_v19, %v4202_v38  ;;  %v13428_v11 = vsub.f32 %v13324_v58, %v4202_v38  ;;  %v13431_v57 = vsub.f32 %v13328_v60, %v4202_v38 }
 0xcd7   : > { %v13434_v39 = vsub.f32 %v13332_v20, %v4202_v38  ;;  %v13437_v30 = vsub.f32 %v13336_v8, %v4202_v38  ;;  %v13440_v40 = vsub.f32 %v13340_v23, %v4202_v38  ;;  %v13443_v62 = vsub.f32 %v13344_v37, %v4202_v38 }
 0xcd8   : > { %v4225_v19 = vmul.f32 %v13425_v53, %v13425_v53  ;;  %v4226_v58 = vmul.f32 %v13428_v11, %v13428_v11  ;;  %v13450_v60 = vsub.f32 %v13348_v10, %v4202_v38  ;;  %v4227_v20 = vmul.f32 %v13431_v57, %v13431_v57 }
 0xcd9   : > { %v13456_v8 = vsub.f32 %v13352_v31, %v4206_v12  ;;  %v13459_v23 = vsub.f32 %v13356_v5, %v4206_v12  ;;  %v13462_v37 = vsub.f32 %v13360_v7, %v4206_v12  ;;  %v13466_v28 = vsub.f32 %v13364_v61, %v4206_v12 }
 0xcda   : > { %10409 = vmatprep.mubr.msk.f32.mxu1 %vm16336_vm7, %v4225_v19  ;;  %v13469_v10 = vsub.f32 %v13368_v29, %v4206_v12  ;;  %v13472_v35 = vsub.f32 %v13372_v24, %v4206_v12  ;;  %v13475_v31 = vsub.f32 %v13376_v9, %v4206_v12  ;;  %v13479_v5 = vsub.f32 %v13380_v63, %v4206_v12 }
 0xcdb   : > { %10410 = vmatmul.mubr.msk.f32.vlgmr.msra.gmra.mrb[24].mxu1 %vm16336_vm7, %v4226_v58  ;;  %v4228_v7 = vmul.f32 %v13434_v39, %v13434_v39  ;;  %v4229_v61 = vmul.f32 %v13437_v30, %v13437_v30  ;;  %v4230_v29 = vmul.f32 %v13440_v40, %v13440_v40  ;;  %v4231_v24 = vmul.f32 %v13443_v62, %v13443_v62 }
 0xcdc   : > { %10412 = vmatprep.mubr.msk.f32.mxu1 %vm16336_vm7, %v4227_v20  ;;  %10637 = vmatpush3.bf16.msra.mxu1 %v13393_v27  ;;  %v4232_v9 = vmul.f32 %v13450_v60, %v13450_v60  ;;  %v4233_v63 = vmul.f32 %v13456_v8, %v13456_v8  ;;  %v4234_v2 = vmul.f32 %v13459_v23, %v13459_v23 }
 0xcdd   : > { %v4235_v3 = vmul.f32 %v13462_v37, %v13462_v37  ;;  %v4236_v4 = vmul.f32 %v13466_v28, %v13466_v28  ;;  %v4237_v56 = vmul.f32 %v13469_v10, %v13469_v10  ;;  %v4238_v49 = vmul.f32 %v13472_v35, %v13472_v35 }
 0xcde   : > { %v4239_v42 = vmul.f32 %v13475_v31, %v13475_v31  ;;  %v4240_v33 = vmul.f32 %v13479_v5, %v13479_v5 }
 0xcdf   : > { %10413 = vmatmul.mubr.msk.f32.gmra.mrb[26].mxu1 %vm16336_vm7, %v4228_v7 }
 0xce0   : > { %10415 = vmatprep.mubr.msk.f32.mxu1 %vm16336_vm7, %v4229_v61 }
 0xce3   : > { %10416 = vmatmul.mubr.msk.f32.gmra.mrb[28].mxu1 %vm16336_vm7, %v4230_v29 }
 0xce4   : > { %10418 = vmatprep.mubr.msk.f32.mxu1 %vm16336_vm7, %v4231_v24 }
 0xce7   : > { %10419 = vmatmul.mubr.msk.f32.gmra.mrb[30].mxu1 %vm16336_vm7, %v4232_v9 }
 0xce8   : > { %10421 = vmatprep.mubr.msk.f32.mxu1 %vm16336_vm7, %v4233_v63 }
 0xceb   : > { %10422 = vmatmul.mubr.msk.f32.gmra.mrb[32].mxu1 %vm16336_vm7, %v4234_v2 }
 0xcec   : > { %10424 = vmatprep.mubr.msk.f32.mxu1 %vm16336_vm7, %v4235_v3 }
 0xcef   : > { %10425 = vmatmul.mubr.msk.f32.gmra.mrb[34].mxu1 %vm16336_vm7, %v4236_v4 }
 0xcf0   : > { %10427 = vmatprep.mubr.msk.f32.mxu1 %vm16336_vm7, %v4237_v56 }
 0xcf3   : > { %10428 = vmatmul.mubr.msk.f32.gmra.mrb[36].mxu1 %vm16336_vm7, %v4238_v49 }
 0xcf4   : > { %10430 = vmatprep.mubr.msk.f32.mxu1 %vm16336_vm7, %v4239_v42 }
 0xcf7   : > { %10431 = vmatmul.mubr.msk.f32.gmra.mrb[38].mxu1 %vm16336_vm7, %v4240_v33 }
 0xcf8   : > { %10437 = vmatprep.mubr.msk.f32.mxu1 %vm16332_vm0, %v16520_v22 }
 0xdae   : > { %v10411_v14 = vpop.f32.mrb[24].mxu1 }
 0xdaf   : > { %v4435_v1 = vsel %vm16331_vm1, %v10411_v14, 0.0  ;;  %v4355_v50 = vpop.f32.mrb[25].mxu1 }
 0xdb0   : > { %v4434_v26 = vsel %vm16331_vm1, %v4355_v50, 0.0 }
 0xdb1   : > { %v4436_v25 = vadd.f32 %v4435_v1, %v4434_v26 }
 0xdb2   : > { %v10414_v6 = vpop.f32.mrb[26].mxu1 }
 0xdb3   : > { %v4365_v16 = vpop.f32.mrb[27].mxu1  ;;  %v4439_v59 = vsel %vm16331_vm1, %v10414_v6, 0.0 }
 0xdb4   : > { %v4437_v18 = vsel %vm16331_vm1, %v4365_v16, 0.0 }
 0xdb5   : > { %v4438_v46 = vadd.f32 %v4437_v18, %v4436_v25 }
 0xdb6   : > { %v10417_v13 = vpop.f32.mrb[28].mxu1 }
 0xdb7   : > { %v4375_v17 = vpop.f32.mrb[29].mxu1  ;;  %v4440_v44 = vadd.f32 %v4439_v59, %v4438_v46  ;;  %v4443_v52 = vsel %vm16331_vm1, %v10417_v13, 0.0 }
 0xdb8   : > { %v4441_v43 = vsel %vm16331_vm1, %v4375_v17, 0.0 }
 0xdb9   : > { %v4442_v55 = vadd.f32 %v4441_v43, %v4440_v44 }
 0xdba   : > { %v10420_v15 = vpop.f32.mrb[30].mxu1 }
 0xdbb   : > { %v4385_v0 = vpop.f32.mrb[31].mxu1  ;;  %v4444_v48 = vadd.f32 %v4443_v52, %v4442_v55  ;;  %v4447_v12 = vsel %vm16331_vm1, %v10420_v15, 0.0 }
 0xdbc   : > { %v4445_v41 = vsel %vm16331_vm1, %v4385_v0, 0.0 }
 0xdbd   : > { %v4446_v38 = vadd.f32 %v4445_v41, %v4444_v48 }
 0xdbe   : > { %v10423_v19 = vpop.f32.mrb[32].mxu1 }
 0xdbf   : > { %v4448_v58 = vadd.f32 %v4447_v12, %v4446_v38  ;;  %v4456_v20 = vsel %vm16331_vm1, %v10423_v19, 0.0  ;;  %v4395_v7 = vpop.f32.mrb[33].mxu1 }
 0xdc0   : > { %v4455_v61 = vsel %vm16331_vm1, %v4395_v7, 0.0 }
 0xdc1   : > { %v4449_v29 = vrot.slane %v4448_v58, 4  ;;  %v4457_v24 = vadd.f32 %v4456_v20, %v4455_v61 }
 0xdc2   : > { %v10426_v9 = vpop.f32.mrb[34].mxu1 }
 0xdc3   : > { %v4405_v63 = vpop.f32.mrb[35].mxu1  ;;  %v4450_v2 = vadd.f32 %v4449_v29, %v4448_v58  ;;  %v4460_v56 = vsel %vm16331_vm1, %v10426_v9, 0.0  ;;  %v9848_v29 = vld [vmem:[%s16525_s12] ss:$0 sm:$0xff] }
 0xdc4   : > { %v4458_v3 = vsel %vm16331_vm1, %v4405_v63, 0.0 }
 0xdc5   : > { %v4459_v4 = vadd.f32 %v4458_v3, %v4457_v24  ;;  %v4451_v14 = vrot.slane %v4450_v2, 2 }
 0xdc6   : > { %v10429_v49 = vpop.f32.mrb[36].mxu1 }
 0xdc7   : > { %v4415_v42 = vpop.f32.mrb[37].mxu1  ;;  %v4461_v33 = vadd.f32 %v4460_v56, %v4459_v4  ;;  %v4464_v26 = vsel %vm16331_vm1, %v10429_v49, 0.0  ;;  %v4452_v18 = vadd.f32 %v4451_v14, %v4450_v2 }
 0xdc8   : > { %v4462_v1 = vsel %vm16331_vm1, %v4415_v42, 0.0 }
 0xdc9   : > { %v4463_v50 = vadd.f32 %v4462_v1, %v4461_v33  ;;  %v4453_v44 = vrot.slane %v4452_v18, 1  ;;  %v9849_v1 = vld [vmem:[%s16525_s12 + $0x1] ss:$0 sm:$0xff] }
 0xdca   : > { %v10432_v25 = vpop.f32.mrb[38].mxu1 }
 0xdcb   : > { %v4425_v6 = vpop.f32.mrb[39].mxu1  ;;  %v4465_v16 = vadd.f32 %v4464_v26, %v4463_v50  ;;  %v4468_v13 = vsel %vm16331_vm1, %v10432_v25, 0.0  ;;  %v4454_v52 = vadd.f32 %v4453_v44, %v4452_v18 }
 0xdcc   : > { %v4466_v46 = vsel %vm16331_vm1, %v4425_v6, 0.0 }
 0xdcd   : > { %v4467_v59 = vadd.f32 %v4466_v46, %v4465_v16  ;;  %v4476_v48 = vmul.f32 0.0078125, %v4454_v52 }
 0xdcf   : > { %v4469_v17 = vadd.f32 %v4468_v13, %v4467_v59  ;;  %v4478_v12 = vadd.f32 1e-05, %v4476_v48 }
 0xdd1   : > { %v4470_v43 = vrot.slane %v4469_v17, 4  ;;  %10921 = vrsqrt.f32 %v4478_v12 }
 0xdd3   : > { %v4471_v55 = vadd.f32 %v4470_v43, %v4469_v17 }
 0xdd5   : > { %v4472_v15 = vrot.slane %v4471_v55, 2 }
 0xdd7   : > { %v4473_v0 = vadd.f32 %v4472_v15, %v4471_v55 }
 0xdd9   : > { %v4474_v41 = vrot.slane %v4473_v0, 1 }
 0xddb   : > { %v4475_v38 = vadd.f32 %v4474_v41, %v4473_v0  ;;  %v10922_v20 = vpop.eup %10921 }
 0xddd   : > { %v4477_v19 = vmul.f32 0.0078125, %v4475_v38 }
 0xddf   : > { %v4479_v58 = vadd.f32 1e-05, %v4477_v19 }
 0xde1   : > { %10923 = vrsqrt.f32 %v4479_v58 }
 0xdeb   : > { %v10924_v7 = vpop.eup %10923 }
 0xdec   : > { %v4484_v61 = vsel %vm16330_vm15, %v10924_v7, %v10922_v20 }
 0xded   : > { %10438 = vmatmul.mubr.msk.f32.vlgmr.msra.gmra.mrb[40].mxu1 %vm16331_vm1, %v4484_v61 }
 0xec0   : > { %v4553_v24 = vpop.f32.mrb[40].mxu1 }
 0xec1   : > { %v4561_v9 = vmul.f32 %v9848_v29, %v4553_v24  ;;  %v10439_v63 = vpop.f32.mrb[41].mxu1 }
 0xec3   : > { %v4569_v2 = vrot.slane %v4561_v9, %v16523_v47 }
 0xec5   : > { %v4570_v3 = vcombine.high %v4569_v2, %v4569_v2  ;;  %v4577_v4 = vrot.slane %v4569_v2, %v16523_v47 }
 0xec7   : > { %v4584_v56 = vrot.slane %v4570_v3, %v16523_v47  ;;  %v4588_v42 = vrot.slane %v4577_v4, %v16524_v34 }
 0xec9   : > { %v4592_v49 = vrot.slane %v4584_v56, %v16524_v34  ;;  %v4595_v50 = vmul.f32 %v4588_v42, %v13425_v53  ;;  %v4596_v25 = vmul.f32 %v4588_v42, %v13428_v11  ;;  %v4597_v6 = vmul.f32 %v4588_v42, %v13431_v57  ;;  %v10857_v34 = vld [vmem:[%s16552_s16 + $0x88] sm:$0xff]  }
 0xeca   : > { %v4598_v16 = vmul.f32 %v4588_v42, %v13434_v39  ;;  %v4599_v18 = vmul.f32 %v4588_v42, %v13437_v30  ;;  %v4600_v46 = vmul.f32 %v4588_v42, %v13440_v40 }
 0xecb   : > { %v4603_v33 = vmul.f32 %v4592_v49, %v13456_v8  ;;  %v4610_v14 = vmul.f32 %v4592_v49, %v13479_v5  ;;  %v4601_v8 = vmul.f32 %v4588_v42, %v13443_v62  ;;  %v4602_v5 = vmul.f32 %v4588_v42, %v13450_v60 }
 0xecc   : > { %v4604_v13 = vmul.f32 %v4592_v49, %v13459_v23  ;;  %v4605_v53 = vmul.f32 %v4592_v49, %v13462_v37  ;;  %v4606_v11 = vmul.f32 %v4592_v49, %v13466_v28  ;;  %v4607_v57 = vmul.f32 %v4592_v49, %v13469_v10 }
 0xecd   : > { %v4623_v26 = vadd.f32 %v9849_v1, %v4603_v33  ;;  %v13562_v59 = vadd.f32 %v9849_v1, %v4610_v14  ;;  %v4615_v17 = vadd.f32 %v9849_v1, %v4595_v50  ;;  %v4616_v39 = vadd.f32 %v9849_v1, %v4596_v25 }
 0xece   : > { %v4617_v44 = vadd.f32 %v9849_v1, %v4597_v6  ;;  %v4618_v30 = vadd.f32 %v9849_v1, %v4598_v16  ;;  %v4619_v43 = vadd.f32 %v9849_v1, %v4599_v18  ;;  %v4620_v40 = vadd.f32 %v9849_v1, %v4600_v46 }
 0xecf   : > { %v4621_v55 = vadd.f32 %v9849_v1, %v4601_v8  ;;  %v4622_v62 = vadd.f32 %v9849_v1, %v4602_v5  ;;  %v4608_v60 = vmul.f32 %v4592_v49, %v13472_v35  ;;  %v4624_v52 = vadd.f32 %v9849_v1, %v4604_v13 }
 0xed0   : > { %v4625_v15 = vadd.f32 %v9849_v1, %v4605_v53  ;;  %v4609_v23 = vmul.f32 %v4592_v49, %v13475_v31  ;;  %v4626_v0 = vadd.f32 %v9849_v1, %v4606_v11  ;;  %v4627_v37 = vadd.f32 %v9849_v1, %v4607_v57 }
 0xed1   : > { %v13570_v48 = vmul.f32 0.5, %v4615_v17  ;;  %v13572_v28 = vmul.f32 0.5, %v4616_v39  ;;  %v13574_v10 = vmul.f32 0.5, %v4617_v44  ;;  %v13576_v41 = vmul.f32 0.5, %v4618_v30 }
 0xed2   : > { %v13578_v38 = vmul.f32 0.5, %v4619_v43  ;;  %v13580_v12 = vmul.f32 0.5, %v4620_v40  ;;  %v13582_v19 = vmul.f32 0.5, %v4621_v55  ;;  %v13584_v35 = vmul.f32 0.5, %v4622_v62 }
 0xed3   : > { %16526 = vst [vmem:[#allocation39_spill] sm:$0xff] %v13570_v48  ;;  %16527 = vst [vmem:[#allocation42_spill] sm:$0xff] %v13572_v28  ;;  %v13586_v58 = vmul.f32 0.70710677, %v4615_v17  ;;  %v13588_v31 = vmul.f32 0.5, %v4623_v26  ;;  %v13590_v20 = vmul.f32 0.5, %v4624_v52  ;;  %v13596_v29 = vadd.f32 %v9849_v1, %v4608_v60 }
 0xed4   : > { %16528 = vst [vmem:[#allocation43_spill] sm:$0xff] %v13574_v10  ;;  %16529 = vst [vmem:[#allocation57_spill] sm:$0xff] %v13576_v41  ;;  %v13592_v7 = vmul.f32 0.5, %v4625_v15  ;;  %v13594_v61 = vmul.f32 0.70710677, %v4616_v39  ;;  %v13604_v2 = vadd.f32 %v9849_v1, %v4609_v23  ;;  %v13689_v47 = vmul.f32 0.5, %v4626_v0 }
 0xed5   : > { %16530 = vst [vmem:[#allocation40_spill] sm:$0xff] %v13578_v38  ;;  %16531 = vst [vmem:[#allocation41_spill] sm:$0xff] %v13580_v12  ;;  %v13598_v24 = vmul.f32 0.70710677, %v4617_v44  ;;  %v13600_v9 = vmul.f32 0.70710677, %v4618_v30 }
 0xed6   : > { %16532 = vst [vmem:[#allocation60_spill] sm:$0xff] %v13582_v19  ;;  %16533 = vst [vmem:[#allocation45_spill] sm:$0xff] %v13584_v35  ;;  %v13602_v63 = vmul.f32 0.70710677, %v4619_v43  ;;  %v13606_v3 = vmul.f32 0.70710677, %v4620_v40 }
 0xed7   : > { %16534 = vst [vmem:[#allocation46_spill] sm:$0xff] %v13588_v31  ;;  %16535 = vst [vmem:[#allocation35_spill] sm:$0xff] %v13590_v20  ;;  %v13608_v4 = vmul.f32 0.70710677, %v4621_v55  ;;  %v13610_v56 = vmul.f32 0.70710677, %v4622_v62 }
 0xed8   : > { %16536 = vst [vmem:[#allocation44_spill] sm:$0xff] %v13592_v7  ;;  %16537 = vst [vmem:[#allocation62_spill] sm:$0xff] %v13598_v24  ;;  %v13612_v49 = vmul.f32 0.70710677, %v4623_v26  ;;  %v13614_v42 = vmul.f32 0.70710677, %v4624_v52 }
 0xed9   : > { %16538 = vst [vmem:[#allocation63_spill] sm:$0xff] %v13600_v9  ;;  %16539 = vst [vmem:[#allocation51_spill] sm:$0xff] %v13602_v63  ;;  %v13617_v33 = vand.u32 2147483647, %v13586_v58  ;;  %v13619_v14 = vmul.f32 0.70710677, %v4625_v15 }
 0xeda   : > { %16540 = vst [vmem:[#allocation52_spill] sm:$0xff] %v13606_v3  ;;  %16541 = vst [vmem:[#allocation49_spill] sm:$0xff] %v13608_v4  ;;  %v13621_v50 = vmul.f32 0.70710677, %v4626_v0  ;;  %v13624_v1 = vand.u32 2147483647, %v13594_v61 }
 0xedb   : > { %16542 = vst [vmem:[#allocation50_spill] sm:$0xff] %v13610_v56  ;;  %16543 = vst [vmem:[#allocation47_spill] sm:$0xff] %v13612_v49  ;;  %v13626_v25 = vmul.f32 0.70710677, %v4627_v37  ;;  %v13629_v6 = vmul.f32 0.70710677, %v13596_v29 }
 0xedc   : > { %16544 = vst [vmem:[#allocation48_spill] sm:$0xff] %v13614_v42  ;;  %16545 = vst [vmem:[#allocation31_spill] sm:$0xff] %v13619_v14  ;;  %v13632_v26 = vand.u32 2147483647, %v13598_v24  ;;  %v13635_v16 = vmul.f32 0.70710677, %v13604_v2 }
 0xedd   : > { %16546 = vst [vmem:[#allocation32_spill] sm:$0xff] %v13621_v50  ;;  %16547 = vst [vmem:[#allocation55_spill] sm:$0xff] %v13626_v25  ;;  %v13638_v18 = vmul.f32 0.70710677, %v13562_v59  ;;  %v13641_v46 = vand.u32 2147483647, %v13600_v9 }
 0xede   : > { %16548 = vst [vmem:[#allocation56_spill] sm:$0xff] %v13629_v6  ;;  %16549 = vst [vmem:[#allocation65_spill] sm:$0xff] %v13635_v16  ;;  %v13644_v8 = vand.u32 2147483647, %v13602_v63  ;;  %v13647_v5 = vand.u32 2147483647, %v13606_v3 }
 0xedf   : > { %16550 = vst [vmem:[#allocation53_spill] sm:$0xff] %v13638_v18  ;;  %v4679_v13 = vmul.f32 0.3275911, %v13617_v33  ;;  %v13651_v53 = vand.u32 2147483647, %v13608_v4  ;;  %v10856_v52 = vld [vmem:[%s16551_s26 + $0x80] sm:$0xff]  }
 0xee0   : > { %v13654_v11 = vand.u32 2147483647, %v13610_v56  ;;  %v4680_v57 = vmul.f32 0.3275911, %v13624_v1  ;;  %v13658_v17 = vand.u32 2147483647, %v13612_v49  ;;  %10440 = vmatprep.subr.bf16.mxu1 %v10856_v52 }
 0xee1   : > { %v13661_v39 = vand.u32 2147483647, %v13614_v42  ;;  %v4681_v44 = vmul.f32 0.3275911, %v13632_v26  ;;  %v13665_v30 = vand.u32 2147483647, %v13619_v14  ;;  %10441 = vmatpush3.bf16.msra.mxu1 %v10856_v52 }
 0xee2   : > { %v13668_v43 = vand.u32 2147483647, %v13621_v50  ;;  %v4682_v40 = vmul.f32 0.3275911, %v13641_v46  ;;  %v13672_v55 = vand.u32 2147483647, %v13626_v25  ;;  %10442 = vmatprep.subr.bf16.mxu1 %v10857_v34 }
 0xee3   : > { %v4683_v62 = vmul.f32 0.3275911, %v13644_v8  ;;  %v13675_v60 = vadd.f32 1.0, %v4679_v13  ;;  %v13681_v15 = vand.u32 2147483647, %v13629_v6  ;;  %v13684_v36 = vadd.f32 1.0, %v4680_v57 }
 0xee4   : > { %v4684_v23 = vmul.f32 0.3275911, %v13647_v5  ;;  %16553 = vst [vmem:[#allocation54_spill] sm:$0xff] %v13689_v47  ;;  %v13692_v13 = vand.u32 2147483647, %v13635_v16  ;;  %v13695_v27 = vadd.f32 1.0, %v4681_v44 }
 0xee5   : > { %v4685_v22 = vmul.f32 0.3275911, %v13651_v53  ;;  %v13697_v32 = vmul.f32 0.5, %v4627_v37  ;;  %v13700_v45 = vand.u32 2147483647, %v13638_v18  ;;  %v13703_v51 = vadd.f32 1.0, %v4682_v40  ;;  %10443 = vmatpush3.bf16.msra.mxu1 %v10857_v34 }
 0xee6   : > { %v4686_v57 = vmul.f32 0.3275911, %v13654_v11  ;;  %v4687_v0 = vmul.f32 0.3275911, %v13658_v17  ;;  %v4688_v47 = vmul.f32 0.3275911, %v13661_v39  ;;  %10925 = vrcp.f32 %v13675_v60  ;;  %10682 = vmatprep.subr.bf16.mxu1 %v13169_v54 }
 0xee7   : > { %16554 = vst [vmem:[#allocation59_spill] sm:$0xff] %v13697_v32  ;;  %v13707_v7 = vadd.f32 1.0, %v4683_v62  ;;  %v4689_v37 = vmul.f32 0.3275911, %v13665_v30  ;;  %v4690_v44 = vmul.f32 0.3275911, %v13668_v43  ;;  %10927 = vrcp.f32 %v13684_v36 }
 0xee8   : > { %v13712_v32 = vadd.f32 1.0, %v4684_v23  ;;  %v4691_v40 = vmul.f32 0.3275911, %v13672_v55  ;;  %v4692_v52 = vmul.f32 0.3275911, %v13681_v15  ;;  %v13717_v20 = vadd.f32 1.0, %v4685_v22 }
 0xee9   : > { %10929 = vrcp.f32 %v13695_v27  ;;  %v4693_v62 = vmul.f32 0.3275911, %v13692_v13  ;;  %v4694_v31 = vmul.f32 0.3275911, %v13700_v45  ;;  %v13722_v35 = vadd.f32 1.0, %v4686_v57 }
 0xeea   : > { %10931 = vrcp.f32 %v13703_v51  ;;  %v13726_v23 = vmul.f32 0.5, %v13596_v29  ;;  %v13729_v19 = vmul.f32 0.5, %v13604_v2  ;;  %v13731_v12 = vadd.f32 1.0, %v4687_v0 }
 0xeeb   : > { %10933 = vrcp.f32 %v13707_v7  ;;  %v13736_v22 = vmul.f32 0.5, %v13562_v59  ;;  %v13738_v57 = vadd.f32 1.0, %v4688_v47  ;;  %v13740_v10 = vadd.f32 1.0, %v4689_v37 }
 0xeec   : > { %16555 = vst [vmem:[#allocation61_spill] sm:$0xff] %v13726_v23  ;;  %16556 = vst [vmem:[#allocation66_spill] sm:$0xff] %v13729_v19  ;;  %10935 = vrcp.f32 %v13712_v32  ;;  %v13743_v34 = vadd.f32 1.0, %v4690_v44  ;;  %v13745_v29 = vadd.f32 1.0, %v4691_v40  ;;  %v13747_v2 = vadd.f32 1.0, %v4692_v52 }
 0xeed   : > { %16557 = vst [vmem:[#allocation67_spill] sm:$0xff] %v13736_v22  ;;  %10937 = vrcp.f32 %v13717_v20  ;;  %v13750_v0 = vadd.f32 1.0, %v4693_v62  ;;  %v13752_v54 = vadd.f32 1.0, %v4694_v31  ;;  %v4919_v47 = vsub.f32 0.0, %v13617_v33 }
 0xeee   : > { %10939 = vrcp.f32 %v13722_v35  ;;  %v4920_v59 = vsub.f32 0.0, %v13624_v1  ;;  %v4921_v37 = vsub.f32 0.0, %v13632_v26  ;;  %v4922_v44 = vsub.f32 0.0, %v13641_v46 }
 0xeef   : > { %10941 = vrcp.f32 %v13731_v12  ;;  %v4923_v40 = vsub.f32 0.0, %v13644_v8  ;;  %v4924_v52 = vsub.f32 0.0, %v13647_v5  ;;  %v4925_v31 = vsub.f32 0.0, %v13651_v53 }
 0xef0   : > { %10943 = vrcp.f32 %v13738_v57  ;;  %v10926_v62 = vpop.eup %10925  ;;  %v4926_v22 = vsub.f32 0.0, %v13654_v11  ;;  %v4927_v19 = vsub.f32 0.0, %v13658_v17  ;;  %v4928_v23 = vsub.f32 0.0, %v13661_v39 }
 0xef1   : > { %10945 = vrcp.f32 %v13740_v10  ;;  %v10928_v28 = vpop.eup %10927  ;;  %v4929_v38 = vsub.f32 0.0, %v13665_v30  ;;  %v4727_v14 = vmul.f32 %v10926_v62, %v13675_v60  ;;  %v4935_v41 = vmul.f32 %v4919_v47, %v13617_v33 }
 0xef2   : > { %10947 = vrcp.f32 %v13743_v34  ;;  %v4936_v48 = vmul.f32 %v4920_v59, %v13624_v1  ;;  %v4728_v49 = vmul.f32 %v10928_v28, %v13684_v36  ;;  %v4937_v16 = vmul.f32 %v4921_v37, %v13632_v26 }
 0xef3   : > { %v13772_v18 = vpop.eup %10929  ;;  %10949 = vrcp.f32 %v13745_v29  ;;  %v4938_v6 = vmul.f32 %v4922_v44, %v13641_v46  ;;  %v4939_v56 = vmul.f32 %v4923_v40, %v13644_v8  ;;  %v4940_v60 = vmul.f32 %v4924_v52, %v13647_v5 }
 0xef4   : > { %v13778_v50 = vpop.eup %10931  ;;  %10951 = vrcp.f32 %v13747_v2  ;;  %v13792_v33 = vmul.f32 %v4925_v31, %v13651_v53  ;;  %v4729_v47 = vmul.f32 %v13772_v18, %v13695_v27  ;;  %v13797_v36 = vmul.f32 %v4926_v22, %v13654_v11 }
 0xef5   : > { %v10934_v42 = vpop.eup %10933  ;;  %10953 = vrcp.f32 %v13750_v0  ;;  %v13800_v26 = vmul.f32 %v4927_v19, %v13658_v17  ;;  %v13803_v46 = vmul.f32 %v4928_v23, %v13661_v39  ;;  %v4730_v8 = vmul.f32 %v13778_v50, %v13703_v51 }
 0xef6   : > { %v10936_v25 = vpop.eup %10935  ;;  %10955 = vrcp.f32 %v13752_v54  ;;  %v4743_v5 = vsub.f32 2.0, %v4727_v14  ;;  %v13808_v53 = vmul.f32 %v4929_v38, %v13665_v30  ;;  %v13810_v37 = vmul.f32 1.442695, %v4935_v41 }
 0xef7   : > { %v10938_v1 = vpop.eup %10937  ;;  %v4731_v11 = vmul.f32 %v10934_v42, %v13707_v7  ;;  %v4732_v22 = vmul.f32 %v10936_v25, %v13712_v32  ;;  %v4744_v19 = vsub.f32 2.0, %v4728_v49  ;;  %v13814_v17 = vmul.f32 1.442695, %v4936_v48 }
 0xef8   : > { %v10940_v59 = vpop.eup %10939  ;;  %v4733_v23 = vmul.f32 %v10938_v1, %v13717_v20  ;;  %v13819_v14 = vmul.f32 1.442695, %v4937_v16  ;;  %v4745_v30 = vsub.f32 2.0, %v4729_v47  ;;  %v13822_v40 = vmul.f32 1.442695, %v4938_v6 }
 0xef9   : > { %v10942_v27 = vpop.eup %10941  ;;  %v4734_v44 = vmul.f32 %v10940_v59, %v13722_v35  ;;  %v13824_v7 = vmul.f32 1.442695, %v4939_v56  ;;  %v4746_v49 = vsub.f32 2.0, %v4730_v8  ;;  %v13827_v52 = vmul.f32 %v10926_v62, %v4743_v5 }
 0xefa   : > { %v10944_v39 = vpop.eup %10943  ;;  %v4735_v51 = vmul.f32 %v10942_v27, %v13731_v12  ;;  %v13829_v20 = vmul.f32 1.442695, %v4940_v60  ;;  %v4747_v16 = vsub.f32 2.0, %v4731_v11  ;;  %v4748_v31 = vsub.f32 2.0, %v4732_v22 }
 0xefb   : > { %v10946_v38 = vpop.eup %10945  ;;  %v4736_v41 = vmul.f32 %v10944_v39, %v13738_v57  ;;  %v13832_v4 = vmul.f32 %v10928_v28, %v4744_v19  ;;  %v4749_v56 = vsub.f32 2.0, %v4733_v23  ;;  %v4750_v47 = vsub.f32 2.0, %v4734_v44 }
 0xefc   : > { %v10948_v32 = vpop.eup %10947  ;;  %v4737_v48 = vmul.f32 %v10946_v38, %v13740_v10  ;;  %v4751_v3 = vsub.f32 2.0, %v4735_v51  ;;  %v13837_v60 = vmul.f32 %v13772_v18, %v4745_v30  ;;  %v13841_v22 = vmul.f32 %v13778_v50, %v4746_v49 }
 0xefd   : > { %v10950_v35 = vpop.eup %10949  ;;  %v4738_v12 = vmul.f32 %v10948_v32, %v13743_v34  ;;  %v4752_v62 = vsub.f32 2.0, %v4736_v41  ;;  %v13844_v23 = vmul.f32 %v10934_v42, %v4747_v16  ;;  %v13846_v44 = vmul.f32 %v10936_v25, %v4748_v31 }
 0xefe   : > { %v10952_v57 = vpop.eup %10951  ;;  %v4739_v6 = vmul.f32 %v10950_v35, %v13745_v29  ;;  %v4753_v8 = vsub.f32 2.0, %v4737_v48  ;;  %v13848_v51 = vmul.f32 %v10938_v1, %v4749_v56  ;;  %v13850_v18 = vmul.f32 %v10940_v59, %v4750_v47 }
 0xeff   : > { %v10954_v63 = vpop.eup %10953  ;;  %v4740_v10 = vmul.f32 %v10952_v57, %v13747_v2  ;;  %v4754_v11 = vsub.f32 2.0, %v4738_v12  ;;  %v13852_v41 = vmul.f32 %v10942_v27, %v4751_v3  ;;  %v13854_v30 = vmul.f32 %v10944_v39, %v4752_v62 }
 0xf00   : > { %v10956_v5 = vpop.eup %10955  ;;  %v4741_v34 = vmul.f32 %v10954_v63, %v13750_v0  ;;  %v4755_v28 = vsub.f32 2.0, %v4739_v6  ;;  %v13856_v48 = vmul.f32 %v10946_v38, %v4753_v8  ;;  %v4775_v50 = vmul.f32 1.0614054, %v13827_v52 }
 0xf01   : > { %v4742_v29 = vmul.f32 %v10956_v5, %v13752_v54  ;;  %v4756_v19 = vsub.f32 2.0, %v4740_v10  ;;  %v13859_v54 = vmul.f32 %v10948_v32, %v4754_v11  ;;  %v4776_v25 = vmul.f32 1.0614054, %v13832_v4 }
 0xf02   : > { %v4757_v2 = vsub.f32 2.0, %v4741_v34  ;;  %v13861_v42 = vmul.f32 %v10950_v35, %v4755_v28  ;;  %v4777_v1 = vmul.f32 1.0614054, %v13837_v60  ;;  %v4778_v3 = vmul.f32 1.0614054, %v13841_v22 }
 0xf03   : > { %v4758_v0 = vsub.f32 2.0, %v4742_v29  ;;  %v13865_v49 = vmul.f32 %v10952_v57, %v4756_v19  ;;  %v4779_v59 = vmul.f32 1.0614054, %v13844_v23  ;;  %v4780_v27 = vmul.f32 1.0614054, %v13846_v44 }
 0xf04   : > { %v13870_v39 = vmul.f32 %v10954_v63, %v4757_v2  ;;  %v4781_v38 = vmul.f32 1.0614054, %v13848_v51  ;;  %v4782_v32 = vmul.f32 1.0614054, %v13850_v18  ;;  %v4783_v35 = vmul.f32 1.0614054, %v13852_v41 }
 0xf05   : > { %v13875_v12 = vmul.f32 %v10956_v5, %v4758_v0  ;;  %v4784_v16 = vmul.f32 1.0614054, %v13854_v30  ;;  %v4785_v31 = vmul.f32 1.0614054, %v13856_v48  ;;  %v4791_v57 = vadd.f32 -1.4531521, %v4775_v50 }
 0xf06   : > { %v4786_v6 = vmul.f32 1.0614054, %v13859_v54  ;;  %v4787_v56 = vmul.f32 1.0614054, %v13861_v42  ;;  %v4792_v47 = vadd.f32 -1.4531521, %v4776_v25  ;;  %10957 = vpow2.f32 %v13810_v37 }
 0xf07   : > { %v16558_v63 = vsub.f32 0.0, %v13668_v43  ;;  %v4788_v62 = vmul.f32 1.0614054, %v13865_v49  ;;  %v4793_v8 = vadd.f32 -1.4531521, %v4777_v1  ;;  %v16559_v34 = vsub.f32 0.0, %v13672_v55 }
 0xf08   : > { %v4794_v5 = vadd.f32 -1.4531521, %v4778_v3  ;;  %v4789_v28 = vmul.f32 1.0614054, %v13870_v39  ;;  %v4795_v29 = vadd.f32 -1.4531521, %v4779_v59  ;;  %v4808_v21 = vmul.f32 %v4792_v47, %v13832_v4 }
 0xf09   : > { %v13884_v10 = vmul.f32 %v16558_v63, %v13668_v43  ;;  %v13890_v11 = vmul.f32 %v16559_v34, %v13672_v55  ;;  %v4796_v19 = vadd.f32 -1.4531521, %v4780_v27  ;;  %v16560_v2 = vsub.f32 0.0, %v13681_v15 }
 0xf0a   : > { %v4790_v43 = vmul.f32 1.0614054, %v13875_v12  ;;  %v4797_v50 = vadd.f32 -1.4531521, %v4781_v38  ;;  %v4798_v25 = vadd.f32 -1.4531521, %v4782_v32  ;;  %v4807_v32 = vmul.f32 %v4791_v57, %v13827_v52 }
 0xf0b   : > { %v13896_v0 = vmul.f32 %v16560_v2, %v13681_v15  ;;  %v16561_v1 = vsub.f32 0.0, %v13692_v13  ;;  %v4799_v55 = vadd.f32 -1.4531521, %v4783_v35  ;;  %v4800_v63 = vadd.f32 -1.4531521, %v4784_v16 }
 0xf0c   : > { %v4801_v34 = vadd.f32 -1.4531521, %v4785_v31  ;;  %v16562_v59 = vsub.f32 0.0, %v13700_v45  ;;  %v4802_v9 = vadd.f32 -1.4531521, %v4786_v6  ;;  %v4810_v16 = vmul.f32 %v4794_v5, %v13841_v22 }
 0xf0d   : > { %v13902_v3 = vmul.f32 %v16561_v1, %v13692_v13  ;;  %v4803_v15 = vadd.f32 -1.4531521, %v4787_v56  ;;  %v4804_v2 = vadd.f32 -1.4531521, %v4788_v62  ;;  %v4805_v38 = vadd.f32 -1.4531521, %v4789_v28 }
 0xf0e   : > { %v13907_v27 = vmul.f32 %v16562_v59, %v13700_v45  ;;  %v4809_v13 = vmul.f32 %v4793_v8, %v13837_v60  ;;  %v4806_v35 = vadd.f32 -1.4531521, %v4790_v43  ;;  %v4811_v31 = vmul.f32 %v4795_v29, %v13844_v23 }
 0xf0f   : > { %v4812_v45 = vmul.f32 %v4796_v19, %v13846_v44  ;;  %v4813_v6 = vmul.f32 %v4797_v50, %v13848_v51  ;;  %v4814_v56 = vmul.f32 %v4798_v25, %v13850_v18  ;;  %v4815_v37 = vmul.f32 %v4799_v55, %v13852_v41 }
 0xf10   : > { %v4816_v62 = vmul.f32 %v4800_v63, %v13854_v30  ;;  %v4817_v57 = vmul.f32 %v4801_v34, %v13856_v48  ;;  %v4818_v47 = vmul.f32 %v4802_v9, %v13859_v54  ;;  %v4819_v8 = vmul.f32 %v4803_v15, %v13861_v42 }
 0xf11   : > { %v4820_v5 = vmul.f32 %v4804_v2, %v13865_v49  ;;  %v4821_v28 = vmul.f32 %v4805_v38, %v13870_v39  ;;  %v4823_v29 = vadd.f32 1.4214138, %v4807_v32  ;;  %v4824_v19 = vadd.f32 1.4214138, %v4808_v21 }
 0xf12   : > { %v4825_v43 = vadd.f32 1.4214138, %v4809_v13  ;;  %v4822_v50 = vmul.f32 %v4806_v35, %v13875_v12  ;;  %v4826_v25 = vadd.f32 1.4214138, %v4810_v16  ;;  %v4827_v1 = vadd.f32 1.4214138, %v4811_v31  ;;  %v13930_v13 = vpop.eup %10957 }
 0xf13   : > { %v4828_v55 = vadd.f32 1.4214138, %v4812_v45  ;;  %v4829_v59 = vadd.f32 1.4214138, %v4813_v6  ;;  %v4830_v63 = vadd.f32 1.4214138, %v4814_v56  ;;  %10959 = vpow2.f32 %v13814_v17 }
 0xf14   : > { %v4831_v24 = vadd.f32 1.4214138, %v4815_v37  ;;  %v4832_v9 = vadd.f32 1.4214138, %v4816_v62  ;;  %v4833_v34 = vadd.f32 1.4214138, %v4817_v57  ;;  %10961 = vpow2.f32 %v13819_v14 }
 0xf15   : > { %v4834_v15 = vadd.f32 1.4214138, %v4818_v47  ;;  %v4835_v2 = vadd.f32 1.4214138, %v4819_v8  ;;  %v4836_v38 = vadd.f32 1.4214138, %v4820_v5  ;;  %v4839_v21 = vmul.f32 %v4823_v29, %v13827_v52 }
 0xf16   : > { %v4840_v32 = vmul.f32 %v4824_v19, %v13832_v4  ;;  %v4837_v35 = vadd.f32 1.4214138, %v4821_v28  ;;  %v4841_v16 = vmul.f32 %v4825_v43, %v13837_v60  ;;  %v4842_v31 = vmul.f32 %v4826_v25, %v13841_v22 }
 0xf17   : > { %v4843_v17 = vmul.f32 %v4827_v1, %v13844_v23  ;;  %v4838_v45 = vadd.f32 1.4214138, %v4822_v50  ;;  %v4844_v6 = vmul.f32 %v4828_v55, %v13846_v44  ;;  %v4845_v14 = vmul.f32 %v4829_v59, %v13848_v51 }
 0xf18   : > { %v4846_v56 = vmul.f32 %v4830_v63, %v13850_v18  ;;  %v4847_v37 = vmul.f32 %v4831_v24, %v13852_v41  ;;  %v4848_v62 = vmul.f32 %v4832_v9, %v13854_v30  ;;  %v4849_v57 = vmul.f32 %v4833_v34, %v13856_v48 }
 0xf19   : > { %v4850_v47 = vmul.f32 %v4834_v15, %v13859_v54  ;;  %v4851_v8 = vmul.f32 %v4835_v2, %v13861_v42  ;;  %v4852_v5 = vmul.f32 %v4836_v38, %v13865_v49  ;;  %v4855_v28 = vadd.f32 -0.28449672, %v4839_v21 }
 0xf1a   : > { %v4856_v29 = vadd.f32 -0.28449672, %v4840_v32  ;;  %v4853_v19 = vmul.f32 %v4837_v35, %v13870_v39  ;;  %v4857_v43 = vadd.f32 -0.28449672, %v4841_v16  ;;  %v4858_v50 = vadd.f32 -0.28449672, %v4842_v31 }
 0xf1b   : > { %v4859_v25 = vadd.f32 -0.28449672, %v4843_v17  ;;  %v4854_v1 = vmul.f32 %v4838_v45, %v13875_v12  ;;  %v4860_v24 = vadd.f32 -0.28449672, %v4844_v6  ;;  %v4861_v55 = vadd.f32 -0.28449672, %v4845_v14 }
 0xf1c   : > { %v4862_v59 = vadd.f32 -0.28449672, %v4846_v56  ;;  %v4863_v63 = vadd.f32 -0.28449672, %v4847_v37  ;;  %v4864_v9 = vadd.f32 -0.28449672, %v4848_v62  ;;  %10963 = vpow2.f32 %v13822_v40 }
 0xf1d   : > { %v4865_v34 = vadd.f32 -0.28449672, %v4849_v57  ;;  %v13947_v15 = vpop.eup %10959  ;;  %v4866_v2 = vadd.f32 -0.28449672, %v4850_v47  ;;  %v4867_v38 = vadd.f32 -0.28449672, %v4851_v8  ;;  %v4871_v32 = vmul.f32 %v4855_v28, %v13827_v52 }
 0xf1e   : > { %v4868_v21 = vadd.f32 -0.28449672, %v4852_v5  ;;  %v13950_v35 = vpop.eup %10961  ;;  %v4869_v16 = vadd.f32 -0.28449672, %v4853_v19  ;;  %v4872_v31 = vmul.f32 %v4856_v29, %v13832_v4  ;;  %v4873_v17 = vmul.f32 %v4857_v43, %v13837_v60 }
 0xf1f   : > { %v4874_v45 = vmul.f32 %v4858_v50, %v13841_v22  ;;  %v4870_v6 = vadd.f32 -0.28449672, %v4854_v1  ;;  %v4875_v14 = vmul.f32 %v4859_v25, %v13844_v23  ;;  %v4876_v40 = vmul.f32 %v4860_v24, %v13846_v44 }
 0xf20   : > { %v4877_v56 = vmul.f32 %v4861_v55, %v13848_v51  ;;  %v4878_v37 = vmul.f32 %v4862_v59, %v13850_v18  ;;  %v4879_v62 = vmul.f32 %v4863_v63, %v13852_v41  ;;  %v4880_v57 = vmul.f32 %v4864_v9, %v13854_v30 }
 0xf21   : > { %v4881_v47 = vmul.f32 %v4865_v34, %v13856_v48  ;;  %v4882_v8 = vmul.f32 %v4866_v2, %v13859_v54  ;;  %v4883_v5 = vmul.f32 %v4867_v38, %v13861_v42  ;;  %v4884_v28 = vmul.f32 %v4868_v21, %v13865_v49 }
 0xf22   : > { %v4887_v29 = vadd.f32 0.2548296, %v4871_v32  ;;  %v4885_v19 = vmul.f32 %v4869_v16, %v13870_v39  ;;  %v4888_v43 = vadd.f32 0.2548296, %v4872_v31  ;;  %v4889_v50 = vadd.f32 0.2548296, %v4873_v17 }
 0xf23   : > { %v4890_v25 = vadd.f32 0.2548296, %v4874_v45  ;;  %v4886_v1 = vmul.f32 %v4870_v6, %v13875_v12  ;;  %v4891_v24 = vadd.f32 0.2548296, %v4875_v14  ;;  %v4892_v55 = vadd.f32 0.2548296, %v4876_v40 }
 0xf24   : > { %v4893_v59 = vadd.f32 0.2548296, %v4877_v56  ;;  %v4894_v63 = vadd.f32 0.2548296, %v4878_v37  ;;  %v4895_v9 = vadd.f32 0.2548296, %v4879_v62  ;;  %10965 = vpow2.f32 %v13824_v7 }
 0xf25   : > { %v4896_v34 = vadd.f32 0.2548296, %v4880_v57  ;;  %v4903_v2 = vmul.f32 %v4887_v29, %v13827_v52  ;;  %v4963_v38 = vmul.f32 1.442695, %v13792_v33  ;;  %v4965_v21 = vmul.f32 1.442695, %v13797_v36 }
 0xf26   : > { %v4967_v32 = vmul.f32 1.442695, %v13800_v26  ;;  %v10964_v16 = vpop.eup %10963  ;;  %v4897_v31 = vadd.f32 0.2548296, %v4881_v47  ;;  %v4904_v17 = vmul.f32 %v4888_v43, %v13832_v4  ;;  %10967 = vpow2.f32 %v13829_v20 }
 0xf27   : > { %v4969_v45 = vmul.f32 1.442695, %v13803_v46  ;;  %v4898_v6 = vadd.f32 0.2548296, %v4882_v8  ;;  %v4899_v14 = vadd.f32 0.2548296, %v4883_v5  ;;  %10969 = vpow2.f32 %v4963_v38 }
 0xf28   : > { %v4971_v7 = vmul.f32 1.442695, %v13808_v53  ;;  %v4900_v52 = vadd.f32 0.2548296, %v4884_v28  ;;  %v4905_v33 = vmul.f32 %v4889_v50, %v13837_v60  ;;  %10971 = vpow2.f32 %v4965_v21 }
 0xf29   : > { %v4973_v36 = vmul.f32 1.442695, %v13884_v10  ;;  %v4901_v26 = vadd.f32 0.2548296, %v4885_v19  ;;  %v4902_v40 = vadd.f32 0.2548296, %v4886_v1  ;;  %10973 = vpow2.f32 %v4967_v32 }
 0xf2a   : > { %v4975_v4 = vmul.f32 1.442695, %v13890_v11  ;;  %v4906_v20 = vmul.f32 %v4890_v25, %v13841_v22  ;;  %v4907_v46 = vmul.f32 %v4891_v24, %v13844_v23  ;;  %10975 = vpow2.f32 %v4969_v45  ;;  %v16565_v1 = vld [vmem:[#allocation63_spill] sm:$0xff] }
 0xf2b   : > { %v4977_v56 = vmul.f32 1.442695, %v13896_v0  ;;  %v4908_v53 = vmul.f32 %v4892_v55, %v13846_v44  ;;  %v4909_v37 = vmul.f32 %v4893_v59, %v13848_v51  ;;  %10977 = vpow2.f32 %v4971_v7  ;;  %v16566_v24 = vld [vmem:[#allocation51_spill] sm:$0xff] }
 0xf2c   : > { %v4979_v60 = vmul.f32 1.442695, %v13902_v3  ;;  %v4910_v10 = vmul.f32 %v4894_v63, %v13850_v18  ;;  %10979 = vpow2.f32 %v4973_v36  ;;  %v4981_v62 = vmul.f32 1.442695, %v13907_v27  ;;  %v16570_v45 = vld [vmem:[#allocation47_spill] sm:$0xff] }
 0xf2d   : > { %v13988_v11 = vmul.f32 %v13930_v13, %v4903_v2  ;;  %v4911_v22 = vmul.f32 %v4895_v9, %v13852_v41  ;;  %10981 = vpow2.f32 %v4975_v4  ;;  %v13992_v23 = vmul.f32 %v13947_v15, %v4904_v17  ;;  %v16568_v2 = vld [vmem:[#allocation49_spill] sm:$0xff]  ;;  %v16569_v17 = vld [vmem:[#allocation50_spill] sm:$0xff] }
 0xf2e   : > { %v13995_v44 = vmul.f32 %v13950_v35, %v4905_v33  ;;  %v10966_v51 = vpop.eup %10965  ;;  %v4912_v0 = vmul.f32 %v4896_v34, %v13854_v30  ;;  %v4913_v18 = vmul.f32 %v4897_v31, %v13856_v48  ;;  %10983 = vpow2.f32 %v4977_v56  ;;  %v16567_v34 = vld [vmem:[#allocation52_spill] sm:$0xff] }
 0xf2f   : > { %v13999_v3 = vmul.f32 %v10964_v16, %v4906_v20  ;;  %v4914_v27 = vmul.f32 %v4898_v6, %v13859_v54  ;;  %v4915_v13 = vmul.f32 %v4899_v14, %v13861_v42  ;;  %10985 = vpow2.f32 %v4979_v60  ;;  %v16571_v6 = vld [vmem:[#allocation48_spill] sm:$0xff] }
 0xf30   : > { %v14003_v41 = vmul.f32 %v10966_v51, %v4907_v46  ;;  %v10968_v15 = vpop.eup %10967  ;;  %v4916_v57 = vmul.f32 %v4900_v52, %v13865_v49  ;;  %v4917_v35 = vmul.f32 %v4901_v26, %v13870_v39  ;;  %10987 = vpow2.f32 %v4981_v62  ;;  %v16572_v26 = vld [vmem:[#allocation31_spill] sm:$0xff]  ;;  %v16573_v56 = vld [vmem:[#allocation32_spill] sm:$0xff] }
 0xf31   : > { %v4999_v30 = vsub.f32 1.0, %v13988_v11  ;;  %v10970_v47 = vpop.eup %10969  ;;  %v4918_v48 = vmul.f32 %v4902_v40, %v13875_v12  ;;  %v14009_v8 = vmul.f32 %v10968_v15, %v4908_v53  ;;  %v5000_v54 = vsub.f32 1.0, %v13992_v23  ;;  %v16563_v12 = vld [vmem:[#allocation62_spill] sm:$0xff]  ;;  %v16574_v11 = vld [vmem:[#allocation55_spill] sm:$0xff] }
 0xf32   : > { %v5001_v42 = vsub.f32 1.0, %v13995_v44  ;;  %v10972_v5 = vpop.eup %10971  ;;  %v14013_v28 = vmul.f32 %v10970_v47, %v4909_v37  ;;  %v5002_v29 = vsub.f32 1.0, %v13999_v3  ;;  %vm5015_vm2 = vcmp.ge.f32.partialorder %v13586_v58, 0.0 }
 0xf33   : > { %v10974_v49 = vpop.eup %10973  ;;  %v14017_v39 = vmul.f32 %v10972_v5, %v4910_v10  ;;  %v5003_v19 = vsub.f32 1.0, %v14003_v41  ;;  %vm5016_vm5 = vcmp.ge.f32.partialorder %v13594_v61, 0.0  ;;  %vm5017_vm8 = vcmp.ge.f32.partialorder %v16563_v12, 0.0 }
 0xf34   : > { %v16564_v43 = vmov 0   ;;  %v10976_v50 = vpop.eup %10975  ;;  %v14030_v25 = vmul.f32 %v10974_v49, %v4911_v22  ;;  %vm5018_vm10 = vcmp.ge.f32.partialorder %v16565_v1, 0.0  ;;  %vm5019_vm12 = vcmp.ge.f32.partialorder %v16566_v24, 0.0  ;;  %v16575_v22 = vld [vmem:[#allocation56_spill] sm:$0xff] }
 0xf35   : > { %5112 = vst.msk [vmem:[#allocation3] sm:$0xf] %vm16337_vm4, %v16564_v43  ;;  %5115 = vst.msk [vmem:[#allocation3 + $0x50] sm:$0xf] %vm16337_vm4, %v16564_v43  ;;  %v5031_v55 = vsub.f32 0.0, %v4999_v30  ;;  %v10978_v59 = vpop.eup %10977  ;;  %v4992_v63 = vmul.f32 %v10976_v50, %v4912_v0  ;;  %v5004_v9 = vsub.f32 1.0, %v14009_v8 }
 0xf36   : > { %5118 = vst.msk [vmem:[#allocation3 + $0x48] sm:$0xf] %vm16337_vm4, %v16564_v43  ;;  %5120 = vst.msk [vmem:[#allocation3 + $0x98] sm:$0xf] %vm16337_vm4, %v16564_v43  ;;  %vm5020_vm15 = vcmp.ge.f32.partialorder %v16567_v34, 0.0  ;;  %vm5021_vm1 = vcmp.ge.f32.partialorder %v16568_v2, 0.0  ;;  %v10980_v21 = vpop.eup %10979  ;;  %v4993_v32 = vmul.f32 %v10978_v59, %v4913_v18 }
 0xf37   : > { %v5032_v38 = vsub.f32 0.0, %v5000_v54  ;;  %v5005_v16 = vsub.f32 1.0, %v14013_v28  ;;  %v5006_v31 = vsub.f32 1.0, %v14017_v39  ;;  %vm5022_vm0 = vcmp.ge.f32.partialorder %v16569_v17, 0.0  ;;  %v10982_v7 = vpop.eup %10981  ;;  %v16577_v8 = vld [vmem:[#allocation53_spill] sm:$0xff] }
 0xf38   : > { %vm5023_vm11 = vcmp.ge.f32.partialorder %v16570_v45, 0.0  ;;  %v5033_v14 = vsub.f32 0.0, %v5001_v42  ;;  %v4994_v52 = vmul.f32 %v10980_v21, %v4914_v27  ;;  %v5007_v33 = vsub.f32 1.0, %v14030_v25  ;;  %v10984_v4 = vpop.eup %10983 }
 0xf39   : > { %v5008_v36 = vsub.f32 1.0, %v4992_v63  ;;  %v5034_v40 = vsub.f32 0.0, %v5002_v29  ;;  %v4995_v20 = vmul.f32 %v10982_v7, %v4915_v13  ;;  %v5009_v46 = vsub.f32 1.0, %v4993_v32  ;;  %v10986_v60 = vpop.eup %10985  ;;  %v16576_v13 = vld [vmem:[#allocation65_spill] sm:$0xff]  ;;  %v16581_v7 = vld [vmem:[#allocation39_spill] sm:$0xff] }
 0xf3a   : > { %v5035_v53 = vsub.f32 0.0, %v5003_v19  ;;  %v5047_v37 = vsel %vm5015_vm2, %v4999_v30, %v5031_v55  ;;  %v4996_v10 = vmul.f32 %v10984_v4, %v4916_v57  ;;  %v5010_v62 = vsub.f32 1.0, %v4994_v52  ;;  %v10988_v0 = vpop.eup %10987 }
 0xf3b   : > { %vm5027_vm9 = vcmp.ge.f32.partialorder %v16574_v11, 0.0  ;;  %vm5028_vm7 = vcmp.ge.f32.partialorder %v16575_v22, 0.0  ;;  %v5036_v23 = vsub.f32 0.0, %v5004_v9  ;;  %v5048_v51 = vsel %vm5016_vm5, %v5000_v54, %v5032_v38  ;;  %v16587_v22 = vld [vmem:[#allocation60_spill] sm:$0xff] }
 0xf3c   : > { %v4997_v18 = vmul.f32 %v10986_v60, %v4917_v35  ;;  %v5011_v27 = vsub.f32 1.0, %v4995_v20  ;;  %vm5029_vm4 = vcmp.ge.f32.partialorder %v16576_v13, 0.0  ;;  %v5037_v15 = vsub.f32 0.0, %v5005_v16  ;;  %v16584_v20 = vld [vmem:[#allocation42_spill] sm:$0xff] }
 0xf3d   : > { %v5038_v47 = vsub.f32 0.0, %v5006_v31  ;;  %v4998_v58 = vmul.f32 %v10988_v0, %v4918_v48  ;;  %v5012_v30 = vsub.f32 1.0, %v4996_v10  ;;  %vm5030_vm2 = vcmp.ge.f32.partialorder %v16577_v8, 0.0  ;;  %v16588_v0 = vld [vmem:[#allocation45_spill] sm:$0xff] }
 0xf3e   : > { %v5039_v57 = vsub.f32 0.0, %v5007_v33  ;;  %v5040_v5 = vsub.f32 0.0, %v5008_v36  ;;  %v5013_v28 = vsub.f32 1.0, %v4997_v18  ;;  %v5041_v49 = vsub.f32 0.0, %v5009_v46 }
 0xf3f   : > { %v5049_v61 = vsel %vm5017_vm8, %v5001_v42, %v5033_v14  ;;  %v5050_v35 = vsel %vm5018_vm10, %v5002_v29, %v5034_v40  ;;  %v5014_v54 = vsub.f32 1.0, %v4998_v58  ;;  %v5042_v39 = vsub.f32 0.0, %v5010_v62  ;;  %v16591_v58 = vld [vmem:[#allocation44_spill] sm:$0xff] }
 0xf40   : > { %v5051_v48 = vsel %vm5019_vm12, %v5003_v19, %v5035_v53  ;;  %v5063_v50 = vadd.f32 1.0, %v5047_v37  ;;  %v5043_v25 = vsub.f32 0.0, %v5011_v27  ;;  %v5044_v55 = vsub.f32 0.0, %v5012_v30  ;;  %v16586_v37 = vld [vmem:[#allocation41_spill] sm:$0xff] }
 0xf41   : > { %v5052_v44 = vsel %vm5020_vm15, %v5004_v9, %v5036_v23  ;;  %v5053_v42 = vsel %vm5021_vm1, %v5005_v16, %v5037_v15  ;;  %v5045_v3 = vsub.f32 0.0, %v5013_v28  ;;  %v5054_v29 = vsel %vm5022_vm0, %v5006_v31, %v5038_v47  ;;  %v16590_v15 = vld [vmem:[#allocation35_spill] sm:$0xff] }
 0xf42   : > { %v5055_v12 = vsel %vm5023_vm11, %v5007_v33, %v5039_v57  ;;  %vm16578_vm5 = vcmp.ge.f32.partialorder %v16571_v6, 0.0  ;;  %v5046_v19 = vsub.f32 0.0, %v5014_v54  ;;  %vm16579_vm8 = vcmp.ge.f32.partialorder %v16572_v26, 0.0  ;;  %v16582_v33 = vld [vmem:[#allocation57_spill] sm:$0xff]  ;;  %v16583_v26 = vld [vmem:[#allocation40_spill] sm:$0xff] }
 0xf43   : > { %v5056_v41 = vsel %vm16578_vm5, %v5008_v36, %v5040_v5  ;;  %v5057_v1 = vsel %vm16579_vm8, %v5009_v46, %v5041_v49  ;;  %v5066_v24 = vadd.f32 1.0, %v5050_v35  ;;  %v5067_v59 = vadd.f32 1.0, %v5051_v48 }
 0xf44   : > { %vm16580_vm15 = vcmp.ge.f32.partialorder %v16573_v56, 0.0  ;;  %v5064_v9 = vadd.f32 1.0, %v5048_v51  ;;  %v5065_v34 = vadd.f32 1.0, %v5049_v61  ;;  %v5068_v2 = vadd.f32 1.0, %v5052_v44  ;;  %v16585_v56 = vld [vmem:[#allocation43_spill] sm:$0xff] }
 0xf45   : > { %v5058_v63 = vsel %vm16580_vm15, %v5010_v62, %v5042_v39  ;;  %v5059_v38 = vsel %vm5027_vm9, %v5011_v27, %v5043_v25  ;;  %v5060_v21 = vsel %vm5028_vm7, %v5012_v30, %v5044_v55  ;;  %v5069_v32 = vadd.f32 1.0, %v5053_v42  ;;  %v16589_v27 = vld [vmem:[#allocation46_spill] sm:$0xff]  ;;  %v16593_v39 = vld [vmem:[#allocation59_spill] sm:$0xff] }
 0xf46   : > { %v5070_v16 = vadd.f32 1.0, %v5054_v29  ;;  %v5061_v31 = vsel %vm5029_vm4, %v5013_v28, %v5045_v3  ;;  %v5071_v17 = vadd.f32 1.0, %v5055_v12  ;;  %v5072_v45 = vadd.f32 1.0, %v5056_v41  ;;  %v16592_v28 = vld [vmem:[#allocation54_spill] sm:$0xff]  ;;  %v16596_v3 = vld [vmem:[#allocation67_spill] sm:$0xff] }
 0xf47   : > { %v5073_v6 = vadd.f32 1.0, %v5057_v1  ;;  %v5062_v14 = vsel %vm5030_vm2, %v5014_v54, %v5046_v19  ;;  %v5079_v52 = vmul.f32 %v5063_v50, %v16581_v7  ;;  %v5082_v36 = vmul.f32 %v5066_v24, %v16582_v33  ;;  %v16594_v50 = vld [vmem:[#allocation61_spill] sm:$0xff]  ;;  %v16595_v55 = vld [vmem:[#allocation66_spill] sm:$0xff] }
 0xf48   : > { %v5083_v40 = vmul.f32 %v5067_v59, %v16583_v26  ;;  %v5074_v4 = vadd.f32 1.0, %v5058_v63  ;;  %v5080_v46 = vmul.f32 %v5064_v9, %v16584_v20  ;;  %v5081_v53 = vmul.f32 %v5065_v34, %v16585_v56 }
 0xf49   : > { %v5084_v60 = vmul.f32 %v5068_v2, %v16586_v37  ;;  %v5075_v10 = vadd.f32 1.0, %v5059_v38  ;;  %v5076_v62 = vadd.f32 1.0, %v5060_v21  ;;  %v5077_v11 = vadd.f32 1.0, %v5061_v31 }
 0xf4a   : > { %v5085_v23 = vmul.f32 %v5069_v32, %v16587_v22  ;;  %v5078_v51 = vadd.f32 1.0, %v5062_v14  ;;  %v5086_v18 = vmul.f32 %v5070_v16, %v16588_v0  ;;  %v5087_v13 = vmul.f32 %v5071_v17, %v16589_v27 }
 0xf4b   : > { %v5088_v47 = vmul.f32 %v5072_v45, %v16590_v15  ;;  %v5089_v30 = vmul.f32 %v5073_v6, %v16591_v58  ;;  %v14104_v8 = vpack.c.bf16 %v5079_v52, %v5079_v52  ;;  %v5098_v57 = vpack.c.bf16 %v5082_v36, %v5082_v36 }
 0xf4c   : > { %v5099_v5 = vpack.c.bf16 %v5083_v40, %v5083_v40  ;;  %v5090_v49 = vmul.f32 %v5074_v4, %v16592_v28  ;;  %v14107_v61 = vpack.c.bf16 %v5080_v46, %v5080_v46  ;;  %v14109_v35 = vpack.c.bf16 %v5081_v53, %v5081_v53 }
 0xf4d   : > { %v5100_v54 = vpack.c.bf16 %v5084_v60, %v5084_v60  ;;  %v5091_v48 = vmul.f32 %v5075_v10, %v16593_v39  ;;  %v5092_v25 = vmul.f32 %v5076_v62, %v16594_v50  ;;  %v5093_v44 = vmul.f32 %v5077_v11, %v16595_v55 }
 0xf4e   : > { %v5101_v42 = vpack.c.bf16 %v5085_v23, %v5085_v23  ;;  %v5094_v29 = vmul.f32 %v5078_v51, %v16596_v3  ;;  %v5102_v12 = vpack.c.bf16 %v5086_v18, %v5086_v18  ;;  %v14115_v41 = vpack.c.bf16 %v5087_v13, %v5087_v13 }
 0xf4f   : > { %v14117_v19 = vpack.c.bf16 %v5088_v47, %v5088_v47  ;;  %v14119_v1 = vpack.c.bf16 %v5089_v30, %v5089_v30  ;;  %v5123_v24 = vshrl.u32 %v14104_v8, 16  ;;  %v5144_v59 = vshrl.u32 %v5098_v57, 16 }
 0xf50   : > { %v5151_v63 = vshrl.u32 %v5099_v5, 16  ;;  %v14122_v9 = vpack.c.bf16 %v5090_v49, %v5090_v49  ;;  %v5130_v34 = vshrl.u32 %v14107_v61, 16  ;;  %v5137_v2 = vshrl.u32 %v14109_v35, 16 }
 0xf51   : > { %v5158_v38 = vshrl.u32 %v5100_v54, 16  ;;  %v14126_v21 = vpack.c.bf16 %v5091_v48, %v5091_v48  ;;  %v14128_v32 = vpack.c.bf16 %v5092_v25, %v5092_v25  ;;  %v14130_v16 = vpack.c.bf16 %v5093_v44, %v5093_v44 }
 0xf52   : > { %v5165_v31 = vshrl.u32 %v5101_v42, 16  ;;  %v14132_v17 = vpack.c.bf16 %v5094_v29, %v5094_v29  ;;  %v5126_v45 = vshll.u32 %v14104_v8, 16  ;;  %v5133_v6 = vshll.u32 %v14107_v61, 16 }
 0xf53   : > { %v5172_v14 = vshrl.u32 %v5102_v12, 16  ;;  %v5125_v7 = vrot.slane %v5123_v24, 7  ;;  %v5140_v52 = vshll.u32 %v14109_v35, 16  ;;  %v5146_v33 = vrot.slane %v5144_v59, 7 }
 0xf54   : > { %v5153_v36 = vrot.slane %v5151_v63, 7  ;;  %v5132_v26 = vrot.slane %v5130_v34, 7  ;;  %v5139_v40 = vrot.slane %v5137_v2, 7  ;;  %v5147_v4 = vshll.u32 %v5098_v57, 16 }
 0xf55   : > { %v5160_v20 = vrot.slane %v5158_v38, 7  ;;  %v5154_v46 = vshll.u32 %v5099_v5, 16  ;;  %v5167_v56 = vrot.slane %v5165_v31, 7  ;;  %v5174_v53 = vrot.slane %v5172_v14, 7 }
 0xf56   : > { %v5179_v37 = vshrl.u32 %v14115_v41, 16  ;;  %v5161_v60 = vshll.u32 %v5100_v54, 16  ;;  %v5168_v10 = vshll.u32 %v5101_v42, 16  ;;  %v5186_v62 = vshrl.u32 %v14117_v19, 16 }
 0xf57   : > { %v5193_v11 = vshrl.u32 %v14119_v1, 16  ;;  %v5149_v22 = vor.u32 %v5147_v4, %v5146_v33  ;;  %v5156_v23 = vor.u32 %v5154_v46, %v5153_v36  ;;  %v5175_v51 = vshll.u32 %v5102_v12, 16 }
 0xf58   : > { %v5200_v0 = vshrl.u32 %v14122_v9, 16  ;;  %v5163_v18 = vor.u32 %v5161_v60, %v5160_v20  ;;  %v5207_v13 = vshrl.u32 %v14126_v21, 16  ;;  %v5214_v15 = vshrl.u32 %v14128_v32, 16 }
 0xf59   : > { %v5170_v47 = vor.u32 %v5168_v10, %v5167_v56  ;;  %v5177_v58 = vor.u32 %v5175_v51, %v5174_v53  ;;  %v14144_v30 = vrot.slane %v5179_v37, 7  ;;  %v5189_v8 = vshll.u32 %v14117_v19, 16 }
 0xf5a   : > { %v5188_v57 = vrot.slane %v5186_v62, 7  ;;  %v14147_v5 = vrot.slane %v5193_v11, 7  ;;  %v5196_v28 = vshll.u32 %v14119_v1, 16  ;;  %v5203_v49 = vshll.u32 %v14122_v9, 16 }
 0xf5b   : > { %v14151_v61 = vrot.slane %v5200_v0, 7  ;;  %v5210_v35 = vshll.u32 %v14126_v21, 16  ;;  %v5253_v39 = vsel %vm12118_vm13, 0, %v5149_v22  ;;  %v5254_v48 = vsel %vm12118_vm13, 0, %v5156_v23 }
 0xf5c   : > { %v14158_v50 = vrot.slane %v5207_v13, 7  ;;  %v14160_v25 = vrot.slane %v5214_v15, 7  ;;  %v5221_v55 = vshrl.u32 %v14130_v16, 16  ;;  %v5255_v44 = vsel %vm12118_vm13, 0, %v5163_v18  ;;  %v14213_v18 = vld [vmem:[#allocation3 + $0x48] sm:$0xe] }
 0xf5d   : > { %v5256_v42 = vsel %vm12118_vm13, 0, %v5170_v47  ;;  %v5257_v3 = vsel %vm12118_vm13, 0, %v5177_v58  ;;  %v5269_v12 = vsel %vm12127_vm14, %v5253_v39, 0  ;;  %v5270_v19 = vsel %vm12127_vm14, %v5254_v48, 0  ;;  %v14215_v13 = vld [vmem:[#allocation3 + $0x48] sm:$0xf] }
 0xf5e   : > { %v5228_v24 = vshrl.u32 %v14132_v17, 16  ;;  %v9856_v59 = vcombine.low %v5269_v12, %v5269_v12  ;;  %v9857_v63 = vcombine.high %v5269_v12, %v5269_v12  ;;  %v9858_v34 = vcombine.low %v5270_v19, %v5270_v19 }
 0xf5f   : > { %v9859_v2 = vcombine.high %v5270_v19, %v5270_v19  ;;  %v5135_v38 = vor.u32 %v5133_v6, %v5132_v26  ;;  %v5142_v31 = vor.u32 %v5140_v52, %v5139_v40  ;;  %v5128_v14 = vor.u32 %v5126_v45, %v5125_v7 }
 0xf60   : > { %vm16599_vm0 = vcmask 257024   ;;  %vm5113_vm7 = vcmask 253952   ;;  %v5271_v33 = vsel %vm12127_vm14, %v5255_v44, 0  ;;  %v5272_v36 = vsel %vm12127_vm14, %v5256_v42, 0 }
 0xf61   : > { %5401 = vst.msk [vmem:[#allocation3 + $0x20] sm:$0xf] %vm16599_vm0, %v9856_v59  ;;  %vm16600_vm1 = vmmov %vm16599_vm0  ;;  %v5273_v4 = vsel %vm12127_vm14, %v5257_v3, 0  ;;  %v5251_v20 = vsel %vm12118_vm13, 0, %v5135_v38  ;;  %v5252_v45 = vsel %vm12118_vm13, 0, %v5142_v31  ;;  %v5250_v6 = vsel %vm12118_vm13, 0, %v5128_v14 }
 0xf62   : > { %5403 = vst.msk [vmem:[#allocation3 + $0x28] sm:$0xf] %vm16600_vm1, %v9858_v34  ;;  %v9860_v7 = vcombine.low %v5271_v33, %v5271_v33  ;;  %v5267_v52 = vsel %vm12127_vm14, %v5251_v20, 0  ;;  %v5268_v26 = vsel %vm12127_vm14, %v5252_v45, 0  ;;  %v5266_v40 = vsel %vm12127_vm14, %v5250_v6, 0  ;;  %vm16601_vm9 = vmmov %vm16599_vm0 }
 0xf63   : > { %5114 = vst.msk [vmem:[#allocation3 + $0x4] sm:$0x1] %vm5113_vm7, %v16564_v43  ;;  %5116 = vst.msk [vmem:[#allocation3 + $0x54] sm:$0x1] %vm5113_vm7, %v16564_v43  ;;  %v9861_v46 = vcombine.high %v5271_v33, %v5271_v33  ;;  %v9852_v56 = vcombine.low %v5267_v52, %v5267_v52  ;;  %v9853_v53 = vcombine.high %v5267_v52, %v5267_v52  ;;  %v5217_v23 = vshll.u32 %v14128_v32, 16 }
 0xf64   : > { %5119 = vst.msk [vmem:[#allocation3 + $0x4c] sm:$0x1] %vm5113_vm7, %v16564_v43  ;;  %5121 = vst.msk [vmem:[#allocation3 + $0x9c] sm:$0x1] %vm5113_vm7, %v16564_v43  ;;  %v9854_v37 = vcombine.low %v5268_v26, %v5268_v26  ;;  %v9855_v60 = vcombine.high %v5268_v26, %v5268_v26  ;;  %v9850_v43 = vcombine.low %v5266_v40, %v5266_v40  ;;  %v5223_v15 = vrot.slane %v5221_v55, 7 }
 0xf65   : > { %5402 = vst.msk [vmem:[#allocation3 + $0x24] sm:$0x1] %vm5113_vm7, %v9857_v63  ;;  %5404 = vst.msk [vmem:[#allocation3 + $0x2c] sm:$0x1] %vm5113_vm7, %v9859_v2  ;;  %v9851_v10 = vcombine.high %v5266_v40, %v5266_v40  ;;  %v9862_v62 = vcombine.low %v5272_v36, %v5272_v36  ;;  %v9863_v11 = vcombine.high %v5272_v36, %v5272_v36  ;;  %v5224_v47 = vshll.u32 %v14130_v16, 16 }
 0xf66   : > { %5405 = vst.msk [vmem:[#allocation3 + $0x30] sm:$0xf] %vm16601_vm9, %v9860_v7  ;;  %v14206_v22 = vor.u32 %v5189_v8, %v5188_v57  ;;  %vm16602_vm11 = vmmov %vm16599_vm0  ;;  %v9864_v51 = vcombine.low %v5273_v4, %v5273_v4  ;;  %v9865_v0 = vcombine.high %v5273_v4, %v5273_v4  ;;  %v14218_v58 = vrot.slane %v5228_v24, 7  ;;  %v14225_v8 = vld [vmem:[#allocation3] sm:$0xe] }
 0xf67   : > { %5406 = vst.msk [vmem:[#allocation3 + $0x34] sm:$0x1] %vm5113_vm7, %v9861_v46  ;;  %vm16603_vm4 = vmmov %vm16599_vm0  ;;  %v14230_v57 = vor.u32 %v5196_v28, %v14147_v5  ;;  %v14235_v16 = vor.u32 %v5203_v49, %v14151_v61  ;;  %v14244_v44 = vor.u32 %v5210_v35, %v14158_v50  ;;  %v14247_v1 = vor.u32 %v5217_v23, %v14160_v25 }
 0xf68   : > { %5397 = vst.msk [vmem:[#allocation3 + $0x10] sm:$0xf] %vm16602_vm11, %v9852_v56  ;;  %vm16604_vm10 = vmmov %vm16599_vm0  ;;  %v6422_v39 = vld [vmem:[#allocation3 + $0x20] sm:$0xe]  ;;  %v9921_v35 = vrot.slane %v14213_v18, 9  ;;  %v6295_v50 = vshrl.u32 %v14215_v13, 16  ;;  %v14267_v2 = vor.u32 %v5224_v47, %v5223_v15 }
 0xf69   : > { %5399 = vst.msk [vmem:[#allocation3 + $0x18] sm:$0xf] %vm16603_vm4, %v9854_v37  ;;  %vm16605_vm12 = vmmov %vm16599_vm0  ;;  %v6423_v48 = vld [vmem:[#allocation3 + $0x28] sm:$0xe]  ;;  %v14237_v55 = vld [vmem:[#allocation3 + $0x20] sm:$0xf] }
 0xf6a   : > { %5398 = vst.msk [vmem:[#allocation3 + $0x14] sm:$0x1] %vm5113_vm7, %v9853_v53  ;;  %5400 = vst.msk [vmem:[#allocation3 + $0x1c] sm:$0x1] %vm5113_vm7, %v9855_v60  ;;  %v9916_v28 = vrot.slane %v6422_v39, 9  ;;  %v9917_v49 = vrot.slane %v6423_v48, 9 }
 0xf6b   : > { %5395 = vst.msk [vmem:[#allocation3 + $0x8] sm:$0xf] %vm16604_vm10, %v9850_v43  ;;  %vm16606_vm2 = vmmov %vm16599_vm0  ;;  %v6167_v3 = vld [vmem:[#allocation3 + $0x28] sm:$0xf]  ;;  %v6225_v12 = vshrl.u32 %v14237_v55, 16  ;;  %v6228_v21 = vshll.u32 %v14237_v55, 16 }
 0xf6c   : > { %5396 = vst.msk [vmem:[#allocation3 + $0xc] sm:$0x1] %vm5113_vm7, %v9851_v10  ;;  %5408 = vst.msk [vmem:[#allocation3 + $0x3c] sm:$0x1] %vm5113_vm7, %v9863_v11  ;;  %v14249_v5 = vld [vmem:[#allocation3 + $0x24] sm:$0x1]  ;;  %v9979_v20 = vcombine.low %v14237_v55, %v6167_v3 }
 0xf6d   : > { %5407 = vst.msk [vmem:[#allocation3 + $0x38] sm:$0xf] %vm16605_vm12, %v9862_v62  ;;  %v14251_v9 = vld [vmem:[#allocation3 + $0x2c] sm:$0x1]  ;;  %v6478_v61 = vrot.slane %v14249_v5, 5  ;;  %v6298_v25 = vshll.u32 %v14215_v13, 16  ;;  %vm16626_vm9 = vmmov %vm16600_vm1 }
 0xf6e   : > { %5409 = vst.msk [vmem:[#allocation3 + $0x40] sm:$0xf] %vm16606_vm2, %v9864_v51  ;;  %v6482_v42 = vrot.slane %v14251_v9, 5  ;;  %v6239_v24 = vshrl.u32 %v6167_v3, 16  ;;  %v6242_v59 = vshll.u32 %v6167_v3, 16  ;;  %v6227_v52 = vrot.slane %v6225_v12, 4  ;;  %vm16638_vm4 = vmmov %vm16600_vm1 }
 0xf6f   : > { %5410 = vst.msk [vmem:[#allocation3 + $0x44] sm:$0x1] %vm5113_vm7, %v9865_v0  ;;  %v6164_v38 = vld [vmem:[#allocation3 + $0x10] sm:$0xf]  ;;  %v14271_v36 = vsel %vm12289_vm3, %v9916_v28, %v6478_v61  ;;  %v6230_v26 = vrot.slane %v6228_v21, 5  ;;  %vm16609_vm5 = vcmask 261120   ;;  %vm16639_vm10 = vmmov %vm16600_vm1 }
 0xf70   : > { %v6165_v31 = vld [vmem:[#allocation3 + $0x18] sm:$0xf]  ;;  %v5796_v14 = vld [vmem:[#allocation3 + $0x10] sm:$0xf]  ;;  %v14275_v4 = vsel %vm12289_vm3, %v9917_v49, %v6482_v42  ;;  %v6197_v60 = vshrl.u32 %v6164_v38, 16  ;;  %v6200_v43 = vshll.u32 %v6164_v38, 16  ;;  %vm16610_vm8 = vmmov %vm16609_vm5 }
 0xf71   : > { %v6211_v45 = vshrl.u32 %v6165_v31, 16  ;;  %v9978_v6 = vcombine.low %v6164_v38, %v6165_v31  ;;  %v6214_v40 = vshll.u32 %v6165_v31, 16  ;;  %v5842_v46 = vshrl.u32 %v5796_v14, 16  ;;  %v14278_v37 = vld [vmem:[#allocation3 + $0x14] sm:$0x1]  ;;  %vm16614_vm15 = vmmov %vm16609_vm5 }
 0xf72   : > { %v5795_v7 = vld [vmem:[#allocation3 + $0x8] sm:$0xf]  ;;  %v5845_v56 = vshll.u32 %v5796_v14, 16  ;;  %v14281_v62 = vld [vmem:[#allocation3 + $0x1c] sm:$0x1]  ;;  %v9995_v11 = vcombine.low %v14271_v36, %v14275_v4  ;;  %v6470_v28 = vrot.slane %v14278_v37, 5  ;;  %vm16618_vm0 = vmmov %vm16609_vm5 }
 0xf73   : > { %v9954_v53 = vcombine.low %v5795_v7, %v5796_v14  ;;  %6812 = vrot.lane.b32.xlu0 %v9978_v6, %s11434_s6  ;;  %v5828_v10 = vshrl.u32 %v5795_v7, 16  ;;  %v14285_v23 = vrot.slane %v6211_v45, 4  ;;  %v5844_v51 = vrot.slane %v5842_v46, 4  ;;  %v6420_v47 = vld [vmem:[#allocation3 + $0x10] sm:$0xe]  ;;  %vm16637_vm11 = vmmov %vm16618_vm0 }
 0xf74   : > { %v5847_v0 = vrot.slane %v5845_v56, 5  ;;  %v5831_v15 = vshll.u32 %v5795_v7, 16  ;;  %v6421_v48 = vld [vmem:[#allocation3 + $0x18] sm:$0xe]  ;;  %v9914_v55 = vrot.slane %v6420_v47, 9  ;;  %v6474_v49 = vrot.slane %v14281_v62, 5  ;;  %vm16640_vm12 = vmmov %vm16600_vm1 }
 0xf75   : > { %6692 = vrot.lane.b32.xlu1 %v9954_v53, %s11429_s17  ;;  %v5830_v39 = vrot.slane %v5828_v10, 4  ;;  %v14290_v61 = vrot.slane %v6214_v40, 5  ;;  %v9915_v12 = vrot.slane %v6421_v48, 9  ;;  %v5797_v21 = vld [vmem:[#allocation3 + $0x18] sm:$0xf]  ;;  %v14292_v38 = vrot.slane %v6197_v60, 4  ;;  %vm16643_vm2 = vmmov %vm16600_vm1 }
 0xf76   : > { %v5848_v42 = vor.u32 %v5847_v0, %v5844_v51  ;;  %v5833_v3 = vrot.slane %v5831_v15, 5  ;;  %v6471_v31 = vsel %vm12289_vm3, %v9914_v55, %v6470_v28  ;;  %v6231_v14 = vor.u32 %v6230_v26, %v6227_v52  ;;  %v5798_v36 = vld [vmem:[#allocation3 + $0x20] sm:$0xf]  ;;  %v6424_v45 = vld [vmem:[#allocation3 + $0x30] sm:$0xe] }
 0xf77   : > { %6814 = vrot.lane.b32.xlu0 %v9979_v20, %s11434_s6  ;;  %v5856_v4 = vshrl.u32 %v5797_v21, 16  ;;  %v14297_v6 = vrot.slane %v6200_v43, 5  ;;  %v6475_v7 = vsel %vm12289_vm3, %v9915_v12, %v6474_v49  ;;  %v6241_v40 = vrot.slane %v6239_v24, 4  ;;  %v14301_v56 = vld [vmem:[#allocation3 + $0x34] sm:$0x1] }
 0xf78   : > { %v6244_v46 = vrot.slane %v6242_v59, 5  ;;  %v14303_v53 = vrot.slane %v5848_v42, 4  ;;  %v5834_v60 = vor.u32 %v5833_v3, %v5830_v39  ;;  %v9994_v10 = vcombine.low %v6471_v31, %v6475_v7  ;;  %v14305_v52 = vld [vmem:[#allocation3 + $0x3c] sm:$0x1]  ;;  %v6425_v20 = vld [vmem:[#allocation3 + $0x38] sm:$0xe] }
 0xf79   : > { %v5859_v51 = vshll.u32 %v5797_v21, 16  ;;  %v5858_v26 = vrot.slane %v5856_v4, 4  ;;  %v5870_v0 = vshrl.u32 %v5798_v36, 16  ;;  %v5873_v15 = vshll.u32 %v5798_v36, 16  ;;  %v6168_v47 = vld [vmem:[#allocation3 + $0x30] sm:$0xf] }
 0xf7a   : > { %16608 = vst [vmem:[#allocation62_spill] sm:$0xff] %v14303_v53  ;;  %v9955_v43 = vcombine.low %v5797_v21, %v5798_v36  ;;  %10444 = vmatprep.mubr.msk.bf16.mxu1 %vm16609_vm5, %v9994_v10  ;;  %v14308_v48 = vrot.slane %v6231_v14, 4  ;;  %v9918_v59 = vrot.slane %v6424_v45, 9  ;;  %v6486_v55 = vrot.slane %v14301_v56, 5  ;;  %v6169_v28 = vld [vmem:[#allocation3 + $0x38] sm:$0xf]  ;;  %vm16653_vm5 = vmmov %vm16618_vm0 }
 0xf7b   : > { %v5861_v24 = vrot.slane %v5859_v51, 5  ;;  %10445 = vmatmul.mubr.msk.bf16.vlgmr.msra.gmra.mrb[44].mxu1 %vm16610_vm8, %v9995_v11  ;;  %v6245_v39 = vor.u32 %v6244_v46, %v6241_v40  ;;  %v5872_v49 = vrot.slane %v5870_v0, 4  ;;  %v9919_v42 = vrot.slane %v6425_v20, 9  ;;  %v16611_v36 = vld [vmem:[#allocation37_spill] sm:$0xff]  ;;  %v5799_v40 = vld [vmem:[#allocation3 + $0x28] sm:$0xf]  ;;  %vm16654_vm8 = vmmov %vm16618_vm0 }
 0xf7c   : > { %6694 = vrot.lane.b32.xlu1 %v9955_v43, %s11429_s17  ;;  %v6490_v3 = vrot.slane %v14305_v52, 5  ;;  %v5875_v12 = vrot.slane %v5873_v15, 5  ;;  %v6487_v21 = vsel %vm12289_vm3, %v9918_v59, %v6486_v55  ;;  %v6253_v31 = vshrl.u32 %v6168_v47, 16  ;;  %10684 = vmatpush3.bf16.msra.mxu1 %v16611_v36  ;;  %v5800_v46 = vld [vmem:[#allocation3 + $0x30] sm:$0xf]  ;;  %v16612_v10 = vld [vmem:[#allocation64_spill] sm:$0xff] }
 0xf7d   : > { %v6256_v14 = vshll.u32 %v6168_v47, 16  ;;  %v5862_v4 = vor.u32 %v5861_v24, %v5858_v26  ;;  %v6267_v11 = vshrl.u32 %v6169_v28, 16  ;;  %v6270_v7 = vshll.u32 %v6169_v28, 16  ;;  %10683 = vmatprep.subr.bf16.mxu1 %v16612_v10  ;;  %v6426_v43 = vld [vmem:[#allocation3 + $0x40] sm:$0xe] }
 0xf7e   : > { %v6491_v45 = vsel %vm12289_vm3, %v9919_v42, %v6490_v3  ;;  %v14320_v51 = vrot.slane %v5834_v60, 4  ;;  %v6255_v0 = vrot.slane %v6253_v31, 4  ;;  %v14322_v59 = vrot.slane %v6245_v39, 4  ;;  %v14324_v24 = vld [vmem:[#allocation3 + $0x44] sm:$0x1] }
 0xf7f   : > { %v9996_v20 = vcombine.low %v6487_v21, %v6491_v45  ;;  %v6258_v15 = vrot.slane %v6256_v14, 5  ;;  %v6269_v55 = vrot.slane %v6267_v11, 4  ;;  %v6272_v27 = vrot.slane %v6270_v7, 5  ;;  %v10872_v42 = vld [vmem:[%s16552_s16 + $0x40] sm:$0xff]   ;;  %v14330_v31 = vld [vmem:[#allocation3 + $0x4c] sm:$0x1] }
 0xf80   : > { %16613 = vst [vmem:[#allocation63_spill] sm:$0xff] %v14320_v51  ;;  %v9980_v26 = vcombine.low %v6168_v47, %v6169_v28  ;;  %v5876_v3 = vor.u32 %v5875_v12, %v5872_v49  ;;  %v5884_v60 = vshrl.u32 %v5799_v40, 16  ;;  %v5887_v32 = vshll.u32 %v5799_v40, 16  ;;  %10685 = vmatpush3.bf16.msra.mxu1 %v16612_v10  ;;  %v6170_v45 = vld [vmem:[#allocation3 + $0x40] sm:$0xf]  ;;  %10166 = vmatprep.subr.bf16.mxu0 %v10872_v42 }
 0xf81   : > { %10448 = vmatprep.mubr.msk.bf16.mxu1 %vm16614_vm15, %v9996_v20  ;;  %v5898_v21 = vshrl.u32 %v5800_v46, 16  ;;  %v14333_v39 = vrot.slane %v5862_v4, 4  ;;  %v5901_v47 = vshll.u32 %v5800_v46, 16  ;;  %v9956_v28 = vcombine.low %v5799_v40, %v5800_v46  ;;  %v5802_v42 = vld [vmem:[#allocation3 + $0x40] sm:$0xf]  ;;  %vm16656_vm15 = vmmov %vm16600_vm1 }
 0xf82   : > { %6816 = vrot.lane.b32.xlu0 %v9980_v26, %s11434_s6  ;;  %v9920_v14 = vrot.slane %v6426_v43, 9  ;;  %v6259_v11 = vor.u32 %v6258_v15, %v6255_v0  ;;  %v6273_v49 = vor.u32 %v6272_v27, %v6269_v55  ;;  %v5886_v12 = vrot.slane %v5884_v60, 4  ;;  %v5801_v27 = vld [vmem:[#allocation3 + $0x38] sm:$0xf] }
 0xf83   : > { %16615 = vst [vmem:[#allocation51_spill] sm:$0xff] %v14333_v39  ;;  %v5889_v7 = vrot.slane %v5887_v32, 5  ;;  %v16616_v20 = vmov 0.0|0.0   ;;  %v5900_v34 = vrot.slane %v5898_v21, 4  ;;  %v5903_v63 = vrot.slane %v5901_v47, 5  ;;  %6696 = vrot.lane.b32.xlu1 %v9956_v28, %s11429_s17 }
 0xf84   : > { %10646 = vmatprep.subr.bf16.mxu1 %v16616_v20  ;;  %v6494_v4 = vrot.slane %v14324_v24, 5  ;;  %v6498_v19 = vrot.slane %v14330_v31, 5  ;;  %v14340_v26 = vrot.slane %v5876_v3, 4  ;;  %v6281_v40 = vshrl.u32 %v6170_v45, 16  ;;  %v14419_v20 = vld [vmem:[#allocation3 + $0x14] sm:$0x1] }
 0xf85   : > { %v6284_v46 = vshll.u32 %v6170_v45, 16  ;;  %v6297_v0 = vrot.slane %v6295_v50, 4  ;;  %v5890_v15 = vor.u32 %v5889_v7, %v5886_v12  ;;  %v6300_v55 = vrot.slane %v6298_v25, 5  ;;  %v10874_v50 = vld [vmem:[%s16552_s16] sm:$0xff]   ;;  %v14361_v7 = vld [vmem:[#allocation3 + $0xc] sm:$0x1] }
 0xf86   : > { %16617 = vst [vmem:[#allocation52_spill] sm:$0xff] %v14340_v26  ;;  %v6495_v32 = vsel %vm12289_vm3, %v9920_v14, %v6494_v4  ;;  %v6499_v43 = vsel %vm12289_vm3, %v9921_v35, %v6498_v19  ;;  %v14352_v3 = vrot.slane %v6259_v11, 4  ;;  %v6283_v21 = vrot.slane %v6281_v40, 4  ;;  %16619 = vst [vmem:[#allocation49_spill] sm:$0xff] %v14361_v7  ;;  %10167 = vmatpush3.bf16.msra.mxu0 %v10874_v50  ;;  %v14539_v26 = vld [vmem:[#allocation3 + $0x18] sm:$0xf] }
 0xf87   : > { %v9997_v60 = vcombine.low %v6495_v32, %v6499_v43  ;;  %v6286_v47 = vrot.slane %v6284_v46, 5  ;;  %v14357_v28 = vrot.slane %v6273_v49, 4  ;;  %v5904_v14 = vor.u32 %v5903_v63, %v5900_v34  ;;  %v6051_v34 = vld [vmem:[#allocation3 + $0x8] sm:$0xe]  ;;  %v6052_v43 = vld [vmem:[#allocation3 + $0x10] sm:$0xe] }
 0xf88   : > { %v9981_v18 = vcombine.low %v6170_v45, %v14215_v13  ;;  %v5912_v12 = vshrl.u32 %v5801_v27, 16  ;;  %v6301_v35 = vor.u32 %v6300_v55, %v6297_v0  ;;  %v5915_v25 = vshll.u32 %v5801_v27, 16  ;;  %16645 = vst [vmem:[#allocation41_spill] sm:$0xff] %v14539_v26 }
 0xf89   : > { %10449 = vmatmul.mubr.msk.bf16.gmra.mrb[48].mxu1 %vm16618_vm0, %v9997_v60  ;;  %v5926_v19 = vshrl.u32 %v5802_v42, 16  ;;  %v5929_v11 = vshll.u32 %v5802_v42, 16  ;;  %v14363_v4 = vrot.slane %v5890_v15, 4  ;;  %v9957_v49 = vcombine.low %v5801_v27, %v5802_v42  ;;  %v14381_v60 = vld [vmem:[#allocation3 + $0x14] sm:$0x1] }
 0xf8a   : > { %6818 = vrot.lane.b32.xlu0 %v9981_v18, %s11434_s6  ;;  %v5914_v40 = vrot.slane %v5912_v12, 4  ;;  %v16621_v13 = vsel %vm12118_vm13, 0, %v14206_v22  ;;  %v6287_v45 = vor.u32 %v6286_v47, %v6283_v21  ;;  %v5917_v46 = vrot.slane %v5915_v25, 5  ;;  %16624 = vst [vmem:[#allocation48_spill] sm:$0xff] %v14381_v60  ;;  %v5443_v21 = vld [vmem:[#allocation3 + $0x4] sm:$0x1] }
 0xf8b   : > { %16620 = vst [vmem:[#allocation50_spill] sm:$0xff] %v14363_v4  ;;  %v5275_v63 = vsel %vm12127_vm14, %v16621_v13, 0  ;;  %v5928_v0 = vrot.slane %v5926_v19, 4  ;;  %v5931_v32 = vrot.slane %v5929_v11, 5  ;;  %v14372_v55 = vrot.slane %v5904_v14, 4  ;;  %6698 = vrot.lane.b32.xlu1 %v9957_v49, %s11429_s17 }
 0xf8c   : > { %v16623_v27 = vsel %vm12118_vm13, 0, %v14230_v57  ;;  %v9868_v15 = vcombine.low %v5275_v63, %v5275_v63  ;;  %v9869_v42 = vcombine.high %v5275_v63, %v5275_v63  ;;  %v14383_v47 = vrot.slane %v6301_v35, 4  ;;  %v5444_v12 = vld [vmem:[#allocation3 + $0xc] sm:$0x1]  ;;  %v5684_v25 = vld [vmem:[#allocation3 + $0x8] sm:$0xe] }
 0xf8d   : > { %16622 = vst [vmem:[#allocation47_spill] sm:$0xff] %v14372_v55  ;;  %v5276_v22 = vsel %vm12127_vm14, %v16623_v27, 0  ;;  %v5918_v50 = vor.u32 %v5917_v46, %v5914_v40  ;;  %v5932_v19 = vor.u32 %v5931_v32, %v5928_v0  ;;  %v9898_v57 = vrot.slane %v6051_v34, 9  ;;  %v14388_v13 = vld [vmem:[#allocation3 + $0x1c] sm:$0x1] }
 0xf8e   : > { %v9870_v18 = vcombine.low %v5276_v22, %v5276_v22  ;;  %v9871_v14 = vcombine.high %v5276_v22, %v5276_v22  ;;  %5413 = vst.msk [vmem:[#allocation3 + $0x60] sm:$0xf] %vm16600_vm1, %v9868_v15  ;;  %v6101_v11 = vrot.slane %v14361_v7, 5  ;;  %v9899_v49 = vrot.slane %v6052_v43, 9  ;;  %16625 = vst [vmem:[#allocation31_spill] sm:$0xff] %v14388_v13 }
 0xf8f   : > { %5414 = vst.msk [vmem:[#allocation3 + $0x64] sm:$0x1] %vm5113_vm7, %v9869_v42  ;;  %v14390_v63 = vrot.slane %v6287_v45, 4  ;;  %v6105_v40 = vrot.slane %v14381_v60, 5  ;;  %v5469_v46 = vshll.u32 %v5443_v21, 16  ;;  %v5483_v32 = vshll.u32 %v5444_v12, 16 }
 0xf90   : > { %5415 = vst.msk [vmem:[#allocation3 + $0x68] sm:$0xf] %vm16626_vm9, %v9870_v18  ;;  %v6053_v0 = vld [vmem:[#allocation3 + $0x18] sm:$0xe]  ;;  %v6102_v34 = vsel %vm12289_vm3, %v9898_v57, %v6101_v11  ;;  %v5733_v27 = vrot.slane %v5443_v21, 5  ;;  %v9883_v43 = vrot.slane %v5684_v25, 9 }
 0xf91   : > { %5416 = vst.msk [vmem:[#allocation3 + $0x6c] sm:$0x1] %vm5113_vm7, %v9871_v14  ;;  %v6054_v22 = vld [vmem:[#allocation3 + $0x20] sm:$0xe]  ;;  %v10876_v45 = vld [vmem:[%s16552_s16 + $0x48] sm:$0xff]   ;;  %v14401_v15 = vrot.slane %v5918_v50, 4  ;;  %v6106_v18 = vsel %vm12289_vm3, %v9899_v49, %v6105_v40 }
 0xf92   : > { %v5737_v14 = vrot.slane %v5444_v12, 5  ;;  %v14406_v35 = vld [vmem:[#allocation3 + $0x24] sm:$0x1]  ;;  %v10877_v21 = vld [vmem:[%s16552_s16 + $0x8] sm:$0xff]   ;;  %v14411_v25 = vrot.slane %v5932_v19, 4  ;;  %v9970_v57 = vcombine.low %v6102_v34, %v6106_v18  ;;  %v14413_v11 = vrot.slane %v5469_v46, 5  ;;  %10168 = vmatprep.subr.bf16.mxu0 %v10876_v45 }
 0xf93   : > { %16627 = vst [vmem:[#allocation32_spill] sm:$0xff] %v14401_v15  ;;  %16628 = vst [vmem:[#allocation55_spill] sm:$0xff] %v14406_v35  ;;  %v16630_v50 = vrot.slane %v14225_v8, 9  ;;  %v5685_v49 = vld [vmem:[#allocation3 + $0x10] sm:$0xe]  ;;  %v9900_v40 = vrot.slane %v6053_v0, 9  ;;  %10169 = vmatpush3.bf16.msra.mxu0 %v10877_v21 }
 0xf94   : > { %16629 = vst [vmem:[#allocation56_spill] sm:$0xff] %v14411_v25  ;;  %v5738_v12 = vsel %vm12289_vm3, %v9883_v43, %v5737_v14  ;;  %v6109_v10 = vrot.slane %v14388_v13, 5  ;;  %v9901_v19 = vrot.slane %v6054_v22, 9  ;;  %v14424_v25 = vld [vmem:[#allocation3 + $0x1c] sm:$0x1]  ;;  %v10878_v8 = vld [vmem:[%s16552_s16 + $0x50] sm:$0xff]   ;;  %6756 = vrot.lane.b32.xlu0 %v9970_v57, %s11432_s22 }
 0xf95   : > { %v5734_v42 = vsel %vm12289_vm3, %v16630_v50, %v5733_v27  ;;  %v14430_v46 = vrot.slane %v5483_v32, 5  ;;  %v6113_v43 = vrot.slane %v14406_v35, 5  ;;  %v5686_v0 = vld [vmem:[#allocation3 + $0x18] sm:$0xe]  ;;  %v10879_v22 = vld [vmem:[%s16552_s16 + $0x10] sm:$0xff]   ;;  %v16631_v45 = vshll.u32 %v14132_v17, 16  ;;  %10170 = vmatprep.subr.bf16.mxu0 %v10878_v8 }
 0xf96   : > { %v9946_v34 = vcombine.low %v5734_v42, %v5738_v12  ;;  %v14442_v14 = vld [vmem:[#allocation3 + $0x64] sm:$0x1]  ;;  %v6428_v21 = vld [vmem:[#allocation3 + $0x60] sm:$0xe]  ;;  %v6110_v32 = vsel %vm12289_vm3, %v9900_v40, %v6109_v10  ;;  %v9884_v42 = vrot.slane %v5685_v49, 9  ;;  %v5741_v57 = vrot.slane %v14419_v20, 5 }
 0xf97   : > { %v14440_v18 = vor.u32 %v16631_v45, %v14218_v58  ;;  %16632 = vst [vmem:[#allocation65_spill] sm:$0xff] %v14442_v14  ;;  %v6429_v12 = vld [vmem:[#allocation3 + $0x68] sm:$0xe]  ;;  %v9922_v27 = vrot.slane %v6428_v21, 9  ;;  %v6502_v15 = vrot.slane %v14442_v14, 5  ;;  %v6114_v17 = vsel %vm12289_vm3, %v9901_v19, %v6113_v43  ;;  %10171 = vmatpush3.bf16.msra.mxu0 %v10879_v22  ;;  %v10880_v21 = vld [vmem:[%s16552_s16 + $0x58] sm:$0xff]  }
 0xf98   : > { %v14447_v50 = vld [vmem:[#allocation3 + $0x6c] sm:$0x1]  ;;  %6636 = vrot.lane.b32.xlu1 %v9946_v34, %s11434_s6  ;;  %v16634_v58 = vshll.u32 %v14115_v41, 16  ;;  %v9923_v10 = vrot.slane %v6429_v12, 9  ;;  %v9971_v40 = vcombine.low %v6110_v32, %v6114_v17  ;;  %v5497_v8 = vshll.u32 %v14419_v20, 16  ;;  %10172 = vmatprep.subr.bf16.mxu0 %v10880_v21 }
 0xf99   : > { %16633 = vst [vmem:[#allocation53_spill] sm:$0xff] %v14447_v50  ;;  %v6506_v49 = vrot.slane %v14447_v50, 5  ;;  %v6503_v34 = vsel %vm12289_vm3, %v9922_v27, %v6502_v15  ;;  %v5511_v19 = vshll.u32 %v14424_v25, 16  ;;  %v5742_v41 = vsel %vm12289_vm3, %v9884_v42, %v5741_v57  ;;  %v10881_v27 = vld [vmem:[%s16552_s16 + $0x18] sm:$0xff]   ;;  %v14488_v42 = vld [vmem:[#allocation3 + $0x2c] sm:$0x1] }
 0xf9a   : > { %v14456_v45 = vor.u32 %v16634_v58, %v14144_v30  ;;  %v9885_v30 = vrot.slane %v5686_v0, 9  ;;  %6758 = vrot.lane.b32.xlu0 %v9971_v40, %s11432_s22  ;;  %v5745_v20 = vrot.slane %v14424_v25, 5  ;;  %v5261_v22 = vsel %vm12118_vm13, 0, %v14235_v16  ;;  %16635 = vst [vmem:[#allocation39_spill] sm:$0xff] %v14488_v42  ;;  %v6056_v40 = vld [vmem:[#allocation3 + $0x30] sm:$0xe] }
 0xf9b   : > { %v6507_v43 = vsel %vm12289_vm3, %v9923_v10, %v6506_v49  ;;  %v5262_v15 = vsel %vm12118_vm13, 0, %v14244_v44  ;;  %v5277_v32 = vsel %vm12127_vm14, %v5261_v22, 0  ;;  %v5263_v16 = vsel %vm12118_vm13, 0, %v14247_v1  ;;  %v10882_v44 = vld [vmem:[%s16552_s16 + $0x60] sm:$0xff]   ;;  %v14495_v10 = vld [vmem:[#allocation3 + $0x34] sm:$0x1]  ;;  %10173 = vmatpush3.bf16.msra.mxu0 %v10881_v27 }
 0xf9c   : > { %v9998_v0 = vcombine.low %v6503_v34, %v6507_v43  ;;  %v5278_v25 = vsel %vm12127_vm14, %v5262_v15, 0  ;;  %v5746_v57 = vsel %vm12289_vm3, %v9885_v30, %v5745_v20  ;;  %v9872_v12 = vcombine.low %v5277_v32, %v5277_v32  ;;  %16636 = vst [vmem:[#allocation57_spill] sm:$0xff] %v14495_v10  ;;  %v6055_v49 = vld [vmem:[#allocation3 + $0x28] sm:$0xe]  ;;  %v5447_v30 = vld [vmem:[#allocation3 + $0x24] sm:$0x1]  ;;  %10174 = vmatprep.subr.bf16.mxu0 %v10882_v44 }
 0xf9d   : > { %v9873_v17 = vcombine.high %v5277_v32, %v5277_v32  ;;  %v9874_v58 = vcombine.low %v5278_v25, %v5278_v25  ;;  %v9947_v1 = vcombine.low %v5742_v41, %v5746_v57  ;;  %v9875_v21 = vcombine.high %v5278_v25, %v5278_v25  ;;  %v14503_v20 = vld [vmem:[#allocation3 + $0x2c] sm:$0x1]  ;;  %v5687_v27 = vld [vmem:[#allocation3 + $0x20] sm:$0xe]  ;;  %v14515_v57 = vld [vmem:[#allocation3 + $0x3c] sm:$0x1] }
 0xf9e   : > { %10452 = vmatprep.mubr.msk.bf16.mxu1 %vm16637_vm11, %v9998_v0  ;;  %v5264_v34 = vsel %vm12118_vm13, 0, %v14267_v2  ;;  %v5279_v43 = vsel %vm12127_vm14, %v5263_v16, 0  ;;  %5417 = vst.msk [vmem:[#allocation3 + $0x70] sm:$0xf] %vm16638_vm4, %v9872_v12  ;;  %v5688_v0 = vld [vmem:[#allocation3 + $0x28] sm:$0xe] }
 0xf9f   : > { %5418 = vst.msk [vmem:[#allocation3 + $0x74] sm:$0x1] %vm5113_vm7, %v9873_v17  ;;  %v5280_v41 = vsel %vm12127_vm14, %v5264_v34, 0  ;;  %v9876_v15 = vcombine.low %v5279_v43, %v5279_v43  ;;  %v9877_v2 = vcombine.high %v5279_v43, %v5279_v43  ;;  %v14511_v32 = vrot.slane %v5497_v8, 5  ;;  %6638 = vrot.lane.b32.xlu1 %v9947_v1, %s11434_s6  ;;  %5420 = vst.msk [vmem:[#allocation3 + $0x7c] sm:$0x1] %vm5113_vm7, %v9875_v21 }
 0xfa0   : > { %5419 = vst.msk [vmem:[#allocation3 + $0x78] sm:$0xf] %vm16639_vm10, %v9874_v58  ;;  %v9878_v25 = vcombine.low %v5280_v41, %v5280_v41  ;;  %v9879_v16 = vcombine.high %v5280_v41, %v5280_v41  ;;  %v9902_v44 = vrot.slane %v6055_v49, 9  ;;  %v14517_v12 = vld [vmem:[#allocation3 + $0x38] sm:$0xe]  ;;  %v6117_v17 = vrot.slane %v14488_v42, 5 }
 0xfa1   : > { %5421 = vst.msk [vmem:[#allocation3 + $0x80] sm:$0xf] %vm16640_vm12, %v9876_v15  ;;  %v9903_v58 = vrot.slane %v6056_v40, 9  ;;  %v6121_v8 = vrot.slane %v14495_v10, 5  ;;  %v5525_v34 = vshll.u32 %v5447_v30, 16  ;;  %v14527_v43 = vrot.slane %v5511_v19, 5 }
 0xfa2   : > { %5422 = vst.msk [vmem:[#allocation3 + $0x84] sm:$0x1] %vm5113_vm7, %v9877_v2  ;;  %v14523_v1 = vld [vmem:[#allocation3] sm:$0xf]  ;;  %v14525_v21 = vld [vmem:[#allocation3 + $0x8] sm:$0xf]  ;;  %v6118_v22 = vsel %vm12289_vm3, %v9902_v44, %v6117_v17 }
 0xfa3   : > { %16641 = vst [vmem:[#allocation40_spill] sm:$0xff] %v14523_v1  ;;  %16642 = vst [vmem:[#allocation42_spill] sm:$0xff] %v14525_v21  ;;  %v9886_v49 = vrot.slane %v5687_v27, 9  ;;  %v5749_v41 = vrot.slane %v5447_v30, 5  ;;  %v9887_v15 = vrot.slane %v5688_v0, 9  ;;  %v6122_v55 = vsel %vm12289_vm3, %v9903_v58, %v6121_v8 }
 0xfa4   : > { %5423 = vst.msk [vmem:[#allocation3 + $0x88] sm:$0xf] %vm16643_vm2, %v9878_v25  ;;  %v14531_v2 = vld [vmem:[#allocation3 + $0x10] sm:$0xf]  ;;  %v5753_v19 = vrot.slane %v14503_v20, 5  ;;  %v9972_v27 = vcombine.low %v6118_v22, %v6122_v55  ;;  %v5539_v0 = vshll.u32 %v14503_v20, 16 }
 0xfa5   : > { %5424 = vst.msk [vmem:[#allocation3 + $0x8c] sm:$0x1] %vm5113_vm7, %v9879_v16  ;;  %16644 = vst [vmem:[#allocation43_spill] sm:$0xff] %v14531_v2  ;;  %v6058_v4 = vld [vmem:[#allocation3 + $0x40] sm:$0xe]  ;;  %v5750_v16 = vsel %vm12289_vm3, %v9886_v49, %v5749_v41  ;;  %v14551_v17 = vrot.slane %v5525_v34, 5 }
 0xfa6   : > { %v14541_v25 = vld [vmem:[#allocation3 + $0x20] sm:$0xf]  ;;  %v14547_v40 = vld [vmem:[#allocation3 + $0x28] sm:$0xf]  ;;  %v14549_v44 = vld [vmem:[#allocation3 + $0x30] sm:$0xf]  ;;  %v5754_v58 = vsel %vm12289_vm3, %v9887_v15, %v5753_v19  ;;  %6760 = vrot.lane.b32.xlu0 %v9972_v27, %s11432_s22 }
 0xfa7   : > { %16646 = vst [vmem:[#allocation60_spill] sm:$0xff] %v14541_v25  ;;  %16647 = vst [vmem:[#allocation45_spill] sm:$0xff] %v14547_v40  ;;  %v14555_v8 = vld [vmem:[#allocation3 + $0x44] sm:$0x1]  ;;  %v9904_v39 = vrot.slane %v14517_v12, 9  ;;  %v6125_v55 = vrot.slane %v14515_v57, 5  ;;  %v9948_v30 = vcombine.low %v5750_v16, %v5754_v58 }
 0xfa8   : > { %16648 = vst [vmem:[#allocation46_spill] sm:$0xff] %v14555_v8  ;;  %v14559_v22 = vld [vmem:[#allocation3 + $0x38] sm:$0xf]  ;;  %v10883_v20 = vld [vmem:[%s16552_s16 + $0x20] sm:$0xff]   ;;  %v14564_v49 = vld [vmem:[#allocation3 + $0x74] sm:$0x1] }
 0xfa9   : > { %16649 = vst [vmem:[#allocation35_spill] sm:$0xff] %v14564_v49  ;;  %v6430_v41 = vld [vmem:[#allocation3 + $0x70] sm:$0xe]  ;;  %v6431_v34 = vld [vmem:[#allocation3 + $0x78] sm:$0xe]  ;;  %v6510_v42 = vrot.slane %v14564_v49, 5  ;;  %10175 = vmatpush3.bf16.msra.mxu0 %v10883_v20  ;;  %6640 = vrot.lane.b32.xlu1 %v9948_v30, %s11434_s6  ;;  %v6126_v49 = vsel %vm12289_vm3, %v9904_v39, %v6125_v55 }
 0xfaa   : > { %v5449_v15 = vld [vmem:[#allocation3 + $0x34] sm:$0x1]  ;;  %v14573_v10 = vld [vmem:[#allocation3 + $0x7c] sm:$0x1]  ;;  %v9924_v51 = vrot.slane %v6430_v41, 9  ;;  %v9925_v35 = vrot.slane %v6431_v34, 9 }
 0xfab   : > { %16650 = vst [vmem:[#allocation44_spill] sm:$0xff] %v14573_v10  ;;  %v5689_v13 = vld [vmem:[#allocation3 + $0x30] sm:$0xe]  ;;  %v10884_v16 = vld [vmem:[%s16552_s16 + $0x68] sm:$0xff]   ;;  %v6514_v58 = vrot.slane %v14573_v10, 5  ;;  %v9905_v41 = vrot.slane %v6058_v4, 9 }
 0xfac   : > { %v14582_v12 = vld [vmem:[#allocation3 + $0x84] sm:$0x1]  ;;  %v6432_v53 = vld [vmem:[#allocation3 + $0x80] sm:$0xe]  ;;  %v6511_v20 = vsel %vm12289_vm3, %v9924_v51, %v6510_v42  ;;  %v14591_v27 = vld [vmem:[#allocation3 + $0x8c] sm:$0x1]  ;;  %10176 = vmatprep.subr.bf16.mxu0 %v10884_v16 }
 0xfad   : > { %16651 = vst [vmem:[#allocation54_spill] sm:$0xff] %v14582_v12  ;;  %16652 = vst [vmem:[#allocation59_spill] sm:$0xff] %v14591_v27  ;;  %v6433_v60 = vld [vmem:[#allocation3 + $0x88] sm:$0xe]  ;;  %v9926_v7 = vrot.slane %v6432_v53, 9  ;;  %v6518_v10 = vrot.slane %v14582_v12, 5  ;;  %v6515_v4 = vsel %vm12289_vm3, %v9925_v35, %v6514_v58 }
 0xfae   : > { %v9927_v30 = vrot.slane %v6433_v60, 9  ;;  %v6522_v34 = vrot.slane %v14591_v27, 5  ;;  %v6129_v19 = vrot.slane %v14555_v8, 5  ;;  %v5450_v50 = vld [vmem:[#allocation3 + $0x3c] sm:$0x1]  ;;  %v10885_v51 = vld [vmem:[%s16552_s16 + $0x28] sm:$0xff]   ;;  %v9999_v53 = vcombine.low %v6511_v20, %v6515_v4 }
 0xfaf   : > { %v6519_v42 = vsel %vm12289_vm3, %v9926_v7, %v6518_v10  ;;  %v14605_v12 = vrot.slane %v5539_v0, 5  ;;  %v5553_v39 = vshll.u32 %v5449_v15, 16  ;;  %v5690_v55 = vld [vmem:[#allocation3 + $0x38] sm:$0xe]  ;;  %v9888_v16 = vrot.slane %v5689_v13, 9  ;;  %10177 = vmatpush3.bf16.msra.mxu0 %v10885_v51  ;;  %v10886_v13 = vld [vmem:[%s16552_s16 + $0x70] sm:$0xff]  }
 0xfb0   : > { %v6523_v60 = vsel %vm12289_vm3, %v9927_v30, %v6522_v34  ;;  %v6130_v35 = vsel %vm12289_vm3, %v9905_v41, %v6129_v19  ;;  %v5757_v58 = vrot.slane %v5449_v15, 5  ;;  %10453 = vmatmul.mubr.msk.bf16.gmra.mrb[52].mxu1 %vm16653_vm5, %v9999_v53  ;;  %v5567_v7 = vshll.u32 %v5450_v50, 16  ;;  %v14631_v53 = vld [vmem:[#allocation3 + $0x9c] sm:$0x1]  ;;  %10178 = vmatprep.subr.bf16.mxu0 %v10886_v13  ;;  %v14655_v54 = vld [vmem:[#allocation3 + $0x60] sm:$0xf] }
 0xfb1   : > { %v10000_v27 = vcombine.low %v6519_v42, %v6523_v60  ;;  %v9973_v4 = vcombine.low %v6126_v49, %v6130_v35  ;;  %v9889_v0 = vrot.slane %v5690_v55, 9  ;;  %v5761_v14 = vrot.slane %v5450_v50, 5  ;;  %v6435_v50 = vld [vmem:[#allocation3 + $0x98] sm:$0xe]  ;;  %v14634_v42 = vld [vmem:[#allocation3 + $0x64] sm:$0x1] }
 0xfb2   : > { %v5758_v10 = vsel %vm12289_vm3, %v9888_v16, %v5757_v58  ;;  %v5265_v34 = vsel %vm12118_vm13, 0, %v14440_v18  ;;  %v14624_v49 = vrot.slane %v5553_v39, 5  ;;  %v5460_v41 = vshrl.u32 %v14523_v1, 16  ;;  %16655 = vst [vmem:[#allocation61_spill] sm:$0xff] %v14634_v42  ;;  %v10887_v39 = vld [vmem:[%s16552_s16 + $0x30] sm:$0xff]  }
 0xfb3   : > { %10456 = vmatprep.mubr.msk.bf16.mxu1 %vm16654_vm8, %v10000_v27  ;;  %6762 = vrot.lane.b32.xlu0 %v9973_v4, %s11432_s22  ;;  %v5281_v19 = vsel %vm12127_vm14, %v5265_v34, 0  ;;  %v5762_v18 = vsel %vm12289_vm3, %v9889_v0, %v5761_v14  ;;  %v5463_v27 = vshll.u32 %v14523_v1, 16  ;;  %v14639_v55 = vrot.slane %v5567_v7, 5  ;;  %v14648_v34 = vld [vmem:[#allocation3 + $0x60] sm:$0xe] }
 0xfb4   : > { %v9880_v30 = vcombine.low %v5281_v19, %v5281_v19  ;;  %v9881_v51 = vcombine.high %v5281_v19, %v5281_v19  ;;  %v9949_v60 = vcombine.low %v5758_v10, %v5762_v18  ;;  %v5462_v35 = vrot.slane %v5460_v41, 4  ;;  %10179 = vmatpush3.bf16.msra.mxu0 %v10887_v39  ;;  %v14746_v8 = vld [vmem:[#allocation3 + $0x60] sm:$0xf] }
 0xfb5   : > { %v5474_v16 = vshrl.u32 %v14525_v21, 16  ;;  %v9929_v14 = vrot.slane %v6435_v50, 9  ;;  %v5465_v58 = vrot.slane %v5463_v27, 5  ;;  %v5477_v4 = vshll.u32 %v14525_v21, 16  ;;  %v5691_v50 = vld [vmem:[#allocation3 + $0x50] sm:$0xe] }
 0xfb6   : > { %5425 = vst.msk [vmem:[#allocation3 + $0x90] sm:$0xf] %vm16656_vm15, %v9880_v30  ;;  %v5258_v0 = vsel %vm12118_vm13, 0, %v14456_v45  ;;  %6642 = vrot.lane.b32.xlu1 %v9949_v60, %s11434_s6  ;;  %v6530_v7 = vrot.slane %v14631_v53, 5  ;;  %v14657_v45 = vld [vmem:[#allocation3 + $0x68] sm:$0xf]  ;;  %v16657_v60 = vor.u32 %v14297_v6, %v14292_v38  ;;  %vm16658_vm13 = vmmov %vm16600_vm1 }
 0xfb7   : > { %5426 = vst.msk [vmem:[#allocation3 + $0x94] sm:$0x1] %vm5113_vm7, %v9881_v51  ;;  %v5476_v10 = vrot.slane %v5474_v16, 4  ;;  %v5274_v13 = vsel %vm12127_vm14, %v5258_v0, 0  ;;  %v5466_v41 = vor.u32 %v5465_v58, %v5462_v35  ;;  %v5479_v18 = vrot.slane %v5477_v4, 5  ;;  %v10888_v27 = vld [vmem:[%s16552_s16 + $0x78] sm:$0xff]   ;;  %vm16661_vm14 = vmmov %vm16618_vm0 }
 0xfb8   : > { %v9866_v30 = vcombine.low %v5274_v13, %v5274_v13  ;;  %v9867_v51 = vcombine.high %v5274_v13, %v5274_v13  ;;  %v9907_v39 = vrot.slane %v14648_v34, 9  ;;  %v6137_v29 = vrot.slane %v14634_v42, 5  ;;  %v10889_v58 = vld [vmem:[%s16552_s16 + $0x38] sm:$0xff]   ;;  %v14677_v38 = vld [vmem:[#allocation3 + $0x54] sm:$0x1]  ;;  %10180 = vmatprep.subr.bf16.mxu0 %v10888_v27 }
 0xfb9   : > { %v6204_v16 = vrot.slane %v16657_v60, 4  ;;  %v6206_v35 = vshll.u32 %v14278_v37, 16  ;;  %v5467_v4 = vrot.slane %v5466_v41, 4  ;;  %v5480_v0 = vor.u32 %v5479_v18, %v5476_v10  ;;  %10181 = vmatpush3.bf16.msra.mxu0 %v10889_v58  ;;  %v14741_v21 = vld [vmem:[#allocation3 + $0x70] sm:$0xf] }
 0xfba   : > { %5411 = vst.msk [vmem:[#allocation3 + $0x58] sm:$0xf] %vm16658_vm13, %v9866_v30  ;;  %v16659_v34 = vor.u32 %v14290_v61, %v14285_v23  ;;  %v6220_v19 = vshll.u32 %v14281_v62, 16  ;;  %v9890_v6 = vrot.slane %v5691_v50, 9  ;;  %v6309_v60 = vshrl.u32 %v14655_v54, 16  ;;  %10639 = vmatprep.subr.bf16.mxu0 %v16611_v36 }
 0xfbb   : > { %5412 = vst.msk [vmem:[#allocation3 + $0x5c] sm:$0x1] %vm5113_vm7, %v9867_v51  ;;  %v6208_v37 = vrot.slane %v6206_v35, 5  ;;  %v6312_v41 = vshll.u32 %v14655_v54, 16  ;;  %v5472_v18 = vsel %vm12416_vm6, %v5467_v4, %v14413_v11  ;;  %v5481_v30 = vrot.slane %v5480_v0, 4  ;;  %vm16702_vm7 = vmmov %vm16618_vm0 }
 0xfbc   : > { %v6218_v13 = vrot.slane %v16659_v34, 4  ;;  %v6222_v51 = vrot.slane %v6220_v19, 5  ;;  %v6323_v23 = vshrl.u32 %v14657_v45, 16  ;;  %v6531_v50 = vsel %vm12289_vm3, %v9929_v14, %v6530_v7 }
 0xfbd   : > { %v6434_v61 = vld [vmem:[#allocation3 + $0x90] sm:$0xe]  ;;  %v6209_v27 = vsel %vm12416_vm6, %v6204_v16, %v6208_v37  ;;  %v5765_v35 = vrot.slane %v14677_v38, 5  ;;  %v14693_v58 = vrot.slane %v6309_v60, 4  ;;  %v5486_v4 = vsel %vm12416_vm6, %v5481_v30, %v14430_v46  ;;  %v14714_v30 = vld [vmem:[#allocation3 + $0x78] sm:$0xf] }
 0xfbe   : > { %v14686_v62 = vld [vmem:[#allocation3 + $0x94] sm:$0x1]  ;;  %v9928_v11 = vrot.slane %v6434_v61, 9  ;;  %v6223_v0 = vsel %vm12416_vm6, %v6218_v13, %v6222_v51  ;;  %v9938_v34 = vcombine.low %v5472_v18, %v5486_v4  ;;  %v14703_v14 = vrot.slane %v6312_v41, 5  ;;  %v14707_v16 = vld [vmem:[#allocation3 + $0x70] sm:$0xf] }
 0xfbf   : > { %v6526_v19 = vrot.slane %v14686_v62, 5  ;;  %v14701_v15 = vcombine.low %v6209_v27, %v6223_v0  ;;  %v14705_v7 = vrot.slane %v6323_v23, 4  ;;  %v5488_v60 = vshrl.u32 %v14531_v2, 16 }
 0xfc0   : > { %v5491_v61 = vshll.u32 %v14531_v2, 16  ;;  %v5502_v46 = vshrl.u32 %v14539_v26, 16  ;;  %6596 = vrot.lane.b32.xlu1 %v9938_v34, %s11432_s22  ;;  %v6138_v51 = vsel %vm12289_vm3, %v9907_v39, %v6137_v29  ;;  %v5766_v27 = vsel %vm12289_vm3, %v9890_v6, %v5765_v35 }
 0xfc1   : > { %v6527_v37 = vsel %vm12289_vm3, %v9928_v11, %v6526_v19  ;;  %v6059_v18 = vld [vmem:[#allocation3 + $0x58] sm:$0xe]  ;;  %v6326_v34 = vshll.u32 %v14657_v45, 16  ;;  %v5490_v29 = vrot.slane %v5488_v60, 4  ;;  %v5505_v11 = vshll.u32 %v14539_v26, 16 }
 0xfc2   : > { %v10001_v13 = vcombine.low %v6527_v37, %v6531_v50  ;;  %v14717_v41 = vld [vmem:[#allocation3 + $0x5c] sm:$0x1]  ;;  %v9906_v19 = vrot.slane %v6059_v18, 9  ;;  %v5692_v50 = vld [vmem:[#allocation3 + $0x58] sm:$0xe]  ;;  %v5493_v20 = vrot.slane %v5491_v61, 5 }
 0xfc3   : > { %v14721_v23 = vld [vmem:[#allocation3 + $0x5c] sm:$0x1]  ;;  %v6133_v4 = vrot.slane %v14717_v41, 5  ;;  %v14730_v37 = vld [vmem:[#allocation3 + $0x68] sm:$0xf]  ;;  %v9891_v39 = vrot.slane %v5692_v50, 9 }
 0xfc4   : > { %v5769_v0 = vrot.slane %v14721_v23, 5  ;;  %10457 = vmatmul.mubr.msk.bf16.gmra.mrb[56].mxu1 %vm16661_vm14, %v10001_v13  ;;  %v14733_v2 = vld [vmem:[#allocation3 + $0x58] sm:$0xf]  ;;  %v5504_v18 = vrot.slane %v5502_v46, 4  ;;  %v6234_v36 = vshll.u32 %v14249_v5, 16  ;;  %v5494_v61 = vor.u32 %v5493_v20, %v5490_v29 }
 0xfc5   : > { %v6134_v35 = vsel %vm12289_vm3, %v9906_v19, %v6133_v4  ;;  %v6248_v13 = vshll.u32 %v14251_v9, 16  ;;  %v5507_v42 = vrot.slane %v5505_v11, 5  ;;  %v5940_v46 = vshrl.u32 %v14733_v2, 16  ;;  %v14750_v4 = vld [vmem:[#allocation3 + $0x6c] sm:$0x1] }
 0xfc6   : > { %v9974_v1 = vcombine.low %v6134_v35, %v6138_v51  ;;  %v5770_v60 = vsel %vm12289_vm3, %v9891_v39, %v5769_v0  ;;  %v6236_v6 = vrot.slane %v6234_v36, 5  ;;  %v5495_v19 = vrot.slane %v5494_v61, 4  ;;  %v6061_v51 = vld [vmem:[#allocation3 + $0x68] sm:$0xe]  ;;  %v14763_v11 = vld [vmem:[#allocation3 + $0x74] sm:$0x1] }
 0xfc7   : > { %v9950_v50 = vcombine.low %v5766_v27, %v5770_v60  ;;  %v6250_v5 = vrot.slane %v6248_v13, 5  ;;  %v14758_v36 = vrot.slane %v6326_v34, 5  ;;  %v5508_v27 = vor.u32 %v5507_v42, %v5504_v18  ;;  %v6062_v39 = vld [vmem:[#allocation3 + $0x70] sm:$0xe]  ;;  %v14793_v20 = vld [vmem:[#allocation3 + $0x6c] sm:$0x1] }
 0xfc8   : > { %6764 = vrot.lane.b32.xlu0 %v9974_v1, %s11432_s22  ;;  %v6237_v1 = vsel %vm12416_vm6, %v14308_v48, %v6236_v6  ;;  %v14768_v35 = vrot.slane %v5940_v46, 4  ;;  %v5943_v60 = vshll.u32 %v14733_v2, 16  ;;  %v5954_v61 = vshrl.u32 %v14746_v8, 16  ;;  %v14780_v46 = vld [vmem:[#allocation3 + $0x64] sm:$0x1] }
 0xfc9   : > { %6644 = vrot.lane.b32.xlu1 %v9950_v50, %s11434_s6  ;;  %v6251_v29 = vsel %vm12416_vm6, %v14322_v59, %v6250_v5  ;;  %v5500_v42 = vsel %vm12416_vm6, %v5495_v19, %v14511_v32  ;;  %v5509_v34 = vrot.slane %v5508_v27, 4  ;;  %v5957_v48 = vshll.u32 %v14746_v8, 16  ;;  %v5694_v0 = vld [vmem:[#allocation3 + $0x68] sm:$0xe] }
 0xfca   : > { %v9987_v18 = vcombine.low %v6237_v1, %v6251_v29  ;;  %v9908_v6 = vrot.slane %v6061_v51, 9  ;;  %v6141_v59 = vrot.slane %v14750_v4, 5  ;;  %v9909_v13 = vrot.slane %v6062_v39, 9  ;;  %v5693_v1 = vld [vmem:[#allocation3 + $0x60] sm:$0xe] }
 0xfcb   : > { %v6145_v50 = vrot.slane %v14763_v11, 5  ;;  %v5514_v5 = vsel %vm12416_vm6, %v5509_v34, %v14527_v43  ;;  %v5516_v32 = vshrl.u32 %v14541_v25, 16  ;;  %v5519_v19 = vshll.u32 %v14541_v25, 16 }
 0xfcc   : > { %6852 = vrot.lane.b32.xlu0 %v14701_v15, %s11429_s17  ;;  %v5530_v27 = vshrl.u32 %v14547_v40, 16  ;;  %v9939_v15 = vcombine.low %v5500_v42, %v5514_v5  ;;  %v14788_v51 = vrot.slane %v5943_v60, 5  ;;  %v6142_v39 = vsel %vm12289_vm3, %v9908_v6, %v6141_v59 }
 0xfcd   : > { %v5533_v29 = vshll.u32 %v14547_v40, 16  ;;  %v6146_v43 = vsel %vm12289_vm3, %v9909_v13, %v6145_v50  ;;  %v5518_v34 = vrot.slane %v5516_v32, 4  ;;  %v5521_v9 = vrot.slane %v5519_v19, 5 }
 0xfce   : > { %v5532_v25 = vrot.slane %v5530_v27, 4  ;;  %v16662_v42 = vcombine.low %v14655_v54, %v14657_v45  ;;  %6598 = vrot.lane.b32.xlu1 %v9939_v15, %s11432_s22  ;;  %v6262_v6 = vshll.u32 %v14301_v56, 16  ;;  %v6276_v59 = vshll.u32 %v14305_v52, 16 }
 0xfcf   : > { %v5535_v60 = vrot.slane %v5533_v29, 5  ;;  %v9892_v5 = vrot.slane %v5693_v1, 9  ;;  %v5522_v40 = vor.u32 %v5521_v9, %v5518_v34  ;;  %v5773_v26 = vrot.slane %v14780_v46, 5 }
 0xfd0   : > { %6820 = vrot.lane.b32.xlu0 %v16662_v42, %s11434_s6  ;;  %v9893_v13 = vrot.slane %v5694_v0, 9  ;;  %v5777_v50 = vrot.slane %v14793_v20, 5  ;;  %v9958_v32 = vcombine.low %v14733_v2, %v14746_v8  ;;  %v6264_v54 = vrot.slane %v6262_v6, 5 }
 0xfd1   : > { %v5536_v19 = vor.u32 %v5535_v60, %v5532_v25  ;;  %v6278_v45 = vrot.slane %v6276_v59, 5  ;;  %v14808_v27 = vrot.slane %v5954_v61, 4  ;;  %v9975_v15 = vcombine.low %v6142_v39, %v6146_v43 }
 0xfd2   : > { %v5523_v29 = vrot.slane %v5522_v40, 4  ;;  %v6337_v56 = vshrl.u32 %v14707_v16, 16  ;;  %6700 = vrot.lane.b32.xlu1 %v9958_v32, %s11429_s17  ;;  %v6265_v0 = vsel %vm12416_vm6, %v14352_v3, %v6264_v54  ;;  %v5774_v25 = vsel %vm12289_vm3, %v9892_v5, %v5773_v26  ;;  %v14848_v54 = vld [vmem:[#allocation3 + $0x7c] sm:$0x1] }
 0xfd3   : > { %v5537_v52 = vrot.slane %v5536_v19, 4  ;;  %v6279_v2 = vsel %vm12416_vm6, %v14357_v28, %v6278_v45  ;;  %v5778_v9 = vsel %vm12289_vm3, %v9893_v13, %v5777_v50  ;;  %v6340_v61 = vshll.u32 %v14707_v16, 16  ;;  %v14850_v45 = vld [vmem:[#allocation3 + $0x50] sm:$0xf] }
 0xfd4   : > { %6854 = vrot.lane.b32.xlu0 %v9987_v18, %s11429_s17  ;;  %v5528_v40 = vsel %vm12416_vm6, %v5523_v29, %v14551_v17  ;;  %v9988_v8 = vcombine.low %v6265_v0, %v6279_v2  ;;  %v6351_v18 = vshrl.u32 %v14714_v30, 16  ;;  %v6354_v28 = vshll.u32 %v14714_v30, 16  ;;  %v6063_v0 = vld [vmem:[#allocation3 + $0x78] sm:$0xe]  ;;  %v6064_v2 = vld [vmem:[#allocation3 + $0x80] sm:$0xe] }
 0xfd5   : > { %v5542_v3 = vsel %vm12416_vm6, %v5537_v52, %v14605_v12  ;;  %v5544_v26 = vshrl.u32 %v14549_v44, 16  ;;  %v5547_v39 = vshll.u32 %v14549_v44, 16  ;;  %v5558_v17 = vshrl.u32 %v14559_v22, 16 }
 0xfd6   : > { %v9940_v1 = vcombine.low %v5528_v40, %v5542_v3  ;;  %v5561_v43 = vshll.u32 %v14559_v22, 16  ;;  %v14836_v34 = vrot.slane %v5957_v48, 5  ;;  %v9951_v42 = vcombine.low %v5774_v25, %v5778_v9  ;;  %v14861_v9 = vld [vmem:[#allocation3 + $0x84] sm:$0x1] }
 0xfd7   : > { %v5546_v60 = vrot.slane %v5544_v26, 4  ;;  %v6290_v12 = vshll.u32 %v14324_v24, 16  ;;  %v5549_v6 = vrot.slane %v5547_v39, 5  ;;  %v5560_v59 = vrot.slane %v5558_v17, 4  ;;  %v14869_v39 = vld [vmem:[#allocation3 + $0x58] sm:$0xf] }
 0xfd8   : > { %6766 = vrot.lane.b32.xlu0 %v9975_v15, %s11432_s22  ;;  %6600 = vrot.lane.b32.xlu1 %v9940_v1, %s11432_s22  ;;  %v5563_v5 = vrot.slane %v5561_v43, 5  ;;  %v6304_v13 = vshll.u32 %v14330_v31, 16  ;;  %v14842_v50 = vrot.slane %v6337_v56, 4  ;;  %v14844_v32 = vrot.slane %v6340_v61, 5 }
 0xfd9   : > { %v14846_v19 = vrot.slane %v6351_v18, 4  ;;  %v6292_v48 = vrot.slane %v6290_v12, 5  ;;  %v14852_v15 = vrot.slane %v6354_v28, 5  ;;  %v5550_v24 = vor.u32 %v5549_v6, %v5546_v60 }
 0xfda   : > { %v5564_v29 = vor.u32 %v5563_v5, %v5560_v59  ;;  %v6306_v52 = vrot.slane %v6304_v13, 5  ;;  %v5968_v56 = vshrl.u32 %v14730_v37, 16  ;;  %v5971_v25 = vshll.u32 %v14730_v37, 16 }
 0xfdb   : > { %v6293_v31 = vsel %vm12416_vm6, %v14390_v63, %v6292_v48  ;;  %v5982_v40 = vshrl.u32 %v14741_v21, 16  ;;  %v5551_v61 = vrot.slane %v5550_v24, 4  ;;  %v5985_v18 = vshll.u32 %v14741_v21, 16  ;;  %v14891_v24 = vld [vmem:[#allocation3 + $0x74] sm:$0x1] }
 0xfdc   : > { %6856 = vrot.lane.b32.xlu0 %v9988_v8, %s11429_s17  ;;  %6646 = vrot.lane.b32.xlu1 %v9951_v42, %s11434_s6  ;;  %v5565_v3 = vrot.slane %v5564_v29, 4  ;;  %v6307_v8 = vsel %vm12416_vm6, %v14383_v47, %v6306_v52  ;;  %v9910_v63 = vrot.slane %v6063_v0, 9  ;;  %v6149_v26 = vrot.slane %v14848_v54, 5  ;;  %v5695_v0 = vld [vmem:[#allocation3 + $0x70] sm:$0xe] }
 0xfdd   : > { %v9989_v28 = vcombine.low %v6293_v31, %v6307_v8  ;;  %v9911_v1 = vrot.slane %v6064_v2, 9  ;;  %v5556_v17 = vsel %vm12416_vm6, %v5551_v61, %v14624_v49  ;;  %v6153_v42 = vrot.slane %v14861_v9, 5 }
 0xfde   : > { %v5570_v43 = vsel %vm12416_vm6, %v5565_v3, %v14639_v55  ;;  %v5572_v47 = vshrl.u32 %v14850_v45, 16  ;;  %v16663_v60 = vcombine.low %v14707_v16, %v14714_v30  ;;  %v6150_v6 = vsel %vm12289_vm3, %v9910_v63, %v6149_v26  ;;  %v16665_v3 = vld [vmem:[#allocation65_spill] sm:$0xff]  ;;  %v5696_v63 = vld [vmem:[#allocation3 + $0x78] sm:$0xe] }
 0xfdf   : > { %v9941_v12 = vcombine.low %v5556_v17, %v5570_v43  ;;  %v5575_v59 = vshll.u32 %v14850_v45, 16  ;;  %v5581_v49 = vshll.u32 %v14677_v38, 16  ;;  %v6154_v55 = vsel %vm12289_vm3, %v9911_v1, %v6153_v42  ;;  %v16666_v43 = vld [vmem:[#allocation53_spill] sm:$0xff] }
 0xfe0   : > { %6822 = vrot.lane.b32.xlu0 %v16663_v60, %s11434_s6  ;;  %v5574_v5 = vrot.slane %v5572_v47, 4  ;;  %v5586_v13 = vshrl.u32 %v14869_v39, 16  ;;  %v5589_v48 = vshll.u32 %v14869_v39, 16  ;;  %v9976_v16 = vcombine.low %v6150_v6, %v6154_v55 }
 0xfe1   : > { %6602 = vrot.lane.b32.xlu1 %v9941_v12, %s11432_s22  ;;  %v5577_v30 = vrot.slane %v5575_v59, 5  ;;  %v5583_v29 = vrot.slane %v5581_v49, 5  ;;  %v5595_v52 = vshll.u32 %v14721_v23, 16  ;;  %v16664_v31 = vor.u32 %v14703_v14, %v14693_v58  ;;  %v14903_v23 = vld [vmem:[#allocation3 + $0x7c] sm:$0x1] }
 0xfe2   : > { %v5588_v2 = vrot.slane %v5586_v13, 4  ;;  %v5591_v38 = vrot.slane %v5589_v48, 5  ;;  %v6318_v8 = vshll.u32 %v16665_v3, 16  ;;  %v6329_v17 = vor.u32 %v14758_v36, %v14705_v7  ;;  %v6176_v14 = vld [vmem:[#allocation3 + $0x80] sm:$0xf] }
 0xfe3   : > { %v6316_v61 = vrot.slane %v16664_v31, 4  ;;  %v5578_v26 = vor.u32 %v5577_v30, %v5574_v5  ;;  %v5597_v1 = vrot.slane %v5595_v52, 5  ;;  %v6332_v42 = vshll.u32 %v16666_v43, 16  ;;  %v6177_v52 = vld [vmem:[#allocation3 + $0x88] sm:$0xf] }
 0xfe4   : > { %6858 = vrot.lane.b32.xlu0 %v9989_v28, %s11429_s17  ;;  %v5592_v47 = vor.u32 %v5591_v38, %v5588_v2  ;;  %v6320_v60 = vrot.slane %v6318_v8, 5  ;;  %v9894_v12 = vrot.slane %v5695_v0, 9  ;;  %v5781_v58 = vrot.slane %v14891_v24, 5  ;;  %v14920_v38 = vld [vmem:[#allocation3 + $0x60] sm:$0xf] }
 0xfe5   : > { %v16667_v6 = vcombine.low %v14730_v37, %v14741_v21  ;;  %v5579_v28 = vrot.slane %v5578_v26, 4  ;;  %v6330_v59 = vrot.slane %v6329_v17, 4  ;;  %v6334_v49 = vrot.slane %v6332_v42, 5  ;;  %v14934_v3 = vld [vmem:[#allocation3 + $0x68] sm:$0xf] }
 0xfe6   : > { %v9895_v55 = vrot.slane %v5696_v63, 9  ;;  %v5593_v7 = vrot.slane %v5592_v47, 4  ;;  %v6321_v36 = vsel %vm12416_vm6, %v6316_v61, %v6320_v60  ;;  %v5782_v5 = vsel %vm12289_vm3, %v9894_v12, %v5781_v58  ;;  %v14957_v58 = vld [vmem:[#allocation3 + $0x78] sm:$0xf] }
 0xfe7   : > { %6702 = vrot.lane.b32.xlu1 %v16667_v6, %s11429_s17  ;;  %v5785_v13 = vrot.slane %v14903_v23, 5  ;;  %v5584_v48 = vsel %vm12416_vm6, %v5579_v28, %v5583_v29  ;;  %v6335_v30 = vsel %vm12416_vm6, %v6330_v59, %v6334_v49  ;;  %v6365_v0 = vshrl.u32 %v6176_v14, 16 }
 0xfe8   : > { %6768 = vrot.lane.b32.xlu0 %v9976_v16, %s11432_s22  ;;  %v6368_v2 = vshll.u32 %v6176_v14, 16  ;;  %v14924_v31 = vrot.slane %v5968_v56, 4  ;;  %v14928_v61 = vrot.slane %v5971_v25, 5  ;;  %v5598_v16 = vsel %vm12416_vm6, %v5593_v7, %v5597_v1 }
 0xfe9   : > { %v5786_v29 = vsel %vm12289_vm3, %v9895_v55, %v5785_v13  ;;  %v14938_v8 = vrot.slane %v5982_v40, 4  ;;  %v14942_v56 = vrot.slane %v5985_v18, 5  ;;  %v9942_v63 = vcombine.low %v5584_v48, %v5598_v16  ;;  %v14966_v48 = vld [vmem:[#allocation3 + $0x80] sm:$0xf] }
 0xfea   : > { %v9990_v37 = vcombine.low %v6321_v36, %v6335_v30  ;;  %v9952_v25 = vcombine.low %v5782_v5, %v5786_v29  ;;  %v14944_v26 = vrot.slane %v6365_v0, 4  ;;  %v6379_v17 = vshrl.u32 %v6177_v52, 16  ;;  %v16668_v36 = vld [vmem:[#allocation35_spill] sm:$0xff]  ;;  %v14971_v29 = vld [vmem:[#allocation3 + $0x8c] sm:$0x1] }
 0xfeb   : > { %v5600_v1 = vshrl.u32 %v14920_v38, 16  ;;  %6604 = vrot.lane.b32.xlu1 %v9942_v63, %s11432_s22  ;;  %v14949_v43 = vrot.slane %v6368_v2, 5  ;;  %v5603_v40 = vshll.u32 %v14920_v38, 16  ;;  %v5614_v21 = vshrl.u32 %v14934_v3, 16 }
 0xfec   : > { %6860 = vrot.lane.b32.xlu0 %v9990_v37, %s11429_s17  ;;  %v5617_v18 = vshll.u32 %v14934_v3, 16  ;;  %v9984_v42 = vcombine.low %v6176_v14, %v6177_v52  ;;  %v5609_v60 = vshll.u32 %v14780_v46, 16  ;;  %v6343_v12 = vor.u32 %v14844_v32, %v14842_v50  ;;  %v16669_v32 = vld [vmem:[#allocation44_spill] sm:$0xff] }
 0xfed   : > { %v5602_v47 = vrot.slane %v5600_v1, 4  ;;  %v5605_v6 = vrot.slane %v5603_v40, 5  ;;  %v5616_v28 = vrot.slane %v5614_v21, 4  ;;  %v5623_v49 = vshll.u32 %v14793_v20, 16  ;;  %v6065_v20 = vld [vmem:[#allocation3 + $0x88] sm:$0xe] }
 0xfee   : > { %v5619_v59 = vrot.slane %v5617_v18, 5  ;;  %v6382_v55 = vshll.u32 %v6177_v52, 16  ;;  %v6344_v7 = vrot.slane %v6343_v12, 4  ;;  %v6346_v5 = vshll.u32 %v16668_v36, 16  ;;  %v6066_v1 = vld [vmem:[#allocation3 + $0x90] sm:$0xe] }
 0xfef   : > { %v6357_v14 = vor.u32 %v14852_v15, %v14846_v19  ;;  %6648 = vrot.lane.b32.xlu1 %v9952_v25, %s11434_s6  ;;  %v5606_v46 = vor.u32 %v5605_v6, %v5602_v47  ;;  %v6360_v13 = vshll.u32 %v16669_v32, 16  ;;  %v5996_v30 = vshrl.u32 %v14957_v58, 16  ;;  %v14973_v19 = vld [vmem:[#allocation3 + $0x94] sm:$0x1] }
 0xff0   : > { %6824 = vrot.lane.b32.xlu0 %v9984_v42, %s11434_s6  ;;  %v5620_v50 = vor.u32 %v5619_v59, %v5616_v28  ;;  %v14969_v52 = vrot.slane %v6379_v17, 4  ;;  %v5611_v0 = vrot.slane %v5609_v60, 5  ;;  %v6348_v2 = vrot.slane %v6346_v5, 5  ;;  %v14979_v42 = vld [vmem:[#allocation3 + $0x70] sm:$0xf] }
 0xff1   : > { %v6358_v16 = vrot.slane %v6357_v14, 4  ;;  %v5607_v15 = vrot.slane %v5606_v46, 4  ;;  %v5625_v37 = vrot.slane %v5623_v49, 5  ;;  %v6362_v25 = vrot.slane %v6360_v13, 5  ;;  %v14989_v28 = vld [vmem:[#allocation3 + $0x78] sm:$0xf] }
 0xff2   : > { %v5621_v63 = vrot.slane %v5620_v50, 4  ;;  %v6384_v40 = vrot.slane %v6382_v55, 5  ;;  %v6349_v21 = vsel %vm12416_vm6, %v6344_v7, %v6348_v2  ;;  %v5999_v18 = vshll.u32 %v14957_v58, 16 }
 0xff3   : > { %v6010_v17 = vshrl.u32 %v14966_v48, 16  ;;  %v5612_v47 = vsel %vm12416_vm6, %v5607_v15, %v5611_v0  ;;  %v6363_v12 = vsel %vm12416_vm6, %v6358_v16, %v6362_v25  ;;  %v14987_v6 = vrot.slane %v5996_v30, 4  ;;  %v5697_v15 = vld [vmem:[#allocation3 + $0x80] sm:$0xe] }
 0xff4   : > { %v5626_v60 = vsel %vm12416_vm6, %v5621_v63, %v5625_v37  ;;  %v9991_v49 = vcombine.low %v6349_v21, %v6363_v12  ;;  %v9960_v55 = vcombine.low %v14957_v58, %v14966_v48  ;;  %v9912_v7 = vrot.slane %v6065_v20, 9  ;;  %v15007_v21 = vld [vmem:[#allocation3 + $0x84] sm:$0x1]  ;;  %v16670_v12 = vld [vmem:[#allocation54_spill] sm:$0xff] }
 0xff5   : > { %v9943_v59 = vcombine.low %v5612_v47, %v5626_v60  ;;  %v6157_v36 = vrot.slane %v14971_v29, 5  ;;  %v9913_v5 = vrot.slane %v6066_v1, 9  ;;  %v6161_v14 = vrot.slane %v14973_v19, 5 }
 0xff6   : > { %v5628_v46 = vshrl.u32 %v14979_v42, 16  ;;  %6862 = vrot.lane.b32.xlu0 %v9991_v49, %s11429_s17  ;;  %v5631_v50 = vshll.u32 %v14979_v42, 16  ;;  %v5637_v32 = vshll.u32 %v14891_v24, 16  ;;  %v5642_v13 = vshrl.u32 %v14989_v28, 16  ;;  %v5698_v49 = vld [vmem:[#allocation3 + $0x88] sm:$0xe] }
 0xff7   : > { %6606 = vrot.lane.b32.xlu1 %v9943_v59, %s11432_s22  ;;  %v5645_v30 = vshll.u32 %v14989_v28, 16  ;;  %v6158_v20 = vsel %vm12289_vm3, %v9912_v7, %v6157_v36  ;;  %v6162_v0 = vsel %vm12289_vm3, %v9913_v5, %v6161_v14  ;;  %v5651_v16 = vshll.u32 %v14903_v23, 16  ;;  %v16671_v36 = vld [vmem:[#allocation59_spill] sm:$0xff]  ;;  %v15016_v14 = vld [vmem:[#allocation3 + $0x8c] sm:$0x1] }
 0xff8   : > { %v5630_v2 = vrot.slane %v5628_v46, 4  ;;  %v9977_v63 = vcombine.low %v6158_v20, %v6162_v0  ;;  %v5633_v37 = vrot.slane %v5631_v50, 5  ;;  %v5639_v25 = vrot.slane %v5637_v32, 5 }
 0xff9   : > { %v5644_v1 = vrot.slane %v5642_v13, 4  ;;  %v5647_v24 = vrot.slane %v5645_v30, 5  ;;  %v5653_v47 = vrot.slane %v5651_v16, 5  ;;  %v6371_v60 = vor.u32 %v14949_v43, %v14944_v26  ;;  %v6178_v43 = vld [vmem:[#allocation3 + $0x90] sm:$0xf] }
 0xffa   : > { %v6374_v59 = vshll.u32 %v16670_v12, 16  ;;  %6770 = vrot.lane.b32.xlu0 %v9977_v63, %s11432_s22  ;;  %v5634_v23 = vor.u32 %v5633_v37, %v5630_v2  ;;  %v6385_v7 = vor.u32 %v6384_v40, %v14969_v52  ;;  %v6388_v5 = vshll.u32 %v16671_v36, 16  ;;  %v6179_v16 = vld [vmem:[#allocation3 + $0x98] sm:$0xf] }
 0xffb   : > { %6704 = vrot.lane.b32.xlu1 %v9960_v55, %s11429_s17  ;;  %v9896_v46 = vrot.slane %v5697_v15, 9  ;;  %v5648_v50 = vor.u32 %v5647_v24, %v5644_v1  ;;  %v6372_v32 = vrot.slane %v6371_v60, 4  ;;  %v5789_v26 = vrot.slane %v15007_v21, 5  ;;  %v15028_v60 = vld [vmem:[#allocation3 + $0x80] sm:$0xf] }
 0xffc   : > { %v6376_v13 = vrot.slane %v6374_v59, 5  ;;  %v5635_v30 = vrot.slane %v5634_v23, 4  ;;  %v6386_v20 = vrot.slane %v6385_v7, 4  ;;  %v6390_v0 = vrot.slane %v6388_v5, 5  ;;  %v15034_v7 = vld [vmem:[#allocation3 + $0x88] sm:$0xf] }
 0xffd   : > { %v9897_v55 = vrot.slane %v5698_v49, 9  ;;  %v5649_v63 = vrot.slane %v5648_v50, 4  ;;  %v5790_v40 = vsel %vm12289_vm3, %v9896_v46, %v5789_v26  ;;  %v5793_v2 = vrot.slane %v15016_v14, 5 }
 0xffe   : > { %v6377_v52 = vsel %vm12416_vm6, %v6372_v32, %v6376_v13  ;;  %v5640_v15 = vsel %vm12416_vm6, %v5635_v30, %v5639_v25  ;;  %v6391_v37 = vsel %vm12416_vm6, %v6386_v20, %v6390_v0  ;;  %v6393_v1 = vshrl.u32 %v6178_v43, 16 }
 0xfff   : > { %v6396_v24 = vshll.u32 %v6178_v43, 16  ;;  %v5654_v12 = vsel %vm12416_vm6, %v5649_v63, %v5653_v47  ;;  %v9992_v59 = vcombine.low %v6377_v52, %v6391_v37  ;;  %v5794_v49 = vsel %vm12289_vm3, %v9897_v55, %v5793_v2  ;;  %vm16701_vm3 = vmmov %vm16618_vm0 }
0x1000   : > { %v6407_v23 = vshrl.u32 %v6179_v16, 16  ;;  %v6013_v36 = vshll.u32 %v14966_v48, 16  ;;  %v9944_v25 = vcombine.low %v5640_v15, %v5654_v12  ;;  %v6395_v5 = vrot.slane %v6393_v1, 4  ;;  %v15051_v12 = vpop.permute.xlu1 %6692  ;;  %vm16708_vm11 = vmmov %vm16701_vm3 }
0x1001   : > { %v6398_v46 = vrot.slane %v6396_v24, 5  ;;  %6864 = vrot.lane.b32.xlu0 %v9992_v59, %s11429_s17  ;;  %v9953_v50 = vcombine.low %v5790_v40, %v5794_v49  ;;  %v6410_v13 = vshll.u32 %v6179_v16, 16  ;;  %v5656_v26 = vshrl.u32 %v15028_v60, 16  ;;  %v5810_v49 = vld [vmem:[#allocation3 + $0x90] sm:$0xf]  ;;  %vm16712_vm4 = vmmov %vm16701_vm3 }
0x1002   : > { %v6409_v32 = vrot.slane %v6407_v23, 4  ;;  %6608 = vrot.lane.b32.xlu1 %v9944_v25, %s11432_s22  ;;  %v9985_v47 = vcombine.low %v6178_v43, %v6179_v16  ;;  %v5659_v33 = vshll.u32 %v15028_v60, 16  ;;  %v5670_v30 = vshrl.u32 %v15034_v7, 16  ;;  %vm16719_vm8 = vmmov %vm16701_vm3 }
0x1003   : > { %v5673_v20 = vshll.u32 %v15034_v7, 16  ;;  %v6412_v0 = vrot.slane %v6410_v13, 5  ;;  %v5658_v55 = vrot.slane %v5656_v26, 4  ;;  %v5665_v63 = vshll.u32 %v15007_v21, 16  ;;  %vm16723_vm15 = vmmov %vm16701_vm3 }
0x1004   : > { %v6399_v52 = vor.u32 %v6398_v46, %v6395_v5  ;;  %v5661_v2 = vrot.slane %v5659_v33, 5  ;;  %v5672_v40 = vrot.slane %v5670_v30, 4  ;;  %v5679_v37 = vshll.u32 %v15016_v14, 16  ;;  %v15063_v33 = vpop.permute.xlu0 %6812 }
0x1005   : > { %v5675_v15 = vrot.slane %v5673_v20, 5  ;;  %v15047_v1 = vrot.slane %v5999_v18, 5  ;;  %6826 = vrot.lane.b32.xlu0 %v9985_v47, %s11434_s6  ;;  %v6402_v16 = vshll.u32 %v14686_v62, 16  ;;  %v6413_v24 = vor.u32 %v6412_v0, %v6409_v32  ;;  %v5809_v18 = vld [vmem:[#allocation3 + $0x88] sm:$0xf] }
0x1006   : > { %v6400_v43 = vrot.slane %v6399_v52, 4  ;;  %v15055_v21 = vrot.slane %v6010_v17, 4  ;;  %6650 = vrot.lane.b32.xlu1 %v9953_v50, %s11434_s6  ;;  %v5662_v59 = vor.u32 %v5661_v2, %v5658_v55  ;;  %v6416_v58 = vshll.u32 %v14631_v53, 16  ;;  %v15071_v52 = vpop.permute.xlu1 %6694  ;;  %v16672_v2 = vld [vmem:[#allocation49_spill] sm:$0xff] }
0x1007   : > { %v5676_v14 = vor.u32 %v5675_v15, %v5672_v40  ;;  %v15059_v23 = vrot.slane %v6013_v36, 5  ;;  %v5667_v25 = vrot.slane %v5665_v63, 5  ;;  %v6404_v5 = vrot.slane %v6402_v16, 5 }
0x1008   : > { %v6414_v62 = vrot.slane %v6413_v24, 4  ;;  %v5663_v46 = vrot.slane %v5662_v59, 4  ;;  %v5681_v13 = vrot.slane %v5679_v37, 5  ;;  %v6418_v26 = vrot.slane %v6416_v58, 5  ;;  %v16674_v37 = vld [vmem:[#allocation48_spill] sm:$0xff]  ;;  %v16676_v24 = vld [vmem:[#allocation31_spill] sm:$0xff] }
0x1009   : > { %v5677_v32 = vrot.slane %v5676_v14, 4  ;;  %v6405_v48 = vsel %vm12416_vm6, %v6400_v43, %v6404_v5  ;;  %v6024_v17 = vshrl.u32 %v5809_v18, 16  ;;  %v6027_v50 = vshll.u32 %v5809_v18, 16  ;;  %v16678_v58 = vld [vmem:[#allocation55_spill] sm:$0xff] }
0x100a   : > { %v6038_v47 = vshrl.u32 %v5810_v49, 16  ;;  %v5668_v53 = vsel %vm12416_vm6, %v5663_v46, %v5667_v25  ;;  %v6419_v30 = vsel %vm12416_vm6, %v6414_v62, %v6418_v26  ;;  %v6041_v20 = vshll.u32 %v5810_v49, 16  ;;  %v16680_v46 = vld [vmem:[#allocation39_spill] sm:$0xff] }
0x100b   : > { %v5682_v36 = vsel %vm12416_vm6, %v5677_v32, %v5681_v13  ;;  %v9993_v55 = vcombine.low %v6405_v48, %v6419_v30  ;;  %v9961_v63 = vcombine.low %v5809_v18, %v5810_v49  ;;  %v16673_v40 = vshll.u32 %v16672_v2, 16  ;;  %v16682_v18 = vld [vmem:[#allocation63_spill] sm:$0xff]  ;;  %v16683_v13 = vld [vmem:[#allocation57_spill] sm:$0xff]  ;;  %v16686_v30 = vld [vmem:[#allocation46_spill] sm:$0xff] }
0x100c   : > { %v9945_v0 = vcombine.low %v5668_v53, %v5682_v36  ;;  %v16675_v43 = vshll.u32 %v16674_v37, 16  ;;  %v16677_v59 = vshll.u32 %v16676_v24, 16  ;;  %v16679_v25 = vshll.u32 %v16678_v58, 16  ;;  %v16688_v37 = vld [vmem:[#allocation62_spill] sm:$0xff]  ;;  %v16690_v24 = vld [vmem:[#allocation52_spill] sm:$0xff]  ;;  %v15106_v58 = vpop.permute.xlu0 %6814 }
0x100d   : > { %v5839_v15 = vrot.slane %v16673_v40, 5  ;;  %v16681_v62 = vshll.u32 %v16680_v46, 16  ;;  %6866 = vrot.lane.b32.xlu0 %v9993_v55, %s11429_s17  ;;  %v16684_v26 = vshll.u32 %v16683_v13, 16  ;;  %v16685_v53 = vshll.u32 %v14515_v57, 16 }
0x100e   : > { %v5853_v16 = vrot.slane %v16675_v43, 5  ;;  %v5867_v14 = vrot.slane %v16677_v59, 5  ;;  %v5881_v5 = vrot.slane %v16679_v25, 5  ;;  %6610 = vrot.lane.b32.xlu1 %v9945_v0, %s11432_s22  ;;  %v16687_v2 = vshll.u32 %v16686_v30, 16  ;;  %v16689_v0 = vld [vmem:[#allocation51_spill] sm:$0xff]  ;;  %v16691_v59 = vld [vmem:[#allocation50_spill] sm:$0xff] }
0x100f   : > { %v5895_v32 = vrot.slane %v16681_v62, 5  ;;  %v5840_v49 = vsel %vm12416_vm6, %v16682_v18, %v5839_v15  ;;  %v5909_v48 = vrot.slane %v16684_v26, 5  ;;  %v5923_v36 = vrot.slane %v16685_v53, 5  ;;  %v16692_v62 = vld [vmem:[#allocation47_spill] sm:$0xff]  ;;  %v16693_v18 = vld [vmem:[#allocation32_spill] sm:$0xff] }
0x1010   : > { %v5937_v40 = vrot.slane %v16687_v2, 5  ;;  %v5854_v43 = vsel %vm12416_vm6, %v16688_v37, %v5853_v16  ;;  %v5868_v55 = vsel %vm12416_vm6, %v16689_v0, %v5867_v14  ;;  %v5882_v15 = vsel %vm12416_vm6, %v16690_v24, %v5881_v5  ;;  %v16694_v26 = vld [vmem:[#allocation56_spill] sm:$0xff]  ;;  %v15126_v2 = vpop.permute.xlu1 %6696 }
0x1011   : > { %v5896_v57 = vsel %vm12416_vm6, %v16691_v59, %v5895_v32  ;;  %v15108_v25 = vcombine.low %v5840_v49, %v5854_v43  ;;  %v15110_v46 = vcombine.low %v5868_v55, %v5882_v15  ;;  %v5910_v16 = vsel %vm12416_vm6, %v16692_v62, %v5909_v48  ;;  %v16695_v43 = vld [vmem:[#allocation61_spill] sm:$0xff]  ;;  %v15146_v15 = vpop.permute.xlu0 %6816 }
0x1012   : > { %v5924_v14 = vsel %vm12416_vm6, %v16693_v18, %v5923_v36  ;;  %v6026_v13 = vrot.slane %v6024_v17, 4  ;;  %v15118_v5 = vcombine.low %v5896_v57, %v5910_v16  ;;  %v5938_v32 = vsel %vm12416_vm6, %v16694_v26, %v5937_v40  ;;  %6706 = vrot.lane.b32.xlu1 %v9961_v63, %s11429_s17 }
0x1013   : > { %v5960_v49 = vor.u32 %v14836_v34, %v14808_v27  ;;  %v6029_v53 = vrot.slane %v6027_v50, 5  ;;  %v6040_v30 = vrot.slane %v6038_v47, 4  ;;  %v15128_v48 = vcombine.low %v5924_v14, %v5938_v32 }
0x1014   : > { %v5946_v17 = vor.u32 %v14788_v51, %v14768_v35  ;;  %v6043_v36 = vrot.slane %v6041_v20, 5  ;;  %v16696_v0 = vshll.u32 %v16695_v43, 16  ;;  %v5974_v40 = vor.u32 %v14928_v61, %v14924_v31 }
0x1015   : > { %v5961_v37 = vrot.slane %v5960_v49, 4  ;;  %v16697_v27 = vshll.u32 %v14717_v41, 16  ;;  %v5977_v47 = vshll.u32 %v14750_v4, 16  ;;  %v5988_v63 = vor.u32 %v14942_v56, %v14938_v8 }
0x1016   : > { %v5965_v55 = vrot.slane %v16696_v0, 5  ;;  %v5947_v50 = vrot.slane %v5946_v17, 4  ;;  %v5975_v51 = vrot.slane %v5974_v40, 4  ;;  %v5991_v20 = vshll.u32 %v14763_v11, 16  ;;  %v15155_v11 = vpop.permute.xlu1 %6698  ;;  %v15174_v0 = vpop.permute.xlu0 %6818 }
0x1017   : > { %v5951_v34 = vrot.slane %v16697_v27, 5  ;;  %v6002_v24 = vor.u32 %v15047_v1, %v14987_v6  ;;  %v5979_v31 = vrot.slane %v5977_v47, 5  ;;  %v5989_v61 = vrot.slane %v5988_v63, 4 }
0x1018   : > { %v5966_v35 = vsel %vm12416_vm6, %v5961_v37, %v5965_v55  ;;  %v6005_v4 = vshll.u32 %v14848_v54, 16  ;;  %v5993_v8 = vrot.slane %v5991_v20, 5  ;;  %v6016_v57 = vor.u32 %v15059_v23, %v15055_v21 }
0x1019   : > { %v5952_v41 = vsel %vm12416_vm6, %v5947_v50, %v5951_v34  ;;  %v6003_v56 = vrot.slane %v6002_v24, 4  ;;  %v5980_v6 = vsel %vm12416_vm6, %v5975_v51, %v5979_v31  ;;  %v6019_v62 = vshll.u32 %v14861_v9, 16  ;;  %v16698_v31 = vld [vmem:[#allocation40_spill] sm:$0xff] }
0x101a   : > { %v15151_v59 = vcombine.low %v5952_v41, %v5966_v35  ;;  %v6007_v1 = vrot.slane %v6005_v4, 5  ;;  %v9934_v16 = vcombine.low %v14850_v45, %v14869_v39  ;;  %v5994_v54 = vsel %vm12416_vm6, %v5989_v61, %v5993_v8  ;;  %v6637_v34 = vpop.permute.xlu1 %6636  ;;  %v6757_v50 = vpop.permute.xlu0 %6756  ;;  %v16699_v61 = vld [vmem:[#allocation42_spill] sm:$0xff] }
0x101b   : > { %v6017_v18 = vrot.slane %v6016_v57, 4  ;;  %v9935_v14 = vcombine.low %v14920_v38, %v14934_v3  ;;  %v6030_v26 = vor.u32 %v6029_v53, %v6026_v13  ;;  %v15166_v21 = vcombine.low %v5980_v6, %v5994_v54 }
0x101c   : > { %v6008_v23 = vsel %vm12416_vm6, %v6003_v56, %v6007_v1  ;;  %v6021_v32 = vrot.slane %v6019_v62, 5  ;;  %v6033_v49 = vshll.u32 %v14971_v29, 16  ;;  %v6044_v17 = vor.u32 %v6043_v36, %v6040_v30 }
0x101d   : > { %v6031_v9 = vrot.slane %v6030_v26, 4  ;;  %v6047_v37 = vshll.u32 %v14973_v19, 16  ;;  %v9936_v43 = vcombine.low %v14979_v42, %v14989_v28  ;;  %v9937_v55 = vcombine.low %v15028_v60, %v15034_v7 }
0x101e   : > { %v6022_v13 = vsel %vm12416_vm6, %v6017_v18, %v6021_v32  ;;  %v6035_v53 = vrot.slane %v6033_v49, 5  ;;  %v6045_v27 = vrot.slane %v6044_v17, 4  ;;  %v6639_v47 = vpop.permute.xlu1 %6638  ;;  %v6759_v63 = vpop.permute.xlu0 %6758  ;;  %v16700_v4 = vcombine.low %v16698_v31, %v16699_v61  ;;  %v16707_v32 = vld [vmem:[#allocation37_spill] sm:$0xff]  ;;  %v16709_v49 = vld [vmem:[#allocation43_spill] sm:$0xff] }
0x101f   : > { %v15180_v40 = vcombine.low %v6008_v23, %v6022_v13  ;;  %v6049_v29 = vrot.slane %v6047_v37, 5  ;;  %v6958_v10 = vsel %vm16702_vm7, %v15108_v25, %v6757_v50  ;;  %vm16705_vm1 = vcmask 785408  }
0x1020   : > { %v6036_v19 = vsel %vm12416_vm6, %v6031_v9, %v6035_v53  ;;  %vm16706_vm9 = vmmov %vm16705_vm1  ;;  %v6961_v25 = vsel %vm16708_vm11, %v15110_v46, %v6759_v63  ;;  %v16710_v9 = vld [vmem:[#allocation41_spill] sm:$0xff] }
0x1021   : > { %v6050_v30 = vsel %vm12416_vm6, %v6045_v27, %v6049_v29  ;;  %vm16703_vm6 = vcmask 523264   ;;  %v16711_v17 = vcombine.low %v16709_v49, %v16710_v9  ;;  %vm16716_vm2 = vmmov %vm16705_vm1  ;;  %v16721_v63 = vld [vmem:[#allocation45_spill] sm:$0xff] }
0x1022   : > { %v15186_v36 = vcombine.low %v6036_v19, %v6050_v30  ;;  %v6641_v35 = vpop.permute.xlu1 %6640  ;;  %v6761_v51 = vpop.permute.xlu0 %6760  ;;  %vm16704_vm0 = vmmov %vm16703_vm6 }
0x1023   : > { %v6981_v62 = vsel %vm16704_vm0, %v6958_v10, %v15063_v33  ;;  %v16713_v33 = vld [vmem:[#allocation64_spill] sm:$0xff]  ;;  %vm16714_vm10 = vmmov %vm16704_vm0  ;;  %v6964_v30 = vsel %vm16719_vm8, %v15118_v5, %v6761_v51 }
0x1024   : > { %vm16715_vm12 = vmmov %vm16704_vm0 }
0x1025   : > { %vm16718_vm5 = vmmov %vm16705_vm1 }
0x1026   : > { %v6763_v24 = vpop.permute.xlu0 %6762  ;;  %vm16724_vm13 = vmmov %vm16704_vm0 }
0x1027   : > { %vm16725_vm14 = vmmov %vm16704_vm0 }
0x1028   : > { %v6643_v20 = vpop.permute.xlu1 %6642  ;;  %vm16727_vm7 = vmmov %vm16705_vm1 }
0x1029   : > { %vm16730_vm0 = vmmov %vm16712_vm4 }
0x102a   : > { %vm16733_vm11 = vmmov %vm16716_vm2 }
0x1032   : > { %v6597_v41 = vpop.permute.xlu1 %6596 }
0x1033   : > { %v6894_v8 = vsel %vm16701_vm3, %v16700_v4, %v6597_v41  ;;  %v6985_v4 = vsel %vm16725_vm14, %v6964_v30, %v15146_v15  ;;  %vm16726_vm3 = vmmov %vm16705_vm1 }
0x1034   : > { %v6917_v6 = vsel %vm16703_vm6, %v6894_v8, %v6637_v34  ;;  %v16717_v34 = vmov 0.0|0.0   ;;  %vm16728_vm6 = vmmov %vm16712_vm4 }
0x1035   : > { %v6933_v18 = vsel %vm16706_vm9, %v6917_v6, %v15051_v12  ;;  %v6983_v12 = vsel %vm16715_vm12, %v6961_v25, %v15106_v58  ;;  %v6967_v51 = vsel %vm16728_vm6, %v15128_v48, %v6763_v24 }
0x103a   : > { %v6765_v56 = vpop.permute.xlu0 %6764 }
0x103b   : > { %v6645_v57 = vpop.permute.xlu1 %6644 }
0x103e   : > { %v6853_v1 = vpop.permute.xlu0 %6852 }
0x103f   : > { %v6997_v54 = vsel %vm16705_vm1, %v6981_v62, %v6853_v1  ;;  %vm16731_vm1 = vmmov %vm16714_vm10 }
0x1040   : > { %7220 = vmatprep.mubr.bf16.mxu0 %v6997_v54  ;;  %v6599_v23 = vpop.permute.xlu1 %6598  ;;  %v6987_v15 = vsel %vm16731_vm1, %v6967_v51, %v15174_v0  ;;  %vm16732_vm9 = vmmov %vm16731_vm1 }
0x1041   : > { %7221 = vmatmul.mubr.bf16.vlgmr.msra.gmra.mrb[40].mxu0 %v6933_v18  ;;  %v6897_v37 = vsel %vm16712_vm4, %v16711_v17, %v6599_v23  ;;  %vm16734_vm4 = vmmov %vm16716_vm2 }
0x1042   : > { %v6821_v26 = vpop.permute.xlu0 %6820  ;;  %10641 = vmatpush3.bf16.msra.mxu0 %v16707_v32  ;;  %v6919_v13 = vsel %vm16714_vm10, %v6897_v37, %v6639_v47  ;;  %v16720_v47 = vld [vmem:[#allocation60_spill] sm:$0xff]  ;;  %vm16735_vm10 = vmmov %vm16730_vm0 }
0x1043   : > { %10643 = vmatprep.subr.bf16.mxu0 %v16713_v33  ;;  %v6936_v46 = vsel %vm16718_vm5, %v6919_v13, %v15071_v52  ;;  %v16722_v41 = vcombine.low %v16720_v47, %v16721_v63  ;;  %v6970_v0 = vsel %vm16735_vm10, %v15151_v59, %v6765_v56  ;;  %vm16736_vm12 = vmmov %vm16731_vm1 }
0x1044   : > { %v6701_v27 = vpop.permute.xlu1 %6700  ;;  %vm16738_vm5 = vmmov %vm16726_vm3 }
0x1045   : > { %vm16739_vm8 = vmmov %vm16731_vm1 }
0x1046   : > { %v6855_v53 = vpop.permute.xlu0 %6854  ;;  %10645 = vmatpush3.bf16.msra.mxu0 %v16713_v33  ;;  %vm16742_vm14 = vmmov %vm16731_vm1 }
0x1047   : > { %v7000_v29 = vsel %vm16716_vm2, %v6983_v12, %v6855_v53  ;;  %10657 = vmatprep.subr.bf16.mxu0 %v16717_v34  ;;  %vm16737_vm2 = vmmov %vm16730_vm0 }
0x1048   : > { %7228 = vmatprep.mubr.bf16.mxu0 %v7000_v29  ;;  %vm16745_vm6 = vmmov %vm16731_vm1 }
0x1049   : > { %7229 = vmatmul.mubr.bf16.gmra.mrb[44].mxu0 %v6936_v46  ;;  %vm16747_vm1 = vmmov %vm16737_vm2 }
0x104a   : > { %v6767_v19 = vpop.permute.xlu0 %6766  ;;  %v6601_v50 = vpop.permute.xlu1 %6600  ;;  %vm16751_vm10 = vmmov %vm16745_vm6 }
0x104b   : > { %v6900_v58 = vsel %vm16723_vm15, %v16722_v41, %v6601_v50  ;;  %vm16740_vm15 = vmmov %vm16726_vm3 }
0x104c   : > { %v6921_v31 = vsel %vm16724_vm13, %v6900_v58, %v6641_v35  ;;  %v16729_v35 = vcombine.low %v14549_v44, %v14559_v22  ;;  %vm16741_vm13 = vmmov %vm16730_vm0 }
0x104d   : > { %v6939_v10 = vsel %vm16727_vm7, %v6921_v31, %v15126_v2  ;;  %v6973_v45 = vsel %vm16741_vm13, %v15166_v21, %v6767_v19  ;;  %vm16744_vm7 = vmmov %vm16734_vm4 }
0x104e   : > { %v6857_v61 = vpop.permute.xlu0 %6856  ;;  %v6647_v8 = vpop.permute.xlu1 %6646 }
0x104f   : > { %v7003_v52 = vsel %vm16726_vm3, %v6985_v4, %v6857_v61  ;;  %v15237_v18 = vpop.f32.mrb[44].mxu1  ;;  %vm16743_vm3 = vmmov %vm16730_vm0 }
0x1050   : > { %7236 = vmatprep.mubr.bf16.mxu0 %v7003_v52  ;;  %v15240_v23 = vpop.f32.mrb[45].mxu1 }
0x1051   : > { %7237 = vmatmul.mubr.bf16.gmra.mrb[48].mxu0 %v6939_v10  ;;  %v15244_v44 = vpop.f32.mrb[46].mxu1 }
0x1052   : > { %v6823_v5 = vpop.permute.xlu0 %6822  ;;  %v15246_v22 = vpop.f32.mrb[47].mxu1 }
0x1053   : > { %v6603_v6 = vpop.permute.xlu1 %6602  ;;  %v6991_v39 = vsel %vm16742_vm14, %v6973_v45, %v6823_v5 }
0x1054   : > { %v6903_v1 = vsel %vm16730_vm0, %v16729_v35, %v6603_v6  ;;  %vm16746_vm0 = vmmov %vm16734_vm4 }
0x1055   : > { %v6923_v54 = vsel %vm16732_vm9, %v6903_v1, %v6643_v20  ;;  %v6989_v20 = vsel %vm16736_vm12, %v6970_v0, %v6821_v26  ;;  %vm16748_vm9 = vmmov %vm16745_vm6 }
0x1056   : > { %v6859_v62 = vpop.permute.xlu0 %6858  ;;  %v6942_v48 = vsel %vm16734_vm4, %v6923_v54, %v15155_v11  ;;  %vm16750_vm4 = vmmov %vm16747_vm1 }
0x1057   : > { %v7006_v2 = vsel %vm16733_vm11, %v6987_v15, %v6859_v62  ;;  %vm16749_vm11 = vmmov %vm16746_vm0 }
0x1058   : > { %7244 = vmatprep.mubr.bf16.mxu0 %v7006_v2  ;;  %vm16752_vm12 = vmmov %vm16746_vm0 }
0x1059   : > { %v6703_v25 = vpop.permute.xlu1 %6702  ;;  %7245 = vmatmul.mubr.bf16.gmra.mrb[52].mxu0 %v6942_v48  ;;  %vm16758_vm14 = vmmov %vm16746_vm0 }
0x105a   : > { %v6769_v24 = vpop.permute.xlu0 %6768 }
0x105b   : > { %v6976_v21 = vsel %vm16747_vm1, %v15180_v40, %v6769_v24 }
0x105c   : > { %v15258_v59 = vpop.f32.mrb[48].mxu1 }
0x105d   : > { %v6605_v49 = vpop.permute.xlu1 %6604  ;;  %v15260_v56 = vpop.f32.mrb[49].mxu1 }
0x105e   : > { %v6861_v9 = vpop.permute.xlu0 %6860  ;;  %v6906_v17 = vsel %vm16737_vm2, %v9934_v16, %v6605_v49  ;;  %v15262_v26 = vpop.f32.mrb[50].mxu1  ;;  %vm16753_vm2 = vmmov %vm16747_vm1 }
0x105f   : > { %v7009_v11 = vsel %vm16738_vm5, %v6989_v20, %v6861_v9  ;;  %v6925_v37 = vsel %vm16739_vm8, %v6906_v17, %v6645_v57  ;;  %v15264_v29 = vpop.f32.mrb[51].mxu1  ;;  %vm16754_vm5 = vmmov %vm16745_vm6  ;;  %v16761_v17 = vld [vmem:[#allocation38_spill] sm:$0xff] }
0x1060   : > { %7252 = vmatprep.mubr.bf16.mxu0 %v7009_v11  ;;  %v6945_v13 = vsel %vm16740_vm15, %v6925_v37, %v6701_v27  ;;  %vm16755_vm8 = vmmov %vm16747_vm1 }
0x1061   : > { %v6649_v53 = vpop.permute.xlu1 %6648  ;;  %7253 = vmatmul.mubr.bf16.gmra.mrb[56].mxu0 %v6945_v13  ;;  %vm16756_vm15 = vmmov %vm16746_vm0 }
0x1062   : > { %v6825_v12 = vpop.permute.xlu0 %6824  ;;  %vm16757_vm13 = vmmov %vm16754_vm5 }
0x1063   : > { %v6993_v19 = vsel %vm16748_vm9, %v6976_v21, %v6825_v12 }
0x1068   : > { %v6863_v57 = vpop.permute.xlu0 %6862 }
0x1069   : > { %v6607_v16 = vpop.permute.xlu1 %6606  ;;  %v7012_v46 = vsel %vm16744_vm7, %v6991_v39, %v6863_v57  ;;  %vm16760_vm7 = vmmov %vm16747_vm1 }
0x106a   : > { %v6909_v27 = vsel %vm16743_vm3, %v9935_v14, %v6607_v16  ;;  %7260 = vmatprep.mubr.bf16.mxu0 %v7012_v46  ;;  %vm16759_vm3 = vmmov %vm16747_vm1 }
0x106b   : > { %v6927_v30 = vsel %vm16745_vm6, %v6909_v27, %v6647_v8  ;;  %vm16762_vm6 = vmmov %vm16747_vm1 }
0x106c   : > { %v6948_v50 = vsel %vm16746_vm0, %v6927_v30, %v6703_v25  ;;  %v6771_v47 = vpop.permute.xlu0 %6770  ;;  %vm16763_vm0 = vmmov %vm16747_vm1 }
0x106d   : > { %7261 = vmatmul.mubr.bf16.gmra.mrb[60].mxu0 %v6948_v50  ;;  %v6705_v63 = vpop.permute.xlu1 %6704  ;;  %v6979_v40 = vsel %vm16753_vm2, %v15186_v36, %v6771_v47  ;;  %vm16764_vm1 = vmmov %vm16763_vm0  ;;  %v16766_v50 = vmov 0.0  }
0x106e   : > { %vm16765_vm9 = vmmov %vm16763_vm0 }
0x106f   : > { %vm16771_vm2 = vmmov %vm16763_vm0 }
0x1073   : > { %v6865_v41 = vpop.permute.xlu0 %6864 }
0x1074   : > { %v6609_v58 = vpop.permute.xlu1 %6608  ;;  %v7015_v38 = vsel %vm16749_vm11, %v6993_v19, %v6865_v41  ;;  %vm16767_vm11 = vmmov 0  }
0x1075   : > { %v6912_v3 = vsel %vm16750_vm4, %v9936_v43, %v6609_v58  ;;  %7268 = vmatprep.mubr.bf16.mxu0 %v7015_v38  ;;  %vm16768_vm4 = vmmov %vm16763_vm0 }
0x1076   : > { %v6929_v14 = vsel %vm16751_vm10, %v6912_v3, %v6649_v53  ;;  %vm16769_vm10 = vmmov %vm16763_vm0 }
0x1077   : > { %v6951_v31 = vsel %vm16752_vm12, %v6929_v14, %v6705_v63  ;;  %v6827_v4 = vpop.permute.xlu0 %6826  ;;  %vm16770_vm12 = vmmov %vm16763_vm0 }
0x1078   : > { %7269 = vmatmul.mubr.bf16.gmra.mrb[64].mxu0 %v6951_v31  ;;  %v6651_v61 = vpop.permute.xlu1 %6650  ;;  %v6995_v8 = vsel %vm16754_vm5, %v6979_v40, %v6827_v4  ;;  %vm16772_vm5 = vmmov %vm16763_vm0 }
0x107f   : > { %v6867_v10 = vpop.permute.xlu0 %6866 }
0x1080   : > { %v6611_v52 = vpop.permute.xlu1 %6610  ;;  %v7018_v28 = vsel %vm16756_vm15, %v6995_v8, %v6867_v10  ;;  %vm16774_vm15 = vmmov %vm16763_vm0 }
0x1081   : > { %v6915_v42 = vsel %vm16755_vm8, %v9937_v55, %v6611_v52  ;;  %7276 = vmatprep.mubr.bf16.mxu0 %v7018_v28  ;;  %vm16773_vm8 = vmmov %vm16763_vm0 }
0x1082   : > { %v6931_v5 = vsel %vm16757_vm13, %v6915_v42, %v6651_v61  ;;  %vm16775_vm13 = vmmov %vm16763_vm0 }
0x1083   : > { %v15296_v6 = vpop.f32.mrb[52].mxu1 }
0x1084   : > { %v6707_v43 = vpop.permute.xlu1 %6706  ;;  %v7351_v36 = vpop.f32.mrb[53].mxu1 }
0x1085   : > { %v6954_v51 = vsel %vm16758_vm14, %v6931_v5, %v6707_v43  ;;  %v15298_v35 = vpop.f32.mrb[54].mxu1  ;;  %vm16776_vm14 = vmmov %vm16763_vm0 }
0x1086   : > { %7277 = vmatmul.mubr.bf16.gmra.mrb[68].mxu0 %v6954_v51  ;;  %v7354_v1 = vpop.f32.mrb[55].mxu1 }
0x1097   : > { %v15300_v62 = vpop.f32.mrb[56].mxu1 }
0x1098   : > { %v15302_v60 = vpop.f32.mrb[57].mxu1 }
0x1099   : > { %v15304_v7 = vpop.f32.mrb[58].mxu1 }
0x109a   : > { %v15306_v55 = vpop.f32.mrb[59].mxu1 }
0x1114   : > { %v10182_v15 = vpop.f32.mrb[40].mxu0 }
0x1115   : > { %v10183_v54 = vpop.f32.mrb[41].mxu0 }
0x1116   : > { %v10184_v2 = vadd.f32 %v10183_v54, %v10182_v15  ;;  %v10185_v25 = vpop.f32.mrb[42].mxu0 }
0x1117   : > { %v10186_v48 = vpop.f32.mrb[43].mxu0 }
0x1118   : > { %v15309_v24 = vadd.f32 %v10184_v2, %v15240_v23  ;;  %v10187_v0 = vadd.f32 %v10186_v48, %v10185_v25 }
0x111a   : > { %v15312_v20 = vadd.f32 %v10187_v0, %v15246_v22  ;;  %10468 = vmatprep.mubr.msk.f32.mxu0 %vm16759_vm3, %v15309_v24  ;;  %vm16777_vm3 = vmmov %vm16763_vm0 }
0x111c   : > { %v10188_v49 = vpop.f32.mrb[44].mxu0  ;;  %10469 = vmatmul.mubr.msk.f32.vlgmr.msra.gmra.mrb[6].mxu0 %vm16760_vm7, %v15312_v20  ;;  %vm16778_vm7 = vcmask 130048  }
0x111d   : > { %v10189_v9 = vpop.f32.mrb[45].mxu0  ;;  %10659 = vmatpush3.bf16.msra.mxu0 %v16761_v17 }
0x111e   : > { %v10190_v11 = vadd.f32 %v10189_v9, %v10188_v49  ;;  %v10191_v37 = vpop.f32.mrb[46].mxu0  ;;  %10661 = vmatprep.subr.bf16.mxu0 %v16707_v32 }
0x111f   : > { %v10192_v23 = vpop.f32.mrb[47].mxu0 }
0x1120   : > { %v15321_v13 = vadd.f32 %v15237_v18, %v10190_v11  ;;  %v10193_v22 = vadd.f32 %v10192_v23, %v10191_v37 }
0x1122   : > { %v15324_v53 = vadd.f32 %v15244_v44, %v10193_v22  ;;  %10471 = vmatprep.mubr.msk.f32.mxu0 %vm16762_vm6, %v15321_v13  ;;  %vm16779_vm6 = vmmov %vm16778_vm7 }
0x1124   : > { %v10194_v12 = vpop.f32.mrb[48].mxu0  ;;  %10472 = vmatmul.mubr.msk.f32.gmra.mrb[72].mxu0 %vm16763_vm0, %v15324_v53  ;;  %vm16780_vm0 = vmmov %vm16779_vm6 }
0x1125   : > { %v10195_v45 = vpop.f32.mrb[49].mxu0 }
0x1126   : > { %v10196_v39 = vadd.f32 %v10195_v45, %v10194_v12  ;;  %v10197_v16 = vpop.f32.mrb[50].mxu0 }
0x1127   : > { %v10198_v57 = vpop.f32.mrb[51].mxu0 }
0x1128   : > { %v15331_v27 = vadd.f32 %v10196_v39, %v15260_v56  ;;  %v10199_v18 = vadd.f32 %v10198_v57, %v10197_v16 }
0x112a   : > { %v15334_v46 = vadd.f32 %v10199_v18, %v15264_v29  ;;  %10474 = vmatprep.mubr.msk.f32.mxu0 %vm16764_vm1, %v15331_v27  ;;  %vm16781_vm1 = vmmov %vm16780_vm0 }
0x112c   : > { %v10200_v44 = vpop.f32.mrb[52].mxu0  ;;  %10475 = vmatmul.mubr.msk.f32.gmra.mrb[74].mxu0 %vm16765_vm9, %v15334_v46  ;;  %vm16782_vm9 = vmmov %vm16780_vm0 }
0x112d   : > { %v10201_v30 = vpop.f32.mrb[53].mxu0  ;;  %10535 = vmatprep.mubr.msk.f32.mxu0 %vm16767_vm11, %v16766_v50 }
0x112e   : > { %v10202_v47 = vadd.f32 %v10201_v30, %v10200_v44  ;;  %v10203_v63 = vpop.f32.mrb[54].mxu0 }
0x112f   : > { %v10204_v21 = vpop.f32.mrb[55].mxu0 }
0x1130   : > { %v15343_v56 = vadd.f32 %v15258_v59, %v10202_v47  ;;  %v10205_v19 = vadd.f32 %v10204_v21, %v10203_v63 }
0x1132   : > { %v15346_v29 = vadd.f32 %v15262_v26, %v10205_v19  ;;  %10477 = vmatprep.mubr.msk.f32.mxu1 %vm16768_vm4, %v15343_v56  ;;  %vm16783_vm4 = vmmov %vm16780_vm0 }
0x1134   : > { %10478 = vmatmul.mubr.msk.f32.vlgmr.msra.gmra.mrb[42].mxu1 %vm16769_vm10, %v15346_v29  ;;  %v10206_v41 = vpop.f32.mrb[56].mxu0  ;;  %vm16784_vm10 = vmmov %vm16780_vm0 }
0x1135   : > { %10648 = vmatpush3.bf16.msra.mxu1 %v16761_v17  ;;  %v10207_v58 = vpop.f32.mrb[57].mxu0 }
0x1136   : > { %10650 = vmatprep.subr.bf16.mxu1 %v16707_v32  ;;  %v10208_v38 = vadd.f32 %v10207_v58, %v10206_v41  ;;  %v10209_v3 = vpop.f32.mrb[58].mxu0 }
0x1137   : > { %v10210_v59 = vpop.f32.mrb[59].mxu0 }
0x1138   : > { %v15354_v14 = vadd.f32 %v10208_v38, %v7351_v36  ;;  %v10211_v31 = vadd.f32 %v10210_v59, %v10209_v3 }
0x113a   : > { %v15356_v26 = vadd.f32 %v10211_v31, %v7354_v1  ;;  %10480 = vmatprep.mubr.msk.f32.mxu1 %vm16770_vm12, %v15354_v14  ;;  %vm16785_vm12 = vmmov %vm16780_vm0 }
0x113c   : > { %10481 = vmatmul.mubr.msk.f32.gmra.mrb[60].mxu1 %vm16771_vm2, %v15356_v26  ;;  %vm16786_vm2 = vmmov %vm16780_vm0 }
0x1140   : > { %v10212_v61 = vpop.f32.mrb[60].mxu0 }
0x1141   : > { %v10213_v4 = vpop.f32.mrb[61].mxu0 }
0x1142   : > { %v10214_v40 = vadd.f32 %v10213_v4, %v10212_v61  ;;  %v10215_v8 = vpop.f32.mrb[62].mxu0 }
0x1143   : > { %v10216_v52 = vpop.f32.mrb[63].mxu0 }
0x1144   : > { %v15363_v10 = vadd.f32 %v15296_v6, %v10214_v40  ;;  %v10217_v42 = vadd.f32 %v10216_v52, %v10215_v8 }
0x1146   : > { %v15366_v28 = vadd.f32 %v15298_v35, %v10217_v42  ;;  %10483 = vmatprep.mubr.msk.f32.mxu1 %vm16772_vm5, %v15363_v10  ;;  %vm16787_vm5 = vmmov %vm16780_vm0 }
0x1148   : > { %10484 = vmatmul.mubr.msk.f32.gmra.mrb[62].mxu1 %vm16773_vm8, %v15366_v28  ;;  %vm16788_vm8 = vmmov %vm16780_vm0 }
0x114b   : > { %v10218_v43 = vpop.f32.mrb[64].mxu0 }
0x114c   : > { %v10219_v5 = vpop.f32.mrb[65].mxu0 }
0x114d   : > { %v10220_v51 = vadd.f32 %v10219_v5, %v10218_v43  ;;  %v10221_v36 = vpop.f32.mrb[66].mxu0 }
0x114e   : > { %v10222_v1 = vpop.f32.mrb[67].mxu0 }
0x114f   : > { %v15373_v15 = vadd.f32 %v10220_v51, %v15302_v60  ;;  %v10223_v6 = vadd.f32 %v10222_v1, %v10221_v36 }
0x1151   : > { %v15376_v54 = vadd.f32 %v10223_v6, %v15306_v55  ;;  %10486 = vmatprep.mubr.msk.f32.mxu1 %vm16774_vm15, %v15373_v15  ;;  %vm16789_vm15 = vmmov %vm16780_vm0 }
0x1153   : > { %10487 = vmatmul.mubr.msk.f32.gmra.mrb[64].mxu1 %vm16775_vm13, %v15376_v54  ;;  %vm16790_vm13 = vmmov %vm16780_vm0 }
0x1159   : > { %v10224_v35 = vpop.f32.mrb[68].mxu0 }
0x115a   : > { %v10225_v2 = vpop.f32.mrb[69].mxu0 }
0x115b   : > { %v10226_v25 = vadd.f32 %v10225_v2, %v10224_v35  ;;  %v10227_v48 = vpop.f32.mrb[70].mxu0 }
0x115c   : > { %v10228_v0 = vpop.f32.mrb[71].mxu0 }
0x115d   : > { %v15383_v49 = vadd.f32 %v15300_v62, %v10226_v25  ;;  %v10229_v60 = vadd.f32 %v10228_v0, %v10227_v48 }
0x115f   : > { %v15386_v9 = vadd.f32 %v15304_v7, %v10229_v60  ;;  %10489 = vmatprep.mubr.msk.f32.mxu1 %vm16776_vm14, %v15383_v49  ;;  %vm16791_vm14 = vmmov %vm16780_vm0 }
0x1161   : > { %10490 = vmatmul.mubr.msk.f32.gmra.mrb[66].mxu1 %vm16777_vm3, %v15386_v9  ;;  %vm16792_vm3 = vmmov %vm16780_vm0 }
0x1162   : > { %10496 = vmatprep.mubr.msk.f32.mxu1 %vm16767_vm11, %v16766_v50 }
0x11ef   : > { %v10470_v55 = vpop.f32.mrb[6].mxu0 }
0x11f0   : > { %v7578_v11 = vsel %vm16778_vm7, %v10470_v55, 0.0  ;;  %v7498_v37 = vpop.f32.mrb[7].mxu0  ;;  %vm16793_vm7 = vmmov %vm16780_vm0 }
0x11f1   : > { %v7577_v62 = vsel %vm16779_vm6, %v7498_v37, 0.0  ;;  %vm16794_vm6 = vcmask 1041409  }
0x11f2   : > { %v7579_v23 = vadd.f32 %v7578_v11, %v7577_v62 }
0x11f7   : > { %v10473_v22 = vpop.f32.mrb[72].mxu0 }
0x11f8   : > { %v7508_v12 = vpop.f32.mrb[73].mxu0  ;;  %v7582_v39 = vsel %vm16781_vm1, %v10473_v22, 0.0  ;;  %vm16797_vm1 = vcmask 261120  }
0x11f9   : > { %v7580_v7 = vsel %vm16780_vm0, %v7508_v12, 0.0 }
0x11fa   : > { %v7581_v45 = vadd.f32 %v7580_v7, %v7579_v23 }
0x11fc   : > { %v7583_v16 = vadd.f32 %v7582_v39, %v7581_v45 }
0x11ff   : > { %v10476_v57 = vpop.f32.mrb[74].mxu0 }
0x1200   : > { %v7518_v18 = vpop.f32.mrb[75].mxu0  ;;  %v7586_v47 = vsel %vm16783_vm4, %v10476_v57, 0.0  ;;  %vm16799_vm4 = vmmov %vm16797_vm1 }
0x1201   : > { %v7584_v44 = vsel %vm16782_vm9, %v7518_v18, 0.0  ;;  %vm16798_vm9 = vmmov %vm16797_vm1 }
0x1202   : > { %v7585_v30 = vadd.f32 %v7584_v44, %v7583_v16 }
0x1204   : > { %v7587_v63 = vadd.f32 %v7586_v47, %v7585_v30 }
0x1207   : > { %v10479_v21 = vpop.f32.mrb[42].mxu1 }
0x1208   : > { %v7528_v19 = vpop.f32.mrb[43].mxu1  ;;  %v7590_v38 = vsel %vm16785_vm12, %v10479_v21, 0.0  ;;  %vm16801_vm12 = vmmov %vm16797_vm1 }
0x1209   : > { %v7588_v41 = vsel %vm16784_vm10, %v7528_v19, 0.0  ;;  %vm16800_vm10 = vmmov %vm16797_vm1 }
0x120a   : > { %v7589_v58 = vadd.f32 %v7588_v41, %v7587_v63  ;;  %v16795_v41 = vld [vmem:[#allocation29_spill] sm:$0xff] }
0x120c   : > { %v7591_v3 = vadd.f32 %v7590_v38, %v7589_v58 }
0x120e   : > { %v7592_v48 = vrot.slane %v7591_v3, 4 }
0x120f   : > { %v10482_v59 = vpop.f32.mrb[60].mxu1 }
0x1210   : > { %v7599_v31 = vsel %vm16786_vm2, %v10482_v59, 0.0  ;;  %v7538_v61 = vpop.f32.mrb[61].mxu1  ;;  %v7593_v0 = vadd.f32 %v7592_v48, %v7591_v3  ;;  %v16796_v59 = vld [vmem:[#allocation30_spill] sm:$0xff]  ;;  %vm16802_vm2 = vmmov %vm16797_vm1 }
0x1211   : > { %v7598_v4 = vsel %vm16787_vm5, %v7538_v61, 0.0  ;;  %vm16803_vm5 = vmmov %vm16797_vm1 }
0x1212   : > { %v7600_v40 = vadd.f32 %v7599_v31, %v7598_v4  ;;  %v7594_v37 = vrot.slane %v7593_v0, 2 }
0x1214   : > { %v7595_v12 = vadd.f32 %v7594_v37, %v7593_v0 }
0x1216   : > { %v7596_v39 = vrot.slane %v7595_v12, 1 }
0x1218   : > { %v7597_v18 = vadd.f32 %v7596_v39, %v7595_v12 }
0x121a   : > { %v7619_v47 = vmul.f32 0.0078125, %v7597_v18 }
0x121b   : > { %v10485_v8 = vpop.f32.mrb[62].mxu1 }
0x121c   : > { %v7548_v52 = vpop.f32.mrb[63].mxu1  ;;  %v7603_v5 = vsel %vm16789_vm15, %v10485_v8, 0.0  ;;  %vm16805_vm15 = vmmov %vm16797_vm1 }
0x121d   : > { %v7601_v42 = vsel %vm16788_vm8, %v7548_v52, 0.0  ;;  %vm16804_vm8 = vmmov %vm16797_vm1 }
0x121e   : > { %v7602_v43 = vadd.f32 %v7601_v42, %v7600_v40 }
0x1220   : > { %v7604_v51 = vadd.f32 %v7603_v5, %v7602_v43 }
0x1226   : > { %v10488_v36 = vpop.f32.mrb[64].mxu1 }
0x1227   : > { %v7558_v1 = vpop.f32.mrb[65].mxu1  ;;  %v7607_v2 = vsel %vm16791_vm14, %v10488_v36, 0.0  ;;  %vm16807_vm14 = vmmov %vm16797_vm1 }
0x1228   : > { %v7605_v6 = vsel %vm16790_vm13, %v7558_v1, 0.0  ;;  %vm16806_vm13 = vmmov %vm16797_vm1 }
0x1229   : > { %v7606_v35 = vadd.f32 %v7605_v6, %v7604_v51 }
0x122b   : > { %v7608_v25 = vadd.f32 %v7607_v2, %v7606_v35 }
0x1234   : > { %v10491_v60 = vpop.f32.mrb[66].mxu1 }
0x1235   : > { %v7568_v55 = vpop.f32.mrb[67].mxu1  ;;  %v7611_v23 = vsel %vm16793_vm7, %v10491_v60, 0.0  ;;  %vm16809_vm7 = vmmov %vm16797_vm1 }
0x1236   : > { %v7609_v11 = vsel %vm16792_vm3, %v7568_v55, 0.0  ;;  %vm16808_vm3 = vmmov %vm16797_vm1 }
0x1237   : > { %v7610_v62 = vadd.f32 %v7609_v11, %v7608_v25 }
0x1239   : > { %v7612_v22 = vadd.f32 %v7611_v23, %v7610_v62 }
0x123b   : > { %v7613_v7 = vrot.slane %v7612_v22, 4 }
0x123d   : > { %v7614_v45 = vadd.f32 %v7613_v7, %v7612_v22 }
0x123f   : > { %v7615_v16 = vrot.slane %v7614_v45, 2 }
0x1241   : > { %v7616_v57 = vadd.f32 %v7615_v16, %v7614_v45 }
0x1243   : > { %v7617_v44 = vrot.slane %v7616_v57, 1 }
0x1245   : > { %v7618_v30 = vadd.f32 %v7617_v44, %v7616_v57 }
0x1247   : > { %v7620_v63 = vmul.f32 0.0078125, %v7618_v30 }
0x1249   : > { %v7623_v21 = vsel %vm16794_vm6, %v7620_v63, %v7619_v47  ;;  %vm16810_vm6 = vmmov %vm16797_vm1 }
0x124a   : > { %10497 = vmatmul.mubr.msk.f32.vlgmr.msra.gmra.mrb[68].mxu1 %vm16780_vm0, %v7623_v21  ;;  %vm16811_vm0 = vmmov %vm16797_vm1 }
0x124b   : > { %10652 = vmatpush3.bf16.msra.mxu1 %v16707_v32 }
0x124c   : > { %10654 = vmatprep.subr.bf16.mxu1 %v16713_v33 }
0x124f   : > { %10656 = vmatpush3.bf16.msra.mxu1 %v16713_v33 }
0x1250   : > { %10668 = vmatprep.subr.bf16.mxu1 %v16717_v34 }
0x131d   : > { %v7692_v19 = vpop.f32.mrb[68].mxu1 }
0x131e   : > { %v7703_v58 = vrot.slane %v7692_v19, %v16795_v41  ;;  %v10498_v38 = vpop.f32.mrb[69].mxu1 }
0x1320   : > { %v7711_v3 = vrot.slane %v7703_v58, %v16795_v41  ;;  %v7704_v61 = vcombine.high %v7703_v58, %v7703_v58 }
0x1322   : > { %v7722_v31 = vrot.slane %v7711_v3, %v16796_v59  ;;  %v7718_v5 = vrot.slane %v7704_v61, %v16795_v41 }
0x1324   : > { %v15420_v4 = vsub.f32 %v15309_v24, %v7722_v31  ;;  %v15423_v40 = vsub.f32 %v15312_v20, %v7722_v31  ;;  %v15426_v8 = vsub.f32 %v15321_v13, %v7722_v31  ;;  %v15433_v43 = vsub.f32 %v15324_v53, %v7722_v31 }
0x1325   : > { %v15440_v20 = vsub.f32 %v15331_v27, %v7722_v31  ;;  %v15447_v53 = vsub.f32 %v15334_v46, %v7722_v31  ;;  %v7726_v51 = vrot.slane %v7718_v5, %v16796_v59  ;;  %v15454_v27 = vsub.f32 %v15343_v56, %v7722_v31 }
0x1326   : > { %v7745_v52 = vmul.f32 %v15420_v4, %v15420_v4  ;;  %v7746_v42 = vmul.f32 %v15423_v40, %v15423_v40  ;;  %v7747_v24 = vmul.f32 %v15426_v8, %v15426_v8  ;;  %v7748_v13 = vmul.f32 %v15433_v43, %v15433_v43 }
0x1327   : > { %v7749_v36 = vmul.f32 %v15440_v20, %v15440_v20  ;;  %v7750_v46 = vmul.f32 %v15447_v53, %v15447_v53  ;;  %v15462_v1 = vsub.f32 %v15346_v29, %v7722_v31  ;;  %v7751_v6 = vmul.f32 %v15454_v27, %v15454_v27 }
0x1328   : > { %10507 = vmatprep.mubr.msk.f32.mxu1 %vm16797_vm1, %v7745_v52  ;;  %v15467_v35 = vsub.f32 %v15354_v14, %v7726_v51  ;;  %v15474_v2 = vsub.f32 %v15356_v26, %v7726_v51  ;;  %v15479_v25 = vsub.f32 %v15363_v10, %v7726_v51  ;;  %v15486_v48 = vsub.f32 %v15366_v28, %v7726_v51  ;;  %vm16812_vm1 = vmmov %vm16811_vm0 }
0x1329   : > { %10508 = vmatmul.mubr.msk.f32.vlgmr.msra.gmra.mrb[70].mxu1 %vm16798_vm9, %v7746_v42  ;;  %v7752_v56 = vmul.f32 %v15462_v1, %v15462_v1  ;;  %v15491_v0 = vsub.f32 %v15373_v15, %v7726_v51  ;;  %v15498_v60 = vsub.f32 %v15376_v54, %v7726_v51  ;;  %v15503_v55 = vsub.f32 %v15383_v49, %v7726_v51 }
0x132a   : > { %10510 = vmatprep.mubr.msk.f32.mxu1 %vm16799_vm4, %v7747_v24  ;;  %10670 = vmatpush3.bf16.msra.mxu1 %v16761_v17  ;;  %v7753_v29 = vmul.f32 %v15467_v35, %v15467_v35  ;;  %v7754_v14 = vmul.f32 %v15474_v2, %v15474_v2  ;;  %v7755_v26 = vmul.f32 %v15479_v25, %v15479_v25  ;;  %vm16813_vm9 = vcmask 130048  }
0x132b   : > { %10672 = vmatprep.subr.bf16.mxu1 %v16707_v32  ;;  %v7756_v10 = vmul.f32 %v15486_v48, %v15486_v48  ;;  %v7757_v28 = vmul.f32 %v15491_v0, %v15491_v0  ;;  %v7758_v15 = vmul.f32 %v15498_v60, %v15498_v60  ;;  %v15510_v11 = vsub.f32 %v15386_v9, %v7726_v51  ;;  %vm16814_vm4 = vmmov %vm16813_vm9 }
0x132c   : > { %v7759_v54 = vmul.f32 %v15503_v55, %v15503_v55 }
0x132d   : > { %10511 = vmatmul.mubr.msk.f32.gmra.mrb[72].mxu1 %vm16800_vm10, %v7748_v13  ;;  %v7760_v49 = vmul.f32 %v15510_v11, %v15510_v11  ;;  %vm16815_vm10 = vmmov %vm16814_vm4 }
0x132e   : > { %10513 = vmatprep.mubr.msk.f32.mxu1 %vm16801_vm12, %v7749_v36  ;;  %vm16816_vm12 = vmmov %vm16814_vm4 }
0x1331   : > { %10514 = vmatmul.mubr.msk.f32.gmra.mrb[74].mxu1 %vm16802_vm2, %v7750_v46  ;;  %vm16817_vm2 = vmmov %vm16814_vm4 }
0x1332   : > { %10516 = vmatprep.mubr.msk.f32.mxu1 %vm16803_vm5, %v7751_v6  ;;  %vm16818_vm5 = vmmov %vm16817_vm2 }
0x1335   : > { %10517 = vmatmul.mubr.msk.f32.gmra.mrb[76].mxu1 %vm16804_vm8, %v7752_v56  ;;  %vm16819_vm8 = vmmov %vm16817_vm2 }
0x1336   : > { %10519 = vmatprep.mubr.msk.f32.mxu1 %vm16805_vm15, %v7753_v29  ;;  %vm16820_vm15 = vmmov %vm16817_vm2 }
0x1339   : > { %10520 = vmatmul.mubr.msk.f32.gmra.mrb[78].mxu1 %vm16806_vm13, %v7754_v14  ;;  %vm16821_vm13 = vmmov %vm16817_vm2 }
0x133a   : > { %10522 = vmatprep.mubr.msk.f32.mxu1 %vm16807_vm14, %v7755_v26  ;;  %vm16822_vm14 = vmmov %vm16817_vm2 }
0x133d   : > { %10523 = vmatmul.mubr.msk.f32.gmra.mrb[80].mxu1 %vm16808_vm3, %v7756_v10  ;;  %vm16823_vm3 = vmmov %vm16817_vm2 }
0x133e   : > { %10525 = vmatprep.mubr.msk.f32.mxu1 %vm16809_vm7, %v7757_v28  ;;  %vm16824_vm7 = vmmov %vm16817_vm2 }
0x1341   : > { %10526 = vmatmul.mubr.msk.f32.gmra.mrb[82].mxu1 %vm16810_vm6, %v7758_v15  ;;  %vm16825_vm6 = vmmov %vm16817_vm2 }
0x1342   : > { %10528 = vmatprep.mubr.msk.f32.mxu1 %vm16811_vm0, %v7759_v54  ;;  %vm16826_vm0 = vmmov %vm16817_vm2 }
0x1345   : > { %10529 = vmatmul.mubr.msk.f32.gmra.mrb[84].mxu1 %vm16812_vm1, %v7760_v49  ;;  %vm16827_vm1 = vmmov %vm16826_vm0 }
0x1346   : > { %10574 = vmatprep.mubr.msk.f32.mxu1 %vm16767_vm11, %v16766_v50 }
0x13fc   : > { %v10509_v37 = vpop.f32.mrb[70].mxu1 }
0x13fd   : > { %v7955_v62 = vsel %vm16813_vm9, %v10509_v37, 0.0  ;;  %v7875_v9 = vpop.f32.mrb[71].mxu1  ;;  %vm16828_vm9 = vmmov %vm16826_vm0 }
0x13fe   : > { %v7954_v23 = vsel %vm16814_vm4, %v7875_v9, 0.0  ;;  %vm16829_vm4 = vcmask 1041409  }
0x13ff   : > { %v7956_v22 = vadd.f32 %v7955_v62, %v7954_v23 }
0x1400   : > { %v10512_v12 = vpop.f32.mrb[72].mxu1 }
0x1401   : > { %v7885_v7 = vpop.f32.mrb[73].mxu1  ;;  %v7959_v16 = vsel %vm16816_vm12, %v10512_v12, 0.0 }
0x1402   : > { %v7957_v45 = vsel %vm16815_vm10, %v7885_v7, 0.0  ;;  %vm16830_vm10 = vmmov %vm16826_vm0 }
0x1403   : > { %v7958_v39 = vadd.f32 %v7957_v45, %v7956_v22 }
0x1404   : > { %v10515_v57 = vpop.f32.mrb[74].mxu1 }
0x1405   : > { %v7895_v18 = vpop.f32.mrb[75].mxu1  ;;  %v7960_v44 = vadd.f32 %v7959_v16, %v7958_v39  ;;  %v7963_v63 = vsel %vm16818_vm5, %v10515_v57, 0.0 }
0x1406   : > { %v7961_v30 = vsel %vm16817_vm2, %v7895_v18, 0.0 }
0x1407   : > { %v7962_v47 = vadd.f32 %v7961_v30, %v7960_v44 }
0x1408   : > { %v10518_v21 = vpop.f32.mrb[76].mxu1 }
0x1409   : > { %v7905_v19 = vpop.f32.mrb[77].mxu1  ;;  %v7964_v58 = vadd.f32 %v7963_v63, %v7962_v47  ;;  %v7967_v31 = vsel %vm16820_vm15, %v10518_v21, 0.0 }
0x140a   : > { %v7965_v38 = vsel %vm16819_vm8, %v7905_v19, 0.0 }
0x140b   : > { %v7966_v3 = vadd.f32 %v7965_v38, %v7964_v58 }
0x140c   : > { %v10521_v61 = vpop.f32.mrb[78].mxu1 }
0x140d   : > { %v7968_v52 = vadd.f32 %v7967_v31, %v7966_v3  ;;  %v7976_v42 = vsel %vm16821_vm13, %v10521_v61, 0.0  ;;  %v7915_v5 = vpop.f32.mrb[79].mxu1 }
0x140e   : > { %v7975_v24 = vsel %vm16822_vm14, %v7915_v5, 0.0  ;;  %vm16832_vm14 = vcmask 261120  }
0x140f   : > { %v7969_v13 = vrot.slane %v7968_v52, 4  ;;  %v7977_v51 = vadd.f32 %v7976_v42, %v7975_v24  ;;  %v10062_v42 = vld [vmem:[%s16525_s12 + $0x2] ss:$0 sm:$0xff] }
0x1410   : > { %v10524_v36 = vpop.f32.mrb[80].mxu1 }
0x1411   : > { %v7925_v46 = vpop.f32.mrb[81].mxu1  ;;  %v7970_v6 = vadd.f32 %v7969_v13, %v7968_v52  ;;  %v7980_v14 = vsel %vm16824_vm7, %v10524_v36, 0.0 }
0x1412   : > { %v7978_v56 = vsel %vm16823_vm3, %v7925_v46, 0.0  ;;  %vm16833_vm3 = vmmov %vm16832_vm14 }
0x1413   : > { %v7979_v29 = vadd.f32 %v7978_v56, %v7977_v51  ;;  %v7971_v15 = vrot.slane %v7970_v6, 2  ;;  %vm16834_vm7 = vmmov %vm16833_vm3 }
0x1414   : > { %v10527_v26 = vpop.f32.mrb[82].mxu1 }
0x1415   : > { %v7935_v10 = vpop.f32.mrb[83].mxu1  ;;  %v7981_v28 = vadd.f32 %v7980_v14, %v7979_v29  ;;  %v7984_v37 = vsel %vm16826_vm0, %v10527_v26, 0.0  ;;  %v7972_v22 = vadd.f32 %v7971_v15, %v7970_v6  ;;  %v15552_v6 = vld [vmem:[%s16525_s12 + $0x3] ss:$0 sm:$0xff] }
0x1416   : > { %v7982_v54 = vsel %vm16825_vm6, %v7935_v10, 0.0  ;;  %vm16835_vm6 = vmmov %vm16833_vm3 }
0x1417   : > { %v7983_v49 = vadd.f32 %v7982_v54, %v7981_v28  ;;  %v7973_v16 = vrot.slane %v7972_v22, 1 }
0x1418   : > { %v10530_v62 = vpop.f32.mrb[84].mxu1 }
0x1419   : > { %v7945_v9 = vpop.f32.mrb[85].mxu1  ;;  %v7985_v23 = vadd.f32 %v7984_v37, %v7983_v49  ;;  %v7988_v45 = vsel %vm16828_vm9, %v10530_v62, 0.0  ;;  %v7974_v44 = vadd.f32 %v7973_v16, %v7972_v22 }
0x141a   : > { %v7986_v12 = vsel %vm16827_vm1, %v7945_v9, 0.0  ;;  %vm16836_vm1 = vmmov %vm16833_vm3 }
0x141b   : > { %v7987_v7 = vadd.f32 %v7986_v12, %v7985_v23  ;;  %v7996_v63 = vmul.f32 0.0078125, %v7974_v44  ;;  %vm16837_vm9 = vmmov %vm16836_vm1 }
0x141d   : > { %v7989_v39 = vadd.f32 %v7988_v45, %v7987_v7  ;;  %v7998_v58 = vadd.f32 1e-05, %v7996_v63 }
0x141f   : > { %v7990_v57 = vrot.slane %v7989_v39, 4  ;;  %10989 = vrsqrt.f32 %v7998_v58 }
0x1421   : > { %v7991_v18 = vadd.f32 %v7990_v57, %v7989_v39 }
0x1423   : > { %v7992_v30 = vrot.slane %v7991_v18, 2 }
0x1425   : > { %v7993_v47 = vadd.f32 %v7992_v30, %v7991_v18 }
0x1427   : > { %v7994_v21 = vrot.slane %v7993_v47, 1 }
0x1429   : > { %v7995_v19 = vadd.f32 %v7994_v21, %v7993_v47  ;;  %v10990_v31 = vpop.eup %10989 }
0x142b   : > { %v7997_v38 = vmul.f32 0.0078125, %v7995_v19 }
0x142d   : > { %v7999_v3 = vadd.f32 1e-05, %v7997_v38 }
0x142f   : > { %10991 = vrsqrt.f32 %v7999_v3 }
0x1439   : > { %v10992_v61 = vpop.eup %10991 }
0x143a   : > { %v8004_v52 = vsel %vm16829_vm4, %v10992_v61, %v10990_v31  ;;  %vm16838_vm4 = vmmov %vm16836_vm1 }
0x143b   : > { %10536 = vmatmul.mubr.msk.f32.vlgmr.msra.gmra.mrb[76].mxu0 %vm16830_vm10, %v8004_v52 }
0x143c   : > { %10663 = vmatpush3.bf16.msra.mxu0 %v16707_v32 }
0x143d   : > { %10665 = vmatprep.subr.bf16.mxu0 %v16713_v33 }
0x1440   : > { %10667 = vmatpush3.bf16.msra.mxu0 %v16713_v33 }
0x1441   : > { %10679 = vmatprep.subr.bf16.mxu0 %v16717_v34 }
0x150e   : > { %v8073_v5 = vpop.f32.mrb[76].mxu0 }
0x150f   : > { %v8081_v24 = vmul.f32 %v10062_v42, %v8073_v5  ;;  %v10537_v13 = vpop.f32.mrb[77].mxu0 }
0x1511   : > { %v8089_v51 = vrot.slane %v8081_v24, %v16795_v41 }
0x1513   : > { %v8097_v36 = vrot.slane %v8089_v51, %v16795_v41  ;;  %v8090_v37 = vcombine.high %v8089_v51, %v8089_v51 }
0x1515   : > { %v8108_v46 = vrot.slane %v8097_v36, %v16796_v59  ;;  %v8104_v57 = vrot.slane %v8090_v37, %v16795_v41 }
0x1517   : > { %v8115_v34 = vmul.f32 %v8108_v46, %v15420_v4  ;;  %v8116_v56 = vmul.f32 %v8108_v46, %v15423_v40  ;;  %v8117_v29 = vmul.f32 %v8108_v46, %v15426_v8  ;;  %v8118_v14 = vmul.f32 %v8108_v46, %v15433_v43 }
0x1518   : > { %v8119_v8 = vmul.f32 %v8108_v46, %v15440_v20  ;;  %v8120_v9 = vmul.f32 %v8108_v46, %v15447_v53  ;;  %v8121_v12 = vmul.f32 %v8108_v46, %v15454_v27  ;;  %v15586_v38 = vrot.slane %v8104_v57, %v16796_v59 }
0x1519   : > { %v8135_v26 = vadd.f32 %v15552_v6, %v8115_v34  ;;  %v8136_v10 = vadd.f32 %v15552_v6, %v8116_v56  ;;  %v8137_v28 = vadd.f32 %v15552_v6, %v8117_v29  ;;  %v8138_v15 = vadd.f32 %v15552_v6, %v8118_v14 }
0x151a   : > { %v8139_v20 = vadd.f32 %v15552_v6, %v8119_v8  ;;  %v15580_v53 = vadd.f32 %v15552_v6, %v8120_v9  ;;  %v15583_v19 = vadd.f32 %v15552_v6, %v8121_v12  ;;  %v8122_v31 = vmul.f32 %v8108_v46, %v15462_v1 }
0x151b   : > { %v15562_v54 = vmul.f32 0.70710677, %v8135_v26  ;;  %v15564_v49 = vmul.f32 0.70710677, %v8136_v10  ;;  %v15566_v4 = vmul.f32 0.70710677, %v8137_v28 }
0x151c   : > { %v15568_v40 = vmul.f32 0.70710677, %v8138_v15  ;;  %v15588_v3 = vmul.f32 0.70710677, %v8139_v20  ;;  %v15591_v61 = vmul.f32 0.5, %v8135_v26  ;;  %v15602_v34 = vmul.f32 0.5, %v8136_v10 }
0x151d   : > { %v8183_v43 = vand.u32 2147483647, %v15562_v54  ;;  %v8184_v62 = vand.u32 2147483647, %v15564_v49  ;;  %v8185_v23 = vand.u32 2147483647, %v15566_v4  ;;  %v15607_v26 = vadd.f32 %v15552_v6, %v8122_v31 }
0x151e   : > { %v8186_v22 = vand.u32 2147483647, %v15568_v40  ;;  %v15596_v5 = vmul.f32 0.70710677, %v15580_v53  ;;  %v8187_v51 = vand.u32 2147483647, %v15588_v3 }
0x151f   : > { %v8199_v7 = vmul.f32 0.3275911, %v8183_v43  ;;  %v8439_v45 = vsub.f32 0.0, %v8183_v43  ;;  %v8200_v39 = vmul.f32 0.3275911, %v8184_v62  ;;  %v8440_v16 = vsub.f32 0.0, %v8184_v62 }
0x1520   : > { %v8201_v18 = vmul.f32 0.3275911, %v8185_v23  ;;  %v8202_v47 = vmul.f32 0.3275911, %v8186_v22  ;;  %v8441_v21 = vsub.f32 0.0, %v8185_v23  ;;  %v8442_v42 = vsub.f32 0.0, %v8186_v22 }
0x1521   : > { %v8215_v44 = vadd.f32 1.0, %v8199_v7  ;;  %v8216_v30 = vadd.f32 1.0, %v8200_v39  ;;  %v8455_v63 = vmul.f32 %v8439_v45, %v8183_v43  ;;  %v8456_v27 = vmul.f32 %v8440_v16, %v8184_v62 }
0x1522   : > { %v8217_v58 = vadd.f32 1.0, %v8201_v18  ;;  %v15593_v52 = vadd.f32 1.0, %v8202_v47  ;;  %v8457_v13 = vmul.f32 %v8441_v21, %v8185_v23  ;;  %v15600_v36 = vmul.f32 0.70710677, %v15583_v19 }
0x1523   : > { %10993 = vrcp.f32 %v8215_v44  ;;  %v8471_v24 = vmul.f32 1.442695, %v8455_v63  ;;  %v8473_v56 = vmul.f32 1.442695, %v8456_v27  ;;  %v8188_v1 = vand.u32 2147483647, %v15596_v5 }
0x1524   : > { %10995 = vrcp.f32 %v8216_v30  ;;  %v8203_v46 = vmul.f32 0.3275911, %v8187_v51  ;;  %v8443_v29 = vsub.f32 0.0, %v8187_v51  ;;  %v8189_v14 = vand.u32 2147483647, %v15600_v36 }
0x1525   : > { %10997 = vrcp.f32 %v8217_v58  ;;  %v15609_v37 = vmul.f32 0.5, %v8137_v28  ;;  %v8458_v8 = vmul.f32 %v8442_v42, %v8186_v22  ;;  %v8204_v43 = vmul.f32 0.3275911, %v8188_v1 }
0x1526   : > { %10999 = vrcp.f32 %v15593_v52  ;;  %v8475_v10 = vmul.f32 1.442695, %v8457_v13  ;;  %v8219_v62 = vadd.f32 1.0, %v8203_v46  ;;  %v8205_v9 = vmul.f32 0.3275911, %v8189_v14 }
0x1527   : > { %11001 = vpow2.f32 %v8471_v24  ;;  %v8459_v23 = vmul.f32 %v8443_v29, %v8187_v51  ;;  %v8220_v12 = vadd.f32 1.0, %v8204_v43  ;;  %v8444_v7 = vsub.f32 0.0, %v8188_v1 }
0x1528   : > { %11003 = vpow2.f32 %v8473_v56  ;;  %v15612_v45 = vmul.f32 0.5, %v8138_v15  ;;  %v15614_v39 = vadd.f32 1.0, %v8205_v9  ;;  %v15617_v28 = vmul.f32 0.70710677, %v15607_v26 }
0x1529   : > { %11005 = vrcp.f32 %v8219_v62  ;;  %v8477_v57 = vmul.f32 1.442695, %v8458_v8  ;;  %v8445_v22 = vsub.f32 0.0, %v8189_v14  ;;  %v8123_v18 = vmul.f32 %v15586_v38, %v15467_v35 }
0x152a   : > { %11007 = vrcp.f32 %v8220_v12  ;;  %v15621_v21 = vmul.f32 0.5, %v8139_v20  ;;  %v8190_v15 = vand.u32 2147483647, %v15617_v28  ;;  %v8479_v31 = vmul.f32 1.442695, %v8459_v23 }
0x152b   : > { %11009 = vpow2.f32 %v8475_v10  ;;  %v8460_v42 = vmul.f32 %v8444_v7, %v8188_v1  ;;  %v15625_v24 = vadd.f32 %v15552_v6, %v8123_v18  ;;  %vm8535_vm12 = vcmp.ge.f32.partialorder %v15562_v54, 0.0 }
0x152c   : > { %11011 = vrcp.f32 %v15614_v39  ;;  %v8206_v51 = vmul.f32 0.3275911, %v8190_v15  ;;  %v8446_v56 = vsub.f32 0.0, %v8190_v15  ;;  %vm8536_vm2 = vcmp.ge.f32.partialorder %v15564_v49, 0.0 }
0x152d   : > { %v10994_v16 = vpop.eup %10993  ;;  %11013 = vpow2.f32 %v8477_v57  ;;  %v15629_v20 = vmul.f32 0.70710677, %v15625_v24  ;;  %v8481_v9 = vmul.f32 1.442695, %v8460_v42  ;;  %vm8537_vm5 = vcmp.ge.f32.partialorder %v15566_v4, 0.0 }
0x152e   : > { %v10996_v47 = vpop.eup %10995  ;;  %v8247_v63 = vmul.f32 %v10994_v16, %v8215_v44  ;;  %v8461_v44 = vmul.f32 %v8445_v22, %v8189_v14  ;;  %v15633_v8 = vadd.f32 1.0, %v8206_v51  ;;  %v8462_v1 = vmul.f32 %v8446_v56, %v8190_v15 }
0x152f   : > { %v8248_v27 = vmul.f32 %v10996_v47, %v8216_v30  ;;  %v10998_v46 = vpop.eup %10997  ;;  %16831 = vst [vmem:[#allocation66_spill] sm:$0xff] %v15629_v20  ;;  %11015 = vpow2.f32 %v8479_v31  ;;  %v15638_v23 = vand.u32 2147483647, %v15629_v20  ;;  %vm8538_vm8 = vcmp.ge.f32.partialorder %v15568_v40, 0.0 }
0x1530   : > { %v8263_v13 = vsub.f32 2.0, %v8247_v63  ;;  %v8249_v30 = vmul.f32 %v10998_v46, %v8217_v58  ;;  %v11000_v43 = vpop.eup %10999  ;;  %11017 = vrcp.f32 %v15633_v8  ;;  %v8483_v18 = vmul.f32 1.442695, %v8461_v44 }
0x1531   : > { %v8264_v35 = vsub.f32 2.0, %v8248_v27  ;;  %v15640_v7 = vpop.eup %11001  ;;  %v8124_v63 = vmul.f32 %v15586_v38, %v15474_v2  ;;  %11019 = vpow2.f32 %v8481_v9  ;;  %vm8539_vm15 = vcmp.ge.f32.partialorder %v15588_v3, 0.0 }
0x1532   : > { %v15631_v29 = vmul.f32 %v10994_v16, %v8263_v13  ;;  %v8265_v57 = vsub.f32 2.0, %v8249_v30  ;;  %v8250_v16 = vmul.f32 %v11000_v43, %v15593_v52  ;;  %v15645_v58 = vpop.eup %11003  ;;  %v8485_v13 = vmul.f32 1.442695, %v8462_v1 }
0x1533   : > { %v15635_v10 = vmul.f32 %v10996_v47, %v8264_v35  ;;  %v8207_v47 = vmul.f32 0.3275911, %v15638_v23  ;;  %v11006_v15 = vpop.eup %11005  ;;  %11021 = vpow2.f32 %v8483_v18  ;;  %v15663_v1 = vadd.f32 %v15552_v6, %v8124_v63 }
0x1534   : > { %v8295_v14 = vmul.f32 1.0614054, %v15631_v29  ;;  %v15651_v31 = vmul.f32 %v10998_v46, %v8265_v57  ;;  %v8266_v42 = vsub.f32 2.0, %v8250_v16  ;;  %v11008_v51 = vpop.eup %11007  ;;  %v8251_v56 = vmul.f32 %v11006_v15, %v8219_v62 }
0x1535   : > { %v8296_v22 = vmul.f32 1.0614054, %v15635_v10  ;;  %v15653_v35 = vadd.f32 1.0, %v8207_v47  ;;  %v15655_v30 = vpop.eup %11009  ;;  %v8252_v2 = vmul.f32 %v11008_v51, %v8220_v12  ;;  %11023 = vpow2.f32 %v8485_v13 }
0x1536   : > { %v8311_v27 = vadd.f32 -1.4531521, %v8295_v14  ;;  %v8297_v59 = vmul.f32 1.0614054, %v15651_v31  ;;  %v15659_v41 = vmul.f32 %v11000_v43, %v8266_v42  ;;  %v8267_v14 = vsub.f32 2.0, %v8251_v56  ;;  %v11012_v62 = vpop.eup %11011 }
0x1537   : > { %v8312_v52 = vadd.f32 -1.4531521, %v8296_v22  ;;  %v15666_v22 = vpop.eup %11013  ;;  %v8268_v43 = vsub.f32 2.0, %v8252_v2  ;;  %v8253_v12 = vmul.f32 %v11012_v62, %v15614_v39  ;;  %11025 = vrcp.f32 %v15653_v35 }
0x1538   : > { %v8327_v44 = vmul.f32 %v8311_v27, %v15631_v29  ;;  %v8313_v57 = vadd.f32 -1.4531521, %v8297_v59  ;;  %v8298_v16 = vmul.f32 1.0614054, %v15659_v41  ;;  %v15668_v27 = vmul.f32 %v11006_v15, %v8267_v14 }
0x1539   : > { %v8328_v46 = vmul.f32 %v8312_v52, %v15635_v10  ;;  %v15674_v52 = vpop.eup %11015  ;;  %v15678_v56 = vmul.f32 %v11008_v51, %v8268_v43  ;;  %v8269_v15 = vsub.f32 2.0, %v8253_v12  ;;  %v15683_v14 = vmul.f32 %v15586_v38, %v15479_v25 }
0x153a   : > { %v8343_v9 = vadd.f32 1.4214138, %v8327_v44  ;;  %v8329_v18 = vmul.f32 %v8313_v57, %v15651_v31  ;;  %v8314_v63 = vadd.f32 -1.4531521, %v8298_v16  ;;  %v8299_v13 = vmul.f32 1.0614054, %v15668_v27  ;;  %v11018_v44 = vpop.eup %11017 }
0x153b   : > { %v8344_v47 = vadd.f32 1.4214138, %v8328_v46  ;;  %v8300_v16 = vmul.f32 1.0614054, %v15678_v56  ;;  %v15686_v33 = vmul.f32 %v11012_v62, %v8269_v15  ;;  %v8254_v12 = vmul.f32 %v11018_v44, %v15633_v8 }
0x153c   : > { %v8359_v42 = vmul.f32 %v8343_v9, %v15631_v29  ;;  %v8345_v46 = vadd.f32 1.4214138, %v8329_v18  ;;  %v8330_v39 = vmul.f32 %v8314_v63, %v15659_v41  ;;  %v8315_v57 = vadd.f32 -1.4531521, %v8299_v13 }
0x153d   : > { %v8360_v59 = vmul.f32 %v8344_v47, %v15635_v10  ;;  %v8316_v63 = vadd.f32 -1.4531521, %v8300_v16  ;;  %v8270_v15 = vsub.f32 2.0, %v8254_v12  ;;  %vm8540_vm13 = vcmp.ge.f32.partialorder %v15596_v5, 0.0 }
0x153e   : > { %v8375_v2 = vadd.f32 -0.28449672, %v8359_v42  ;;  %v8361_v51 = vmul.f32 %v8345_v46, %v15651_v31  ;;  %v8346_v43 = vadd.f32 1.4214138, %v8330_v39  ;;  %v15691_v42 = vpop.eup %11019  ;;  %v8331_v25 = vmul.f32 %v8315_v57, %v15668_v27 }
0x153f   : > { %v8376_v9 = vadd.f32 -0.28449672, %v8360_v59  ;;  %v8301_v59 = vmul.f32 1.0614054, %v15686_v33  ;;  %v8332_v39 = vmul.f32 %v8316_v63, %v15678_v56  ;;  %vm8541_vm0 = vcmp.ge.f32.partialorder %v15600_v36, 0.0 }
0x1540   : > { %v8391_v47 = vmul.f32 %v8375_v2, %v15631_v29  ;;  %v8377_v32 = vadd.f32 -0.28449672, %v8361_v51  ;;  %v8362_v62 = vmul.f32 %v8346_v43, %v15659_v41  ;;  %v15697_v2 = vpop.eup %11021  ;;  %v8347_v8 = vadd.f32 1.4214138, %v8331_v25 }
0x1541   : > { %v8392_v18 = vmul.f32 %v8376_v9, %v15635_v10  ;;  %v8317_v50 = vadd.f32 -1.4531521, %v8301_v59  ;;  %v15701_v9 = vpop.eup %11023  ;;  %v15706_v51 = vmul.f32 %v11018_v44, %v8270_v15  ;;  %v8126_v5 = vmul.f32 %v15586_v38, %v15486_v48 }
0x1542   : > { %v8407_v13 = vadd.f32 0.2548296, %v8391_v47  ;;  %v8393_v16 = vmul.f32 %v8377_v32, %v15651_v31  ;;  %v8378_v47 = vadd.f32 -0.28449672, %v8362_v62  ;;  %v8363_v12 = vmul.f32 %v8347_v8, %v15668_v27  ;;  %v15711_v63 = vpop.eup %11025 }
0x1543   : > { %v8408_v46 = vadd.f32 0.2548296, %v8392_v18  ;;  %v8348_v18 = vadd.f32 1.4214138, %v8332_v39  ;;  %v8333_v25 = vmul.f32 %v8317_v50, %v15686_v33  ;;  %v8255_v4 = vmul.f32 %v15711_v63, %v15653_v35 }
0x1544   : > { %v8423_v57 = vmul.f32 %v8407_v13, %v15631_v29  ;;  %v8409_v20 = vadd.f32 0.2548296, %v8393_v16  ;;  %v8394_v29 = vmul.f32 %v8378_v47, %v15659_v41  ;;  %v8302_v13 = vmul.f32 1.0614054, %v15706_v51 }
0x1545   : > { %v8424_v43 = vmul.f32 %v8408_v46, %v15635_v10  ;;  %v8379_v44 = vadd.f32 -0.28449672, %v8363_v12  ;;  %v8364_v10 = vmul.f32 %v8348_v18, %v15678_v56  ;;  %v8349_v62 = vadd.f32 1.4214138, %v8333_v25 }
0x1546   : > { %v8503_v59 = vmul.f32 %v15640_v7, %v8423_v57  ;;  %v8425_v50 = vmul.f32 %v8409_v20, %v15651_v31  ;;  %v8410_v46 = vadd.f32 0.2548296, %v8394_v29  ;;  %v8318_v8 = vadd.f32 -1.4531521, %v8302_v13 }
0x1547   : > { %v8504_v32 = vmul.f32 %v15645_v58, %v8424_v43  ;;  %v8395_v7 = vmul.f32 %v8379_v44, %v15668_v27  ;;  %v8380_v57 = vadd.f32 -0.28449672, %v8364_v10  ;;  %v8365_v16 = vmul.f32 %v8349_v62, %v15686_v33 }
0x1548   : > { %v8519_v15 = vsub.f32 1.0, %v8503_v59  ;;  %v8505_v47 = vmul.f32 %v15655_v30, %v8425_v50  ;;  %v8426_v43 = vmul.f32 %v8410_v46, %v15659_v41  ;;  %v8334_v12 = vmul.f32 %v8318_v8, %v15706_v51 }
0x1549   : > { %v8520_v39 = vsub.f32 1.0, %v8504_v32  ;;  %v8411_v25 = vadd.f32 0.2548296, %v8395_v7  ;;  %v8396_v20 = vmul.f32 %v8380_v57, %v15678_v56  ;;  %v8381_v31 = vadd.f32 -0.28449672, %v8365_v16 }
0x154a   : > { %v8551_v58 = vsub.f32 0.0, %v8519_v15  ;;  %v8521_v29 = vsub.f32 1.0, %v8505_v47  ;;  %v8506_v13 = vmul.f32 %v15666_v22, %v8426_v43  ;;  %v8350_v32 = vadd.f32 1.4214138, %v8334_v12 }
0x154b   : > { %v8552_v18 = vsub.f32 0.0, %v8520_v39  ;;  %v8427_v30 = vmul.f32 %v8411_v25, %v15668_v27  ;;  %v8412_v10 = vadd.f32 0.2548296, %v8396_v20  ;;  %v8397_v54 = vmul.f32 %v8381_v31, %v15686_v33 }
0x154c   : > { %v8567_v59 = vsel %vm8535_vm12, %v8519_v15, %v8551_v58  ;;  %v8553_v50 = vsub.f32 0.0, %v8521_v29  ;;  %v8522_v46 = vsub.f32 1.0, %v8506_v13  ;;  %v8366_v49 = vmul.f32 %v8350_v32, %v15706_v51  ;;  %vm16839_vm12 = vmmov %vm16836_vm1 }
0x154d   : > { %v8583_v44 = vadd.f32 1.0, %v8567_v59  ;;  %v8568_v41 = vsel %vm8536_vm2, %v8520_v39, %v8552_v18  ;;  %v8507_v22 = vmul.f32 %v15674_v52, %v8427_v30  ;;  %v8428_v8 = vmul.f32 %v8412_v10, %v15678_v56 }
0x154e   : > { %v8584_v62 = vadd.f32 1.0, %v8568_v41  ;;  %v8569_v27 = vsel %vm8537_vm5, %v8521_v29, %v8553_v50  ;;  %v8554_v7 = vsub.f32 0.0, %v8522_v46  ;;  %v8413_v57 = vadd.f32 0.2548296, %v8397_v54  ;;  %vm16841_vm5 = vmmov %vm16836_vm1 }
0x154f   : > { %v15737_v15 = vmul.f32 %v8583_v44, %v15591_v61  ;;  %v8585_v16 = vadd.f32 1.0, %v8569_v27  ;;  %v8523_v61 = vsub.f32 1.0, %v8507_v22  ;;  %v8508_v58 = vmul.f32 %v15691_v42, %v8428_v8 }
0x1550   : > { %v15743_v39 = vmul.f32 %v8584_v62, %v15602_v34  ;;  %v8382_v52 = vadd.f32 -0.28449672, %v8366_v49  ;;  %v8570_v34 = vsel %vm8538_vm8, %v8522_v46, %v8554_v7  ;;  %v8429_v56 = vmul.f32 %v8413_v57, %v15686_v33 }
0x1551   : > { %10546 = vmatprep.mubr.msk.f32.mxu0 %vm16832_vm14, %v15737_v15  ;;  %v8447_v47 = vsub.f32 0.0, %v15638_v23  ;;  %v15759_v43 = vmul.f32 %v8585_v16, %v15609_v37  ;;  %v8586_v12 = vadd.f32 1.0, %v8570_v34  ;;  %v8555_v18 = vsub.f32 0.0, %v8523_v61 }
0x1552   : > { %10547 = vmatmul.mubr.msk.f32.vlgmr.msra.gmra.mrb[78].mxu0 %vm16833_vm3, %v15743_v39  ;;  %v8524_v42 = vsub.f32 1.0, %v8508_v58  ;;  %v8509_v25 = vmul.f32 %v15697_v2, %v8429_v56  ;;  %v8398_v40 = vmul.f32 %v8382_v52, %v15706_v51  ;;  %v8271_v20 = vsub.f32 2.0, %v8255_v4  ;;  %vm16843_vm3 = vmmov %vm16836_vm1 }
0x1553   : > { %10681 = vmatpush3.bf16.msra.mxu0 %v16761_v17  ;;  %v15765_v33 = vmul.f32 0.70710677, %v15663_v1  ;;  %10549 = vmatprep.mubr.msk.f32.mxu0 %vm16834_vm7, %v15759_v43  ;;  %v15770_v35 = vmul.f32 %v8586_v12, %v15612_v45  ;;  %v8571_v37 = vsel %vm8539_vm15, %v8523_v61, %v8555_v18  ;;  %v15776_v17 = vadd.f32 %v15552_v6, %v15683_v14 }
0x1554   : > { %v8556_v31 = vsub.f32 0.0, %v8524_v42  ;;  %v8587_v2 = vadd.f32 1.0, %v8571_v37  ;;  %v8525_v59 = vsub.f32 1.0, %v8509_v25  ;;  %v8414_v29 = vadd.f32 0.2548296, %v8398_v40 }
0x1555   : > { %v15779_v13 = vmul.f32 %v15711_v63, %v8271_v20  ;;  %v8156_v45 = vmul.f32 0.5, %v15580_v53  ;;  %v8463_v32 = vmul.f32 %v8447_v47, %v15638_v23  ;;  %v15788_v44 = vand.u32 2147483647, %v15765_v33 }
0x1556   : > { %10550 = vmatmul.mubr.msk.f32.gmra.mrb[80].mxu0 %vm16835_vm6, %v15770_v35  ;;  %v8572_v3 = vsel %vm8540_vm13, %v8524_v42, %v8556_v31  ;;  %v15791_v14 = vmul.f32 %v8587_v2, %v15621_v21  ;;  %v8557_v30 = vsub.f32 0.0, %v8525_v59  ;;  %v8430_v63 = vmul.f32 %v8414_v29, %v15706_v51  ;;  %vm16842_vm13 = vmmov %vm16836_vm1 }
0x1557   : > { %v8588_v41 = vadd.f32 1.0, %v8572_v3  ;;  %v8303_v10 = vmul.f32 1.0614054, %v15779_v13  ;;  %v8208_v53 = vmul.f32 0.3275911, %v15788_v44  ;;  %v8157_v36 = vmul.f32 0.5, %v15583_v19  ;;  %vm16844_vm6 = vmmov %vm16836_vm1 }
0x1558   : > { %10552 = vmatprep.mubr.msk.f32.mxu0 %vm16836_vm1, %v15791_v14  ;;  %v8573_v21 = vsel %vm8541_vm0, %v8525_v59, %v8557_v30  ;;  %v8510_v62 = vmul.f32 %v15701_v9, %v8430_v63  ;;  %v15805_v50 = vmul.f32 0.70710677, %v15776_v17  ;;  %v8487_v22 = vmul.f32 1.442695, %v8463_v32 }
0x1559   : > { %v15801_v23 = vmul.f32 %v8588_v41, %v8156_v45  ;;  %v8589_v51 = vadd.f32 1.0, %v8573_v21  ;;  %v8319_v46 = vadd.f32 -1.4531521, %v8303_v10  ;;  %v8224_v54 = vadd.f32 1.0, %v8208_v53 }
0x155a   : > { %v8526_v48 = vsub.f32 1.0, %v8510_v62  ;;  %v15811_v8 = vand.u32 2147483647, %v15805_v50  ;;  %v15814_v49 = vadd.f32 %v15552_v6, %v8126_v5  ;;  %vm8542_vm10 = vcmp.ge.f32.partialorder %v15617_v28, 0.0 }
0x155b   : > { %10553 = vmatmul.mubr.msk.f32.gmra.mrb[82].mxu0 %vm16837_vm9, %v15801_v23  ;;  %v15816_v9 = vmul.f32 %v8589_v51, %v8157_v36  ;;  %v8335_v27 = vmul.f32 %v8319_v46, %v15779_v13  ;;  %11027 = vrcp.f32 %v8224_v54  ;;  %v8127_v61 = vmul.f32 %v15586_v38, %v15491_v0  ;;  %vm16845_vm9 = vmmov %vm16836_vm1 }
0x155c   : > { %v8558_v19 = vsub.f32 0.0, %v8526_v48  ;;  %v8209_v7 = vmul.f32 0.3275911, %v15811_v8  ;;  %v15824_v16 = vmul.f32 0.70710677, %v15814_v49  ;;  %11029 = vpow2.f32 %v8487_v22 }
0x155d   : > { %10555 = vmatprep.mubr.msk.f32.mxu0 %vm16838_vm4, %v15816_v9  ;;  %v8351_v57 = vadd.f32 1.4214138, %v8335_v27  ;;  %v8128_v34 = vmul.f32 %v15586_v38, %v15498_v60  ;;  %v8158_v56 = vmul.f32 0.5, %v15607_v26  ;;  %v15836_v12 = vadd.f32 %v15552_v6, %v8127_v61 }
0x155e   : > { %v8574_v58 = vsel %vm8542_vm10, %v8526_v48, %v8558_v19  ;;  %v8225_v52 = vadd.f32 1.0, %v8209_v7  ;;  %v15833_v28 = vand.u32 2147483647, %v15824_v16  ;;  %v8129_v31 = vmul.f32 %v15586_v38, %v15503_v55 }
0x155f   : > { %v8590_v4 = vadd.f32 1.0, %v8574_v58  ;;  %v8367_v47 = vmul.f32 %v8351_v57, %v15779_v13  ;;  %v15839_v0 = vadd.f32 %v15552_v6, %v8128_v34  ;;  %v15845_v26 = vmul.f32 0.70710677, %v15836_v12 }
0x1560   : > { %11031 = vrcp.f32 %v8225_v52  ;;  %v8210_v60 = vmul.f32 0.3275911, %v15833_v28  ;;  %v8130_v45 = vmul.f32 %v15586_v38, %v15510_v11  ;;  %v8448_v32 = vsub.f32 0.0, %v15788_v44 }
0x1561   : > { %v15841_v18 = vmul.f32 %v8590_v4, %v8158_v56  ;;  %v8383_v42 = vadd.f32 -0.28449672, %v8367_v47  ;;  %v15851_v20 = vmul.f32 0.70710677, %v15839_v0  ;;  %v15854_v37 = vand.u32 2147483647, %v15845_v26 }
0x1562   : > { %v8226_v40 = vadd.f32 1.0, %v8210_v60  ;;  %v15868_v5 = vadd.f32 %v15552_v6, %v8129_v31  ;;  %v15871_v36 = vadd.f32 %v15552_v6, %v8130_v45  ;;  %v8464_v51 = vmul.f32 %v8448_v32, %v15788_v44  ;;  %v16840_v6 = vld [vmem:[#allocation66_spill] sm:$0xff] }
0x1563   : > { %10556 = vmatmul.mubr.msk.f32.gmra.mrb[84].mxu0 %vm16839_vm12, %v15841_v18  ;;  %v8399_v25 = vmul.f32 %v8383_v42, %v15779_v13  ;;  %v15859_v29 = vand.u32 2147483647, %v15851_v20  ;;  %v8211_v41 = vmul.f32 0.3275911, %v15854_v37  ;;  %v8159_v48 = vmul.f32 0.5, %v15625_v24  ;;  %vm16846_vm12 = vmmov %vm16836_vm1 }
0x1564   : > { %11033 = vrcp.f32 %v8226_v40  ;;  %v15880_v27 = vmul.f32 0.70710677, %v15868_v5  ;;  %vm8543_vm2 = vcmp.ge.f32.partialorder %v16840_v6, 0.0  ;;  %v15884_v57 = vmul.f32 0.70710677, %v15871_v36 }
0x1565   : > { %v11028_v2 = vpop.eup %11027  ;;  %v8415_v59 = vadd.f32 0.2548296, %v8399_v25  ;;  %v8212_v63 = vmul.f32 0.3275911, %v15859_v29  ;;  %v8227_v53 = vadd.f32 1.0, %v8211_v41  ;;  %v8450_v4 = vsub.f32 0.0, %v15833_v28 }
0x1566   : > { %v8256_v3 = vmul.f32 %v11028_v2, %v8224_v54  ;;  %v11030_v10 = vpop.eup %11029  ;;  %v8489_v61 = vmul.f32 1.442695, %v8464_v51  ;;  %v15894_v47 = vand.u32 2147483647, %v15884_v57  ;;  %vm8544_vm8 = vcmp.ge.f32.partialorder %v15765_v33, 0.0 }
0x1567   : > { %v8431_v30 = vmul.f32 %v8415_v59, %v15779_v13  ;;  %v8228_v62 = vadd.f32 1.0, %v8212_v63  ;;  %v8449_v13 = vsub.f32 0.0, %v15811_v8  ;;  %11035 = vrcp.f32 %v8227_v53 }
0x1568   : > { %v8272_v55 = vsub.f32 2.0, %v8256_v3  ;;  %v8452_v59 = vsub.f32 0.0, %v15859_v29  ;;  %v8214_v45 = vmul.f32 0.3275911, %v15894_v47  ;;  %v8466_v51 = vmul.f32 %v8450_v4, %v15833_v28 }
0x1569   : > { %v8511_v21 = vmul.f32 %v11030_v10, %v8431_v30  ;;  %11037 = vrcp.f32 %v8228_v62  ;;  %v8465_v58 = vmul.f32 %v8449_v13, %v15811_v8  ;;  %v8160_v4 = vmul.f32 0.5, %v15663_v1 }
0x156a   : > { %v11032_v11 = vpop.eup %11031  ;;  %v15873_v38 = vmul.f32 %v11028_v2, %v8272_v55  ;;  %v8451_v2 = vsub.f32 0.0, %v15854_v37  ;;  %11039 = vpow2.f32 %v8489_v61  ;;  %v8230_v55 = vadd.f32 1.0, %v8214_v45 }
0x156b   : > { %v8527_v46 = vsub.f32 1.0, %v8511_v21  ;;  %v8257_v54 = vmul.f32 %v11032_v11, %v8225_v52  ;;  %v15888_v52 = vand.u32 2147483647, %v15880_v27  ;;  %v8491_v10 = vmul.f32 1.442695, %v8465_v58 }
0x156c   : > { %v8304_v22 = vmul.f32 1.0614054, %v15873_v38  ;;  %vm8545_vm15 = vcmp.ge.f32.partialorder %v15805_v50, 0.0  ;;  %vm8546_vm14 = vcmp.ge.f32.partialorder %v15824_v16, 0.0  ;;  %vm8547_vm7 = vcmp.ge.f32.partialorder %v15845_v26, 0.0 }
0x156d   : > { %v8559_v19 = vsub.f32 0.0, %v8527_v46  ;;  %v8273_v7 = vsub.f32 2.0, %v8257_v54  ;;  %v8213_v31 = vmul.f32 0.3275911, %v15888_v52  ;;  %vm8548_vm0 = vcmp.ge.f32.partialorder %v15851_v20, 0.0 }
0x156e   : > { %v8320_v44 = vadd.f32 -1.4531521, %v8304_v22  ;;  %v11034_v24 = vpop.eup %11033  ;;  %vm8549_vm4 = vcmp.ge.f32.partialorder %v15880_v27, 0.0  ;;  %vm8550_vm10 = vcmp.ge.f32.partialorder %v15884_v57, 0.0  ;;  %v16848_v27 = vmov 0.0  }
0x156f   : > { %v8575_v34 = vsel %vm8543_vm2, %v8527_v46, %v8559_v19  ;;  %v15890_v56 = vmul.f32 %v11032_v11, %v8273_v7  ;;  %v8258_v25 = vmul.f32 %v11034_v24, %v8226_v40  ;;  %v8229_v30 = vadd.f32 1.0, %v8213_v31  ;;  %vm16847_vm2 = vmmov %vm16836_vm1 }
0x1570   : > { %v8591_v42 = vadd.f32 1.0, %v8575_v34  ;;  %v8336_v60 = vmul.f32 %v8320_v44, %v15873_v38  ;;  %v8468_v7 = vmul.f32 %v8452_v59, %v15859_v29  ;;  %v15924_v31 = vmul.f32 0.5, %v15776_v17 }
0x1571   : > { %v8305_v8 = vmul.f32 1.0614054, %v15890_v56  ;;  %v8274_v41 = vsub.f32 2.0, %v8258_v25  ;;  %v11036_v40 = vpop.eup %11035  ;;  %11041 = vrcp.f32 %v8229_v30 }
0x1572   : > { %v15902_v3 = vmul.f32 %v8591_v42, %v8159_v48  ;;  %v8352_v32 = vadd.f32 1.4214138, %v8336_v60  ;;  %v8259_v54 = vmul.f32 %v11036_v40, %v8227_v53  ;;  %v8467_v48 = vmul.f32 %v8451_v2, %v15854_v37 }
0x1573   : > { %v8321_v63 = vadd.f32 -1.4531521, %v8305_v8  ;;  %v15907_v11 = vmul.f32 %v11034_v24, %v8274_v41  ;;  %v11038_v13 = vpop.eup %11037  ;;  %11043 = vrcp.f32 %v8230_v55  ;;  %v8493_v24 = vmul.f32 1.442695, %v8466_v51 }
0x1574   : > { %10558 = vmatprep.mubr.msk.f32.mxu0 %vm16841_vm5, %v15902_v3  ;;  %v8368_v21 = vmul.f32 %v8352_v32, %v15873_v38  ;;  %v8260_v19 = vmul.f32 %v11038_v13, %v8228_v62  ;;  %11045 = vpow2.f32 %v8491_v10  ;;  %v8275_v61 = vsub.f32 2.0, %v8259_v54  ;;  %v11040_v32 = vpop.eup %11039 }
0x1575   : > { %v8337_v46 = vmul.f32 %v8321_v63, %v15890_v56  ;;  %v8306_v6 = vmul.f32 1.0614054, %v15907_v11  ;;  %v8495_v42 = vmul.f32 1.442695, %v8467_v48  ;;  %v8497_v29 = vmul.f32 1.442695, %v8468_v7 }
0x1576   : > { %v8384_v22 = vadd.f32 -0.28449672, %v8368_v21  ;;  %v8276_v34 = vsub.f32 2.0, %v8260_v19  ;;  %v15917_v37 = vmul.f32 %v11036_v40, %v8275_v61  ;;  %11047 = vpow2.f32 %v8493_v24 }
0x1577   : > { %v8353_v44 = vadd.f32 1.4214138, %v8337_v46  ;;  %v8322_v28 = vadd.f32 -1.4531521, %v8306_v6  ;;  %11049 = vpow2.f32 %v8495_v42  ;;  %v8453_v10 = vsub.f32 0.0, %v15888_v52 }
0x1578   : > { %v8400_v58 = vmul.f32 %v8384_v22, %v15873_v38  ;;  %v15920_v25 = vmul.f32 %v11038_v13, %v8276_v34  ;;  %v8307_v2 = vmul.f32 1.0614054, %v15917_v37  ;;  %11051 = vpow2.f32 %v8497_v29 }
0x1579   : > { %v8369_v53 = vmul.f32 %v8353_v44, %v15890_v56  ;;  %v8338_v62 = vmul.f32 %v8322_v28, %v15907_v11  ;;  %v8454_v48 = vsub.f32 0.0, %v15894_v47  ;;  %v8469_v24 = vmul.f32 %v8453_v10, %v15888_v52 }
0x157a   : > { %v8416_v60 = vadd.f32 0.2548296, %v8400_v58  ;;  %v8308_v45 = vmul.f32 1.0614054, %v15920_v25  ;;  %v8323_v63 = vadd.f32 -1.4531521, %v8307_v2 }
0x157b   : > { %v8385_v8 = vadd.f32 -0.28449672, %v8369_v53  ;;  %v8354_v59 = vadd.f32 1.4214138, %v8338_v62  ;;  %v11042_v40 = vpop.eup %11041  ;;  %vm16849_vm5 = vcmask 130048  }
0x157c   : > { %v8432_v1 = vmul.f32 %v8416_v60, %v15873_v38  ;;  %v8324_v51 = vadd.f32 -1.4531521, %v8308_v45  ;;  %v8339_v38 = vmul.f32 %v8323_v63, %v15917_v37  ;;  %v8261_v54 = vmul.f32 %v11042_v40, %v8229_v30 }
0x157d   : > { %v8401_v41 = vmul.f32 %v8385_v8, %v15890_v56  ;;  %v8370_v17 = vmul.f32 %v8354_v59, %v15907_v11  ;;  %v11044_v13 = vpop.eup %11043  ;;  %v8470_v8 = vmul.f32 %v8454_v48, %v15894_v47 }
0x157e   : > { %v8512_v21 = vmul.f32 %v11040_v32, %v8432_v1  ;;  %v8340_v19 = vmul.f32 %v8324_v51, %v15920_v25  ;;  %v8262_v7 = vmul.f32 %v11044_v13, %v8230_v55  ;;  %v11046_v44 = vpop.eup %11045  ;;  %v8355_v58 = vadd.f32 1.4214138, %v8339_v38 }
0x157f   : > { %v8417_v46 = vadd.f32 0.2548296, %v8401_v41  ;;  %v8386_v6 = vadd.f32 -0.28449672, %v8370_v17  ;;  %v8277_v28 = vsub.f32 2.0, %v8261_v54 }
0x1580   : > { %v8528_v22 = vsub.f32 1.0, %v8512_v21  ;;  %v8356_v42 = vadd.f32 1.4214138, %v8340_v19  ;;  %v8278_v60 = vsub.f32 2.0, %v8262_v7  ;;  %v8371_v62 = vmul.f32 %v8355_v58, %v15917_v37  ;;  %v11048_v41 = vpop.eup %11047 }
0x1581   : > { %v8433_v61 = vmul.f32 %v8417_v46, %v15890_v56  ;;  %v8402_v53 = vmul.f32 %v8386_v6, %v15907_v11  ;;  %v15939_v29 = vmul.f32 %v11042_v40, %v8277_v28  ;;  %v8499_v40 = vmul.f32 1.442695, %v8469_v24  ;;  %v11050_v21 = vpop.eup %11049 }
0x1582   : > { %v8560_v34 = vsub.f32 0.0, %v8528_v22  ;;  %v8372_v2 = vmul.f32 %v8356_v42, %v15920_v25  ;;  %v15945_v1 = vmul.f32 %v11044_v13, %v8278_v60  ;;  %v8387_v45 = vadd.f32 -0.28449672, %v8371_v62  ;;  %v11052_v46 = vpop.eup %11051 }
0x1583   : > { %v8513_v30 = vmul.f32 %v11046_v44, %v8433_v61  ;;  %v8418_v56 = vadd.f32 0.2548296, %v8402_v53  ;;  %v8309_v32 = vmul.f32 1.0614054, %v15939_v29  ;;  %11053 = vpow2.f32 %v8499_v40 }
0x1584   : > { %v8576_v55 = vsel %vm8544_vm8, %v8528_v22, %v8560_v34  ;;  %v8388_v10 = vadd.f32 -0.28449672, %v8372_v2  ;;  %v8310_v47 = vmul.f32 1.0614054, %v15945_v1  ;;  %v8403_v51 = vmul.f32 %v8387_v45, %v15917_v37  ;;  %vm16850_vm8 = vmmov %vm16849_vm5 }
0x1585   : > { %v8592_v52 = vadd.f32 1.0, %v8576_v55  ;;  %v8529_v59 = vsub.f32 1.0, %v8513_v30  ;;  %v8434_v63 = vmul.f32 %v8418_v56, %v15907_v11  ;;  %v8325_v13 = vadd.f32 -1.4531521, %v8309_v32 }
0x1586   : > { %v8404_v54 = vmul.f32 %v8388_v10, %v15920_v25  ;;  %v8326_v48 = vadd.f32 -1.4531521, %v8310_v47  ;;  %v8419_v22 = vadd.f32 0.2548296, %v8403_v51 }
0x1587   : > { %v15950_v33 = vmul.f32 %v8592_v52, %v8160_v4  ;;  %v8561_v17 = vsub.f32 0.0, %v8529_v59  ;;  %v8514_v38 = vmul.f32 %v11048_v41, %v8434_v63  ;;  %v8341_v6 = vmul.f32 %v8325_v13, %v15939_v29 }
0x1588   : > { %v8501_v4 = vmul.f32 1.442695, %v8470_v8  ;;  %v8420_v44 = vadd.f32 0.2548296, %v8404_v54  ;;  %v8342_v61 = vmul.f32 %v8326_v48, %v15945_v1  ;;  %v8435_v58 = vmul.f32 %v8419_v22, %v15917_v37 }
0x1589   : > { %10559 = vmatmul.mubr.msk.f32.gmra.mrb[86].mxu0 %vm16842_vm13, %v15950_v33  ;;  %v8577_v11 = vsel %vm8545_vm15, %v8529_v59, %v8561_v17  ;;  %v8530_v7 = vsub.f32 1.0, %v8514_v38  ;;  %v8357_v50 = vadd.f32 1.4214138, %v8341_v6  ;;  %v8163_v63 = vmul.f32 0.5, %v15836_v12  ;;  %vm16851_vm15 = vmmov %vm16849_vm5 }
0x158a   : > { %v8593_v19 = vadd.f32 1.0, %v8577_v11  ;;  %v8436_v34 = vmul.f32 %v8420_v44, %v15920_v25  ;;  %v8358_v53 = vadd.f32 1.4214138, %v8342_v61  ;;  %v8515_v42 = vmul.f32 %v11050_v21, %v8435_v58  ;;  %vm16852_vm13 = vmmov %vm16849_vm5 }
0x158b   : > { %v8562_v24 = vsub.f32 0.0, %v8530_v7  ;;  %v8373_v60 = vmul.f32 %v8357_v50, %v15939_v29  ;;  %11055 = vpow2.f32 %v8501_v4  ;;  %v8164_v17 = vmul.f32 0.5, %v15839_v0 }
0x158c   : > { %v15961_v28 = vmul.f32 %v8593_v19, %v15924_v31  ;;  %v8516_v37 = vmul.f32 %v11052_v46, %v8436_v34  ;;  %v8374_v62 = vmul.f32 %v8358_v53, %v15945_v1  ;;  %v8162_v31 = vmul.f32 0.5, %v15814_v49 }
0x158d   : > { %v8578_v30 = vsel %vm8546_vm14, %v8530_v7, %v8562_v24  ;;  %v8531_v55 = vsub.f32 1.0, %v8515_v42  ;;  %v8389_v56 = vadd.f32 -0.28449672, %v8373_v60  ;;  %v11054_v21 = vpop.eup %11053  ;;  %v8166_v19 = vmul.f32 0.5, %v15871_v36  ;;  %vm16853_vm14 = vmmov %vm16849_vm5 }
0x158e   : > { %10561 = vmatprep.mubr.msk.f32.mxu0 %vm16843_vm3, %v15961_v28  ;;  %v8594_v8 = vadd.f32 1.0, %v8578_v30  ;;  %v8532_v25 = vsub.f32 1.0, %v8516_v37  ;;  %v8390_v2 = vadd.f32 -0.28449672, %v8374_v62  ;;  %vm16855_vm3 = vmmov %vm16849_vm5 }
0x158f   : > { %v8563_v16 = vsub.f32 0.0, %v8531_v55  ;;  %v8405_v59 = vmul.f32 %v8389_v56, %v15939_v29 }
0x1590   : > { %v15970_v52 = vmul.f32 %v8594_v8, %v8162_v31  ;;  %v8564_v45 = vsub.f32 0.0, %v8532_v25  ;;  %v8406_v32 = vmul.f32 %v8390_v2, %v15945_v1 }
0x1591   : > { %v8579_v41 = vsel %vm8547_vm7, %v8531_v55, %v8563_v16  ;;  %v8421_v49 = vadd.f32 0.2548296, %v8405_v59  ;;  %vm16856_vm7 = vmmov %vm16855_vm3 }
0x1592   : > { %10562 = vmatmul.mubr.msk.f32.gmra.mrb[88].mxu0 %vm16844_vm6, %v15970_v52  ;;  %v8595_v10 = vadd.f32 1.0, %v8579_v41  ;;  %v8580_v40 = vsel %vm8548_vm0, %v8532_v25, %v8564_v45  ;;  %v8422_v47 = vadd.f32 0.2548296, %v8406_v32  ;;  %vm16857_vm6 = vmmov %vm16855_vm3 }
0x1593   : > { %v8596_v51 = vadd.f32 1.0, %v8580_v40  ;;  %v8437_v26 = vmul.f32 %v8421_v49, %v15939_v29  ;;  %vm16858_vm0 = vmmov %vm16855_vm3 }
0x1594   : > { %v15981_v13 = vmul.f32 %v8595_v10, %v8163_v63  ;;  %v8438_v46 = vmul.f32 %v8422_v47, %v15945_v1  ;;  %v8165_v1 = vmul.f32 0.5, %v15868_v5 }
0x1595   : > { %v11056_v38 = vpop.eup %11055  ;;  %v15984_v54 = vmul.f32 %v8596_v51, %v8164_v17  ;;  %v8517_v20 = vmul.f32 %v11054_v21, %v8437_v26 }
0x1596   : > { %10564 = vmatprep.mubr.msk.f32.mxu0 %vm16836_vm1, %v15981_v13  ;;  %v8518_v12 = vmul.f32 %v11056_v38, %v8438_v46  ;;  %vm16859_vm1 = vmmov %vm16858_vm0 }
0x1597   : > { %10565 = vmatmul.mubr.msk.f32.gmra.mrb[90].mxu0 %vm16845_vm9, %v15984_v54  ;;  %v8533_v48 = vsub.f32 1.0, %v8517_v20  ;;  %vm16860_vm9 = vmmov %vm16858_vm0 }
0x1598   : > { %v8534_v0 = vsub.f32 1.0, %v8518_v12 }
0x1599   : > { %v8565_v11 = vsub.f32 0.0, %v8533_v48 }
0x159a   : > { %v8566_v29 = vsub.f32 0.0, %v8534_v0 }
0x159b   : > { %v8581_v22 = vsel %vm8549_vm4, %v8533_v48, %v8565_v11  ;;  %vm16861_vm4 = vmmov %vm16858_vm0 }
0x159c   : > { %v8597_v6 = vadd.f32 1.0, %v8581_v22  ;;  %v8582_v4 = vsel %vm8550_vm10, %v8534_v0, %v8566_v29  ;;  %vm16862_vm10 = vmmov %vm16858_vm0 }
0x159d   : > { %v8598_v7 = vadd.f32 1.0, %v8582_v4 }
0x159e   : > { %v15994_v44 = vmul.f32 %v8597_v6, %v8165_v1 }
0x159f   : > { %v15996_v61 = vmul.f32 %v8598_v7, %v8166_v19 }
0x15a0   : > { %10567 = vmatprep.mubr.msk.f32.mxu0 %vm16846_vm12, %v15994_v44  ;;  %vm16863_vm12 = vmmov %vm16858_vm0 }
0x15a1   : > { %10568 = vmatmul.mubr.msk.f32.gmra.mrb[92].mxu0 %vm16847_vm2, %v15996_v61  ;;  %vm16864_vm2 = vmmov %vm16858_vm0 }
0x15a2   : > { %10613 = vmatprep.mubr.msk.f32.mxu0 %vm16767_vm11, %v16848_v27  ;;  %vm16854_vm11 = vmmov %vm16849_vm5 }
0x1625   : > { %v10548_v57 = vpop.f32.mrb[78].mxu0 }
0x1626   : > { %v8811_v5 = vsel %vm16849_vm5, %v10548_v57, 0.0  ;;  %v8731_v58 = vpop.f32.mrb[79].mxu0  ;;  %vm16865_vm5 = vcmask 1041409  }
0x1627   : > { %v8810_v36 = vsel %vm16850_vm8, %v8731_v58, 0.0  ;;  %vm16866_vm8 = vmmov %vm16858_vm0 }
0x1628   : > { %v8812_v50 = vadd.f32 %v8811_v5, %v8810_v36 }
0x1629   : > { %v10551_v24 = vpop.f32.mrb[80].mxu0 }
0x162a   : > { %v8741_v34 = vpop.f32.mrb[81].mxu0  ;;  %v8815_v60 = vsel %vm16852_vm13, %v10551_v24, 0.0 }
0x162b   : > { %v8813_v53 = vsel %vm16851_vm15, %v8741_v34, 0.0  ;;  %vm16871_vm15 = vcmask 261120  }
0x162c   : > { %v8814_v42 = vadd.f32 %v8813_v53, %v8812_v50  ;;  %vm16872_vm13 = vmmov %vm16871_vm15 }
0x162e   : > { %v10554_v30 = vpop.f32.mrb[82].mxu0  ;;  %v8816_v37 = vadd.f32 %v8815_v60, %v8814_v42 }
0x162f   : > { %v8751_v62 = vpop.f32.mrb[83].mxu0  ;;  %v8819_v55 = vsel %vm16854_vm11, %v10554_v30, 0.0  ;;  %vm16874_vm11 = vmmov %vm16872_vm13 }
0x1630   : > { %v8817_v31 = vsel %vm16853_vm14, %v8751_v62, 0.0  ;;  %vm16873_vm14 = vmmov %vm16872_vm13 }
0x1631   : > { %v8818_v8 = vadd.f32 %v8817_v31, %v8816_v37  ;;  %v16867_v31 = vld [vmem:[#allocation37_spill] sm:$0xff] }
0x1633   : > { %v8820_v56 = vadd.f32 %v8819_v55, %v8818_v8  ;;  %v16868_v8 = vld [vmem:[#allocation64_spill] sm:$0xff] }
0x1636   : > { %v10557_v25 = vpop.f32.mrb[84].mxu0 }
0x1637   : > { %v8761_v2 = vpop.f32.mrb[85].mxu0  ;;  %v8823_v45 = vsel %vm16856_vm7, %v10557_v25, 0.0 }
0x1638   : > { %v8821_v16 = vsel %vm16855_vm3, %v8761_v2, 0.0  ;;  %vm16875_vm3 = vmmov %vm16874_vm11 }
0x1639   : > { %v8822_v59 = vadd.f32 %v8821_v16, %v8820_v56  ;;  %v16869_v56 = vld [vmem:[#allocation29_spill] sm:$0xff]  ;;  %vm16876_vm7 = vmmov %vm16875_vm3 }
0x163b   : > { %v8824_v32 = vadd.f32 %v8823_v45, %v8822_v59  ;;  %v16870_v59 = vld [vmem:[#allocation30_spill] sm:$0xff] }
0x163d   : > { %v8825_v11 = vrot.slane %v8824_v32, 4 }
0x163f   : > { %v8826_v22 = vadd.f32 %v8825_v11, %v8824_v32 }
0x1641   : > { %v8827_v19 = vrot.slane %v8826_v22, 2 }
0x1643   : > { %v8828_v5 = vadd.f32 %v8827_v19, %v8826_v22 }
0x1645   : > { %v8829_v50 = vrot.slane %v8828_v5, 1 }
0x1647   : > { %v8830_v53 = vadd.f32 %v8829_v50, %v8828_v5 }
0x1649   : > { %v8852_v30 = vmul.f32 0.0078125, %v8830_v53 }
0x165c   : > { %v10560_v41 = vpop.f32.mrb[86].mxu0 }
0x165d   : > { %v8832_v49 = vsel %vm16857_vm6, %v10560_v41, 0.0  ;;  %v8771_v63 = vpop.f32.mrb[87].mxu0  ;;  %vm16877_vm6 = vmmov %vm16875_vm3 }
0x165e   : > { %v8831_v10 = vsel %vm16858_vm0, %v8771_v63, 0.0  ;;  %vm16878_vm0 = vmmov %vm16875_vm3 }
0x165f   : > { %v8833_v40 = vadd.f32 %v8832_v49, %v8831_v10 }
0x1665   : > { %v10563_v47 = vpop.f32.mrb[88].mxu0 }
0x1666   : > { %v8781_v21 = vpop.f32.mrb[89].mxu0  ;;  %v8836_v26 = vsel %vm16860_vm9, %v10563_v47, 0.0  ;;  %vm16880_vm9 = vmmov %vm16878_vm0 }
0x1667   : > { %v8834_v17 = vsel %vm16859_vm1, %v8781_v21, 0.0  ;;  %vm16879_vm1 = vmmov %vm16878_vm0 }
0x1668   : > { %v8835_v51 = vadd.f32 %v8834_v17, %v8833_v40 }
0x166a   : > { %v8837_v46 = vadd.f32 %v8836_v26, %v8835_v51  ;;  %v10566_v38 = vpop.f32.mrb[90].mxu0 }
0x166b   : > { %v8791_v20 = vpop.f32.mrb[91].mxu0  ;;  %v8840_v0 = vsel %vm16862_vm10, %v10566_v38, 0.0  ;;  %vm16882_vm10 = vmmov %vm16878_vm0 }
0x166c   : > { %v8838_v12 = vsel %vm16861_vm4, %v8791_v20, 0.0  ;;  %vm16881_vm4 = vmmov %vm16878_vm0 }
0x166d   : > { %v8839_v48 = vadd.f32 %v8838_v12, %v8837_v46 }
0x166f   : > { %v8841_v29 = vadd.f32 %v8840_v0, %v8839_v48 }
0x1674   : > { %v10569_v1 = vpop.f32.mrb[92].mxu0 }
0x1675   : > { %v8801_v6 = vpop.f32.mrb[93].mxu0  ;;  %v8844_v27 = vsel %vm16864_vm2, %v10569_v1, 0.0  ;;  %vm16884_vm2 = vmmov %vm16878_vm0 }
0x1676   : > { %v8842_v4 = vsel %vm16863_vm12, %v8801_v6, 0.0  ;;  %vm16883_vm12 = vmmov %vm16878_vm0 }
0x1677   : > { %v8843_v7 = vadd.f32 %v8842_v4, %v8841_v29 }
0x1679   : > { %v8845_v57 = vadd.f32 %v8844_v27, %v8843_v7 }
0x167b   : > { %v8846_v58 = vrot.slane %v8845_v57, 4 }
0x167d   : > { %v8847_v36 = vadd.f32 %v8846_v58, %v8845_v57 }
0x167f   : > { %v8848_v24 = vrot.slane %v8847_v36, 2 }
0x1681   : > { %v8849_v34 = vadd.f32 %v8848_v24, %v8847_v36 }
0x1683   : > { %v8850_v42 = vrot.slane %v8849_v34, 1 }
0x1685   : > { %v8851_v60 = vadd.f32 %v8850_v42, %v8849_v34 }
0x1687   : > { %v8853_v37 = vmul.f32 0.0078125, %v8851_v60 }
0x1689   : > { %v8856_v62 = vsel %vm16865_vm5, %v8853_v37, %v8852_v30  ;;  %vm16885_vm5 = vmmov %vm16878_vm0 }
0x168a   : > { %10575 = vmatmul.mubr.msk.f32.vlgmr.msra.gmra.mrb[86].mxu1 %vm16866_vm8, %v8856_v62  ;;  %vm16886_vm8 = vmmov %vm16878_vm0 }
0x168b   : > { %10674 = vmatpush3.bf16.msra.mxu1 %v16867_v31 }
0x168c   : > { %10676 = vmatprep.subr.bf16.mxu1 %v16868_v8 }
0x168f   : > { %10678 = vmatpush3.bf16.msra.mxu1 %v16868_v8 }
0x175d   : > { %v8925_v55 = vpop.f32.mrb[86].mxu1 }
0x175e   : > { %v8936_v25 = vrot.slane %v8925_v55, %v16869_v56  ;;  %v10576_v2 = vpop.f32.mrb[87].mxu1 }
0x1760   : > { %v8944_v16 = vrot.slane %v8936_v25, %v16869_v56  ;;  %v8937_v32 = vcombine.high %v8936_v25, %v8936_v25 }
0x1762   : > { %v8955_v45 = vrot.slane %v8944_v16, %v16870_v59  ;;  %v8951_v21 = vrot.slane %v8937_v32, %v16869_v56 }
0x1764   : > { %v16029_v41 = vsub.f32 %v15737_v15, %v8955_v45  ;;  %v16032_v49 = vsub.f32 %v15743_v39, %v8955_v45  ;;  %v16035_v63 = vsub.f32 %v15759_v43, %v8955_v45  ;;  %v16042_v47 = vsub.f32 %v15770_v35, %v8955_v45 }
0x1765   : > { %v16049_v39 = vsub.f32 %v15791_v14, %v8955_v45  ;;  %v16056_v35 = vsub.f32 %v15801_v23, %v8955_v45  ;;  %v8959_v17 = vrot.slane %v8951_v21, %v16870_v59  ;;  %v16062_v26 = vsub.f32 %v15816_v9, %v8955_v45 }
0x1766   : > { %v8978_v10 = vmul.f32 %v16029_v41, %v16029_v41  ;;  %v8979_v40 = vmul.f32 %v16032_v49, %v16032_v49  ;;  %v8980_v15 = vmul.f32 %v16035_v63, %v16035_v63  ;;  %v8981_v43 = vmul.f32 %v16042_v47, %v16042_v47 }
0x1767   : > { %v8982_v51 = vmul.f32 %v16049_v39, %v16049_v39  ;;  %v8983_v14 = vmul.f32 %v16056_v35, %v16056_v35  ;;  %v16069_v46 = vsub.f32 %v15841_v18, %v8955_v45  ;;  %v8984_v23 = vmul.f32 %v16062_v26, %v16062_v26 }
0x1768   : > { %10585 = vmatprep.mubr.msk.f32.mxu1 %vm16871_vm15, %v8978_v10  ;;  %v16074_v38 = vsub.f32 %v15902_v3, %v8959_v17  ;;  %v16081_v20 = vsub.f32 %v15950_v33, %v8959_v17  ;;  %v16086_v12 = vsub.f32 %v15961_v28, %v8959_v17  ;;  %v16093_v48 = vsub.f32 %v15970_v52, %v8959_v17 }
0x1769   : > { %10586 = vmatmul.mubr.msk.f32.vlgmr.msra.gmra.mrb[88].mxu1 %vm16872_vm13, %v8979_v40  ;;  %v8985_v9 = vmul.f32 %v16069_v46, %v16069_v46  ;;  %v16098_v0 = vsub.f32 %v15981_v13, %v8959_v17  ;;  %v16105_v11 = vsub.f32 %v15984_v54, %v8959_v17  ;;  %v16110_v29 = vsub.f32 %v15994_v44, %v8959_v17 }
0x176a   : > { %10588 = vmatprep.mubr.msk.f32.mxu1 %vm16873_vm14, %v8980_v15  ;;  %v8986_v18 = vmul.f32 %v16074_v38, %v16074_v38  ;;  %v8987_v3 = vmul.f32 %v16081_v20, %v16081_v20  ;;  %v8988_v33 = vmul.f32 %v16086_v12, %v16086_v12  ;;  %v8989_v28 = vmul.f32 %v16093_v48, %v16093_v48 }
0x176b   : > { %v8990_v52 = vmul.f32 %v16098_v0, %v16098_v0  ;;  %v8991_v13 = vmul.f32 %v16105_v11, %v16105_v11  ;;  %v16117_v22 = vsub.f32 %v15996_v61, %v8959_v17  ;;  %v8992_v54 = vmul.f32 %v16110_v29, %v16110_v29 }
0x176c   : > { %vm16887_vm15 = vcmask 130048  }
0x176d   : > { %10589 = vmatmul.mubr.msk.f32.gmra.mrb[90].mxu1 %vm16874_vm11, %v8981_v43  ;;  %v8993_v44 = vmul.f32 %v16117_v22, %v16117_v22  ;;  %vm16888_vm13 = vmmov %vm16887_vm15 }
0x176e   : > { %10591 = vmatprep.mubr.msk.f32.mxu1 %vm16875_vm3, %v8982_v51  ;;  %vm16889_vm14 = vmmov %vm16888_vm13 }
0x176f   : > { %vm16890_vm11 = vmmov %vm16888_vm13 }
0x1770   : > { %vm16891_vm3 = vmmov %vm16890_vm11 }
0x1771   : > { %10592 = vmatmul.mubr.msk.f32.gmra.mrb[92].mxu1 %vm16876_vm7, %v8983_v14  ;;  %vm16892_vm7 = vmmov %vm16891_vm3 }
0x1772   : > { %10594 = vmatprep.mubr.msk.f32.mxu1 %vm16877_vm6, %v8984_v23  ;;  %vm16893_vm6 = vmmov %vm16891_vm3 }
0x1775   : > { %10595 = vmatmul.mubr.msk.f32.gmra.mrb[94].mxu1 %vm16878_vm0, %v8985_v9  ;;  %vm16894_vm0 = vmmov %vm16891_vm3 }
0x1776   : > { %10597 = vmatprep.mubr.msk.f32.mxu1 %vm16879_vm1, %v8986_v18  ;;  %vm16895_vm1 = vmmov %vm16894_vm0 }
0x1779   : > { %10598 = vmatmul.mubr.msk.f32.gmra.mrb[96].mxu1 %vm16880_vm9, %v8987_v3  ;;  %vm16896_vm9 = vmmov %vm16894_vm0 }
0x177a   : > { %10600 = vmatprep.mubr.msk.f32.mxu1 %vm16881_vm4, %v8988_v33  ;;  %vm16897_vm4 = vmmov %vm16894_vm0 }
0x177d   : > { %10601 = vmatmul.mubr.msk.f32.gmra.mrb[98].mxu1 %vm16882_vm10, %v8989_v28  ;;  %vm16898_vm10 = vmmov %vm16894_vm0 }
0x177e   : > { %10603 = vmatprep.mubr.msk.f32.mxu1 %vm16883_vm12, %v8990_v52  ;;  %vm16899_vm12 = vmmov %vm16894_vm0 }
0x1781   : > { %10604 = vmatmul.mubr.msk.f32.gmra.mrb[100].mxu1 %vm16884_vm2, %v8991_v13  ;;  %vm16900_vm2 = vmmov %vm16894_vm0 }
0x1782   : > { %10606 = vmatprep.mubr.msk.f32.mxu1 %vm16885_vm5, %v8992_v54  ;;  %vm16901_vm5 = vmmov %vm16894_vm0 }
0x1785   : > { %10607 = vmatmul.mubr.msk.f32.gmra.mrb[102].mxu1 %vm16886_vm8, %v8993_v44  ;;  %vm16902_vm8 = vmmov %vm16894_vm0 }
0x183c   : > { %v10587_v1 = vpop.f32.mrb[88].mxu1 }
0x183d   : > { %v9188_v6 = vsel %vm16887_vm15, %v10587_v1, 0.0  ;;  %v9108_v4 = vpop.f32.mrb[89].mxu1  ;;  %vm16903_vm15 = vcmask 1041409  }
0x183e   : > { %v9187_v19 = vsel %vm16888_vm13, %v9108_v4, 0.0  ;;  %vm16904_vm13 = vmmov %vm16894_vm0 }
0x183f   : > { %v9189_v61 = vadd.f32 %v9188_v6, %v9187_v19 }
0x1840   : > { %v10590_v7 = vpop.f32.mrb[90].mxu1 }
0x1841   : > { %v9118_v27 = vpop.f32.mrb[91].mxu1  ;;  %v9192_v58 = vsel %vm16890_vm11, %v10590_v7, 0.0 }
0x1842   : > { %v9190_v57 = vsel %vm16889_vm14, %v9118_v27, 0.0  ;;  %vm16906_vm14 = vcmask 261120  }
0x1843   : > { %v9191_v5 = vadd.f32 %v9190_v57, %v9189_v61  ;;  %vm16907_vm11 = vmmov %vm16906_vm14 }
0x1844   : > { %v10593_v36 = vpop.f32.mrb[92].mxu1 }
0x1845   : > { %v9128_v50 = vpop.f32.mrb[93].mxu1  ;;  %v9193_v24 = vadd.f32 %v9192_v58, %v9191_v5  ;;  %v9196_v42 = vsel %vm16892_vm7, %v10593_v36, 0.0 }
0x1846   : > { %v9194_v34 = vsel %vm16891_vm3, %v9128_v50, 0.0  ;;  %vm16908_vm3 = vmmov %vm16907_vm11 }
0x1847   : > { %v9195_v53 = vadd.f32 %v9194_v34, %v9193_v24  ;;  %vm16909_vm7 = vmmov %vm16908_vm3 }
0x1848   : > { %v10596_v60 = vpop.f32.mrb[94].mxu1 }
0x1849   : > { %v9138_v30 = vpop.f32.mrb[95].mxu1  ;;  %v9197_v37 = vadd.f32 %v9196_v42, %v9195_v53  ;;  %v9200_v8 = vsel %vm16894_vm0, %v10596_v60, 0.0  ;;  %vm16911_vm0 = vmmov %vm16908_vm3 }
0x184a   : > { %v9198_v62 = vsel %vm16893_vm6, %v9138_v30, 0.0  ;;  %vm16910_vm6 = vmmov %vm16908_vm3 }
0x184b   : > { %v9199_v31 = vadd.f32 %v9198_v62, %v9197_v37  ;;  %v10098_v62 = vld [vmem:[%s16525_s12 + $0x4] ss:$0 sm:$0xff] }
0x184c   : > { %v10599_v55 = vpop.f32.mrb[96].mxu1 }
0x184d   : > { %v9201_v25 = vadd.f32 %v9200_v8, %v9199_v31  ;;  %v9209_v2 = vsel %vm16895_vm1, %v10599_v55, 0.0  ;;  %v9148_v16 = vpop.f32.mrb[97].mxu1  ;;  %vm16912_vm1 = vmmov %vm16911_vm0 }
0x184e   : > { %v9208_v45 = vsel %vm16896_vm9, %v9148_v16, 0.0  ;;  %vm16913_vm9 = vmmov %vm16911_vm0 }
0x184f   : > { %v9202_v32 = vrot.slane %v9201_v25, 4  ;;  %v9210_v10 = vadd.f32 %v9209_v2, %v9208_v45 }
0x1850   : > { %v10602_v40 = vpop.f32.mrb[98].mxu1 }
0x1851   : > { %v9158_v21 = vpop.f32.mrb[99].mxu1  ;;  %v9203_v15 = vadd.f32 %v9202_v32, %v9201_v25  ;;  %v9213_v51 = vsel %vm16898_vm10, %v10602_v40, 0.0  ;;  %vm16915_vm10 = vmmov %vm16911_vm0 }
0x1852   : > { %v9211_v43 = vsel %vm16897_vm4, %v9158_v21, 0.0  ;;  %vm16914_vm4 = vmmov %vm16911_vm0 }
0x1853   : > { %v9212_v17 = vadd.f32 %v9211_v43, %v9210_v10  ;;  %v9204_v18 = vrot.slane %v9203_v15, 2  ;;  %v10099_v43 = vld [vmem:[%s16525_s12 + $0x5] ss:$0 sm:$0xff] }
0x1854   : > { %v10605_v14 = vpop.f32.mrb[100].mxu1 }
0x1855   : > { %v9168_v23 = vpop.f32.mrb[101].mxu1  ;;  %v9214_v9 = vadd.f32 %v9213_v51, %v9212_v17  ;;  %v9217_v28 = vsel %vm16900_vm2, %v10605_v14, 0.0  ;;  %v9205_v44 = vadd.f32 %v9204_v18, %v9203_v15  ;;  %vm16917_vm2 = vmmov %vm16911_vm0 }
0x1856   : > { %v9215_v3 = vsel %vm16899_vm12, %v9168_v23, 0.0  ;;  %vm16916_vm12 = vmmov %vm16911_vm0 }
0x1857   : > { %v9216_v33 = vadd.f32 %v9215_v3, %v9214_v9  ;;  %v9206_v61 = vrot.slane %v9205_v44, 1 }
0x1858   : > { %v10608_v52 = vpop.f32.mrb[102].mxu1 }
0x1859   : > { %v9178_v13 = vpop.f32.mrb[103].mxu1  ;;  %v9218_v54 = vadd.f32 %v9217_v28, %v9216_v33  ;;  %v9221_v4 = vsel %vm16902_vm8, %v10608_v52, 0.0  ;;  %v9207_v57 = vadd.f32 %v9206_v61, %v9205_v44  ;;  %vm16919_vm8 = vmmov %vm16911_vm0 }
0x185a   : > { %v9219_v1 = vsel %vm16901_vm5, %v9178_v13, 0.0  ;;  %vm16918_vm5 = vmmov %vm16911_vm0 }
0x185b   : > { %v9220_v6 = vadd.f32 %v9219_v1, %v9218_v54  ;;  %v9229_v36 = vmul.f32 0.0078125, %v9207_v57 }
0x185d   : > { %v9222_v19 = vadd.f32 %v9221_v4, %v9220_v6  ;;  %v9231_v34 = vadd.f32 1e-05, %v9229_v36 }
0x185f   : > { %v9223_v7 = vrot.slane %v9222_v19, 4  ;;  %11057 = vrsqrt.f32 %v9231_v34 }
0x1861   : > { %v9224_v27 = vadd.f32 %v9223_v7, %v9222_v19 }
0x1863   : > { %v9225_v5 = vrot.slane %v9224_v27, 2 }
0x1865   : > { %v9226_v58 = vadd.f32 %v9225_v5, %v9224_v27 }
0x1867   : > { %v9227_v50 = vrot.slane %v9226_v58, 1 }
0x1869   : > { %v9228_v24 = vadd.f32 %v9227_v50, %v9226_v58  ;;  %v11058_v60 = vpop.eup %11057 }
0x186b   : > { %v9230_v53 = vmul.f32 0.0078125, %v9228_v24 }
0x186d   : > { %v9232_v42 = vadd.f32 1e-05, %v9230_v53 }
0x186f   : > { %11059 = vrsqrt.f32 %v9232_v42 }
0x1879   : > { %v11060_v30 = vpop.eup %11059 }
0x187a   : > { %v9237_v37 = vsel %vm16903_vm15, %v11060_v30, %v11058_v60  ;;  %vm16920_vm15 = vmmov %vm16911_vm0 }
0x187b   : > { %10614 = vmatmul.mubr.msk.f32.vlgmr.msra.gmra.mrb[94].mxu0 %vm16904_vm13, %v9237_v37  ;;  %vm16921_vm13 = vmmov %vm16911_vm0 }
0x194e   : > { %v9306_v31 = vpop.f32.mrb[94].mxu0 }
0x194f   : > { %v9314_v8 = vmul.f32 %v10098_v62, %v9306_v31  ;;  %v10615_v55 = vpop.f32.mrb[95].mxu0 }
0x1951   : > { %v9322_v25 = vrot.slane %v9314_v8, %v16869_v56 }
0x1953   : > { %v9323_v2 = vcombine.high %v9322_v25, %v9322_v25  ;;  %v9330_v16 = vrot.slane %v9322_v25, %v16869_v56 }
0x1955   : > { %v9337_v45 = vrot.slane %v9323_v2, %v16869_v56  ;;  %v9341_v32 = vrot.slane %v9330_v16, %v16870_v59 }
0x1957   : > { %v9345_v10 = vrot.slane %v9337_v45, %v16870_v59  ;;  %v9348_v40 = vmul.f32 %v9341_v32, %v16029_v41  ;;  %v9349_v21 = vmul.f32 %v9341_v32, %v16032_v49  ;;  %v9350_v15 = vmul.f32 %v9341_v32, %v16035_v63 }
0x1958   : > { %v9351_v17 = vmul.f32 %v9341_v32, %v16042_v47  ;;  %v9352_v51 = vmul.f32 %v9341_v32, %v16049_v39  ;;  %v9353_v56 = vmul.f32 %v9341_v32, %v16056_v35  ;;  %v9354_v14 = vmul.f32 %v9341_v32, %v16062_v26 }
0x1959   : > { %v9355_v59 = vmul.f32 %v9341_v32, %v16069_v46  ;;  %v9356_v41 = vmul.f32 %v9345_v10, %v16074_v38  ;;  %v9357_v49 = vmul.f32 %v9345_v10, %v16081_v20  ;;  %v9358_v63 = vmul.f32 %v9345_v10, %v16086_v12 }
0x195a   : > { %v9359_v47 = vmul.f32 %v9345_v10, %v16093_v48  ;;  %v9360_v39 = vmul.f32 %v9345_v10, %v16098_v0  ;;  %v9361_v35 = vmul.f32 %v9345_v10, %v16105_v11  ;;  %v9362_v26 = vmul.f32 %v9345_v10, %v16110_v29 }
0x195b   : > { %v9363_v46 = vmul.f32 %v9345_v10, %v16117_v22  ;;  %v9368_v38 = vadd.f32 %v10099_v43, %v9348_v40  ;;  %v9369_v20 = vadd.f32 %v10099_v43, %v9349_v21  ;;  %v9370_v12 = vadd.f32 %v10099_v43, %v9350_v15 }
0x195c   : > { %v9371_v23 = vadd.f32 %v10099_v43, %v9351_v17  ;;  %v9372_v9 = vadd.f32 %v10099_v43, %v9352_v51  ;;  %v9373_v48 = vadd.f32 %v10099_v43, %v9353_v56  ;;  %v9374_v18 = vadd.f32 %v10099_v43, %v9354_v14 }
0x195d   : > { %v9375_v0 = vadd.f32 %v10099_v43, %v9355_v59  ;;  %v9376_v3 = vadd.f32 %v10099_v43, %v9356_v41  ;;  %v9377_v11 = vadd.f32 %v10099_v43, %v9357_v49  ;;  %v9378_v29 = vadd.f32 %v10099_v43, %v9358_v63  ;;  %9384 = vst.msk [vmem:[%s16171_s27] sm:$0xff] %vm16906_vm14, %v9368_v38 }
0x195e   : > { %9385 = vst.msk [vmem:[%s16171_s27 + $0x8] sm:$0xff] %vm16907_vm11, %v9369_v20  ;;  %v9379_v22 = vadd.f32 %v10099_v43, %v9359_v47  ;;  %v9380_v33 = vadd.f32 %v10099_v43, %v9360_v39  ;;  %v9381_v28 = vadd.f32 %v10099_v43, %v9361_v35  ;;  %v9382_v52 = vadd.f32 %v10099_v43, %v9362_v26 }
0x195f   : > { %9386 = vst.msk [vmem:[%s16171_s27 + $0x10] sm:$0xff] %vm16908_vm3, %v9370_v12  ;;  %v9383_v13 = vadd.f32 %v10099_v43, %v9363_v46 }
0x1960   : > { %9387 = vst.msk [vmem:[%s16171_s27 + $0x18] sm:$0xff] %vm16909_vm7, %v9371_v23 }
0x1961   : > { %9388 = vst.msk [vmem:[%s16171_s27 + $0x20] sm:$0xff] %vm16910_vm6, %v9372_v9 }
0x1962   : > { %9389 = vst.msk [vmem:[%s16171_s27 + $0x28] sm:$0xff] %vm16911_vm0, %v9373_v48 }
0x1963   : > { %9390 = vst.msk [vmem:[%s16171_s27 + $0x30] sm:$0xff] %vm16912_vm1, %v9374_v18 }
0x1964   : > { %9391 = vst.msk [vmem:[%s16171_s27 + $0x38] sm:$0xff] %vm16913_vm9, %v9375_v0 }
0x1965   : > { %9392 = vst.msk [vmem:[%s16171_s27 + $0x40] sm:$0xff] %vm16914_vm4, %v9376_v3 }
0x1966   : > { %9393 = vst.msk [vmem:[%s16171_s27 + $0x48] sm:$0xff] %vm16915_vm10, %v9377_v11 }
0x1967   : > { %9394 = vst.msk [vmem:[%s16171_s27 + $0x50] sm:$0xff] %vm16916_vm12, %v9378_v29 }
0x1968   : > { %9395 = vst.msk [vmem:[%s16171_s27 + $0x58] sm:$0xff] %vm16917_vm2, %v9379_v22 }
0x1969   : > { %9396 = vst.msk [vmem:[%s16171_s27 + $0x60] sm:$0xff] %vm16918_vm5, %v9380_v33 }
0x196a   : > { %9397 = vst.msk [vmem:[%s16171_s27 + $0x68] sm:$0xff] %vm16919_vm8, %v9381_v28 }
0x196b   : > { %9398 = vst.msk [vmem:[%s16171_s27 + $0x70] sm:$0xff] %vm16920_vm15, %v9382_v52 }
0x196c   : > { %9399 = vst.msk [vmem:[%s16171_s27 + $0x78] sm:$0xff] %vm16921_vm13, %v9383_v13 }
0x196d PF: > { %s16922_s27 = sld [smem:[#allocation27_spill]]  ;;  %s16923_s1 = sld [smem:[#allocation26_spill]] }
0x196e   : > { %s16924_s26 = sld [smem:[#allocation28_spill]]  ;;  %s16925_s24 = smov %s11400_s25 }
0x1973   : > { %p34_p1 = scmp.ge.s32.totalorder %s16922_s27, 4   ;;  %s16926_s25 = smov %s16923_s1 }
0x1975   :  { %36 = sbr.rel (!%p34_p1) target bundleno = 21 (0x15), region = 189 }
0x197c   :  { %9424 = vsyncpa [#allocation5], 1 }
0x197d   :  { %9426 = vsyncpa [#allocation5 + $0x1], 1 }
0x197e   :  { %9427 = vsyncpa [#allocation7], 1 }
0x197f   :  { %9429 = vsyncpa [#allocation7 + $0x1], 1 }
0x1980   :  { %9430 = vsyncpa [#allocation10], 1 }
0x1981   :  { %9431 = vsyncpa [#allocation13], 1 }
0x1982   :  { %9432 = vsyncpa [#allocation16], 1 }
0x1983   :  { %9433 = vsyncpa [#allocation19], 1 }

</bundles_post_ra>
